<compile_context>
chip_gen: v5e
topology: v5e:2x2
jax: 0.10.0
libtpu: 0.0.40
codegen_flags: <defaults>
</compile_context>

<pallas_src>
import jax
import jax.numpy as jnp
from jax.experimental import pallas as pl
from jax.experimental.pallas import tpu as pltpu

HIDDEN = 128
INPUT = 6
OUT = 7


def _make_kernel(T, B):
    H = HIDDEN

    def _sigmoid(x):
        # sigmoid(x) == 0.5*tanh(0.5*x) + 0.5 : one EUP transcendental
        # instead of exp + reciprocal.
        return 0.5 * jnp.tanh(0.5 * x) + 0.5

    def kernel(x2d_ref,                       # (T*B, INPUT) time-major rows
               wih1_ref, whh1_ref, b1_ref,    # (INPUT,4H), (H,4H), (1,4H)
               w2cat_ref, b2_ref,             # (2H,4H) = [wih2; whh2], (1,4H)
               wfc1_ref, bfc1_ref,            # (H,H), (1,H)
               wfc2_ref, bfc2_ref,            # (H,OUT), (1,OUT)
               out_ref,                       # (B, OUT)
               h1_ref, c1_ref, h2_ref, c2_ref,  # scratch (B,H)
               gx1_ref):                      # scratch (T*B, 4H)
        # zero the recurrent state
        h1_ref[...] = jnp.zeros_like(h1_ref)
        c1_ref[...] = jnp.zeros_like(c1_ref)
        h2_ref[...] = jnp.zeros_like(h2_ref)
        c2_ref[...] = jnp.zeros_like(c2_ref)

        # Hoisted layer-1 input projection: one matmul over all timesteps,
        # bias b1 folded in here so it disappears from the loop.
        gx1_ref[...] = (
            jnp.dot(x2d_ref[...], wih1_ref[...],
                    preferred_element_type=jnp.float32)
            + b1_ref[...])

        # Hoisted layer-2 bias broadcast (JAX does not CSE broadcast_in_dim,
        # so inside the unrolled loop it would be re-emitted T times).
        b2 = jnp.broadcast_to(b2_ref[...], (B, 4 * H))

        # T is small & static -> fully unrolled (LLO sees the whole schedule).
        for t in range(T):
            # ---- layer 1: gates = gx1[t] + h1 @ whh1 ----------------------
            gates1 = (gx1_ref[t * B:(t + 1) * B, :]
                      + jnp.dot(h1_ref[...], whh1_ref[...],
                                preferred_element_type=jnp.float32))
            i1 = _sigmoid(gates1[:, 0 * H:1 * H])
            f1 = _sigmoid(gates1[:, 1 * H:2 * H])
            g1 = jnp.tanh(gates1[:, 2 * H:3 * H])
            o1 = _sigmoid(gates1[:, 3 * H:4 * H])
            c1 = f1 * c1_ref[...] + i1 * g1
            h1 = o1 * jnp.tanh(c1)
            c1_ref[...] = c1
            h1_ref[...] = h1

            # ---- layer 2: single fused K=2H matmul ------------------------
            hcat = jnp.concatenate([h1, h2_ref[...]], axis=-1)   # (B, 2H)
            gates2 = (jnp.dot(hcat, w2cat_ref[...],
                              preferred_element_type=jnp.float32)
                      + b2)
            i2 = _sigmoid(gates2[:, 0 * H:1 * H])
            f2 = _sigmoid(gates2[:, 1 * H:2 * H])
            g2 = jnp.tanh(gates2[:, 2 * H:3 * H])
            o2 = _sigmoid(gates2[:, 3 * H:4 * H])
            c2 = f2 * c2_ref[...] + i2 * g2
            h2 = o2 * jnp.tanh(c2)
            c2_ref[...] = c2
            h2_ref[...] = h2

        # ---- FC head on the last hidden state of layer 2 -------------------
        h = h2_ref[...]
        z = jnp.maximum(
            jnp.dot(h, wfc1_ref[...], preferred_element_type=jnp.float32)
            + bfc1_ref[...], 0.0)
        pose = (jnp.dot(z, wfc2_ref[...], preferred_element_type=jnp.float32)
                + bfc2_ref[...])                                  # (B, OUT)

        # F.normalize on the quaternion part (cols 3:7), eps = 1e-12,
        # implemented with a lane mask instead of slice + concat.
        col = jax.lax.broadcasted_iota(jnp.int32, (B, OUT), 1)
        qmask = col >= 3
        nrm2 = jnp.sum(jnp.where(qmask, pose * pose, 0.0),
                       axis=-1, keepdims=True)
        nrm = jnp.maximum(jnp.sqrt(nrm2), 1e-12)
        scale = jnp.where(qmask, 1.0 / nrm, 1.0)
        out_ref[...] = pose * scale

    return kernel


def inertial_only_forward(imu_data, params):
    """imu_data: (B, T, 6) float32 (batch_first, like the PyTorch module)."""
    B, T, D = imu_data.shape
    assert D == INPUT
    # time-major, flattened: row t*B + b is timestep t of batch element b
    x2d = jnp.transpose(imu_data, (1, 0, 2)).reshape(T * B, INPUT)

    # Fused layer-2 weight: [h1 ; h2_prev] @ [wih2 ; whh2]
    w2cat = jnp.concatenate([params["wih2"], params["whh2"]], axis=0)

    args = (x2d,
            params["wih1"], params["whh1"], params["b1"],
            w2cat, params["b2"],
            params["wfc1"], params["bfc1"],
            params["wfc2"], params["bfc2"])

    vmem = pl.BlockSpec(memory_space=pltpu.MemorySpace.VMEM)
    return pl.pallas_call(
        _make_kernel(T, B),
        out_shape=jax.ShapeDtypeStruct((B, OUT), jnp.float32),
        in_specs=[vmem] * len(args),
        out_specs=vmem,
        scratch_shapes=[pltpu.VMEM((B, HIDDEN), jnp.float32)] * 4
                       + [pltpu.VMEM((T * B, 4 * HIDDEN), jnp.float32)],
    )(*args)


def init_params(key):
    """Deterministic init, PyTorch-style U(-1/sqrt(H), 1/sqrt(H))."""
    H = HIDDEN
    k = 1.0 / jnp.sqrt(jnp.float32(H))
    keys = jax.random.split(key, 12)

    def u(kk, shape):
        return jax.random.uniform(kk, shape, jnp.float32, -k, k)

    # LSTM weights stored pre-transposed: x @ W_ih^T  ->  pass (in, 4H)
    params = {
        "wih1": u(keys[0], (INPUT, 4 * H)),
        "whh1": u(keys[1], (H, 4 * H)),
        # b_ih + b_hh folded together
        "b1": u(keys[2], (1, 4 * H)) + u(keys[3], (1, 4 * H)),
        "wih2": u(keys[4], (H, 4 * H)),
        "whh2": u(keys[5], (H, 4 * H)),
        "b2": u(keys[6], (1, 4 * H)) + u(keys[7], (1, 4 * H)),
        "wfc1": u(keys[8], (H, H)),
        "bfc1": u(keys[9], (1, H)),
        "wfc2": u(keys[10], (H, OUT)),
        "bfc2": u(keys[11], (1, OUT)),
    }
    return params


def _reference_forward(imu_data, p):
    """Pure-JAX reference replicating the PyTorch semantics (unfused)."""
    B, T, _ = imu_data.shape
    H = HIDDEN

    def cell(x_t, h, c, wih, whh, b):
        g = x_t @ wih + h @ whh + b
        i = jax.nn.sigmoid(g[:, 0 * H:1 * H])
        f = jax.nn.sigmoid(g[:, 1 * H:2 * H])
        gg = jnp.tanh(g[:, 2 * H:3 * H])
        o = jax.nn.sigmoid(g[:, 3 * H:4 * H])
        c = f * c + i * gg
        h = o * jnp.tanh(c)
        return h, c

    h1 = c1 = h2 = c2 = jnp.zeros((B, H), jnp.float32)
    for t in range(T):
        x_t = imu_data[:, t, :]
        h1, c1 = cell(x_t, h1, c1, p["wih1"], p["whh1"], p["b1"])
        h2, c2 = cell(h1, h2, c2, p["wih2"], p["whh2"], p["b2"])
    z = jnp.maximum(h2 @ p["wfc1"] + p["bfc1"], 0.0)
    pose = z @ p["wfc2"] + p["bfc2"]
    q = pose[:, 3:]
    q = q / jnp.maximum(jnp.linalg.norm(q, axis=1, keepdims=True), 1e-12)
    return jnp.concatenate([pose[:, :3], q], axis=1)


if __name__ == "__main__":
    key = jax.random.PRNGKey(0)
    k_data, k_params = jax.random.split(key)

    B, T = 2, 8
    imu_data = jax.random.normal(k_data, (B, T, INPUT), jnp.float32)
    params = init_params(k_params)

    out = inertial_only_forward(imu_data, params)
    out = jax.block_until_ready(out)

    ref = _reference_forward(imu_data, params)
    assert out.shape == (B, OUT)
    assert jnp.allclose(out, ref, atol=1e-4, rtol=1e-4), (
        f"mismatch: max abs diff {jnp.max(jnp.abs(out - ref))}")

    print("KERNEL_OK")
</pallas_src>

<mosaic_0001>
module attributes {stable_mosaic.version = 11 : i64} {
  func.func @kernel(%arg0: memref<16x6xf32, #tpu.memory_space<vmem>>, %arg1: memref<6x512xf32, #tpu.memory_space<vmem>>, %arg2: memref<128x512xf32, #tpu.memory_space<vmem>>, %arg3: memref<1x512xf32, #tpu.memory_space<vmem>>, %arg4: memref<256x512xf32, #tpu.memory_space<vmem>>, %arg5: memref<1x512xf32, #tpu.memory_space<vmem>>, %arg6: memref<128x128xf32, #tpu.memory_space<vmem>>, %arg7: memref<1x128xf32, #tpu.memory_space<vmem>>, %arg8: memref<128x7xf32, #tpu.memory_space<vmem>>, %arg9: memref<1x7xf32, #tpu.memory_space<vmem>>, %arg10: memref<2x7xf32, #tpu.memory_space<vmem>>, %arg11: memref<2x128xf32, #tpu.memory_space<vmem>>, %arg12: memref<2x128xf32, #tpu.memory_space<vmem>>, %arg13: memref<2x128xf32, #tpu.memory_space<vmem>>, %arg14: memref<2x128xf32, #tpu.memory_space<vmem>>, %arg15: memref<16x512xf32, #tpu.memory_space<vmem>>) attributes {dimension_semantics = [], scalar_prefetch = 0 : i64, scratch_operands = 5 : i64, tpu.core_type = #tpu.core_type<tc>} {
    %cst = arith.constant 0.000000e+00 : f32
    %0 = vector.broadcast %cst : f32 to vector<2x128xf32>
    %c0 = arith.constant 0 : index
    %c0_0 = arith.constant 0 : index
    %1 = vector.load %arg11[%c0, %c0_0] : memref<2x128xf32, #tpu.memory_space<vmem>>, vector<2x128xf32>
    tpu.vector_store %arg11[%c0, %c0_0], %0 {strides = array<i32>} : memref<2x128xf32, #tpu.memory_space<vmem>>, vector<2x128xf32>,
    %cst_1 = arith.constant 0.000000e+00 : f32
    %2 = vector.broadcast %cst_1 : f32 to vector<2x128xf32>
    %c0_2 = arith.constant 0 : index
    %c0_3 = arith.constant 0 : index
    %3 = vector.load %arg12[%c0_2, %c0_3] : memref<2x128xf32, #tpu.memory_space<vmem>>, vector<2x128xf32>
    tpu.vector_store %arg12[%c0_2, %c0_3], %2 {strides = array<i32>} : memref<2x128xf32, #tpu.memory_space<vmem>>, vector<2x128xf32>,
    %cst_4 = arith.constant 0.000000e+00 : f32
    %4 = vector.broadcast %cst_4 : f32 to vector<2x128xf32>
    %c0_5 = arith.constant 0 : index
    %c0_6 = arith.constant 0 : index
    %5 = vector.load %arg13[%c0_5, %c0_6] : memref<2x128xf32, #tpu.memory_space<vmem>>, vector<2x128xf32>
    tpu.vector_store %arg13[%c0_5, %c0_6], %4 {strides = array<i32>} : memref<2x128xf32, #tpu.memory_space<vmem>>, vector<2x128xf32>,
    %cst_7 = arith.constant 0.000000e+00 : f32
    %6 = vector.broadcast %cst_7 : f32 to vector<2x128xf32>
    %c0_8 = arith.constant 0 : index
    %c0_9 = arith.constant 0 : index
    %7 = vector.load %arg14[%c0_8, %c0_9] : memref<2x128xf32, #tpu.memory_space<vmem>>, vector<2x128xf32>
    tpu.vector_store %arg14[%c0_8, %c0_9], %6 {strides = array<i32>} : memref<2x128xf32, #tpu.memory_space<vmem>>, vector<2x128xf32>,
    %c0_10 = arith.constant 0 : index
    %c0_11 = arith.constant 0 : index
    %8 = vector.load %arg0[%c0_10, %c0_11] : memref<16x6xf32, #tpu.memory_space<vmem>>, vector<16x6xf32>
    %c0_12 = arith.constant 0 : index
    %c0_13 = arith.constant 0 : index
    %9 = vector.load %arg1[%c0_12, %c0_13] : memref<6x512xf32, #tpu.memory_space<vmem>>, vector<6x512xf32>
    %cst_14 = arith.constant dense<0.000000e+00> : vector<16x512xf32>
    %10 = tpu.matmul %8, %9, %cst_14 {dimension_numbers = #tpu.dot_dimension_numbers<[1], [0], [0], [1], [0, 0, 1, 1], [], []>} : vector<16x6xf32>, vector<6x512xf32>, vector<16x512xf32> -> vector<16x512xf32>
    %c0_15 = arith.constant 0 : index
    %c0_16 = arith.constant 0 : index
    %11 = vector.load %arg3[%c0_15, %c0_16] : memref<1x512xf32, #tpu.memory_space<vmem>>, vector<1x512xf32>
    %12 = vector.broadcast %11 : vector<1x512xf32> to vector<16x512xf32>
    %13 = arith.addf %10, %12 : vector<16x512xf32>
    %c0_17 = arith.constant 0 : index
    %c0_18 = arith.constant 0 : index
    %14 = vector.load %arg15[%c0_17, %c0_18] : memref<16x512xf32, #tpu.memory_space<vmem>>, vector<16x512xf32>
    tpu.vector_store %arg15[%c0_17, %c0_18], %13 {strides = array<i32>} : memref<16x512xf32, #tpu.memory_space<vmem>>, vector<16x512xf32>,
    %c0_19 = arith.constant 0 : index
    %c0_20 = arith.constant 0 : index
    %15 = vector.load %arg5[%c0_19, %c0_20] : memref<1x512xf32, #tpu.memory_space<vmem>>, vector<1x512xf32>
    %16 = vector.shape_cast %15 : vector<1x512xf32> to vector<1x512xf32>
    %17 = vector.broadcast %16 : vector<1x512xf32> to vector<2x512xf32>
    %c0_21 = arith.constant 0 : index
    %c0_22 = arith.constant 0 : index
    %18 = vector.load %arg15[%c0_21, %c0_22] : memref<16x512xf32, #tpu.memory_space<vmem>>, vector<2x512xf32>
    %c0_23 = arith.constant 0 : index
    %c0_24 = arith.constant 0 : index
    %19 = vector.load %arg11[%c0_23, %c0_24] : memref<2x128xf32, #tpu.memory_space<vmem>>, vector<2x128xf32>
    %c0_25 = arith.constant 0 : index
    %c0_26 = arith.constant 0 : index
    %20 = vector.load %arg2[%c0_25, %c0_26] : memref<128x512xf32, #tpu.memory_space<vmem>>, vector<128x512xf32>
    %cst_27 = arith.constant dense<0.000000e+00> : vector<2x512xf32>
    %21 = tpu.matmul %19, %20, %cst_27 {dimension_numbers = #tpu.dot_dimension_numbers<[1], [0], [0], [1], [0, 0, 1, 1], [], []>} : vector<2x128xf32>, vector<128x512xf32>, vector<2x512xf32> -> vector<2x512xf32>
    %22 = arith.addf %18, %21 : vector<2x512xf32>
    %23 = vector.extract_strided_slice %22 {offsets = [0, 0], sizes = [2, 128], strides = [1, 1]} : vector<2x512xf32> to vector<2x128xf32>
    %cst_28 = arith.constant 5.000000e-01 : f32
    %24 = vector.broadcast %cst_28 : f32 to vector<2x128xf32>
    %25 = arith.mulf %24, %23 : vector<2x128xf32>
    %26 = math.tanh %25 : vector<2x128xf32>
    %cst_29 = arith.constant 5.000000e-01 : f32
    %27 = vector.broadcast %cst_29 : f32 to vector<2x128xf32>
    %28 = arith.mulf %27, %26 : vector<2x128xf32>
    %cst_30 = arith.constant 5.000000e-01 : f32
    %29 = vector.broadcast %cst_30 : f32 to vector<2x128xf32>
    %30 = arith.addf %28, %29 : vector<2x128xf32>
    %31 = vector.extract_strided_slice %22 {offsets = [0, 128], sizes = [2, 128], strides = [1, 1]} : vector<2x512xf32> to vector<2x128xf32>
    %cst_31 = arith.constant 5.000000e-01 : f32
    %32 = vector.broadcast %cst_31 : f32 to vector<2x128xf32>
    %33 = arith.mulf %32, %31 : vector<2x128xf32>
    %34 = math.tanh %33 : vector<2x128xf32>
    %cst_32 = arith.constant 5.000000e-01 : f32
    %35 = vector.broadcast %cst_32 : f32 to vector<2x128xf32>
    %36 = arith.mulf %35, %34 : vector<2x128xf32>
    %cst_33 = arith.constant 5.000000e-01 : f32
    %37 = vector.broadcast %cst_33 : f32 to vector<2x128xf32>
    %38 = arith.addf %36, %37 : vector<2x128xf32>
    %39 = vector.extract_strided_slice %22 {offsets = [0, 256], sizes = [2, 128], strides = [1, 1]} : vector<2x512xf32> to vector<2x128xf32>
    %40 = math.tanh %39 : vector<2x128xf32>
    %41 = vector.extract_strided_slice %22 {offsets = [0, 384], sizes = [2, 128], strides = [1, 1]} : vector<2x512xf32> to vector<2x128xf32>
    %cst_34 = arith.constant 5.000000e-01 : f32
    %42 = vector.broadcast %cst_34 : f32 to vector<2x128xf32>
    %43 = arith.mulf %42, %41 : vector<2x128xf32>
    %44 = math.tanh %43 : vector<2x128xf32>
    %cst_35 = arith.constant 5.000000e-01 : f32
    %45 = vector.broadcast %cst_35 : f32 to vector<2x128xf32>
    %46 = arith.mulf %45, %44 : vector<2x128xf32>
    %cst_36 = arith.constant 5.000000e-01 : f32
    %47 = vector.broadcast %cst_36 : f32 to vector<2x128xf32>
    %48 = arith.addf %46, %47 : vector<2x128xf32>
    %c0_37 = arith.constant 0 : index
    %c0_38 = arith.constant 0 : index
    %49 = vector.load %arg12[%c0_37, %c0_38] : memref<2x128xf32, #tpu.memory_space<vmem>>, vector<2x128xf32>
    %50 = arith.mulf %38, %49 : vector<2x128xf32>
    %51 = arith.mulf %30, %40 : vector<2x128xf32>
    %52 = arith.addf %50, %51 : vector<2x128xf32>
    %53 = math.tanh %52 : vector<2x128xf32>
    %54 = arith.mulf %48, %53 : vector<2x128xf32>
    %c0_39 = arith.constant 0 : index
    %c0_40 = arith.constant 0 : index
    %55 = vector.load %arg12[%c0_39, %c0_40] : memref<2x128xf32, #tpu.memory_space<vmem>>, vector<2x128xf32>
    tpu.vector_store %arg12[%c0_39, %c0_40], %52 {strides = array<i32>} : memref<2x128xf32, #tpu.memory_space<vmem>>, vector<2x128xf32>,
    %c0_41 = arith.constant 0 : index
    %c0_42 = arith.constant 0 : index
    %56 = vector.load %arg11[%c0_41, %c0_42] : memref<2x128xf32, #tpu.memory_space<vmem>>, vector<2x128xf32>
    tpu.vector_store %arg11[%c0_41, %c0_42], %54 {strides = array<i32>} : memref<2x128xf32, #tpu.memory_space<vmem>>, vector<2x128xf32>,
    %c0_43 = arith.constant 0 : index
    %c0_44 = arith.constant 0 : index
    %57 = vector.load %arg13[%c0_43, %c0_44] : memref<2x128xf32, #tpu.memory_space<vmem>>, vector<2x128xf32>
    %58 = tpu.concatenate %54, %57 in 1 : vector<2x128xf32>, vector<2x128xf32> -> vector<2x256xf32>
    %c0_45 = arith.constant 0 : index
    %c0_46 = arith.constant 0 : index
    %59 = vector.load %arg4[%c0_45, %c0_46] : memref<256x512xf32, #tpu.memory_space<vmem>>, vector<256x512xf32>
    %cst_47 = arith.constant dense<0.000000e+00> : vector<2x512xf32>
    %60 = tpu.matmul %58, %59, %cst_47 {dimension_numbers = #tpu.dot_dimension_numbers<[1], [0], [0], [1], [0, 0, 1, 1], [], []>} : vector<2x256xf32>, vector<256x512xf32>, vector<2x512xf32> -> vector<2x512xf32>
    %61 = arith.addf %60, %17 : vector<2x512xf32>
    %62 = vector.extract_strided_slice %61 {offsets = [0, 0], sizes = [2, 128], strides = [1, 1]} : vector<2x512xf32> to vector<2x128xf32>
    %cst_48 = arith.constant 5.000000e-01 : f32
    %63 = vector.broadcast %cst_48 : f32 to vector<2x128xf32>
    %64 = arith.mulf %63, %62 : vector<2x128xf32>
    %65 = math.tanh %64 : vector<2x128xf32>
    %cst_49 = arith.constant 5.000000e-01 : f32
    %66 = vector.broadcast %cst_49 : f32 to vector<2x128xf32>
    %67 = arith.mulf %66, %65 : vector<2x128xf32>
    %cst_50 = arith.constant 5.000000e-01 : f32
    %68 = vector.broadcast %cst_50 : f32 to vector<2x128xf32>
    %69 = arith.addf %67, %68 : vector<2x128xf32>
    %70 = vector.extract_strided_slice %61 {offsets = [0, 128], sizes = [2, 128], strides = [1, 1]} : vector<2x512xf32> to vector<2x128xf32>
    %cst_51 = arith.constant 5.000000e-01 : f32
    %71 = vector.broadcast %cst_51 : f32 to vector<2x128xf32>
    %72 = arith.mulf %71, %70 : vector<2x128xf32>
    %73 = math.tanh %72 : vector<2x128xf32>
    %cst_52 = arith.constant 5.000000e-01 : f32
    %74 = vector.broadcast %cst_52 : f32 to vector<2x128xf32>
    %75 = arith.mulf %74, %73 : vector<2x128xf32>
    %cst_53 = arith.constant 5.000000e-01 : f32
    %76 = vector.broadcast %cst_53 : f32 to vector<2x128xf32>
    %77 = arith.addf %75, %76 : vector<2x128xf32>
    %78 = vector.extract_strided_slice %61 {offsets = [0, 256], sizes = [2, 128], strides = [1, 1]} : vector<2x512xf32> to vector<2x128xf32>
    %79 = math.tanh %78 : vector<2x128xf32>
    %80 = vector.extract_strided_slice %61 {offsets = [0, 384], sizes = [2, 128], strides = [1, 1]} : vector<2x512xf32> to vector<2x128xf32>
    %cst_54 = arith.constant 5.000000e-01 : f32
    %81 = vector.broadcast %cst_54 : f32 to vector<2x128xf32>
    %82 = arith.mulf %81, %80 : vector<2x128xf32>
    %83 = math.tanh %82 : vector<2x128xf32>
    %cst_55 = arith.constant 5.000000e-01 : f32
    %84 = vector.broadcast %cst_55 : f32 to vector<2x128xf32>
    %85 = arith.mulf %84, %83 : vector<2x128xf32>
    %cst_56 = arith.constant 5.000000e-01 : f32
    %86 = vector.broadcast %cst_56 : f32 to vector<2x128xf32>
    %87 = arith.addf %85, %86 : vector<2x128xf32>
    %c0_57 = arith.constant 0 : index
    %c0_58 = arith.constant 0 : index
    %88 = vector.load %arg14[%c0_57, %c0_58] : memref<2x128xf32, #tpu.memory_space<vmem>>, vector<2x128xf32>
    %89 = arith.mulf %77, %88 : vector<2x128xf32>
    %90 = arith.mulf %69, %79 : vector<2x128xf32>
    %91 = arith.addf %89, %90 : vector<2x128xf32>
    %92 = math.tanh %91 : vector<2x128xf32>
    %93 = arith.mulf %87, %92 : vector<2x128xf32>
    %c0_59 = arith.constant 0 : index
    %c0_60 = arith.constant 0 : index
    %94 = vector.load %arg14[%c0_59, %c0_60] : memref<2x128xf32, #tpu.memory_space<vmem>>, vector<2x128xf32>
    tpu.vector_store %arg14[%c0_59, %c0_60], %91 {strides = array<i32>} : memref<2x128xf32, #tpu.memory_space<vmem>>, vector<2x128xf32>,
    %c0_61 = arith.constant 0 : index
    %c0_62 = arith.constant 0 : index
    %95 = vector.load %arg13[%c0_61, %c0_62] : memref<2x128xf32, #tpu.memory_space<vmem>>, vector<2x128xf32>
    tpu.vector_store %arg13[%c0_61, %c0_62], %93 {strides = array<i32>} : memref<2x128xf32, #tpu.memory_space<vmem>>, vector<2x128xf32>,
    %c2 = arith.constant 2 : index
    %c0_63 = arith.constant 0 : index
    %96 = vector.load %arg15[%c2, %c0_63] : memref<16x512xf32, #tpu.memory_space<vmem>>, vector<2x512xf32>
    %c0_64 = arith.constant 0 : index
    %c0_65 = arith.constant 0 : index
    %97 = vector.load %arg11[%c0_64, %c0_65] : memref<2x128xf32, #tpu.memory_space<vmem>>, vector<2x128xf32>
    %c0_66 = arith.constant 0 : index
    %c0_67 = arith.constant 0 : index
    %98 = vector.load %arg2[%c0_66, %c0_67] : memref<128x512xf32, #tpu.memory_space<vmem>>, vector<128x512xf32>
    %cst_68 = arith.constant dense<0.000000e+00> : vector<2x512xf32>
    %99 = tpu.matmul %97, %98, %cst_68 {dimension_numbers = #tpu.dot_dimension_numbers<[1], [0], [0], [1], [0, 0, 1, 1], [], []>} : vector<2x128xf32>, vector<128x512xf32>, vector<2x512xf32> -> vector<2x512xf32>
    %100 = arith.addf %96, %99 : vector<2x512xf32>
    %101 = vector.extract_strided_slice %100 {offsets = [0, 0], sizes = [2, 128], strides = [1, 1]} : vector<2x512xf32> to vector<2x128xf32>
    %cst_69 = arith.constant 5.000000e-01 : f32
    %102 = vector.broadcast %cst_69 : f32 to vector<2x128xf32>
    %103 = arith.mulf %102, %101 : vector<2x128xf32>
    %104 = math.tanh %103 : vector<2x128xf32>
    %cst_70 = arith.constant 5.000000e-01 : f32
    %105 = vector.broadcast %cst_70 : f32 to vector<2x128xf32>
    %106 = arith.mulf %105, %104 : vector<2x128xf32>
    %cst_71 = arith.constant 5.000000e-01 : f32
    %107 = vector.broadcast %cst_71 : f32 to vector<2x128xf32>
    %108 = arith.addf %106, %107 : vector<2x128xf32>
    %109 = vector.extract_strided_slice %100 {offsets = [0, 128], sizes = [2, 128], strides = [1, 1]} : vector<2x512xf32> to vector<2x128xf32>
    %cst_72 = arith.constant 5.000000e-01 : f32
    %110 = vector.broadcast %cst_72 : f32 to vector<2x128xf32>
    %111 = arith.mulf %110, %109 : vector<2x128xf32>
    %112 = math.tanh %111 : vector<2x128xf32>
    %cst_73 = arith.constant 5.000000e-01 : f32
    %113 = vector.broadcast %cst_73 : f32 to vector<2x128xf32>
    %114 = arith.mulf %113, %112 : vector<2x128xf32>
    %cst_74 = arith.constant 5.000000e-01 : f32
    %115 = vector.broadcast %cst_74 : f32 to vector<2x128xf32>
    %116 = arith.addf %114, %115 : vector<2x128xf32>
    %117 = vector.extract_strided_slice %100 {offsets = [0, 256], sizes = [2, 128], strides = [1, 1]} : vector<2x512xf32> to vector<2x128xf32>
    %118 = math.tanh %117 : vector<2x128xf32>
    %119 = vector.extract_strided_slice %100 {offsets = [0, 384], sizes = [2, 128], strides = [1, 1]} : vector<2x512xf32> to vector<2x128xf32>
    %cst_75 = arith.constant 5.000000e-01 : f32
    %120 = vector.broadcast %cst_75 : f32 to vector<2x128xf32>
    %121 = arith.mulf %120, %119 : vector<2x128xf32>
    %122 = math.tanh %121 : vector<2x128xf32>
    %cst_76 = arith.constant 5.000000e-01 : f32
    %123 = vector.broadcast %cst_76 : f32 to vector<2x128xf32>
    %124 = arith.mulf %123, %122 : vector<2x128xf32>
    %cst_77 = arith.constant 5.000000e-01 : f32
    %125 = vector.broadcast %cst_77 : f32 to vector<2x128xf32>
    %126 = arith.addf %124, %125 : vector<2x128xf32>
    %c0_78 = arith.constant 0 : index
    %c0_79 = arith.constant 0 : index
    %127 = vector.load %arg12[%c0_78, %c0_79] : memref<2x128xf32, #tpu.memory_space<vmem>>, vector<2x128xf32>
    %128 = arith.mulf %116, %127 : vector<2x128xf32>
    %129 = arith.mulf %108, %118 : vector<2x128xf32>
    %130 = arith.addf %128, %129 : vector<2x128xf32>
    %131 = math.tanh %130 : vector<2x128xf32>
    %132 = arith.mulf %126, %131 : vector<2x128xf32>
    %c0_80 = arith.constant 0 : index
    %c0_81 = arith.constant 0 : index
    %133 = vector.load %arg12[%c0_80, %c0_81] : memref<2x128xf32, #tpu.memory_space<vmem>>, vector<2x128xf32>
    tpu.vector_store %arg12[%c0_80, %c0_81], %130 {strides = array<i32>} : memref<2x128xf32, #tpu.memory_space<vmem>>, vector<2x128xf32>,
    %c0_82 = arith.constant 0 : index
    %c0_83 = arith.constant 0 : index
    %134 = vector.load %arg11[%c0_82, %c0_83] : memref<2x128xf32, #tpu.memory_space<vmem>>, vector<2x128xf32>
    tpu.vector_store %arg11[%c0_82, %c0_83], %132 {strides = array<i32>} : memref<2x128xf32, #tpu.memory_space<vmem>>, vector<2x128xf32>,
    %c0_84 = arith.constant 0 : index
    %c0_85 = arith.constant 0 : index
    %135 = vector.load %arg13[%c0_84, %c0_85] : memref<2x128xf32, #tpu.memory_space<vmem>>, vector<2x128xf32>
    %136 = tpu.concatenate %132, %135 in 1 : vector<2x128xf32>, vector<2x128xf32> -> vector<2x256xf32>
    %c0_86 = arith.constant 0 : index
    %c0_87 = arith.constant 0 : index
    %137 = vector.load %arg4[%c0_86, %c0_87] : memref<256x512xf32, #tpu.memory_space<vmem>>, vector<256x512xf32>
    %cst_88 = arith.constant dense<0.000000e+00> : vector<2x512xf32>
    %138 = tpu.matmul %136, %137, %cst_88 {dimension_numbers = #tpu.dot_dimension_numbers<[1], [0], [0], [1], [0, 0, 1, 1], [], []>} : vector<2x256xf32>, vector<256x512xf32>, vector<2x512xf32> -> vector<2x512xf32>
    %139 = arith.addf %138, %17 : vector<2x512xf32>
    %140 = vector.extract_strided_slice %139 {offsets = [0, 0], sizes = [2, 128], strides = [1, 1]} : vector<2x512xf32> to vector<2x128xf32>
    %cst_89 = arith.constant 5.000000e-01 : f32
    %141 = vector.broadcast %cst_89 : f32 to vector<2x128xf32>
    %142 = arith.mulf %141, %140 : vector<2x128xf32>
    %143 = math.tanh %142 : vector<2x128xf32>
    %cst_90 = arith.constant 5.000000e-01 : f32
    %144 = vector.broadcast %cst_90 : f32 to vector<2x128xf32>
    %145 = arith.mulf %144, %143 : vector<2x128xf32>
    %cst_91 = arith.constant 5.000000e-01 : f32
    %146 = vector.broadcast %cst_91 : f32 to vector<2x128xf32>
    %147 = arith.addf %145, %146 : vector<2x128xf32>
    %148 = vector.extract_strided_slice %139 {offsets = [0, 128], sizes = [2, 128], strides = [1, 1]} : vector<2x512xf32> to vector<2x128xf32>
    %cst_92 = arith.constant 5.000000e-01 : f32
    %149 = vector.broadcast %cst_92 : f32 to vector<2x128xf32>
    %150 = arith.mulf %149, %148 : vector<2x128xf32>
    %151 = math.tanh %150 : vector<2x128xf32>
    %cst_93 = arith.constant 5.000000e-01 : f32
    %152 = vector.broadcast %cst_93 : f32 to vector<2x128xf32>
    %153 = arith.mulf %152, %151 : vector<2x128xf32>
    %cst_94 = arith.constant 5.000000e-01 : f32
    %154 = vector.broadcast %cst_94 : f32 to vector<2x128xf32>
    %155 = arith.addf %153, %154 : vector<2x128xf32>
    %156 = vector.extract_strided_slice %139 {offsets = [0, 256], sizes = [2, 128], strides = [1, 1]} : vector<2x512xf32> to vector<2x128xf32>
    %157 = math.tanh %156 : vector<2x128xf32>
    %158 = vector.extract_strided_slice %139 {offsets = [0, 384], sizes = [2, 128], strides = [1, 1]} : vector<2x512xf32> to vector<2x128xf32>
    %cst_95 = arith.constant 5.000000e-01 : f32
    %159 = vector.broadcast %cst_95 : f32 to vector<2x128xf32>
    %160 = arith.mulf %159, %158 : vector<2x128xf32>
    %161 = math.tanh %160 : vector<2x128xf32>
    %cst_96 = arith.constant 5.000000e-01 : f32
    %162 = vector.broadcast %cst_96 : f32 to vector<2x128xf32>
    %163 = arith.mulf %162, %161 : vector<2x128xf32>
    %cst_97 = arith.constant 5.000000e-01 : f32
    %164 = vector.broadcast %cst_97 : f32 to vector<2x128xf32>
    %165 = arith.addf %163, %164 : vector<2x128xf32>
    %c0_98 = arith.constant 0 : index
    %c0_99 = arith.constant 0 : index
    %166 = vector.load %arg14[%c0_98, %c0_99] : memref<2x128xf32, #tpu.memory_space<vmem>>, vector<2x128xf32>
    %167 = arith.mulf %155, %166 : vector<2x128xf32>
    %168 = arith.mulf %147, %157 : vector<2x128xf32>
    %169 = arith.addf %167, %168 : vector<2x128xf32>
    %170 = math.tanh %169 : vector<2x128xf32>
    %171 = arith.mulf %165, %170 : vector<2x128xf32>
    %c0_100 = arith.constant 0 : index
    %c0_101 = arith.constant 0 : index
    %172 = vector.load %arg14[%c0_100, %c0_101] : memref<2x128xf32, #tpu.memory_space<vmem>>, vector<2x128xf32>
    tpu.vector_store %arg14[%c0_100, %c0_101], %169 {strides = array<i32>} : memref<2x128xf32, #tpu.memory_space<vmem>>, vector<2x128xf32>,
    %c0_102 = arith.constant 0 : index
    %c0_103 = arith.constant 0 : index
    %173 = vector.load %arg13[%c0_102, %c0_103] : memref<2x128xf32, #tpu.memory_space<vmem>>, vector<2x128xf32>
    tpu.vector_store %arg13[%c0_102, %c0_103], %171 {strides = array<i32>} : memref<2x128xf32, #tpu.memory_space<vmem>>, vector<2x128xf32>,
    %c4 = arith.constant 4 : index
    %c0_104 = arith.constant 0 : index
    %174 = vector.load %arg15[%c4, %c0_104] : memref<16x512xf32, #tpu.memory_space<vmem>>, vector<2x512xf32>
    %c0_105 = arith.constant 0 : index
    %c0_106 = arith.constant 0 : index
    %175 = vector.load %arg11[%c0_105, %c0_106] : memref<2x128xf32, #tpu.memory_space<vmem>>, vector<2x128xf32>
    %c0_107 = arith.constant 0 : index
    %c0_108 = arith.constant 0 : index
    %176 = vector.load %arg2[%c0_107, %c0_108] : memref<128x512xf32, #tpu.memory_space<vmem>>, vector<128x512xf32>
    %cst_109 = arith.constant dense<0.000000e+00> : vector<2x512xf32>
    %177 = tpu.matmul %175, %176, %cst_109 {dimension_numbers = #tpu.dot_dimension_numbers<[1], [0], [0], [1], [0, 0, 1, 1], [], []>} : vector<2x128xf32>, vector<128x512xf32>, vector<2x512xf32> -> vector<2x512xf32>
    %178 = arith.addf %174, %177 : vector<2x512xf32>
    %179 = vector.extract_strided_slice %178 {offsets = [0, 0], sizes = [2, 128], strides = [1, 1]} : vector<2x512xf32> to vector<2x128xf32>
    %cst_110 = arith.constant 5.000000e-01 : f32
    %180 = vector.broadcast %cst_110 : f32 to vector<2x128xf32>
    %181 = arith.mulf %180, %179 : vector<2x128xf32>
    %182 = math.tanh %181 : vector<2x128xf32>
    %cst_111 = arith.constant 5.000000e-01 : f32
    %183 = vector.broadcast %cst_111 : f32 to vector<2x128xf32>
    %184 = arith.mulf %183, %182 : vector<2x128xf32>
    %cst_112 = arith.constant 5.000000e-01 : f32
    %185 = vector.broadcast %cst_112 : f32 to vector<2x128xf32>
    %186 = arith.addf %184, %185 : vector<2x128xf32>
    %187 = vector.extract_strided_slice %178 {offsets = [0, 128], sizes = [2, 128], strides = [1, 1]} : vector<2x512xf32> to vector<2x128xf32>
    %cst_113 = arith.constant 5.000000e-01 : f32
    %188 = vector.broadcast %cst_113 : f32 to vector<2x128xf32>
    %189 = arith.mulf %188, %187 : vector<2x128xf32>
    %190 = math.tanh %189 : vector<2x128xf32>
    %cst_114 = arith.constant 5.000000e-01 : f32
    %191 = vector.broadcast %cst_114 : f32 to vector<2x128xf32>
    %192 = arith.mulf %191, %190 : vector<2x128xf32>
    %cst_115 = arith.constant 5.000000e-01 : f32
    %193 = vector.broadcast %cst_115 : f32 to vector<2x128xf32>
    %194 = arith.addf %192, %193 : vector<2x128xf32>
    %195 = vector.extract_strided_slice %178 {offsets = [0, 256], sizes = [2, 128], strides = [1, 1]} : vector<2x512xf32> to vector<2x128xf32>
    %196 = math.tanh %195 : vector<2x128xf32>
    %197 = vector.extract_strided_slice %178 {offsets = [0, 384], sizes = [2, 128], strides = [1, 1]} : vector<2x512xf32> to vector<2x128xf32>
    %cst_116 = arith.constant 5.000000e-01 : f32
    %198 = vector.broadcast %cst_116 : f32 to vector<2x128xf32>
    %199 = arith.mulf %198, %197 : vector<2x128xf32>
    %200 = math.tanh %199 : vector<2x128xf32>
    %cst_117 = arith.constant 5.000000e-01 : f32
    %201 = vector.broadcast %cst_117 : f32 to vector<2x128xf32>
    %202 = arith.mulf %201, %200 : vector<2x128xf32>
    %cst_118 = arith.constant 5.000000e-01 : f32
    %203 = vector.broadcast %cst_118 : f32 to vector<2x128xf32>
    %204 = arith.addf %202, %203 : vector<2x128xf32>
    %c0_119 = arith.constant 0 : index
    %c0_120 = arith.constant 0 : index
    %205 = vector.load %arg12[%c0_119, %c0_120] : memref<2x128xf32, #tpu.memory_space<vmem>>, vector<2x128xf32>
    %206 = arith.mulf %194, %205 : vector<2x128xf32>
    %207 = arith.mulf %186, %196 : vector<2x128xf32>
    %208 = arith.addf %206, %207 : vector<2x128xf32>
    %209 = math.tanh %208 : vector<2x128xf32>
    %210 = arith.mulf %204, %209 : vector<2x128xf32>
    %c0_121 = arith.constant 0 : index
    %c0_122 = arith.constant 0 : index
    %211 = vector.load %arg12[%c0_121, %c0_122] : memref<2x128xf32, #tpu.memory_space<vmem>>, vector<2x128xf32>
    tpu.vector_store %arg12[%c0_121, %c0_122], %208 {strides = array<i32>} : memref<2x128xf32, #tpu.memory_space<vmem>>, vector<2x128xf32>,
    %c0_123 = arith.constant 0 : index
    %c0_124 = arith.constant 0 : index
    %212 = vector.load %arg11[%c0_123, %c0_124] : memref<2x128xf32, #tpu.memory_space<vmem>>, vector<2x128xf32>
    tpu.vector_store %arg11[%c0_123, %c0_124], %210 {strides = array<i32>} : memref<2x128xf32, #tpu.memory_space<vmem>>, vector<2x128xf32>,
    %c0_125 = arith.constant 0 : index
    %c0_126 = arith.constant 0 : index
    %213 = vector.load %arg13[%c0_125, %c0_126] : memref<2x128xf32, #tpu.memory_space<vmem>>, vector<2x128xf32>
    %214 = tpu.concatenate %210, %213 in 1 : vector<2x128xf32>, vector<2x128xf32> -> vector<2x256xf32>
    %c0_127 = arith.constant 0 : index
    %c0_128 = arith.constant 0 : index
    %215 = vector.load %arg4[%c0_127, %c0_128] : memref<256x512xf32, #tpu.memory_space<vmem>>, vector<256x512xf32>
    %cst_129 = arith.constant dense<0.000000e+00> : vector<2x512xf32>
    %216 = tpu.matmul %214, %215, %cst_129 {dimension_numbers = #tpu.dot_dimension_numbers<[1], [0], [0], [1], [0, 0, 1, 1], [], []>} : vector<2x256xf32>, vector<256x512xf32>, vector<2x512xf32> -> vector<2x512xf32>
    %217 = arith.addf %216, %17 : vector<2x512xf32>
    %218 = vector.extract_strided_slice %217 {offsets = [0, 0], sizes = [2, 128], strides = [1, 1]} : vector<2x512xf32> to vector<2x128xf32>
    %cst_130 = arith.constant 5.000000e-01 : f32
    %219 = vector.broadcast %cst_130 : f32 to vector<2x128xf32>
    %220 = arith.mulf %219, %218 : vector<2x128xf32>
    %221 = math.tanh %220 : vector<2x128xf32>
    %cst_131 = arith.constant 5.000000e-01 : f32
    %222 = vector.broadcast %cst_131 : f32 to vector<2x128xf32>
    %223 = arith.mulf %222, %221 : vector<2x128xf32>
    %cst_132 = arith.constant 5.000000e-01 : f32
    %224 = vector.broadcast %cst_132 : f32 to vector<2x128xf32>
    %225 = arith.addf %223, %224 : vector<2x128xf32>
    %226 = vector.extract_strided_slice %217 {offsets = [0, 128], sizes = [2, 128], strides = [1, 1]} : vector<2x512xf32> to vector<2x128xf32>
    %cst_133 = arith.constant 5.000000e-01 : f32
    %227 = vector.broadcast %cst_133 : f32 to vector<2x128xf32>
    %228 = arith.mulf %227, %226 : vector<2x128xf32>
    %229 = math.tanh %228 : vector<2x128xf32>
    %cst_134 = arith.constant 5.000000e-01 : f32
    %230 = vector.broadcast %cst_134 : f32 to vector<2x128xf32>
    %231 = arith.mulf %230, %229 : vector<2x128xf32>
    %cst_135 = arith.constant 5.000000e-01 : f32
    %232 = vector.broadcast %cst_135 : f32 to vector<2x128xf32>
    %233 = arith.addf %231, %232 : vector<2x128xf32>
    %234 = vector.extract_strided_slice %217 {offsets = [0, 256], sizes = [2, 128], strides = [1, 1]} : vector<2x512xf32> to vector<2x128xf32>
    %235 = math.tanh %234 : vector<2x128xf32>
    %236 = vector.extract_strided_slice %217 {offsets = [0, 384], sizes = [2, 128], strides = [1, 1]} : vector<2x512xf32> to vector<2x128xf32>
    %cst_136 = arith.constant 5.000000e-01 : f32
    %237 = vector.broadcast %cst_136 : f32 to vector<2x128xf32>
    %238 = arith.mulf %237, %236 : vector<2x128xf32>
    %239 = math.tanh %238 : vector<2x128xf32>
    %cst_137 = arith.constant 5.000000e-01 : f32
    %240 = vector.broadcast %cst_137 : f32 to vector<2x128xf32>
    %241 = arith.mulf %240, %239 : vector<2x128xf32>
    %cst_138 = arith.constant 5.000000e-01 : f32
    %242 = vector.broadcast %cst_138 : f32 to vector<2x128xf32>
    %243 = arith.addf %241, %242 : vector<2x128xf32>
    %c0_139 = arith.constant 0 : index
    %c0_140 = arith.constant 0 : index
    %244 = vector.load %arg14[%c0_139, %c0_140] : memref<2x128xf32, #tpu.memory_space<vmem>>, vector<2x128xf32>
    %245 = arith.mulf %233, %244 : vector<2x128xf32>
    %246 = arith.mulf %225, %235 : vector<2x128xf32>
    %247 = arith.addf %245, %246 : vector<2x128xf32>
    %248 = math.tanh %247 : vector<2x128xf32>
    %249 = arith.mulf %243, %248 : vector<2x128xf32>
    %c0_141 = arith.constant 0 : index
    %c0_142 = arith.constant 0 : index
    %250 = vector.load %arg14[%c0_141, %c0_142] : memref<2x128xf32, #tpu.memory_space<vmem>>, vector<2x128xf32>
    tpu.vector_store %arg14[%c0_141, %c0_142], %247 {strides = array<i32>} : memref<2x128xf32, #tpu.memory_space<vmem>>, vector<2x128xf32>,
    %c0_143 = arith.constant 0 : index
    %c0_144 = arith.constant 0 : index
    %251 = vector.load %arg13[%c0_143, %c0_144] : memref<2x128xf32, #tpu.memory_space<vmem>>, vector<2x128xf32>
    tpu.vector_store %arg13[%c0_143, %c0_144], %249 {strides = array<i32>} : memref<2x128xf32, #tpu.memory_space<vmem>>, vector<2x128xf32>,
    %c6 = arith.constant 6 : index
    %c0_145 = arith.constant 0 : index
    %252 = vector.load %arg15[%c6, %c0_145] : memref<16x512xf32, #tpu.memory_space<vmem>>, vector<2x512xf32>
    %c0_146 = arith.constant 0 : index
    %c0_147 = arith.constant 0 : index
    %253 = vector.load %arg11[%c0_146, %c0_147] : memref<2x128xf32, #tpu.memory_space<vmem>>, vector<2x128xf32>
    %c0_148 = arith.constant 0 : index
    %c0_149 = arith.constant 0 : index
    %254 = vector.load %arg2[%c0_148, %c0_149] : memref<128x512xf32, #tpu.memory_space<vmem>>, vector<128x512xf32>
    %cst_150 = arith.constant dense<0.000000e+00> : vector<2x512xf32>
    %255 = tpu.matmul %253, %254, %cst_150 {dimension_numbers = #tpu.dot_dimension_numbers<[1], [0], [0], [1], [0, 0, 1, 1], [], []>} : vector<2x128xf32>, vector<128x512xf32>, vector<2x512xf32> -> vector<2x512xf32>
    %256 = arith.addf %252, %255 : vector<2x512xf32>
    %257 = vector.extract_strided_slice %256 {offsets = [0, 0], sizes = [2, 128], strides = [1, 1]} : vector<2x512xf32> to vector<2x128xf32>
    %cst_151 = arith.constant 5.000000e-01 : f32
    %258 = vector.broadcast %cst_151 : f32 to vector<2x128xf32>
    %259 = arith.mulf %258, %257 : vector<2x128xf32>
    %260 = math.tanh %259 : vector<2x128xf32>
    %cst_152 = arith.constant 5.000000e-01 : f32
    %261 = vector.broadcast %cst_152 : f32 to vector<2x128xf32>
    %262 = arith.mulf %261, %260 : vector<2x128xf32>
    %cst_153 = arith.constant 5.000000e-01 : f32
    %263 = vector.broadcast %cst_153 : f32 to vector<2x128xf32>
    %264 = arith.addf %262, %263 : vector<2x128xf32>
    %265 = vector.extract_strided_slice %256 {offsets = [0, 128], sizes = [2, 128], strides = [1, 1]} : vector<2x512xf32> to vector<2x128xf32>
    %cst_154 = arith.constant 5.000000e-01 : f32
    %266 = vector.broadcast %cst_154 : f32 to vector<2x128xf32>
    %267 = arith.mulf %266, %265 : vector<2x128xf32>
    %268 = math.tanh %267 : vector<2x128xf32>
    %cst_155 = arith.constant 5.000000e-01 : f32
    %269 = vector.broadcast %cst_155 : f32 to vector<2x128xf32>
    %270 = arith.mulf %269, %268 : vector<2x128xf32>
    %cst_156 = arith.constant 5.000000e-01 : f32
    %271 = vector.broadcast %cst_156 : f32 to vector<2x128xf32>
    %272 = arith.addf %270, %271 : vector<2x128xf32>
    %273 = vector.extract_strided_slice %256 {offsets = [0, 256], sizes = [2, 128], strides = [1, 1]} : vector<2x512xf32> to vector<2x128xf32>
    %274 = math.tanh %273 : vector<2x128xf32>
    %275 = vector.extract_strided_slice %256 {offsets = [0, 384], sizes = [2, 128], strides = [1, 1]} : vector<2x512xf32> to vector<2x128xf32>
    %cst_157 = arith.constant 5.000000e-01 : f32
    %276 = vector.broadcast %cst_157 : f32 to vector<2x128xf32>
    %277 = arith.mulf %276, %275 : vector<2x128xf32>
    %278 = math.tanh %277 : vector<2x128xf32>
    %cst_158 = arith.constant 5.000000e-01 : f32
    %279 = vector.broadcast %cst_158 : f32 to vector<2x128xf32>
    %280 = arith.mulf %279, %278 : vector<2x128xf32>
    %cst_159 = arith.constant 5.000000e-01 : f32
    %281 = vector.broadcast %cst_159 : f32 to vector<2x128xf32>
    %282 = arith.addf %280, %281 : vector<2x128xf32>
    %c0_160 = arith.constant 0 : index
    %c0_161 = arith.constant 0 : index
    %283 = vector.load %arg12[%c0_160, %c0_161] : memref<2x128xf32, #tpu.memory_space<vmem>>, vector<2x128xf32>
    %284 = arith.mulf %272, %283 : vector<2x128xf32>
    %285 = arith.mulf %264, %274 : vector<2x128xf32>
    %286 = arith.addf %284, %285 : vector<2x128xf32>
    %287 = math.tanh %286 : vector<2x128xf32>
    %288 = arith.mulf %282, %287 : vector<2x128xf32>
    %c0_162 = arith.constant 0 : index
    %c0_163 = arith.constant 0 : index
    %289 = vector.load %arg12[%c0_162, %c0_163] : memref<2x128xf32, #tpu.memory_space<vmem>>, vector<2x128xf32>
    tpu.vector_store %arg12[%c0_162, %c0_163], %286 {strides = array<i32>} : memref<2x128xf32, #tpu.memory_space<vmem>>, vector<2x128xf32>,
    %c0_164 = arith.constant 0 : index
    %c0_165 = arith.constant 0 : index
    %290 = vector.load %arg11[%c0_164, %c0_165] : memref<2x128xf32, #tpu.memory_space<vmem>>, vector<2x128xf32>
    tpu.vector_store %arg11[%c0_164, %c0_165], %288 {strides = array<i32>} : memref<2x128xf32, #tpu.memory_space<vmem>>, vector<2x128xf32>,
    %c0_166 = arith.constant 0 : index
    %c0_167 = arith.constant 0 : index
    %291 = vector.load %arg13[%c0_166, %c0_167] : memref<2x128xf32, #tpu.memory_space<vmem>>, vector<2x128xf32>
    %292 = tpu.concatenate %288, %291 in 1 : vector<2x128xf32>, vector<2x128xf32> -> vector<2x256xf32>
    %c0_168 = arith.constant 0 : index
    %c0_169 = arith.constant 0 : index
    %293 = vector.load %arg4[%c0_168, %c0_169] : memref<256x512xf32, #tpu.memory_space<vmem>>, vector<256x512xf32>
    %cst_170 = arith.constant dense<0.000000e+00> : vector<2x512xf32>
    %294 = tpu.matmul %292, %293, %cst_170 {dimension_numbers = #tpu.dot_dimension_numbers<[1], [0], [0], [1], [0, 0, 1, 1], [], []>} : vector<2x256xf32>, vector<256x512xf32>, vector<2x512xf32> -> vector<2x512xf32>
    %295 = arith.addf %294, %17 : vector<2x512xf32>
    %296 = vector.extract_strided_slice %295 {offsets = [0, 0], sizes = [2, 128], strides = [1, 1]} : vector<2x512xf32> to vector<2x128xf32>
    %cst_171 = arith.constant 5.000000e-01 : f32
    %297 = vector.broadcast %cst_171 : f32 to vector<2x128xf32>
    %298 = arith.mulf %297, %296 : vector<2x128xf32>
    %299 = math.tanh %298 : vector<2x128xf32>
    %cst_172 = arith.constant 5.000000e-01 : f32
    %300 = vector.broadcast %cst_172 : f32 to vector<2x128xf32>
    %301 = arith.mulf %300, %299 : vector<2x128xf32>
    %cst_173 = arith.constant 5.000000e-01 : f32
    %302 = vector.broadcast %cst_173 : f32 to vector<2x128xf32>
    %303 = arith.addf %301, %302 : vector<2x128xf32>
    %304 = vector.extract_strided_slice %295 {offsets = [0, 128], sizes = [2, 128], strides = [1, 1]} : vector<2x512xf32> to vector<2x128xf32>
    %cst_174 = arith.constant 5.000000e-01 : f32
    %305 = vector.broadcast %cst_174 : f32 to vector<2x128xf32>
    %306 = arith.mulf %305, %304 : vector<2x128xf32>
    %307 = math.tanh %306 : vector<2x128xf32>
    %cst_175 = arith.constant 5.000000e-01 : f32
    %308 = vector.broadcast %cst_175 : f32 to vector<2x128xf32>
    %309 = arith.mulf %308, %307 : vector<2x128xf32>
    %cst_176 = arith.constant 5.000000e-01 : f32
    %310 = vector.broadcast %cst_176 : f32 to vector<2x128xf32>
    %311 = arith.addf %309, %310 : vector<2x128xf32>
    %312 = vector.extract_strided_slice %295 {offsets = [0, 256], sizes = [2, 128], strides = [1, 1]} : vector<2x512xf32> to vector<2x128xf32>
    %313 = math.tanh %312 : vector<2x128xf32>
    %314 = vector.extract_strided_slice %295 {offsets = [0, 384], sizes = [2, 128], strides = [1, 1]} : vector<2x512xf32> to vector<2x128xf32>
    %cst_177 = arith.constant 5.000000e-01 : f32
    %315 = vector.broadcast %cst_177 : f32 to vector<2x128xf32>
    %316 = arith.mulf %315, %314 : vector<2x128xf32>
    %317 = math.tanh %316 : vector<2x128xf32>
    %cst_178 = arith.constant 5.000000e-01 : f32
    %318 = vector.broadcast %cst_178 : f32 to vector<2x128xf32>
    %319 = arith.mulf %318, %317 : vector<2x128xf32>
    %cst_179 = arith.constant 5.000000e-01 : f32
    %320 = vector.broadcast %cst_179 : f32 to vector<2x128xf32>
    %321 = arith.addf %319, %320 : vector<2x128xf32>
    %c0_180 = arith.constant 0 : index
    %c0_181 = arith.constant 0 : index
    %322 = vector.load %arg14[%c0_180, %c0_181] : memref<2x128xf32, #tpu.memory_space<vmem>>, vector<2x128xf32>
    %323 = arith.mulf %311, %322 : vector<2x128xf32>
    %324 = arith.mulf %303, %313 : vector<2x128xf32>
    %325 = arith.addf %323, %324 : vector<2x128xf32>
    %326 = math.tanh %325 : vector<2x128xf32>
    %327 = arith.mulf %321, %326 : vector<2x128xf32>
    %c0_182 = arith.constant 0 : index
    %c0_183 = arith.constant 0 : index
    %328 = vector.load %arg14[%c0_182, %c0_183] : memref<2x128xf32, #tpu.memory_space<vmem>>, vector<2x128xf32>
    tpu.vector_store %arg14[%c0_182, %c0_183], %325 {strides = array<i32>} : memref<2x128xf32, #tpu.memory_space<vmem>>, vector<2x128xf32>,
    %c0_184 = arith.constant 0 : index
    %c0_185 = arith.constant 0 : index
    %329 = vector.load %arg13[%c0_184, %c0_185] : memref<2x128xf32, #tpu.memory_space<vmem>>, vector<2x128xf32>
    tpu.vector_store %arg13[%c0_184, %c0_185], %327 {strides = array<i32>} : memref<2x128xf32, #tpu.memory_space<vmem>>, vector<2x128xf32>,
    %c8 = arith.constant 8 : index
    %c0_186 = arith.constant 0 : index
    %330 = vector.load %arg15[%c8, %c0_186] : memref<16x512xf32, #tpu.memory_space<vmem>>, vector<2x512xf32>
    %c0_187 = arith.constant 0 : index
    %c0_188 = arith.constant 0 : index
    %331 = vector.load %arg11[%c0_187, %c0_188] : memref<2x128xf32, #tpu.memory_space<vmem>>, vector<2x128xf32>
    %c0_189 = arith.constant 0 : index
    %c0_190 = arith.constant 0 : index
    %332 = vector.load %arg2[%c0_189, %c0_190] : memref<128x512xf32, #tpu.memory_space<vmem>>, vector<128x512xf32>
    %cst_191 = arith.constant dense<0.000000e+00> : vector<2x512xf32>
    %333 = tpu.matmul %331, %332, %cst_191 {dimension_numbers = #tpu.dot_dimension_numbers<[1], [0], [0], [1], [0, 0, 1, 1], [], []>} : vector<2x128xf32>, vector<128x512xf32>, vector<2x512xf32> -> vector<2x512xf32>
    %334 = arith.addf %330, %333 : vector<2x512xf32>
    %335 = vector.extract_strided_slice %334 {offsets = [0, 0], sizes = [2, 128], strides = [1, 1]} : vector<2x512xf32> to vector<2x128xf32>
    %cst_192 = arith.constant 5.000000e-01 : f32
    %336 = vector.broadcast %cst_192 : f32 to vector<2x128xf32>
    %337 = arith.mulf %336, %335 : vector<2x128xf32>
    %338 = math.tanh %337 : vector<2x128xf32>
    %cst_193 = arith.constant 5.000000e-01 : f32
    %339 = vector.broadcast %cst_193 : f32 to vector<2x128xf32>
    %340 = arith.mulf %339, %338 : vector<2x128xf32>
    %cst_194 = arith.constant 5.000000e-01 : f32
    %341 = vector.broadcast %cst_194 : f32 to vector<2x128xf32>
    %342 = arith.addf %340, %341 : vector<2x128xf32>
    %343 = vector.extract_strided_slice %334 {offsets = [0, 128], sizes = [2, 128], strides = [1, 1]} : vector<2x512xf32> to vector<2x128xf32>
    %cst_195 = arith.constant 5.000000e-01 : f32
    %344 = vector.broadcast %cst_195 : f32 to vector<2x128xf32>
    %345 = arith.mulf %344, %343 : vector<2x128xf32>
    %346 = math.tanh %345 : vector<2x128xf32>
    %cst_196 = arith.constant 5.000000e-01 : f32
    %347 = vector.broadcast %cst_196 : f32 to vector<2x128xf32>
    %348 = arith.mulf %347, %346 : vector<2x128xf32>
    %cst_197 = arith.constant 5.000000e-01 : f32
    %349 = vector.broadcast %cst_197 : f32 to vector<2x128xf32>
    %350 = arith.addf %348, %349 : vector<2x128xf32>
    %351 = vector.extract_strided_slice %334 {offsets = [0, 256], sizes = [2, 128], strides = [1, 1]} : vector<2x512xf32> to vector<2x128xf32>
    %352 = math.tanh %351 : vector<2x128xf32>
    %353 = vector.extract_strided_slice %334 {offsets = [0, 384], sizes = [2, 128], strides = [1, 1]} : vector<2x512xf32> to vector<2x128xf32>
    %cst_198 = arith.constant 5.000000e-01 : f32
    %354 = vector.broadcast %cst_198 : f32 to vector<2x128xf32>
    %355 = arith.mulf %354, %353 : vector<2x128xf32>
    %356 = math.tanh %355 : vector<2x128xf32>
    %cst_199 = arith.constant 5.000000e-01 : f32
    %357 = vector.broadcast %cst_199 : f32 to vector<2x128xf32>
    %358 = arith.mulf %357, %356 : vector<2x128xf32>
    %cst_200 = arith.constant 5.000000e-01 : f32
    %359 = vector.broadcast %cst_200 : f32 to vector<2x128xf32>
    %360 = arith.addf %358, %359 : vector<2x128xf32>
    %c0_201 = arith.constant 0 : index
    %c0_202 = arith.constant 0 : index
    %361 = vector.load %arg12[%c0_201, %c0_202] : memref<2x128xf32, #tpu.memory_space<vmem>>, vector<2x128xf32>
    %362 = arith.mulf %350, %361 : vector<2x128xf32>
    %363 = arith.mulf %342, %352 : vector<2x128xf32>
    %364 = arith.addf %362, %363 : vector<2x128xf32>
    %365 = math.tanh %364 : vector<2x128xf32>
    %366 = arith.mulf %360, %365 : vector<2x128xf32>
    %c0_203 = arith.constant 0 : index
    %c0_204 = arith.constant 0 : index
    %367 = vector.load %arg12[%c0_203, %c0_204] : memref<2x128xf32, #tpu.memory_space<vmem>>, vector<2x128xf32>
    tpu.vector_store %arg12[%c0_203, %c0_204], %364 {strides = array<i32>} : memref<2x128xf32, #tpu.memory_space<vmem>>, vector<2x128xf32>,
    %c0_205 = arith.constant 0 : index
    %c0_206 = arith.constant 0 : index
    %368 = vector.load %arg11[%c0_205, %c0_206] : memref<2x128xf32, #tpu.memory_space<vmem>>, vector<2x128xf32>
    tpu.vector_store %arg11[%c0_205, %c0_206], %366 {strides = array<i32>} : memref<2x128xf32, #tpu.memory_space<vmem>>, vector<2x128xf32>,
    %c0_207 = arith.constant 0 : index
    %c0_208 = arith.constant 0 : index
    %369 = vector.load %arg13[%c0_207, %c0_208] : memref<2x128xf32, #tpu.memory_space<vmem>>, vector<2x128xf32>
    %370 = tpu.concatenate %366, %369 in 1 : vector<2x128xf32>, vector<2x128xf32> -> vector<2x256xf32>
    %c0_209 = arith.constant 0 : index
    %c0_210 = arith.constant 0 : index
    %371 = vector.load %arg4[%c0_209, %c0_210] : memref<256x512xf32, #tpu.memory_space<vmem>>, vector<256x512xf32>
    %cst_211 = arith.constant dense<0.000000e+00> : vector<2x512xf32>
    %372 = tpu.matmul %370, %371, %cst_211 {dimension_numbers = #tpu.dot_dimension_numbers<[1], [0], [0], [1], [0, 0, 1, 1], [], []>} : vector<2x256xf32>, vector<256x512xf32>, vector<2x512xf32> -> vector<2x512xf32>
    %373 = arith.addf %372, %17 : vector<2x512xf32>
    %374 = vector.extract_strided_slice %373 {offsets = [0, 0], sizes = [2, 128], strides = [1, 1]} : vector<2x512xf32> to vector<2x128xf32>
    %cst_212 = arith.constant 5.000000e-01 : f32
    %375 = vector.broadcast %cst_212 : f32 to vector<2x128xf32>
    %376 = arith.mulf %375, %374 : vector<2x128xf32>
    %377 = math.tanh %376 : vector<2x128xf32>
    %cst_213 = arith.constant 5.000000e-01 : f32
    %378 = vector.broadcast %cst_213 : f32 to vector<2x128xf32>
    %379 = arith.mulf %378, %377 : vector<2x128xf32>
    %cst_214 = arith.constant 5.000000e-01 : f32
    %380 = vector.broadcast %cst_214 : f32 to vector<2x128xf32>
    %381 = arith.addf %379, %380 : vector<2x128xf32>
    %382 = vector.extract_strided_slice %373 {offsets = [0, 128], sizes = [2, 128], strides = [1, 1]} : vector<2x512xf32> to vector<2x128xf32>
    %cst_215 = arith.constant 5.000000e-01 : f32
    %383 = vector.broadcast %cst_215 : f32 to vector<2x128xf32>
    %384 = arith.mulf %383, %382 : vector<2x128xf32>
    %385 = math.tanh %384 : vector<2x128xf32>
    %cst_216 = arith.constant 5.000000e-01 : f32
    %386 = vector.broadcast %cst_216 : f32 to vector<2x128xf32>
    %387 = arith.mulf %386, %385 : vector<2x128xf32>
    %cst_217 = arith.constant 5.000000e-01 : f32
    %388 = vector.broadcast %cst_217 : f32 to vector<2x128xf32>
    %389 = arith.addf %387, %388 : vector<2x128xf32>
    %390 = vector.extract_strided_slice %373 {offsets = [0, 256], sizes = [2, 128], strides = [1, 1]} : vector<2x512xf32> to vector<2x128xf32>
    %391 = math.tanh %390 : vector<2x128xf32>
    %392 = vector.extract_strided_slice %373 {offsets = [0, 384], sizes = [2, 128], strides = [1, 1]} : vector<2x512xf32> to vector<2x128xf32>
    %cst_218 = arith.constant 5.000000e-01 : f32
    %393 = vector.broadcast %cst_218 : f32 to vector<2x128xf32>
    %394 = arith.mulf %393, %392 : vector<2x128xf32>
    %395 = math.tanh %394 : vector<2x128xf32>
    %cst_219 = arith.constant 5.000000e-01 : f32
    %396 = vector.broadcast %cst_219 : f32 to vector<2x128xf32>
    %397 = arith.mulf %396, %395 : vector<2x128xf32>
    %cst_220 = arith.constant 5.000000e-01 : f32
    %398 = vector.broadcast %cst_220 : f32 to vector<2x128xf32>
    %399 = arith.addf %397, %398 : vector<2x128xf32>
    %c0_221 = arith.constant 0 : index
    %c0_222 = arith.constant 0 : index
    %400 = vector.load %arg14[%c0_221, %c0_222] : memref<2x128xf32, #tpu.memory_space<vmem>>, vector<2x128xf32>
    %401 = arith.mulf %389, %400 : vector<2x128xf32>
    %402 = arith.mulf %381, %391 : vector<2x128xf32>
    %403 = arith.addf %401, %402 : vector<2x128xf32>
    %404 = math.tanh %403 : vector<2x128xf32>
    %405 = arith.mulf %399, %404 : vector<2x128xf32>
    %c0_223 = arith.constant 0 : index
    %c0_224 = arith.constant 0 : index
    %406 = vector.load %arg14[%c0_223, %c0_224] : memref<2x128xf32, #tpu.memory_space<vmem>>, vector<2x128xf32>
    tpu.vector_store %arg14[%c0_223, %c0_224], %403 {strides = array<i32>} : memref<2x128xf32, #tpu.memory_space<vmem>>, vector<2x128xf32>,
    %c0_225 = arith.constant 0 : index
    %c0_226 = arith.constant 0 : index
    %407 = vector.load %arg13[%c0_225, %c0_226] : memref<2x128xf32, #tpu.memory_space<vmem>>, vector<2x128xf32>
    tpu.vector_store %arg13[%c0_225, %c0_226], %405 {strides = array<i32>} : memref<2x128xf32, #tpu.memory_space<vmem>>, vector<2x128xf32>,
    %c10 = arith.constant 10 : index
    %c0_227 = arith.constant 0 : index
    %408 = vector.load %arg15[%c10, %c0_227] : memref<16x512xf32, #tpu.memory_space<vmem>>, vector<2x512xf32>
    %c0_228 = arith.constant 0 : index
    %c0_229 = arith.constant 0 : index
    %409 = vector.load %arg11[%c0_228, %c0_229] : memref<2x128xf32, #tpu.memory_space<vmem>>, vector<2x128xf32>
    %c0_230 = arith.constant 0 : index
    %c0_231 = arith.constant 0 : index
    %410 = vector.load %arg2[%c0_230, %c0_231] : memref<128x512xf32, #tpu.memory_space<vmem>>, vector<128x512xf32>
    %cst_232 = arith.constant dense<0.000000e+00> : vector<2x512xf32>
    %411 = tpu.matmul %409, %410, %cst_232 {dimension_numbers = #tpu.dot_dimension_numbers<[1], [0], [0], [1], [0, 0, 1, 1], [], []>} : vector<2x128xf32>, vector<128x512xf32>, vector<2x512xf32> -> vector<2x512xf32>
    %412 = arith.addf %408, %411 : vector<2x512xf32>
    %413 = vector.extract_strided_slice %412 {offsets = [0, 0], sizes = [2, 128], strides = [1, 1]} : vector<2x512xf32> to vector<2x128xf32>
    %cst_233 = arith.constant 5.000000e-01 : f32
    %414 = vector.broadcast %cst_233 : f32 to vector<2x128xf32>
    %415 = arith.mulf %414, %413 : vector<2x128xf32>
    %416 = math.tanh %415 : vector<2x128xf32>
    %cst_234 = arith.constant 5.000000e-01 : f32
    %417 = vector.broadcast %cst_234 : f32 to vector<2x128xf32>
    %418 = arith.mulf %417, %416 : vector<2x128xf32>
    %cst_235 = arith.constant 5.000000e-01 : f32
    %419 = vector.broadcast %cst_235 : f32 to vector<2x128xf32>
    %420 = arith.addf %418, %419 : vector<2x128xf32>
    %421 = vector.extract_strided_slice %412 {offsets = [0, 128], sizes = [2, 128], strides = [1, 1]} : vector<2x512xf32> to vector<2x128xf32>
    %cst_236 = arith.constant 5.000000e-01 : f32
    %422 = vector.broadcast %cst_236 : f32 to vector<2x128xf32>
    %423 = arith.mulf %422, %421 : vector<2x128xf32>
    %424 = math.tanh %423 : vector<2x128xf32>
    %cst_237 = arith.constant 5.000000e-01 : f32
    %425 = vector.broadcast %cst_237 : f32 to vector<2x128xf32>
    %426 = arith.mulf %425, %424 : vector<2x128xf32>
    %cst_238 = arith.constant 5.000000e-01 : f32
    %427 = vector.broadcast %cst_238 : f32 to vector<2x128xf32>
    %428 = arith.addf %426, %427 : vector<2x128xf32>
    %429 = vector.extract_strided_slice %412 {offsets = [0, 256], sizes = [2, 128], strides = [1, 1]} : vector<2x512xf32> to vector<2x128xf32>
    %430 = math.tanh %429 : vector<2x128xf32>
    %431 = vector.extract_strided_slice %412 {offsets = [0, 384], sizes = [2, 128], strides = [1, 1]} : vector<2x512xf32> to vector<2x128xf32>
    %cst_239 = arith.constant 5.000000e-01 : f32
    %432 = vector.broadcast %cst_239 : f32 to vector<2x128xf32>
    %433 = arith.mulf %432, %431 : vector<2x128xf32>
    %434 = math.tanh %433 : vector<2x128xf32>
    %cst_240 = arith.constant 5.000000e-01 : f32
    %435 = vector.broadcast %cst_240 : f32 to vector<2x128xf32>
    %436 = arith.mulf %435, %434 : vector<2x128xf32>
    %cst_241 = arith.constant 5.000000e-01 : f32
    %437 = vector.broadcast %cst_241 : f32 to vector<2x128xf32>
    %438 = arith.addf %436, %437 : vector<2x128xf32>
    %c0_242 = arith.constant 0 : index
    %c0_243 = arith.constant 0 : index
    %439 = vector.load %arg12[%c0_242, %c0_243] : memref<2x128xf32, #tpu.memory_space<vmem>>, vector<2x128xf32>
    %440 = arith.mulf %428, %439 : vector<2x128xf32>
    %441 = arith.mulf %420, %430 : vector<2x128xf32>
    %442 = arith.addf %440, %441 : vector<2x128xf32>
    %443 = math.tanh %442 : vector<2x128xf32>
    %444 = arith.mulf %438, %443 : vector<2x128xf32>
    %c0_244 = arith.constant 0 : index
    %c0_245 = arith.constant 0 : index
    %445 = vector.load %arg12[%c0_244, %c0_245] : memref<2x128xf32, #tpu.memory_space<vmem>>, vector<2x128xf32>
    tpu.vector_store %arg12[%c0_244, %c0_245], %442 {strides = array<i32>} : memref<2x128xf32, #tpu.memory_space<vmem>>, vector<2x128xf32>,
    %c0_246 = arith.constant 0 : index
    %c0_247 = arith.constant 0 : index
    %446 = vector.load %arg11[%c0_246, %c0_247] : memref<2x128xf32, #tpu.memory_space<vmem>>, vector<2x128xf32>
    tpu.vector_store %arg11[%c0_246, %c0_247], %444 {strides = array<i32>} : memref<2x128xf32, #tpu.memory_space<vmem>>, vector<2x128xf32>,
    %c0_248 = arith.constant 0 : index
    %c0_249 = arith.constant 0 : index
    %447 = vector.load %arg13[%c0_248, %c0_249] : memref<2x128xf32, #tpu.memory_space<vmem>>, vector<2x128xf32>
    %448 = tpu.concatenate %444, %447 in 1 : vector<2x128xf32>, vector<2x128xf32> -> vector<2x256xf32>
    %c0_250 = arith.constant 0 : index
    %c0_251 = arith.constant 0 : index
    %449 = vector.load %arg4[%c0_250, %c0_251] : memref<256x512xf32, #tpu.memory_space<vmem>>, vector<256x512xf32>
    %cst_252 = arith.constant dense<0.000000e+00> : vector<2x512xf32>
    %450 = tpu.matmul %448, %449, %cst_252 {dimension_numbers = #tpu.dot_dimension_numbers<[1], [0], [0], [1], [0, 0, 1, 1], [], []>} : vector<2x256xf32>, vector<256x512xf32>, vector<2x512xf32> -> vector<2x512xf32>
    %451 = arith.addf %450, %17 : vector<2x512xf32>
    %452 = vector.extract_strided_slice %451 {offsets = [0, 0], sizes = [2, 128], strides = [1, 1]} : vector<2x512xf32> to vector<2x128xf32>
    %cst_253 = arith.constant 5.000000e-01 : f32
    %453 = vector.broadcast %cst_253 : f32 to vector<2x128xf32>
    %454 = arith.mulf %453, %452 : vector<2x128xf32>
    %455 = math.tanh %454 : vector<2x128xf32>
    %cst_254 = arith.constant 5.000000e-01 : f32
    %456 = vector.broadcast %cst_254 : f32 to vector<2x128xf32>
    %457 = arith.mulf %456, %455 : vector<2x128xf32>
    %cst_255 = arith.constant 5.000000e-01 : f32
    %458 = vector.broadcast %cst_255 : f32 to vector<2x128xf32>
    %459 = arith.addf %457, %458 : vector<2x128xf32>
    %460 = vector.extract_strided_slice %451 {offsets = [0, 128], sizes = [2, 128], strides = [1, 1]} : vector<2x512xf32> to vector<2x128xf32>
    %cst_256 = arith.constant 5.000000e-01 : f32
    %461 = vector.broadcast %cst_256 : f32 to vector<2x128xf32>
    %462 = arith.mulf %461, %460 : vector<2x128xf32>
    %463 = math.tanh %462 : vector<2x128xf32>
    %cst_257 = arith.constant 5.000000e-01 : f32
    %464 = vector.broadcast %cst_257 : f32 to vector<2x128xf32>
    %465 = arith.mulf %464, %463 : vector<2x128xf32>
    %cst_258 = arith.constant 5.000000e-01 : f32
    %466 = vector.broadcast %cst_258 : f32 to vector<2x128xf32>
    %467 = arith.addf %465, %466 : vector<2x128xf32>
    %468 = vector.extract_strided_slice %451 {offsets = [0, 256], sizes = [2, 128], strides = [1, 1]} : vector<2x512xf32> to vector<2x128xf32>
    %469 = math.tanh %468 : vector<2x128xf32>
    %470 = vector.extract_strided_slice %451 {offsets = [0, 384], sizes = [2, 128], strides = [1, 1]} : vector<2x512xf32> to vector<2x128xf32>
    %cst_259 = arith.constant 5.000000e-01 : f32
    %471 = vector.broadcast %cst_259 : f32 to vector<2x128xf32>
    %472 = arith.mulf %471, %470 : vector<2x128xf32>
    %473 = math.tanh %472 : vector<2x128xf32>
    %cst_260 = arith.constant 5.000000e-01 : f32
    %474 = vector.broadcast %cst_260 : f32 to vector<2x128xf32>
    %475 = arith.mulf %474, %473 : vector<2x128xf32>
    %cst_261 = arith.constant 5.000000e-01 : f32
    %476 = vector.broadcast %cst_261 : f32 to vector<2x128xf32>
    %477 = arith.addf %475, %476 : vector<2x128xf32>
    %c0_262 = arith.constant 0 : index
    %c0_263 = arith.constant 0 : index
    %478 = vector.load %arg14[%c0_262, %c0_263] : memref<2x128xf32, #tpu.memory_space<vmem>>, vector<2x128xf32>
    %479 = arith.mulf %467, %478 : vector<2x128xf32>
    %480 = arith.mulf %459, %469 : vector<2x128xf32>
    %481 = arith.addf %479, %480 : vector<2x128xf32>
    %482 = math.tanh %481 : vector<2x128xf32>
    %483 = arith.mulf %477, %482 : vector<2x128xf32>
    %c0_264 = arith.constant 0 : index
    %c0_265 = arith.constant 0 : index
    %484 = vector.load %arg14[%c0_264, %c0_265] : memref<2x128xf32, #tpu.memory_space<vmem>>, vector<2x128xf32>
    tpu.vector_store %arg14[%c0_264, %c0_265], %481 {strides = array<i32>} : memref<2x128xf32, #tpu.memory_space<vmem>>, vector<2x128xf32>,
    %c0_266 = arith.constant 0 : index
    %c0_267 = arith.constant 0 : index
    %485 = vector.load %arg13[%c0_266, %c0_267] : memref<2x128xf32, #tpu.memory_space<vmem>>, vector<2x128xf32>
    tpu.vector_store %arg13[%c0_266, %c0_267], %483 {strides = array<i32>} : memref<2x128xf32, #tpu.memory_space<vmem>>, vector<2x128xf32>,
    %c12 = arith.constant 12 : index
    %c0_268 = arith.constant 0 : index
    %486 = vector.load %arg15[%c12, %c0_268] : memref<16x512xf32, #tpu.memory_space<vmem>>, vector<2x512xf32>
    %c0_269 = arith.constant 0 : index
    %c0_270 = arith.constant 0 : index
    %487 = vector.load %arg11[%c0_269, %c0_270] : memref<2x128xf32, #tpu.memory_space<vmem>>, vector<2x128xf32>
    %c0_271 = arith.constant 0 : index
    %c0_272 = arith.constant 0 : index
    %488 = vector.load %arg2[%c0_271, %c0_272] : memref<128x512xf32, #tpu.memory_space<vmem>>, vector<128x512xf32>
    %cst_273 = arith.constant dense<0.000000e+00> : vector<2x512xf32>
    %489 = tpu.matmul %487, %488, %cst_273 {dimension_numbers = #tpu.dot_dimension_numbers<[1], [0], [0], [1], [0, 0, 1, 1], [], []>} : vector<2x128xf32>, vector<128x512xf32>, vector<2x512xf32> -> vector<2x512xf32>
    %490 = arith.addf %486, %489 : vector<2x512xf32>
    %491 = vector.extract_strided_slice %490 {offsets = [0, 0], sizes = [2, 128], strides = [1, 1]} : vector<2x512xf32> to vector<2x128xf32>
    %cst_274 = arith.constant 5.000000e-01 : f32
    %492 = vector.broadcast %cst_274 : f32 to vector<2x128xf32>
    %493 = arith.mulf %492, %491 : vector<2x128xf32>
    %494 = math.tanh %493 : vector<2x128xf32>
    %cst_275 = arith.constant 5.000000e-01 : f32
    %495 = vector.broadcast %cst_275 : f32 to vector<2x128xf32>
    %496 = arith.mulf %495, %494 : vector<2x128xf32>
    %cst_276 = arith.constant 5.000000e-01 : f32
    %497 = vector.broadcast %cst_276 : f32 to vector<2x128xf32>
    %498 = arith.addf %496, %497 : vector<2x128xf32>
    %499 = vector.extract_strided_slice %490 {offsets = [0, 128], sizes = [2, 128], strides = [1, 1]} : vector<2x512xf32> to vector<2x128xf32>
    %cst_277 = arith.constant 5.000000e-01 : f32
    %500 = vector.broadcast %cst_277 : f32 to vector<2x128xf32>
    %501 = arith.mulf %500, %499 : vector<2x128xf32>
    %502 = math.tanh %501 : vector<2x128xf32>
    %cst_278 = arith.constant 5.000000e-01 : f32
    %503 = vector.broadcast %cst_278 : f32 to vector<2x128xf32>
    %504 = arith.mulf %503, %502 : vector<2x128xf32>
    %cst_279 = arith.constant 5.000000e-01 : f32
    %505 = vector.broadcast %cst_279 : f32 to vector<2x128xf32>
    %506 = arith.addf %504, %505 : vector<2x128xf32>
    %507 = vector.extract_strided_slice %490 {offsets = [0, 256], sizes = [2, 128], strides = [1, 1]} : vector<2x512xf32> to vector<2x128xf32>
    %508 = math.tanh %507 : vector<2x128xf32>
    %509 = vector.extract_strided_slice %490 {offsets = [0, 384], sizes = [2, 128], strides = [1, 1]} : vector<2x512xf32> to vector<2x128xf32>
    %cst_280 = arith.constant 5.000000e-01 : f32
    %510 = vector.broadcast %cst_280 : f32 to vector<2x128xf32>
    %511 = arith.mulf %510, %509 : vector<2x128xf32>
    %512 = math.tanh %511 : vector<2x128xf32>
    %cst_281 = arith.constant 5.000000e-01 : f32
    %513 = vector.broadcast %cst_281 : f32 to vector<2x128xf32>
    %514 = arith.mulf %513, %512 : vector<2x128xf32>
    %cst_282 = arith.constant 5.000000e-01 : f32
    %515 = vector.broadcast %cst_282 : f32 to vector<2x128xf32>
    %516 = arith.addf %514, %515 : vector<2x128xf32>
    %c0_283 = arith.constant 0 : index
    %c0_284 = arith.constant 0 : index
    %517 = vector.load %arg12[%c0_283, %c0_284] : memref<2x128xf32, #tpu.memory_space<vmem>>, vector<2x128xf32>
    %518 = arith.mulf %506, %517 : vector<2x128xf32>
    %519 = arith.mulf %498, %508 : vector<2x128xf32>
    %520 = arith.addf %518, %519 : vector<2x128xf32>
    %521 = math.tanh %520 : vector<2x128xf32>
    %522 = arith.mulf %516, %521 : vector<2x128xf32>
    %c0_285 = arith.constant 0 : index
    %c0_286 = arith.constant 0 : index
    %523 = vector.load %arg12[%c0_285, %c0_286] : memref<2x128xf32, #tpu.memory_space<vmem>>, vector<2x128xf32>
    tpu.vector_store %arg12[%c0_285, %c0_286], %520 {strides = array<i32>} : memref<2x128xf32, #tpu.memory_space<vmem>>, vector<2x128xf32>,
    %c0_287 = arith.constant 0 : index
    %c0_288 = arith.constant 0 : index
    %524 = vector.load %arg11[%c0_287, %c0_288] : memref<2x128xf32, #tpu.memory_space<vmem>>, vector<2x128xf32>
    tpu.vector_store %arg11[%c0_287, %c0_288], %522 {strides = array<i32>} : memref<2x128xf32, #tpu.memory_space<vmem>>, vector<2x128xf32>,
    %c0_289 = arith.constant 0 : index
    %c0_290 = arith.constant 0 : index
    %525 = vector.load %arg13[%c0_289, %c0_290] : memref<2x128xf32, #tpu.memory_space<vmem>>, vector<2x128xf32>
    %526 = tpu.concatenate %522, %525 in 1 : vector<2x128xf32>, vector<2x128xf32> -> vector<2x256xf32>
    %c0_291 = arith.constant 0 : index
    %c0_292 = arith.constant 0 : index
    %527 = vector.load %arg4[%c0_291, %c0_292] : memref<256x512xf32, #tpu.memory_space<vmem>>, vector<256x512xf32>
    %cst_293 = arith.constant dense<0.000000e+00> : vector<2x512xf32>
    %528 = tpu.matmul %526, %527, %cst_293 {dimension_numbers = #tpu.dot_dimension_numbers<[1], [0], [0], [1], [0, 0, 1, 1], [], []>} : vector<2x256xf32>, vector<256x512xf32>, vector<2x512xf32> -> vector<2x512xf32>
    %529 = arith.addf %528, %17 : vector<2x512xf32>
    %530 = vector.extract_strided_slice %529 {offsets = [0, 0], sizes = [2, 128], strides = [1, 1]} : vector<2x512xf32> to vector<2x128xf32>
    %cst_294 = arith.constant 5.000000e-01 : f32
    %531 = vector.broadcast %cst_294 : f32 to vector<2x128xf32>
    %532 = arith.mulf %531, %530 : vector<2x128xf32>
    %533 = math.tanh %532 : vector<2x128xf32>
    %cst_295 = arith.constant 5.000000e-01 : f32
    %534 = vector.broadcast %cst_295 : f32 to vector<2x128xf32>
    %535 = arith.mulf %534, %533 : vector<2x128xf32>
    %cst_296 = arith.constant 5.000000e-01 : f32
    %536 = vector.broadcast %cst_296 : f32 to vector<2x128xf32>
    %537 = arith.addf %535, %536 : vector<2x128xf32>
    %538 = vector.extract_strided_slice %529 {offsets = [0, 128], sizes = [2, 128], strides = [1, 1]} : vector<2x512xf32> to vector<2x128xf32>
    %cst_297 = arith.constant 5.000000e-01 : f32
    %539 = vector.broadcast %cst_297 : f32 to vector<2x128xf32>
    %540 = arith.mulf %539, %538 : vector<2x128xf32>
    %541 = math.tanh %540 : vector<2x128xf32>
    %cst_298 = arith.constant 5.000000e-01 : f32
    %542 = vector.broadcast %cst_298 : f32 to vector<2x128xf32>
    %543 = arith.mulf %542, %541 : vector<2x128xf32>
    %cst_299 = arith.constant 5.000000e-01 : f32
    %544 = vector.broadcast %cst_299 : f32 to vector<2x128xf32>
    %545 = arith.addf %543, %544 : vector<2x128xf32>
    %546 = vector.extract_strided_slice %529 {offsets = [0, 256], sizes = [2, 128], strides = [1, 1]} : vector<2x512xf32> to vector<2x128xf32>
    %547 = math.tanh %546 : vector<2x128xf32>
    %548 = vector.extract_strided_slice %529 {offsets = [0, 384], sizes = [2, 128], strides = [1, 1]} : vector<2x512xf32> to vector<2x128xf32>
    %cst_300 = arith.constant 5.000000e-01 : f32
    %549 = vector.broadcast %cst_300 : f32 to vector<2x128xf32>
    %550 = arith.mulf %549, %548 : vector<2x128xf32>
    %551 = math.tanh %550 : vector<2x128xf32>
    %cst_301 = arith.constant 5.000000e-01 : f32
    %552 = vector.broadcast %cst_301 : f32 to vector<2x128xf32>
    %553 = arith.mulf %552, %551 : vector<2x128xf32>
    %cst_302 = arith.constant 5.000000e-01 : f32
    %554 = vector.broadcast %cst_302 : f32 to vector<2x128xf32>
    %555 = arith.addf %553, %554 : vector<2x128xf32>
    %c0_303 = arith.constant 0 : index
    %c0_304 = arith.constant 0 : index
    %556 = vector.load %arg14[%c0_303, %c0_304] : memref<2x128xf32, #tpu.memory_space<vmem>>, vector<2x128xf32>
    %557 = arith.mulf %545, %556 : vector<2x128xf32>
    %558 = arith.mulf %537, %547 : vector<2x128xf32>
    %559 = arith.addf %557, %558 : vector<2x128xf32>
    %560 = math.tanh %559 : vector<2x128xf32>
    %561 = arith.mulf %555, %560 : vector<2x128xf32>
    %c0_305 = arith.constant 0 : index
    %c0_306 = arith.constant 0 : index
    %562 = vector.load %arg14[%c0_305, %c0_306] : memref<2x128xf32, #tpu.memory_space<vmem>>, vector<2x128xf32>
    tpu.vector_store %arg14[%c0_305, %c0_306], %559 {strides = array<i32>} : memref<2x128xf32, #tpu.memory_space<vmem>>, vector<2x128xf32>,
    %c0_307 = arith.constant 0 : index
    %c0_308 = arith.constant 0 : index
    %563 = vector.load %arg13[%c0_307, %c0_308] : memref<2x128xf32, #tpu.memory_space<vmem>>, vector<2x128xf32>
    tpu.vector_store %arg13[%c0_307, %c0_308], %561 {strides = array<i32>} : memref<2x128xf32, #tpu.memory_space<vmem>>, vector<2x128xf32>,
    %c14 = arith.constant 14 : index
    %c0_309 = arith.constant 0 : index
    %564 = vector.load %arg15[%c14, %c0_309] : memref<16x512xf32, #tpu.memory_space<vmem>>, vector<2x512xf32>
    %c0_310 = arith.constant 0 : index
    %c0_311 = arith.constant 0 : index
    %565 = vector.load %arg11[%c0_310, %c0_311] : memref<2x128xf32, #tpu.memory_space<vmem>>, vector<2x128xf32>
    %c0_312 = arith.constant 0 : index
    %c0_313 = arith.constant 0 : index
    %566 = vector.load %arg2[%c0_312, %c0_313] : memref<128x512xf32, #tpu.memory_space<vmem>>, vector<128x512xf32>
    %cst_314 = arith.constant dense<0.000000e+00> : vector<2x512xf32>
    %567 = tpu.matmul %565, %566, %cst_314 {dimension_numbers = #tpu.dot_dimension_numbers<[1], [0], [0], [1], [0, 0, 1, 1], [], []>} : vector<2x128xf32>, vector<128x512xf32>, vector<2x512xf32> -> vector<2x512xf32>
    %568 = arith.addf %564, %567 : vector<2x512xf32>
    %569 = vector.extract_strided_slice %568 {offsets = [0, 0], sizes = [2, 128], strides = [1, 1]} : vector<2x512xf32> to vector<2x128xf32>
    %cst_315 = arith.constant 5.000000e-01 : f32
    %570 = vector.broadcast %cst_315 : f32 to vector<2x128xf32>
    %571 = arith.mulf %570, %569 : vector<2x128xf32>
    %572 = math.tanh %571 : vector<2x128xf32>
    %cst_316 = arith.constant 5.000000e-01 : f32
    %573 = vector.broadcast %cst_316 : f32 to vector<2x128xf32>
    %574 = arith.mulf %573, %572 : vector<2x128xf32>
    %cst_317 = arith.constant 5.000000e-01 : f32
    %575 = vector.broadcast %cst_317 : f32 to vector<2x128xf32>
    %576 = arith.addf %574, %575 : vector<2x128xf32>
    %577 = vector.extract_strided_slice %568 {offsets = [0, 128], sizes = [2, 128], strides = [1, 1]} : vector<2x512xf32> to vector<2x128xf32>
    %cst_318 = arith.constant 5.000000e-01 : f32
    %578 = vector.broadcast %cst_318 : f32 to vector<2x128xf32>
    %579 = arith.mulf %578, %577 : vector<2x128xf32>
    %580 = math.tanh %579 : vector<2x128xf32>
    %cst_319 = arith.constant 5.000000e-01 : f32
    %581 = vector.broadcast %cst_319 : f32 to vector<2x128xf32>
    %582 = arith.mulf %581, %580 : vector<2x128xf32>
    %cst_320 = arith.constant 5.000000e-01 : f32
    %583 = vector.broadcast %cst_320 : f32 to vector<2x128xf32>
    %584 = arith.addf %582, %583 : vector<2x128xf32>
    %585 = vector.extract_strided_slice %568 {offsets = [0, 256], sizes = [2, 128], strides = [1, 1]} : vector<2x512xf32> to vector<2x128xf32>
    %586 = math.tanh %585 : vector<2x128xf32>
    %587 = vector.extract_strided_slice %568 {offsets = [0, 384], sizes = [2, 128], strides = [1, 1]} : vector<2x512xf32> to vector<2x128xf32>
    %cst_321 = arith.constant 5.000000e-01 : f32
    %588 = vector.broadcast %cst_321 : f32 to vector<2x128xf32>
    %589 = arith.mulf %588, %587 : vector<2x128xf32>
    %590 = math.tanh %589 : vector<2x128xf32>
    %cst_322 = arith.constant 5.000000e-01 : f32
    %591 = vector.broadcast %cst_322 : f32 to vector<2x128xf32>
    %592 = arith.mulf %591, %590 : vector<2x128xf32>
    %cst_323 = arith.constant 5.000000e-01 : f32
    %593 = vector.broadcast %cst_323 : f32 to vector<2x128xf32>
    %594 = arith.addf %592, %593 : vector<2x128xf32>
    %c0_324 = arith.constant 0 : index
    %c0_325 = arith.constant 0 : index
    %595 = vector.load %arg12[%c0_324, %c0_325] : memref<2x128xf32, #tpu.memory_space<vmem>>, vector<2x128xf32>
    %596 = arith.mulf %584, %595 : vector<2x128xf32>
    %597 = arith.mulf %576, %586 : vector<2x128xf32>
    %598 = arith.addf %596, %597 : vector<2x128xf32>
    %599 = math.tanh %598 : vector<2x128xf32>
    %600 = arith.mulf %594, %599 : vector<2x128xf32>
    %c0_326 = arith.constant 0 : index
    %c0_327 = arith.constant 0 : index
    %601 = vector.load %arg12[%c0_326, %c0_327] : memref<2x128xf32, #tpu.memory_space<vmem>>, vector<2x128xf32>
    tpu.vector_store %arg12[%c0_326, %c0_327], %598 {strides = array<i32>} : memref<2x128xf32, #tpu.memory_space<vmem>>, vector<2x128xf32>,
    %c0_328 = arith.constant 0 : index
    %c0_329 = arith.constant 0 : index
    %602 = vector.load %arg11[%c0_328, %c0_329] : memref<2x128xf32, #tpu.memory_space<vmem>>, vector<2x128xf32>
    tpu.vector_store %arg11[%c0_328, %c0_329], %600 {strides = array<i32>} : memref<2x128xf32, #tpu.memory_space<vmem>>, vector<2x128xf32>,
    %c0_330 = arith.constant 0 : index
    %c0_331 = arith.constant 0 : index
    %603 = vector.load %arg13[%c0_330, %c0_331] : memref<2x128xf32, #tpu.memory_space<vmem>>, vector<2x128xf32>
    %604 = tpu.concatenate %600, %603 in 1 : vector<2x128xf32>, vector<2x128xf32> -> vector<2x256xf32>
    %c0_332 = arith.constant 0 : index
    %c0_333 = arith.constant 0 : index
    %605 = vector.load %arg4[%c0_332, %c0_333] : memref<256x512xf32, #tpu.memory_space<vmem>>, vector<256x512xf32>
    %cst_334 = arith.constant dense<0.000000e+00> : vector<2x512xf32>
    %606 = tpu.matmul %604, %605, %cst_334 {dimension_numbers = #tpu.dot_dimension_numbers<[1], [0], [0], [1], [0, 0, 1, 1], [], []>} : vector<2x256xf32>, vector<256x512xf32>, vector<2x512xf32> -> vector<2x512xf32>
    %607 = arith.addf %606, %17 : vector<2x512xf32>
    %608 = vector.extract_strided_slice %607 {offsets = [0, 0], sizes = [2, 128], strides = [1, 1]} : vector<2x512xf32> to vector<2x128xf32>
    %cst_335 = arith.constant 5.000000e-01 : f32
    %609 = vector.broadcast %cst_335 : f32 to vector<2x128xf32>
    %610 = arith.mulf %609, %608 : vector<2x128xf32>
    %611 = math.tanh %610 : vector<2x128xf32>
    %cst_336 = arith.constant 5.000000e-01 : f32
    %612 = vector.broadcast %cst_336 : f32 to vector<2x128xf32>
    %613 = arith.mulf %612, %611 : vector<2x128xf32>
    %cst_337 = arith.constant 5.000000e-01 : f32
    %614 = vector.broadcast %cst_337 : f32 to vector<2x128xf32>
    %615 = arith.addf %613, %614 : vector<2x128xf32>
    %616 = vector.extract_strided_slice %607 {offsets = [0, 128], sizes = [2, 128], strides = [1, 1]} : vector<2x512xf32> to vector<2x128xf32>
    %cst_338 = arith.constant 5.000000e-01 : f32
    %617 = vector.broadcast %cst_338 : f32 to vector<2x128xf32>
    %618 = arith.mulf %617, %616 : vector<2x128xf32>
    %619 = math.tanh %618 : vector<2x128xf32>
    %cst_339 = arith.constant 5.000000e-01 : f32
    %620 = vector.broadcast %cst_339 : f32 to vector<2x128xf32>
    %621 = arith.mulf %620, %619 : vector<2x128xf32>
    %cst_340 = arith.constant 5.000000e-01 : f32
    %622 = vector.broadcast %cst_340 : f32 to vector<2x128xf32>
    %623 = arith.addf %621, %622 : vector<2x128xf32>
    %624 = vector.extract_strided_slice %607 {offsets = [0, 256], sizes = [2, 128], strides = [1, 1]} : vector<2x512xf32> to vector<2x128xf32>
    %625 = math.tanh %624 : vector<2x128xf32>
    %626 = vector.extract_strided_slice %607 {offsets = [0, 384], sizes = [2, 128], strides = [1, 1]} : vector<2x512xf32> to vector<2x128xf32>
    %cst_341 = arith.constant 5.000000e-01 : f32
    %627 = vector.broadcast %cst_341 : f32 to vector<2x128xf32>
    %628 = arith.mulf %627, %626 : vector<2x128xf32>
    %629 = math.tanh %628 : vector<2x128xf32>
    %cst_342 = arith.constant 5.000000e-01 : f32
    %630 = vector.broadcast %cst_342 : f32 to vector<2x128xf32>
    %631 = arith.mulf %630, %629 : vector<2x128xf32>
    %cst_343 = arith.constant 5.000000e-01 : f32
    %632 = vector.broadcast %cst_343 : f32 to vector<2x128xf32>
    %633 = arith.addf %631, %632 : vector<2x128xf32>
    %c0_344 = arith.constant 0 : index
    %c0_345 = arith.constant 0 : index
    %634 = vector.load %arg14[%c0_344, %c0_345] : memref<2x128xf32, #tpu.memory_space<vmem>>, vector<2x128xf32>
    %635 = arith.mulf %623, %634 : vector<2x128xf32>
    %636 = arith.mulf %615, %625 : vector<2x128xf32>
    %637 = arith.addf %635, %636 : vector<2x128xf32>
    %638 = math.tanh %637 : vector<2x128xf32>
    %639 = arith.mulf %633, %638 : vector<2x128xf32>
    %c0_346 = arith.constant 0 : index
    %c0_347 = arith.constant 0 : index
    %640 = vector.load %arg14[%c0_346, %c0_347] : memref<2x128xf32, #tpu.memory_space<vmem>>, vector<2x128xf32>
    tpu.vector_store %arg14[%c0_346, %c0_347], %637 {strides = array<i32>} : memref<2x128xf32, #tpu.memory_space<vmem>>, vector<2x128xf32>,
    %c0_348 = arith.constant 0 : index
    %c0_349 = arith.constant 0 : index
    %641 = vector.load %arg13[%c0_348, %c0_349] : memref<2x128xf32, #tpu.memory_space<vmem>>, vector<2x128xf32>
    tpu.vector_store %arg13[%c0_348, %c0_349], %639 {strides = array<i32>} : memref<2x128xf32, #tpu.memory_space<vmem>>, vector<2x128xf32>,
    %c0_350 = arith.constant 0 : index
    %c0_351 = arith.constant 0 : index
    %642 = vector.load %arg13[%c0_350, %c0_351] : memref<2x128xf32, #tpu.memory_space<vmem>>, vector<2x128xf32>
    %c0_352 = arith.constant 0 : index
    %c0_353 = arith.constant 0 : index
    %643 = vector.load %arg6[%c0_352, %c0_353] : memref<128x128xf32, #tpu.memory_space<vmem>>, vector<128x128xf32>
    %cst_354 = arith.constant dense<0.000000e+00> : vector<2x128xf32>
    %644 = tpu.matmul %642, %643, %cst_354 {dimension_numbers = #tpu.dot_dimension_numbers<[1], [0], [0], [1], [0, 0, 1, 1], [], []>} : vector<2x128xf32>, vector<128x128xf32>, vector<2x128xf32> -> vector<2x128xf32>
    %c0_355 = arith.constant 0 : index
    %c0_356 = arith.constant 0 : index
    %645 = vector.load %arg7[%c0_355, %c0_356] : memref<1x128xf32, #tpu.memory_space<vmem>>, vector<1x128xf32>
    %646 = vector.broadcast %645 : vector<1x128xf32> to vector<2x128xf32>
    %647 = arith.addf %644, %646 : vector<2x128xf32>
    %cst_357 = arith.constant 0.000000e+00 : f32
    %648 = vector.broadcast %cst_357 : f32 to vector<2x128xf32>
    %649 = arith.maximumf %647, %648 : vector<2x128xf32>
    %c0_358 = arith.constant 0 : index
    %c0_359 = arith.constant 0 : index
    %650 = vector.load %arg8[%c0_358, %c0_359] : memref<128x7xf32, #tpu.memory_space<vmem>>, vector<128x7xf32>
    %cst_360 = arith.constant dense<0.000000e+00> : vector<2x7xf32>
    %651 = tpu.matmul %649, %650, %cst_360 {dimension_numbers = #tpu.dot_dimension_numbers<[1], [0], [0], [1], [0, 0, 1, 1], [], []>} : vector<2x128xf32>, vector<128x7xf32>, vector<2x7xf32> -> vector<2x7xf32>
    %c0_361 = arith.constant 0 : index
    %c0_362 = arith.constant 0 : index
    %652 = vector.load %arg9[%c0_361, %c0_362] : memref<1x7xf32, #tpu.memory_space<vmem>>, vector<1x7xf32>
    %653 = vector.broadcast %652 : vector<1x7xf32> to vector<2x7xf32>
    %654 = arith.addf %651, %653 : vector<2x7xf32>
    %655 = tpu.iota {dimensions = array<i32: 1>} : vector<2x7xi32>
    %c3_i32 = arith.constant 3 : i32
    %656 = vector.broadcast %c3_i32 : i32 to vector<2x7xi32>
    %657 = arith.cmpi sge, %655, %656 : vector<2x7xi32>
    %658 = arith.mulf %654, %654 : vector<2x7xf32>
    %cst_363 = arith.constant 0.000000e+00 : f32
    %659 = vector.broadcast %cst_363 : f32 to vector<2x7xf32>
    %660 = arith.select %657, %658, %659 : vector<2x7xi1>, vector<2x7xf32>
    %cst_364 = arith.constant dense<0.000000e+00> : vector<2xf32>
    %661 = vector.multi_reduction <add>, %660, %cst_364 [1] : vector<2x7xf32> to vector<2xf32>
    %662 = vector.shape_cast %661 : vector<2xf32> to vector<2x1xf32>
    %663 = math.sqrt %662 : vector<2x1xf32>
    %cst_365 = arith.constant 9.99999996E-13 : f32
    %664 = vector.broadcast %cst_365 : f32 to vector<2x1xf32>
    %665 = arith.maximumf %663, %664 : vector<2x1xf32>
    %cst_366 = arith.constant 1.000000e+00 : f32
    %666 = vector.broadcast %cst_366 : f32 to vector<2x1xf32>
    %667 = arith.divf %666, %665 : vector<2x1xf32>
    %cst_367 = arith.constant 1.000000e+00 : f32
    %668 = vector.shape_cast %667 : vector<2x1xf32> to vector<2x1xf32>
    %669 = vector.broadcast %668 : vector<2x1xf32> to vector<2x7xf32>
    %670 = vector.broadcast %cst_367 : f32 to vector<2x7xf32>
    %671 = arith.select %657, %669, %670 : vector<2x7xi1>, vector<2x7xf32>
    %672 = arith.mulf %654, %671 : vector<2x7xf32>
    %c0_368 = arith.constant 0 : index
    %c0_369 = arith.constant 0 : index
    %673 = vector.load %arg10[%c0_368, %c0_369] : memref<2x7xf32, #tpu.memory_space<vmem>>, vector<2x7xf32>
    tpu.vector_store %arg10[%c0_368, %c0_369], %672 {strides = array<i32>} : memref<2x7xf32, #tpu.memory_space<vmem>>, vector<2x7xf32>,
    return
  }
}

</mosaic_0001>

<bundles_post_ra>
// kernel: tpu_custom_call.1
= control target key start
LH: loop header
LB: loop body
LE: loop exit
PB: predicated region body
PF: predicated region fallthrough
CT: control target
= control target key end

     0   :  { %15 = vsyncpa [#allocation8], 0  ;;  %s7825_s0 = inlined_call_operand.vmem [shape: f32[16,6], index: 0, kind: input, shape index: {}]   ;;  %s7826_s1 = inlined_call_operand.hbm [shape: f32[6,512], index: 1, kind: input, shape index: {}]   ;;  %s7827_s2 = inlined_call_operand.hbm [shape: f32[128,512], index: 2, kind: input, shape index: {}]   ;;  %s7828_s3 = inlined_call_operand.vmem [shape: f32[1,512], index: 3, kind: input, shape index: {}]   ;;  %s7829_s4 = inlined_call_operand.hbm [shape: f32[256,512], index: 4, kind: input, shape index: {}]   ;;  %s7830_s5 = inlined_call_operand.vmem [shape: f32[1,512], index: 5, kind: input, shape index: {}]   ;;  %s7831_s6 = inlined_call_operand.vmem [shape: f32[128,128], index: 6, kind: input, shape index: {}]   ;;  %s7832_s7 = inlined_call_operand.vmem [shape: f32[1,128], index: 7, kind: input, shape index: {}]   ;;  %s7833_s8 = inlined_call_operand.vmem [shape: f32[128,7], index: 8, kind: input, shape index: {}]   ;;  %s7834_s9 = inlined_call_operand.vmem [shape: f32[1,7], index: 9, kind: input, shape index: {}]   ;;  %s7835_s10 = inlined_call_operand.hbm [shape: f32[2,7], index: 10, kind: output, shape index: {}]  }
   0x1   :  { %16 = vsyncpa [#allocation11], 0  ;;  %s35_s15 = sshll.u32 %s7827_s2, 4  ;;  %s36_s15 = int_to_ptr.hbm [resolvable:$true] %s35_s15 }
   0x2   :  { %17 = vsyncpa [#allocation9], 0  ;;  %s4665_s16 = smov [#allocation10]   ;;  %s25_s20 = sshll.u32 %s7826_s1, 4  ;;  %s26_s20 = int_to_ptr.hbm [resolvable:$true] %s25_s20 }
   0x3   :  { %s37_s17 = sshll.u32 %s4665_s16, 4  ;;  %s4666_s21 = smov 512   ;;  %s38_s17 = int_to_ptr.vmem [resolvable:$true] %s37_s17 }
   0x4   :  { %s4667_s22 = smov 32   ;;  %s4668_s23 = smov [#allocation7]  }
   0x5   :  { %43 = dma.hbm_to_vmem [thread:$0]  %s36_s15, 8192, %s38_s17, [#allocation11], %s4666_s21, %s4666_s21, %s4667_s22  }
   0x6   :  { %s27_s24 = sshll.u32 %s4668_s23, 4  ;;  %s50_s27 = sshll.u32 %s7829_s4, 4  ;;  %s28_s24 = int_to_ptr.vmem [resolvable:$true] %s27_s24  ;;  %s51_s27 = int_to_ptr.hbm [resolvable:$true] %s50_s27 }
   0x7   :  { %30 = dma.hbm_to_vmem [thread:$0]  %s26_s20, 512, %s28_s24, [#allocation8]  }
   0x8   :  { %s4669_s2 = smov [#allocation12]  }
   0x9   :  { %s52_s28 = sshll.u32 %s4669_s2, 4  ;;  %s53_s28 = int_to_ptr.vmem [resolvable:$true] %s52_s28 }
   0xa   :  { %58 = dma.hbm_to_vmem [thread:$0]  %s51_s27, 16384, %s53_s28, [#allocation11], %s4666_s21, %s4666_s21, %s4667_s22  }
   0xb   :  { %4659 = dma.done.wait [#allocation8], 512  }
   0xc   :  { %4660 = vsyncadd [#allocation8], 4294966784 }
   0xd   :  { %4661 = dma.done.wait [#allocation11], 24576  }
   0xe   :  { %4662 = vsyncadd [#allocation11], 4294942720  ;;  %vm108_vm0 = vcmask 1045504   ;;  %v4670_v0 = vmov 0.0   ;;  %v87_v1 = vld [vmem:[#allocation7] sm:$0x3f] }
   0xf   :  { %81 = vst [vmem:[#allocation2] sm:$0x3] %v4670_v0  ;;  %v88_v2 = vld [vmem:[#allocation7 + $0x8] sm:$0x3f]  ;;  %v296_v3 = vld [vmem:[#allocation10 + $0x1e0] sm:$0xff]  ;;  %vm101_vm1 = vcmask 48128   ;;  %4375 = vmatpush.msk.msra.mxu2 %vm108_vm0, %v87_v1 }
  0x10   :  { %82 = vst [vmem:[#allocation3] sm:$0x3] %v4670_v0  ;;  %4378 = vmatpush.msk.msra.mxu3 %vm108_vm0, %v88_v2  ;;  %v4738_v4 = vld [vmem:[#allocation10 + $0x1e8] sm:$0xff]  ;;  %v4743_v5 = vld [vmem:[%s7825_s0] sm:$0xff]  ;;  %v89_v6 = vld [vmem:[#allocation7 + $0x10] sm:$0x3f]  ;;  %300 = vmatpush.msra.mxu0 %v296_v3 }
  0x11   :  { %83 = vst [vmem:[#allocation4] sm:$0x3] %v4670_v0  ;;  %320 = vmatpush.msra.mxu1 %v4738_v4  ;;  %v90_v7 = vld [vmem:[#allocation7 + $0x18] sm:$0x3f]  ;;  %v292_v8 = vld [vmem:[#allocation10 + $0x1c0] sm:$0xff]  ;;  %v4746_v9 = vld [vmem:[#allocation10 + $0x1c8] sm:$0xff]  ;;  %4376 = vmatmul.msk.f32.vlgmr.msra.gmra.mxu2 %vm101_vm1, %v4743_v5 }
  0x12   :  { %84 = vst [vmem:[#allocation5] sm:$0x3] %v4670_v0  ;;  %4379 = vmatmul.msk.f32.vlgmr.msra.gmra.mxu3 %vm101_vm1, %v4743_v5  ;;  %v298_v10 = vld [vmem:[#allocation10 + $0x1f0] sm:$0xff]  ;;  %v4752_v11 = vld [vmem:[#allocation10 + $0x1f8] sm:$0xff]  ;;  %4381 = vmatpush.msk.msrb.mxu2 %vm108_vm0, %v89_v6  ;;  %v288_v12 = vld [vmem:[#allocation10 + $0x1a0] sm:$0xff]  ;;  %vm4322_vm3 = vcmask 50176  }
  0x13   :  { %4384 = vmatpush.msk.msrb.mxu3 %vm108_vm0, %v90_v7  ;;  %v4756_v13 = vld [vmem:[#allocation10 + $0x1a8] sm:$0xff]  ;;  %301 = vmatpush.msra.mxu0 %v292_v8  ;;  %v294_v14 = vld [vmem:[#allocation10 + $0x1d0] sm:$0xff]  ;;  %v4759_v15 = vld [vmem:[#allocation10 + $0x1d8] sm:$0xff]  ;;  %s4364_s27 = sshll.u32 %s7835_s10, 4  ;;  %s4365_s27 = int_to_ptr.hbm [resolvable:$true] %s4364_s27 }
  0x14   :  { %321 = vmatpush.msra.mxu1 %v4746_v9  ;;  %340 = vmatpush.msra.mxu2 %v298_v10  ;;  %v284_v16 = vld [vmem:[#allocation10 + $0x180] sm:$0xff]  ;;  %v4762_v17 = vld [vmem:[#allocation10 + $0x188] sm:$0xff]  ;;  %v290_v18 = vld [vmem:[#allocation10 + $0x1b0] sm:$0xff] }
  0x15   :  { %360 = vmatpush.msra.mxu3 %v4752_v11  ;;  %302 = vmatpush.msra.mxu0 %v288_v12  ;;  %v4765_v19 = vld [vmem:[#allocation10 + $0x1b8] sm:$0xff]  ;;  %v280_v20 = vld [vmem:[#allocation10 + $0x160] sm:$0xff]  ;;  %v4768_v21 = vld [vmem:[#allocation10 + $0x168] sm:$0xff] }
  0x16   :  { %322 = vmatpush.msra.mxu1 %v4756_v13  ;;  %341 = vmatpush.msra.mxu2 %v294_v14  ;;  %v4771_v22 = vld [vmem:[#allocation10 + $0x190] sm:$0xff]  ;;  %v4773_v23 = vld [vmem:[#allocation10 + $0x198] sm:$0xff]  ;;  %v4779_v24 = vld [vmem:[%s7825_s0 + $0x8] sm:$0xff] }
  0x17   :  { %361 = vmatpush.msra.mxu3 %v4759_v15  ;;  %303 = vmatpush.msra.mxu0 %v284_v16  ;;  %8252 = vst [vmem:[#allocation17_spill] sm:$0xff] %v4771_v22  ;;  %v276_v25 = vld [vmem:[#allocation10 + $0x140] sm:$0xff]  ;;  %v4782_v26 = vld [vmem:[#allocation10 + $0x148] sm:$0xff]  ;;  %v282_v27 = vld [vmem:[#allocation10 + $0x170] sm:$0xff] }
  0x18   :  { %323 = vmatpush.msra.mxu1 %v4762_v17  ;;  %342 = vmatpush.msra.mxu2 %v290_v18  ;;  %v4786_v28 = vld [vmem:[#allocation10 + $0x178] sm:$0xff]  ;;  %v272_v29 = vld [vmem:[#allocation10 + $0x120] sm:$0xff]  ;;  %v4792_v30 = vld [vmem:[#allocation10 + $0x128] sm:$0xff] }
  0x19   :  { %362 = vmatpush.msra.mxu3 %v4765_v19  ;;  %304 = vmatpush.msra.mxu0 %v280_v20  ;;  %v4795_v31 = vld [vmem:[#allocation10 + $0x150] sm:$0xff]  ;;  %v4797_v32 = vld [vmem:[#allocation10 + $0x158] sm:$0xff]  ;;  %v4800_v33 = vld [vmem:[#allocation10 + $0x100] sm:$0xff] }
  0x1a   :  { %324 = vmatpush.msra.mxu1 %v4768_v21  ;;  %343 = vmatpush.msra.mxu2 %v4771_v22  ;;  %8253 = vst [vmem:[#allocation18_spill] sm:$0xff] %v4795_v31  ;;  %v4802_v34 = vld [vmem:[#allocation10 + $0x108] sm:$0xff]  ;;  %v4805_v35 = vld [vmem:[#allocation10 + $0x130] sm:$0xff]  ;;  %v4807_v36 = vld [vmem:[#allocation10 + $0x138] sm:$0xff] }
  0x1b   :  { %363 = vmatpush.msra.mxu3 %v4773_v23  ;;  %4377 = vmatmul.msk.f32.gmra.mxu2 %vm101_vm1, %v4779_v24  ;;  %8254 = vst [vmem:[#allocation19_spill] sm:$0xff] %v4800_v33  ;;  %v4811_v37 = vld [vmem:[#allocation10 + $0xe0] sm:$0xff]  ;;  %v4813_v38 = vld [vmem:[#allocation10 + $0xe8] sm:$0xff]  ;;  %v4817_v39 = vld [vmem:[#allocation10 + $0x110] sm:$0xff] }
  0x1c   :  { %4380 = vmatmul.msk.f32.gmra.mxu3 %vm101_vm1, %v4779_v24  ;;  %305 = vmatpush.msra.mxu0 %v276_v25  ;;  %8255 = vst [vmem:[#allocation20_spill] sm:$0xff] %v4805_v35  ;;  %v4819_v40 = vld [vmem:[#allocation10 + $0x118] sm:$0xff]  ;;  %v4825_v41 = vld [vmem:[#allocation10 + $0xc0] sm:$0xff]  ;;  %v4827_v42 = vld [vmem:[#allocation10 + $0xc8] sm:$0xff] }
  0x1d   :  { %325 = vmatpush.msra.mxu1 %v4782_v26  ;;  %344 = vmatpush.msra.mxu2 %v282_v27  ;;  %8256 = vst [vmem:[#allocation21_spill] sm:$0xff] %v4811_v37  ;;  %v4831_v43 = vld [vmem:[#allocation10 + $0xf0] sm:$0xff]  ;;  %v4833_v44 = vld [vmem:[#allocation10 + $0xf8] sm:$0xff]  ;;  %v4839_v45 = vld [vmem:[#allocation10 + $0xa0] sm:$0xff] }
  0x1e   :  { %364 = vmatpush.msra.mxu3 %v4786_v28  ;;  %306 = vmatpush.msra.mxu0 %v272_v29  ;;  %8257 = vst [vmem:[#allocation22_spill] sm:$0xff] %v4817_v39  ;;  %v4841_v46 = vld [vmem:[#allocation10 + $0xa8] sm:$0xff]  ;;  %v4845_v47 = vld [vmem:[#allocation10 + $0xd0] sm:$0xff]  ;;  %v4847_v48 = vld [vmem:[#allocation10 + $0xd8] sm:$0xff] }
  0x1f   :  { %326 = vmatpush.msra.mxu1 %v4792_v30  ;;  %345 = vmatpush.msra.mxu2 %v4795_v31  ;;  %8258 = vst [vmem:[#allocation23_spill] sm:$0xff] %v4825_v41  ;;  %v4851_v49 = vld [vmem:[#allocation10 + $0x80] sm:$0xff]  ;;  %v4853_v50 = vld [vmem:[#allocation10 + $0x88] sm:$0xff]  ;;  %v4857_v51 = vld [vmem:[#allocation10 + $0xb0] sm:$0xff] }
  0x20   :  { %365 = vmatpush.msra.mxu3 %v4797_v32  ;;  %307 = vmatpush.msra.mxu0 %v4800_v33  ;;  %8259 = vst [vmem:[#allocation24_spill] sm:$0xff] %v4831_v43  ;;  %v4859_v52 = vld [vmem:[#allocation10 + $0xb8] sm:$0xff]  ;;  %v4863_v53 = vld [vmem:[#allocation10 + $0x60] sm:$0xff]  ;;  %v4865_v54 = vld [vmem:[#allocation10 + $0x68] sm:$0xff] }
  0x21   :  { %327 = vmatpush.msra.mxu1 %v4802_v34  ;;  %346 = vmatpush.msra.mxu2 %v4805_v35  ;;  %8260 = vst [vmem:[#allocation25_spill] sm:$0xff] %v4839_v45  ;;  %v4869_v55 = vld [vmem:[#allocation10 + $0x90] sm:$0xff]  ;;  %v4871_v56 = vld [vmem:[#allocation10 + $0x98] sm:$0xff]  ;;  %v4877_v57 = vld [vmem:[#allocation10 + $0x40] sm:$0xff] }
  0x22   :  { %366 = vmatpush.msra.mxu3 %v4807_v36  ;;  %308 = vmatpush.msra.mxu0 %v4811_v37  ;;  %8261 = vst [vmem:[#allocation26_spill] sm:$0xff] %v4845_v47  ;;  %v4879_v58 = vld [vmem:[#allocation10 + $0x48] sm:$0xff]  ;;  %v4883_v59 = vld [vmem:[#allocation10 + $0x70] sm:$0xff]  ;;  %v4885_v60 = vld [vmem:[#allocation10 + $0x78] sm:$0xff] }
  0x23   :  { %328 = vmatpush.msra.mxu1 %v4813_v38  ;;  %347 = vmatpush.msra.mxu2 %v4817_v39  ;;  %8262 = vst [vmem:[#allocation27_spill] sm:$0xff] %v4851_v49  ;;  %v4891_v61 = vld [vmem:[#allocation10 + $0x20] sm:$0xff]  ;;  %v4893_v62 = vld [vmem:[#allocation10 + $0x28] sm:$0xff]  ;;  %v4897_v63 = vld [vmem:[#allocation10 + $0x50] sm:$0xff] }
  0x24   :  { %367 = vmatpush.msra.mxu3 %v4819_v40  ;;  %4382 = vmatmul.msk.f32.vlgmr.msrb.gmra.mxu2 %vm101_vm1, %v4743_v5  ;;  %8263 = vst [vmem:[#allocation28_spill] sm:$0xff] %v4857_v51  ;;  %v4899_v0 = vld [vmem:[#allocation10 + $0x58] sm:$0xff]  ;;  %v4903_v1 = vld [vmem:[#allocation10] sm:$0xff]  ;;  %v4905_v2 = vld [vmem:[#allocation10 + $0x8] sm:$0xff] }
  0x25   :  { %4385 = vmatmul.msk.f32.vlgmr.msrb.gmra.mxu3 %vm101_vm1, %v4743_v5  ;;  %309 = vmatpush.msra.mxu0 %v4825_v41  ;;  %8264 = vst [vmem:[#allocation29_spill] sm:$0xff] %v4863_v53  ;;  %v4909_v3 = vld [vmem:[#allocation10 + $0x30] sm:$0xff]  ;;  %v4911_v5 = vld [vmem:[#allocation10 + $0x38] sm:$0xff]  ;;  %v4923_v10 = vld [vmem:[#allocation12 + $0x3e0] sm:$0xff] }
  0x26   :  { %329 = vmatpush.msra.mxu1 %v4827_v42  ;;  %348 = vmatpush.msra.mxu2 %v4831_v43  ;;  %8265 = vst [vmem:[#allocation30_spill] sm:$0xff] %v4869_v55  ;;  %v235_v6 = vld [vmem:[#allocation2] sm:$0x3]  ;;  %v4917_v7 = vld [vmem:[#allocation10 + $0x10] sm:$0xff]  ;;  %v4925_v12 = vld [vmem:[#allocation12 + $0x3e8] sm:$0xff] }
  0x27   :  { %368 = vmatpush.msra.mxu3 %v4833_v44  ;;  %310 = vmatpush.msra.mxu0 %v4839_v45  ;;  %8266 = vst [vmem:[#allocation31_spill] sm:$0xff] %v4877_v57  ;;  %v4919_v8 = vld [vmem:[#allocation10 + $0x18] sm:$0xff]  ;;  %v4929_v14 = vld [vmem:[#allocation12 + $0x1e0] sm:$0xff]  ;;  %v4931_v16 = vld [vmem:[#allocation12 + $0x1e8] sm:$0xff] }
  0x28   :  { %330 = vmatpush.msra.mxu1 %v4841_v46  ;;  %349 = vmatpush.msra.mxu2 %v4845_v47  ;;  %8267 = vst [vmem:[#allocation32_spill] sm:$0xff] %v4883_v59  ;;  %v4933_v18 = vld [vmem:[#allocation12 + $0x3c0] sm:$0xff]  ;;  %v4935_v20 = vld [vmem:[#allocation12 + $0x3c8] sm:$0xff] }
  0x29   :  { %369 = vmatpush.msra.mxu3 %v4847_v48  ;;  %311 = vmatpush.msra.mxu0 %v4851_v49  ;;  %8268 = vst [vmem:[#allocation33_spill] sm:$0xff] %v4891_v61  ;;  %v4941_v25 = vld [vmem:[#allocation12 + $0x1c8] sm:$0xff]  ;;  %v4943_v27 = vld [vmem:[#allocation12 + $0x3a0] sm:$0xff] }
  0x2a   :  { %331 = vmatpush.msra.mxu1 %v4853_v50  ;;  %350 = vmatpush.msra.mxu2 %v4857_v51  ;;  %8269 = vst [vmem:[#allocation34_spill] sm:$0xff] %v4897_v63  ;;  %v4945_v29 = vld [vmem:[#allocation12 + $0x3a8] sm:$0xff]  ;;  %v5007_v49 = vld [vmem:[#allocation12 + $0x2a0] sm:$0xff] }
  0x2b   :  { %370 = vmatpush.msra.mxu3 %v4859_v52  ;;  %312 = vmatpush.msra.mxu0 %v4863_v53  ;;  %8270 = vst [vmem:[#allocation35_spill] sm:$0xff] %v4903_v1  ;;  %v5001_v53 = vld [vmem:[#allocation12 + $0x2c0] sm:$0xff]  ;;  %v5009_v51 = vld [vmem:[#allocation12 + $0x2a8] sm:$0xff] }
  0x2c   :  { %332 = vmatpush.msra.mxu1 %v4865_v54  ;;  %351 = vmatpush.msra.mxu2 %v4869_v55  ;;  %8271 = vst [vmem:[#allocation36_spill] sm:$0xff] %v4909_v3  ;;  %v5003_v55 = vld [vmem:[#allocation12 + $0x2c8] sm:$0xff]  ;;  %v486_v45 = vld [vmem:[#allocation12 + $0x280] sm:$0xff] }
  0x2d   :  { %371 = vmatpush.msra.mxu3 %v4871_v56  ;;  %4383 = vmatmul.msk.f32.gmra.mxu2 %vm101_vm1, %v4779_v24  ;;  %8272 = vst [vmem:[#allocation37_spill] sm:$0xff] %v4917_v7  ;;  %v487_v47 = vld [vmem:[#allocation12 + $0x288] sm:$0xff]  ;;  %v482_v41 = vld [vmem:[#allocation12 + $0x260] sm:$0xff] }
  0x2e   :  { %4386 = vmatmul.msk.f32.gmra.mxu3 %vm101_vm1, %v4779_v24  ;;  %313 = vmatpush.msra.mxu0 %v4877_v57  ;;  %8273 = vst [vmem:[#allocation38_spill] sm:$0xff] %v4929_v14  ;;  %v4939_v24 = vld [vmem:[#allocation12 + $0x1c0] sm:$0xff]  ;;  %v483_v43 = vld [vmem:[#allocation12 + $0x268] sm:$0xff] }
  0x2f   :  { %333 = vmatpush.msra.mxu1 %v4879_v58  ;;  %352 = vmatpush.msra.mxu2 %v4883_v59  ;;  %8274 = vst [vmem:[#allocation39_spill] sm:$0xff] %v4931_v16  ;;  %v4983_v57 = vld [vmem:[#allocation12 + $0x320] sm:$0xff]  ;;  %v4991_v59 = vld [vmem:[#allocation12 + $0x308] sm:$0xff] }
  0x30   :  { %372 = vmatpush.msra.mxu3 %v4885_v60  ;;  %314 = vmatpush.msra.mxu0 %v4891_v61  ;;  %8275 = vst [vmem:[#allocation40_spill] sm:$0xff] %v4939_v24  ;;  %v4967_v61 = vld [vmem:[#allocation12 + $0x360] sm:$0xff]  ;;  %v479_v39 = vld [vmem:[#allocation12 + $0x248] sm:$0xff] }
  0x31   :  { %334 = vmatpush.msra.mxu1 %v4893_v62  ;;  %353 = vmatpush.msra.mxu2 %v4897_v63  ;;  %8276 = vst [vmem:[#allocation41_spill] sm:$0xff] %v4941_v25  ;;  %v4969_v63 = vld [vmem:[#allocation12 + $0x368] sm:$0xff]  ;;  %v478_v37 = vld [vmem:[#allocation12 + $0x240] sm:$0xff] }
  0x32   :  { %373 = vmatpush.msra.mxu3 %v4899_v0  ;;  %315 = vmatpush.msra.mxu0 %v4903_v1  ;;  %v4955_v1 = vld [vmem:[#allocation12 + $0x380] sm:$0xff]  ;;  %8281 = vst [vmem:[#allocation46_spill] sm:$0xff] %v5003_v55  ;;  %v475_v35 = vld [vmem:[#allocation12 + $0x228] sm:$0xff] }
  0x33   :  { %335 = vmatpush.msra.mxu1 %v4905_v2  ;;  %354 = vmatpush.msra.mxu2 %v4909_v3  ;;  %v4957_v3 = vld [vmem:[#allocation12 + $0x388] sm:$0xff]  ;;  %8282 = vst [vmem:[#allocation47_spill] sm:$0xff] %v5007_v49  ;;  %v474_v33 = vld [vmem:[#allocation12 + $0x220] sm:$0xff] }
  0x34   :  { %374 = vmatpush.msra.mxu3 %v4911_v5  ;;  %316 = vmatmul.f32.vlgmr.msra.gmra.mxu0 %v235_v6  ;;  %8283 = vst [vmem:[#allocation48_spill] sm:$0xff] %v5009_v51  ;;  %v470_v31 = vld [vmem:[#allocation12 + $0x200] sm:$0xff]  ;;  %v471_v22 = vld [vmem:[#allocation12 + $0x208] sm:$0xff] }
  0x35   :  { %336 = vmatmul.f32.vlgmr.msra.gmra.mxu1 %v235_v6  ;;  %355 = vmatpush.msra.mxu2 %v4917_v7  ;;  %v4953_v7 = vld [vmem:[#allocation12 + $0x1a8] sm:$0xff] }
  0x36   :  { %375 = vmatpush.msra.mxu3 %v4919_v8  ;;  %356 = vmatmul.f32.vlgmr.msra.gmra.mxu2 %v235_v6  ;;  %8278 = vst [vmem:[#allocation43_spill] sm:$0xff] %v4953_v7 }
  0x37   :  { %376 = vmatmul.f32.vlgmr.msra.gmra.mxu3 %v235_v6  ;;  %554 = vmatpush.msrb.mxu1 %v4923_v10  ;;  %v4951_v6 = vld [vmem:[#allocation12 + $0x1a0] sm:$0xff] }
  0x38   :  { %594 = vmatpush.msrb.mxu3 %v4925_v12  ;;  %534 = vmatpush.msrb.mxu0 %v4929_v14  ;;  %8277 = vst [vmem:[#allocation42_spill] sm:$0xff] %v4951_v6  ;;  %v4965_v14 = vld [vmem:[#allocation12 + $0x188] sm:$0xff] }
  0x39   :  { %574 = vmatpush.msrb.mxu2 %v4931_v16  ;;  %555 = vmatpush.msrb.mxu1 %v4933_v18  ;;  %v4963_v16 = vld [vmem:[#allocation12 + $0x180] sm:$0xff]  ;;  %8280 = vst [vmem:[#allocation45_spill] sm:$0xff] %v4965_v14 }
  0x3a   :  { %595 = vmatpush.msrb.mxu3 %v4935_v20  ;;  %535 = vmatpush.msrb.mxu0 %v4939_v24  ;;  %8279 = vst [vmem:[#allocation44_spill] sm:$0xff] %v4963_v16  ;;  %v4977_v24 = vld [vmem:[#allocation12 + $0x348] sm:$0xff] }
  0x3b   :  { %575 = vmatpush.msrb.mxu2 %v4941_v25  ;;  %556 = vmatpush.msrb.mxu1 %v4943_v27  ;;  %v4975_v25 = vld [vmem:[#allocation12 + $0x340] sm:$0xff] }
  0x3c   :  { %596 = vmatpush.msrb.mxu3 %v4945_v29  ;;  %536 = vmatpush.msrb.mxu0 %v4951_v6  ;;  %v4985_v6 = vld [vmem:[#allocation12 + $0x328] sm:$0xff] }
  0x3d   :  { %576 = vmatpush.msrb.mxu2 %v4953_v7  ;;  %557 = vmatpush.msrb.mxu1 %v4955_v1  ;;  %v4989_v7 = vld [vmem:[#allocation12 + $0x300] sm:$0xff] }
  0x3e   :  { %597 = vmatpush.msrb.mxu3 %v4957_v3  ;;  %537 = vmatpush.msrb.mxu0 %v4963_v16  ;;  %v4997_v16 = vld [vmem:[#allocation12 + $0x2e8] sm:$0xff] }
  0x3f   :  { %577 = vmatpush.msrb.mxu2 %v4965_v14  ;;  %558 = vmatpush.msrb.mxu1 %v4967_v61  ;;  %v4995_v14 = vld [vmem:[#allocation12 + $0x2e0] sm:$0xff] }
  0x40   :  { %598 = vmatpush.msrb.mxu3 %v4969_v63 }
  0x41   :  { %559 = vmatpush.msrb.mxu1 %v4975_v25 }
  0x42   :  { %599 = vmatpush.msrb.mxu3 %v4977_v24 }
  0x43   :  { %560 = vmatpush.msrb.mxu1 %v4983_v57 }
  0x44   :  { %600 = vmatpush.msrb.mxu3 %v4985_v6 }
  0x45   :  { %561 = vmatpush.msrb.mxu1 %v4989_v7 }
  0x46   :  { %601 = vmatpush.msrb.mxu3 %v4991_v59 }
  0x47   :  { %562 = vmatpush.msrb.mxu1 %v4995_v14 }
  0x48   :  { %602 = vmatpush.msrb.mxu3 %v4997_v16 }
  0x49   :  { %563 = vmatpush.msrb.mxu1 %v5001_v53 }
  0x4a   :  { %603 = vmatpush.msrb.mxu3 %v5003_v55  ;;  %v5015_v55 = vld [vmem:[#allocation12 + $0x160] sm:$0xff] }
  0x4b   :  { %564 = vmatpush.msrb.mxu1 %v5007_v49  ;;  %8284 = vst [vmem:[#allocation49_spill] sm:$0xff] %v5015_v55  ;;  %538 = vmatpush.msrb.mxu0 %v5015_v55  ;;  %v5033_v55 = vld [vmem:[#allocation12 + $0x108] sm:$0xff] }
  0x4c   :  { %604 = vmatpush.msrb.mxu3 %v5009_v51  ;;  %v5017_v51 = vld [vmem:[#allocation12 + $0x168] sm:$0xff]  ;;  %8291 = vst [vmem:[#allocation56_spill] sm:$0xff] %v5033_v55 }
  0x4d   :  { %565 = vmatpush.msrb.mxu1 %v486_v45  ;;  %8285 = vst [vmem:[#allocation50_spill] sm:$0xff] %v5017_v51  ;;  %v532_v45 = vld [vmem:[#allocation12 + $0x3f0] sm:$0xff]  ;;  %578 = vmatpush.msrb.mxu2 %v5017_v51  ;;  %v5031_v51 = vld [vmem:[#allocation12 + $0x100] sm:$0xff] }
  0x4e   :  { %605 = vmatpush.msrb.mxu3 %v487_v47  ;;  %v533_v47 = vld [vmem:[#allocation12 + $0x3f8] sm:$0xff]  ;;  %8290 = vst [vmem:[#allocation55_spill] sm:$0xff] %v5031_v51 }
  0x4f   :  { %566 = vmatpush.msrb.mxu1 %v482_v41  ;;  %v5021_v41 = vld [vmem:[#allocation12 + $0x140] sm:$0xff] }
  0x50   :  { %606 = vmatpush.msrb.mxu3 %v483_v43  ;;  %8286 = vst [vmem:[#allocation51_spill] sm:$0xff] %v5021_v41  ;;  %539 = vmatpush.msrb.mxu0 %v5021_v41  ;;  %v525_v43 = vld [vmem:[#allocation12 + $0x3b8] sm:$0xff]  ;;  %v5057_v41 = vld [vmem:[#allocation12 + $0x88] sm:$0xff] }
  0x51   :  { %567 = vmatpush.msrb.mxu1 %v478_v37  ;;  %v5023_v37 = vld [vmem:[#allocation12 + $0x148] sm:$0xff]  ;;  %8299 = vst [vmem:[#allocation64_spill] sm:$0xff] %v5057_v41 }
  0x52   :  { %607 = vmatpush.msrb.mxu3 %v479_v39  ;;  %8287 = vst [vmem:[#allocation52_spill] sm:$0xff] %v5023_v37  ;;  %v5025_v39 = vld [vmem:[#allocation12 + $0x120] sm:$0xff]  ;;  %579 = vmatpush.msrb.mxu2 %v5023_v37  ;;  %v516_v37 = vld [vmem:[#allocation12 + $0x370] sm:$0xff] }
  0x53   :  { %568 = vmatpush.msrb.mxu1 %v474_v33  ;;  %v528_v33 = vld [vmem:[#allocation12 + $0x3d0] sm:$0xff]  ;;  %8288 = vst [vmem:[#allocation53_spill] sm:$0xff] %v5025_v39  ;;  %540 = vmatpush.msrb.mxu0 %v5025_v39  ;;  %v5045_v39 = vld [vmem:[#allocation12 + $0xc0] sm:$0xff] }
  0x54   :  { %608 = vmatpush.msrb.mxu3 %v475_v35  ;;  %v529_v35 = vld [vmem:[#allocation12 + $0x3d8] sm:$0xff]  ;;  %8294 = vst [vmem:[#allocation59_spill] sm:$0xff] %v5045_v39 }
  0x55   :  { %569 = vmatpush.msrb.mxu1 %v470_v31  ;;  %v5027_v31 = vld [vmem:[#allocation12 + $0x128] sm:$0xff]  ;;  %541 = vmatpush.msrb.mxu0 %v5031_v51  ;;  %v509_v51 = vld [vmem:[#allocation12 + $0x338] sm:$0xff] }
  0x56   :  { %609 = vmatpush.msrb.mxu3 %v471_v22  ;;  %8289 = vst [vmem:[#allocation54_spill] sm:$0xff] %v5027_v31  ;;  %v524_v22 = vld [vmem:[#allocation12 + $0x3b0] sm:$0xff]  ;;  %580 = vmatpush.msrb.mxu2 %v5027_v31  ;;  %v517_v31 = vld [vmem:[#allocation12 + $0x378] sm:$0xff] }
  0x57   :  { %634 = vmatpush.msra.mxu1 %v532_v45  ;;  %v520_v45 = vld [vmem:[#allocation12 + $0x390] sm:$0xff] }
  0x58   :  { %674 = vmatpush.msra.mxu3 %v533_v47  ;;  %v521_v47 = vld [vmem:[#allocation12 + $0x398] sm:$0xff]  ;;  %581 = vmatpush.msrb.mxu2 %v5033_v55 }
  0x59   :  { %635 = vmatpush.msra.mxu1 %v528_v33  ;;  %v5039_v33 = vld [vmem:[#allocation12 + $0xe0] sm:$0xff]  ;;  %v513_v55 = vld [vmem:[#allocation12 + $0x358] sm:$0xff] }
  0x5a   :  { %675 = vmatpush.msra.mxu3 %v529_v35  ;;  %8292 = vst [vmem:[#allocation57_spill] sm:$0xff] %v5039_v33  ;;  %v5041_v35 = vld [vmem:[#allocation12 + $0xe8] sm:$0xff]  ;;  %542 = vmatpush.msrb.mxu0 %v5039_v33  ;;  %v508_v33 = vld [vmem:[#allocation12 + $0x330] sm:$0xff] }
  0x5b   :  { %636 = vmatpush.msra.mxu1 %v524_v22  ;;  %8293 = vst [vmem:[#allocation58_spill] sm:$0xff] %v5041_v35  ;;  %582 = vmatpush.msrb.mxu2 %v5041_v35  ;;  %v5047_v22 = vld [vmem:[#allocation12 + $0xc8] sm:$0xff]  ;;  %v5055_v35 = vld [vmem:[#allocation12 + $0x80] sm:$0xff] }
  0x5c   :  { %676 = vmatpush.msra.mxu3 %v525_v43  ;;  %8295 = vst [vmem:[#allocation60_spill] sm:$0xff] %v5047_v22  ;;  %v512_v43 = vld [vmem:[#allocation12 + $0x350] sm:$0xff]  ;;  %543 = vmatpush.msrb.mxu0 %v5045_v39  ;;  %v489_v39 = vld [vmem:[#allocation12 + $0x298] sm:$0xff] }
  0x5d   :  { %637 = vmatpush.msra.mxu1 %v520_v45  ;;  %v5049_v45 = vld [vmem:[#allocation12 + $0xa0] sm:$0xff]  ;;  %583 = vmatpush.msrb.mxu2 %v5047_v22  ;;  %8298 = vst [vmem:[#allocation63_spill] sm:$0xff] %v5055_v35  ;;  %v500_v22 = vld [vmem:[#allocation12 + $0x2f0] sm:$0xff] }
  0x5e   :  { %677 = vmatpush.msra.mxu3 %v521_v47  ;;  %8296 = vst [vmem:[#allocation61_spill] sm:$0xff] %v5049_v45  ;;  %v5053_v47 = vld [vmem:[#allocation12 + $0xa8] sm:$0xff]  ;;  %544 = vmatpush.msrb.mxu0 %v5049_v45 }
  0x5f   :  { %638 = vmatpush.msra.mxu1 %v516_v37  ;;  %8297 = vst [vmem:[#allocation62_spill] sm:$0xff] %v5053_v47  ;;  %584 = vmatpush.msrb.mxu2 %v5053_v47  ;;  %v504_v37 = vld [vmem:[#allocation12 + $0x310] sm:$0xff]  ;;  %v501_v47 = vld [vmem:[#allocation12 + $0x2f8] sm:$0xff]  ;;  %v5088_v45 = vld [vmem:[#allocation12 + $0x8] sm:$0xff] }
  0x60   :  { %678 = vmatpush.msra.mxu3 %v517_v31  ;;  %v505_v31 = vld [vmem:[#allocation12 + $0x318] sm:$0xff]  ;;  %545 = vmatpush.msrb.mxu0 %v5055_v35  ;;  %v496_v35 = vld [vmem:[#allocation12 + $0x2d0] sm:$0xff]  ;;  %8307 = vst [vmem:[#allocation72_spill] sm:$0xff] %v5088_v45 }
  0x61   :  { %639 = vmatpush.msra.mxu1 %v512_v43  ;;  %585 = vmatpush.msrb.mxu2 %v5057_v41  ;;  %v5063_v43 = vld [vmem:[#allocation12 + $0x60] sm:$0xff] }
  0x62   :  { %679 = vmatpush.msra.mxu3 %v513_v55  ;;  %8300 = vst [vmem:[#allocation65_spill] sm:$0xff] %v5063_v43  ;;  %v5065_v55 = vld [vmem:[#allocation12 + $0x68] sm:$0xff]  ;;  %546 = vmatpush.msrb.mxu0 %v5063_v43  ;;  %v5080_v43 = vld [vmem:[#allocation12 + $0x20] sm:$0xff] }
  0x63   :  { %640 = vmatpush.msra.mxu1 %v508_v33  ;;  %8301 = vst [vmem:[#allocation66_spill] sm:$0xff] %v5065_v55  ;;  %586 = vmatpush.msrb.mxu2 %v5065_v55  ;;  %v5069_v33 = vld [vmem:[#allocation12 + $0x40] sm:$0xff]  ;;  %v5082_v55 = vld [vmem:[#allocation12 + $0x28] sm:$0xff] }
  0x64   :  { %680 = vmatpush.msra.mxu3 %v509_v51  ;;  %8302 = vst [vmem:[#allocation67_spill] sm:$0xff] %v5069_v33  ;;  %v5071_v51 = vld [vmem:[#allocation12 + $0x48] sm:$0xff]  ;;  %547 = vmatpush.msrb.mxu0 %v5069_v33  ;;  %v5084_v41 = vld [vmem:[#allocation12] sm:$0xff]  ;;  %v488_v33 = vld [vmem:[#allocation12 + $0x290] sm:$0xff] }
  0x65   :  { %641 = vmatpush.msra.mxu1 %v504_v37  ;;  %8303 = vst [vmem:[#allocation68_spill] sm:$0xff] %v5071_v51  ;;  %v5076_v37 = vld [vmem:[%s7828_s3] sm:$0xf]  ;;  %587 = vmatpush.msrb.mxu2 %v5071_v51  ;;  %v5094_v51 = vld [vmem:[#allocation12 + $0x1f0] sm:$0xff] }
  0x66   :  { %681 = vmatpush.msra.mxu3 %v505_v31  ;;  %v497_v31 = vld [vmem:[#allocation12 + $0x2d8] sm:$0xff]  ;;  %8304 = vst [vmem:[#allocation69_spill] sm:$0xff] %v5080_v43  ;;  %548 = vmatpush.msrb.mxu0 %v5080_v43 }
  0x67   :  { %642 = vmatpush.msra.mxu1 %v500_v22  ;;  %8305 = vst [vmem:[#allocation70_spill] sm:$0xff] %v5082_v55  ;;  %v492_v22 = vld [vmem:[#allocation12 + $0x2b0] sm:$0xff]  ;;  %588 = vmatpush.msrb.mxu2 %v5082_v55  ;;  %v5096_v43 = vld [vmem:[#allocation12 + $0x1f8] sm:$0xff] }
  0x68   :  { %682 = vmatpush.msra.mxu3 %v501_v47  ;;  %v493_v47 = vld [vmem:[#allocation12 + $0x2b8] sm:$0xff]  ;;  %8306 = vst [vmem:[#allocation71_spill] sm:$0xff] %v5084_v41  ;;  %549 = vmatpush.msrb.mxu0 %v5084_v41 }
  0x69   :  { %643 = vmatpush.msra.mxu1 %v496_v35  ;;  %589 = vmatpush.msrb.mxu2 %v5088_v45  ;;  %v93_v35 = vperm.slane %v5076_v37, 0  ;;  %8308 = vst [vmem:[#allocation73_spill] sm:$0xff] %v5094_v51  ;;  %v5106_v45 = vld [vmem:[#allocation12 + $0x1d0] sm:$0xff] }
  0x6a   :  { %683 = vmatpush.msra.mxu3 %v497_v31  ;;  %v94_v31 = vperm.slane %v5076_v37, 1  ;;  %8309 = vst [vmem:[#allocation74_spill] sm:$0xff] %v5096_v43  ;;  %614 = vmatpush.msra.mxu0 %v5094_v51  ;;  %v5112_v51 = vld [vmem:[#allocation12 + $0x250] sm:$0xff] }
  0x6b   :  { %644 = vmatpush.msra.mxu1 %v492_v22  ;;  %654 = vmatpush.msra.mxu2 %v5096_v43  ;;  %v5100_v22 = vld [vmem:[#allocation12 + $0x270] sm:$0xff]  ;;  %8312 = vst [vmem:[#allocation77_spill] sm:$0xff] %v5106_v45  ;;  %v5114_v43 = vld [vmem:[#allocation12 + $0x258] sm:$0xff] }
  0x6c   :  { %684 = vmatpush.msra.mxu3 %v493_v47  ;;  %8310 = vst [vmem:[#allocation75_spill] sm:$0xff] %v5100_v22  ;;  %v5102_v47 = vld [vmem:[#allocation12 + $0x278] sm:$0xff]  ;;  %615 = vmatpush.msra.mxu0 %v5106_v45  ;;  %v5124_v45 = vld [vmem:[#allocation12 + $0x230] sm:$0xff] }
  0x6d   :  { %645 = vmatpush.msra.mxu1 %v488_v33  ;;  %8311 = vst [vmem:[#allocation76_spill] sm:$0xff] %v5102_v47  ;;  %v5108_v33 = vld [vmem:[#allocation12 + $0x1d8] sm:$0xff] }
  0x6e   :  { %685 = vmatpush.msra.mxu3 %v489_v39  ;;  %8313 = vst [vmem:[#allocation78_spill] sm:$0xff] %v5108_v33  ;;  %655 = vmatpush.msra.mxu2 %v5108_v33  ;;  %v5126_v33 = vld [vmem:[#allocation12 + $0x238] sm:$0xff] }
  0x6f   :  { %646 = vmatpush.msra.mxu1 %v5100_v22  ;;  %8314 = vst [vmem:[#allocation79_spill] sm:$0xff] %v5112_v51  ;;  %v5120_v22 = vld [vmem:[#allocation12 + $0x1b8] sm:$0xff] }
  0x70   :  { %686 = vmatpush.msra.mxu3 %v5102_v47  ;;  %8315 = vst [vmem:[#allocation80_spill] sm:$0xff] %v5114_v43  ;;  %v5118_v47 = vld [vmem:[#allocation12 + $0x1b0] sm:$0xff]  ;;  %656 = vmatpush.msra.mxu2 %v5120_v22 }
  0x71   :  { %647 = vmatpush.msra.mxu1 %v5112_v51  ;;  %8316 = vst [vmem:[#allocation81_spill] sm:$0xff] %v5120_v22  ;;  %616 = vmatpush.msra.mxu0 %v5118_v47  ;;  %v5138_v51 = vld [vmem:[#allocation12 + $0x218] sm:$0xff] }
  0x72   :  { %687 = vmatpush.msra.mxu3 %v5114_v43  ;;  %8317 = vst [vmem:[#allocation82_spill] sm:$0xff] %v5124_v45  ;;  %v5136_v43 = vld [vmem:[#allocation12 + $0x210] sm:$0xff] }
  0x73   :  { %8318 = vst [vmem:[#allocation83_spill] sm:$0xff] %v5126_v33  ;;  %648 = vmatpush.msra.mxu1 %v5124_v45  ;;  %v5146_v45 = vld [vmem:[#allocation12 + $0x178] sm:$0xff] }
  0x74   :  { %688 = vmatpush.msra.mxu3 %v5126_v33  ;;  %8321 = vst [vmem:[#allocation86_spill] sm:$0xff] %v5136_v43  ;;  %v5144_v33 = vld [vmem:[#allocation12 + $0x170] sm:$0xff] }
  0x75   :  { %8322 = vst [vmem:[#allocation87_spill] sm:$0xff] %v5138_v51  ;;  %649 = vmatpush.msra.mxu1 %v5136_v43  ;;  %v5162_v43 = vld [vmem:[#allocation12 + $0x138] sm:$0xff] }
  0x76   :  { %689 = vmatpush.msra.mxu3 %v5138_v51  ;;  %8323 = vst [vmem:[#allocation88_spill] sm:$0xff] %v5144_v33  ;;  %v5160_v51 = vld [vmem:[#allocation12 + $0x130] sm:$0xff] }
  0x77   :  { %8324 = vst [vmem:[#allocation89_spill] sm:$0xff] %v5146_v45 }
  0x94   :  { %v138_v39 = vpop.f32.mrf.mxu2 }
  0x95   :  { %v161_v41 = vpop.f32.mrf.mxu3  ;;  %v139_v55 = vadd.f32 %v138_v39, %v93_v35  ;;  %v5132_v39 = vld [vmem:[#allocation12 + $0x198] sm:$0xff] }
  0x96   :  { %v162_v49 = vadd.f32 %v161_v41, %v94_v31  ;;  %v5130_v41 = vld [vmem:[#allocation12 + $0x190] sm:$0xff]  ;;  %8320 = vst [vmem:[#allocation85_spill] sm:$0xff] %v5132_v39  ;;  %657 = vmatpush.msra.mxu2 %v5132_v39  ;;  %v5154_v39 = vld [vmem:[#allocation12 + $0x158] sm:$0xff] }
  0x97   :  { %213 = vst [vmem:[#allocation6 + $0x30] sm:$0xff] %v139_v55  ;;  %617 = vmatpush.msra.mxu0 %v5130_v41  ;;  %v5142_v55 = vld [vmem:[#allocation4] sm:$0x3] }
  0x98   :  { %8319 = vst [vmem:[#allocation84_spill] sm:$0xff] %v5130_v41  ;;  %570 = vmatmul.f32.vlgmr.msrb.gmra.mxu1 %v5142_v55  ;;  %610 = vmatmul.f32.vlgmr.msrb.gmra.mxu3 %v5142_v55 }
  0x99   :  { %214 = vst [vmem:[#allocation6] sm:$0xff] %v162_v49  ;;  %618 = vmatpush.msra.mxu0 %v5144_v33  ;;  %658 = vmatpush.msra.mxu2 %v5146_v45  ;;  %v5152_v49 = vld [vmem:[#allocation12 + $0x150] sm:$0xff] }
  0x9a   :  { %804 = vmatpush.msrb.mxu1 %v4738_v4  ;;  %844 = vmatpush.msrb.mxu3 %v4752_v11  ;;  %v5168_v4 = vld [vmem:[#allocation12 + $0x110] sm:$0xff]  ;;  %v5170_v11 = vld [vmem:[#allocation12 + $0x118] sm:$0xff] }
  0x9b   :  { %619 = vmatpush.msra.mxu0 %v5152_v49  ;;  %659 = vmatpush.msra.mxu2 %v5154_v39 }
  0x9c   :  { %805 = vmatpush.msrb.mxu1 %v4746_v9  ;;  %845 = vmatpush.msrb.mxu3 %v4759_v15  ;;  %v5176_v9 = vld [vmem:[#allocation12 + $0xf0] sm:$0xff]  ;;  %v5178_v15 = vld [vmem:[#allocation12 + $0xf8] sm:$0xff] }
  0x9d   :  { %620 = vmatpush.msra.mxu0 %v5160_v51  ;;  %660 = vmatpush.msra.mxu2 %v5162_v43 }
  0x9e   :  { %v141_v41 = vpop.f32.mrf.mxu2  ;;  %806 = vmatpush.msrb.mxu1 %v4756_v13  ;;  %846 = vmatpush.msrb.mxu3 %v4765_v19  ;;  %v5184_v13 = vld [vmem:[#allocation12 + $0xd0] sm:$0xff]  ;;  %v5186_v19 = vld [vmem:[#allocation12 + $0xd8] sm:$0xff] }
  0x9f   :  { %v164_v33 = vpop.f32.mrf.mxu3  ;;  %v142_v45 = vadd.f32 %v141_v41, %v93_v35  ;;  %621 = vmatpush.msra.mxu0 %v5168_v4  ;;  %661 = vmatpush.msra.mxu2 %v5170_v11  ;;  %v96_v35 = vperm.slane %v5076_v37, 3  ;;  %v5234_v41 = vld [vmem:[#allocation12 + $0x10] sm:$0xff] }
  0xa0   :  { %v165_v22 = vadd.f32 %v164_v33, %v94_v31  ;;  %807 = vmatpush.msrb.mxu1 %v4762_v17  ;;  %847 = vmatpush.msrb.mxu3 %v4773_v23  ;;  %v5194_v17 = vld [vmem:[#allocation12 + $0xb0] sm:$0xff]  ;;  %v5196_v23 = vld [vmem:[#allocation12 + $0xb8] sm:$0xff] }
  0xa1   :  { %217 = vst [vmem:[#allocation6 + $0x8] sm:$0xff] %v142_v45  ;;  %622 = vmatpush.msra.mxu0 %v5176_v9  ;;  %662 = vmatpush.msra.mxu2 %v5178_v15  ;;  %v95_v45 = vperm.slane %v5076_v37, 2 }
  0xa2   :  { %218 = vst [vmem:[#allocation6 + $0x20] sm:$0xff] %v165_v22  ;;  %808 = vmatpush.msrb.mxu1 %v4768_v21  ;;  %848 = vmatpush.msrb.mxu3 %v4786_v28  ;;  %v5202_v21 = vld [vmem:[#allocation12 + $0x90] sm:$0xff]  ;;  %v5204_v28 = vld [vmem:[#allocation12 + $0x98] sm:$0xff] }
  0xa3   :  { %623 = vmatpush.msra.mxu0 %v5184_v13  ;;  %663 = vmatpush.msra.mxu2 %v5186_v19 }
  0xa4   :  { %809 = vmatpush.msrb.mxu1 %v4782_v26  ;;  %849 = vmatpush.msrb.mxu3 %v4797_v32  ;;  %v5210_v26 = vld [vmem:[#allocation12 + $0x70] sm:$0xff]  ;;  %v5212_v32 = vld [vmem:[#allocation12 + $0x78] sm:$0xff] }
  0xa5   :  { %624 = vmatpush.msra.mxu0 %v5194_v17  ;;  %664 = vmatpush.msra.mxu2 %v5196_v23 }
  0xa6   :  { %810 = vmatpush.msrb.mxu1 %v4792_v30  ;;  %850 = vmatpush.msrb.mxu3 %v4807_v36  ;;  %v5218_v30 = vld [vmem:[#allocation12 + $0x50] sm:$0xff]  ;;  %v5220_v36 = vld [vmem:[#allocation12 + $0x58] sm:$0xff] }
  0xa7   :  { %v184_v31 = vpop.f32.mrf.mxu2  ;;  %625 = vmatpush.msra.mxu0 %v5202_v21  ;;  %665 = vmatpush.msra.mxu2 %v5204_v28  ;;  %8325 = vst [vmem:[#allocation90_spill] sm:$0xff] %v5220_v36 }
  0xa8   :  { %v207_v22 = vpop.f32.mrf.mxu3  ;;  %v185_v37 = vadd.f32 %v184_v31, %v95_v45  ;;  %811 = vmatpush.msrb.mxu1 %v4802_v34  ;;  %851 = vmatpush.msrb.mxu3 %v4819_v40  ;;  %v5226_v34 = vld [vmem:[#allocation12 + $0x30] sm:$0xff]  ;;  %v5228_v40 = vld [vmem:[#allocation12 + $0x38] sm:$0xff] }
  0xa9   :  { %v208_v33 = vadd.f32 %v207_v22, %v96_v35  ;;  %626 = vmatpush.msra.mxu0 %v5210_v26  ;;  %666 = vmatpush.msra.mxu2 %v5212_v32  ;;  %8326 = vst [vmem:[#allocation91_spill] sm:$0xff] %v5226_v34 }
  0xaa   :  { %215 = vst [vmem:[#allocation6 + $0x18] sm:$0xff] %v185_v37  ;;  %812 = vmatpush.msrb.mxu1 %v4813_v38  ;;  %852 = vmatpush.msrb.mxu3 %v4833_v44  ;;  %v5236_v38 = vld [vmem:[#allocation12 + $0x18] sm:$0xff] }
  0xab   :  { %216 = vst [vmem:[#allocation6 + $0x10] sm:$0xff] %v208_v33  ;;  %627 = vmatpush.msra.mxu0 %v5218_v30  ;;  %667 = vmatpush.msra.mxu2 %v5220_v36  ;;  %v231_v33 = vld [vmem:[#allocation6 + $0x30] sm:$0x3]  ;;  %v232_v36 = vld [vmem:[#allocation6] sm:$0x3] }
  0xac   :  { %8327 = vst [vmem:[#allocation92_spill] sm:$0xff] %v5228_v40  ;;  %813 = vmatpush.msrb.mxu1 %v4827_v42  ;;  %853 = vmatpush.msrb.mxu3 %v4847_v48 }
  0xad   :  { %628 = vmatpush.msra.mxu0 %v5226_v34  ;;  %668 = vmatpush.msra.mxu2 %v5228_v40 }
  0xae   :  { %814 = vmatpush.msrb.mxu1 %v4841_v46  ;;  %854 = vmatpush.msrb.mxu3 %v4859_v52 }
  0xaf   :  { %629 = vmatpush.msra.mxu0 %v5234_v41  ;;  %669 = vmatpush.msra.mxu2 %v5236_v38 }
  0xb0   :  { %v187_v44 = vpop.f32.mrf.mxu2  ;;  %815 = vmatpush.msrb.mxu1 %v4853_v50  ;;  %855 = vmatpush.msrb.mxu3 %v4871_v56 }
  0xb1   :  { %v210_v31 = vpop.f32.mrf.mxu3  ;;  %v188_v22 = vadd.f32 %v187_v44, %v95_v45  ;;  %v317_v42 = vpop.f32.mrf.mxu0  ;;  %650 = vmatmul.f32.vlgmr.msra.gmra.mxu1 %v5142_v55  ;;  %690 = vmatmul.f32.vlgmr.msra.gmra.mxu3 %v5142_v55  ;;  %v233_v56 = vld [vmem:[#allocation6 + $0x18] sm:$0x3] }
  0xb2   :  { %v211_v37 = vadd.f32 %v210_v31, %v96_v35  ;;  %v337_v48 = vpop.f32.mrf.mxu1  ;;  %v380_v40 = vadd.f32 %v317_v42, %v231_v33  ;;  %816 = vmatpush.msrb.mxu1 %v4865_v54  ;;  %856 = vmatpush.msrb.mxu3 %v4885_v60  ;;  %v234_v50 = vld [vmem:[#allocation6 + $0x10] sm:$0x3]  ;;  %v8333_v42 = vld [vmem:[#allocation20_spill] sm:$0xff] }
  0xb3   :  { %v381_v34 = vadd.f32 %v337_v48, %v232_v36  ;;  %219 = vst [vmem:[#allocation6 + $0x28] sm:$0xff] %v188_v22  ;;  %v5291_v31 = vld [vmem:[#allocation10 + $0x170] sm:$0xff]  ;;  %v5293_v22 = vld [vmem:[#allocation10 + $0x140] sm:$0xff] }
  0xb4   :  { %220 = vst [vmem:[#allocation6 + $0x38] sm:$0xff] %v211_v37  ;;  %v384_v46 = vmul.f32 0.5, %v380_v40  ;;  %817 = vmatpush.msrb.mxu1 %v4879_v58  ;;  %857 = vmatpush.msrb.mxu3 %v4899_v0  ;;  %v8331_v40 = vld [vmem:[#allocation17_spill] sm:$0xff]  ;;  %v8332_v33 = vld [vmem:[#allocation18_spill] sm:$0xff]  ;;  %v8334_v48 = vld [vmem:[#allocation19_spill] sm:$0xff] }
  0xb5   :  { %v388_v52 = vmul.f32 0.5, %v381_v34  ;;  %v5297_v37 = vld [vmem:[#allocation10 + $0x120] sm:$0xff] }
  0xb6   :  { %4396 = vtanh.f32 %v384_v46  ;;  %818 = vmatpush.msrb.mxu1 %v4893_v62  ;;  %858 = vmatpush.msrb.mxu3 %v4911_v5  ;;  %v397_v5 = vld [vmem:[#allocation3] sm:$0x3]  ;;  %v8335_v46 = vld [vmem:[#allocation22_spill] sm:$0xff] }
  0xb7   :  { %4398 = vtanh.f32 %v388_v52  ;;  %v8336_v52 = vld [vmem:[#allocation21_spill] sm:$0xff] }
  0xb8   :  { %819 = vmatpush.msrb.mxu1 %v4905_v2  ;;  %859 = vmatpush.msrb.mxu3 %v4919_v8 }
  0xb9   :  { %v357_v55 = vpop.f32.mrf.mxu2 }
  0xba   :  { %v377_v45 = vpop.f32.mrf.mxu3  ;;  %v382_v35 = vadd.f32 %v357_v55, %v233_v56  ;;  %1060 = vmatpush.msra.mxu1 %v4923_v10  ;;  %1100 = vmatpush.msra.mxu3 %v4925_v12  ;;  %v8338_v56 = vld [vmem:[#allocation23_spill] sm:$0xff]  ;;  %v8339_v55 = vld [vmem:[#allocation26_spill] sm:$0xff] }
  0xbb   :  { %v383_v36 = vadd.f32 %v377_v45, %v234_v50  ;;  %v8337_v50 = vld [vmem:[#allocation24_spill] sm:$0xff]  ;;  %v8340_v45 = vld [vmem:[#allocation25_spill] sm:$0xff] }
  0xbc   :  { %v4397_v54 = vpop.eup %4396  ;;  %4400 = vtanh.f32 %v382_v35  ;;  %1061 = vmatpush.msra.mxu1 %v4933_v18  ;;  %1101 = vmatpush.msra.mxu3 %v4935_v20  ;;  %v8341_v35 = vld [vmem:[#allocation28_spill] sm:$0xff] }
  0xbd   :  { %v393_v58 = vmul.f32 0.5, %v383_v36  ;;  %v4399_v60 = vpop.eup %4398  ;;  %v386_v62 = vmul.f32 0.5, %v4397_v54  ;;  %v8342_v36 = vld [vmem:[#allocation27_spill] sm:$0xff]  ;;  %v8343_v54 = vld [vmem:[#allocation30_spill] sm:$0xff] }
  0xbe   :  { %v390_v0 = vmul.f32 0.5, %v4399_v60  ;;  %1062 = vmatpush.msra.mxu1 %v4943_v27  ;;  %1102 = vmatpush.msra.mxu3 %v4945_v29  ;;  %v8330_v27 = vld [vmem:[#allocation48_spill] sm:$0xff]  ;;  %v4562_v29 = vld [vmem:[#allocation10 + $0x1b0] sm:$0xff] }
  0xbf   :  { %4402 = vtanh.f32 %v393_v58  ;;  %v387_v8 = vadd.f32 0.5, %v386_v62  ;;  %v8344_v58 = vld [vmem:[#allocation29_spill] sm:$0xff]  ;;  %v8345_v60 = vld [vmem:[#allocation32_spill] sm:$0xff]  ;;  %v8346_v62 = vld [vmem:[#allocation31_spill] sm:$0xff] }
  0xc0   :  { %v391_v2 = vadd.f32 0.5, %v390_v0  ;;  %1063 = vmatpush.msra.mxu1 %v4955_v1  ;;  %1103 = vmatpush.msra.mxu3 %v4957_v3  ;;  %v8328_v3 = vld [vmem:[#allocation46_spill] sm:$0xff] }
  0xc1   :  { %v8347_v0 = vld [vmem:[#allocation34_spill] sm:$0xff] }
  0xc2   :  { %v4401_v10 = vpop.eup %4400  ;;  %v398_v12 = vmul.f32 %v397_v5, %v391_v2  ;;  %1064 = vmatpush.msra.mxu1 %v4967_v61  ;;  %1104 = vmatpush.msra.mxu3 %v4969_v63  ;;  %v8348_v2 = vld [vmem:[#allocation33_spill] sm:$0xff]  ;;  %v8349_v5 = vld [vmem:[#allocation36_spill] sm:$0xff] }
  0xc3   :  { %v399_v34 = vmul.f32 %v4401_v10, %v387_v8  ;;  %v8350_v8 = vld [vmem:[#allocation35_spill] sm:$0xff]  ;;  %v8351_v10 = vld [vmem:[#allocation37_spill] sm:$0xff] }
  0xc4   :  { %1065 = vmatpush.msra.mxu1 %v4975_v25  ;;  %1105 = vmatpush.msra.mxu3 %v4977_v24  ;;  %v5274_v25 = vld [vmem:[#allocation10 + $0x1e0] sm:$0xff] }
  0xc5   :  { %v4403_v18 = vpop.eup %4402  ;;  %v400_v20 = vadd.f32 %v399_v34, %v398_v12  ;;  %v8352_v12 = vld [vmem:[#allocation38_spill] sm:$0xff]  ;;  %v8353_v34 = vld [vmem:[#allocation39_spill] sm:$0xff] }
  0xc6   :  { %1066 = vmatpush.msra.mxu1 %v4983_v57  ;;  %1106 = vmatpush.msra.mxu3 %v4985_v6  ;;  %v395_v1 = vmul.f32 0.5, %v4403_v18  ;;  %v8329_v57 = vld [vmem:[#allocation47_spill] sm:$0xff]  ;;  %v5287_v6 = vld [vmem:[#allocation10 + $0x160] sm:$0xff] }
  0xc7   :  { %4404 = vtanh.f32 %v400_v20  ;;  %403 = vst [vmem:[#allocation3] sm:$0x3] %v400_v20  ;;  %v8354_v18 = vld [vmem:[#allocation40_spill] sm:$0xff]  ;;  %v8355_v20 = vld [vmem:[#allocation41_spill] sm:$0xff] }
  0xc8   :  { %1067 = vmatpush.msra.mxu1 %v4989_v7  ;;  %1107 = vmatpush.msra.mxu3 %v4991_v59  ;;  %v396_v61 = vadd.f32 0.5, %v395_v1  ;;  %v5278_v59 = vld [vmem:[#allocation10 + $0x1c0] sm:$0xff]  ;;  %v4560_v7 = vld [vmem:[#allocation10 + $0x1f0] sm:$0xff] }
  0xc9   :  { %v8356_v1 = vld [vmem:[#allocation42_spill] sm:$0xff] }
  0xca   :  { %1068 = vmatpush.msra.mxu1 %v4995_v14  ;;  %1108 = vmatpush.msra.mxu3 %v4997_v16  ;;  %v5281_v14 = vld [vmem:[#allocation10 + $0x1a0] sm:$0xff] }
  0xcb   :  { %v5284_v16 = vld [vmem:[#allocation10 + $0x180] sm:$0xff] }
  0xcc   :  { %1069 = vmatpush.msra.mxu1 %v5001_v53  ;;  %1109 = vmatpush.msra.mxu3 %v8328_v3  ;;  %v4561_v53 = vld [vmem:[#allocation10 + $0x1d0] sm:$0xff]  ;;  %v8359_v3 = vld [vmem:[#allocation45_spill] sm:$0xff] }
  0xcd   :  { %v4405_v63 = vpop.eup %4404 }
  0xce   :  { %v402_v24 = vmul.f32 %v4405_v63, %v396_v61  ;;  %1070 = vmatpush.msra.mxu1 %v8329_v57  ;;  %1110 = vmatpush.msra.mxu3 %v8330_v27  ;;  %v8357_v61 = vld [vmem:[#allocation43_spill] sm:$0xff]  ;;  %v8358_v63 = vld [vmem:[#allocation44_spill] sm:$0xff]  ;;  %v8361_v57 = vld [vmem:[#allocation50_spill] sm:$0xff] }
  0xcf   :  { %v8362_v27 = vld [vmem:[#allocation51_spill] sm:$0xff] }
  0xd0   :  { %404 = vst [vmem:[#allocation2] sm:$0x3] %v402_v24  ;;  %550 = vmatmul.f32.vlgmr.msrb.gmra.mxu0 %v402_v24  ;;  %590 = vmatmul.f32.vlgmr.msrb.gmra.mxu2 %v402_v24 }
  0xd1   :  { %784 = vmatpush.msrb.mxu0 %v5274_v25  ;;  %824 = vmatpush.msrb.mxu2 %v4560_v7  ;;  %v8363_v7 = vld [vmem:[#allocation52_spill] sm:$0xff] }
  0xd3   :  { %785 = vmatpush.msrb.mxu0 %v5278_v59  ;;  %825 = vmatpush.msrb.mxu2 %v4561_v53  ;;  %v8364_v53 = vld [vmem:[#allocation53_spill] sm:$0xff] }
  0xd5   :  { %786 = vmatpush.msrb.mxu0 %v5281_v14  ;;  %826 = vmatpush.msrb.mxu2 %v4562_v29  ;;  %v8365_v29 = vld [vmem:[#allocation54_spill] sm:$0xff] }
  0xd7   :  { %787 = vmatpush.msrb.mxu0 %v5284_v16  ;;  %827 = vmatpush.msrb.mxu2 %v8331_v40  ;;  %v719_v44 = vld [vmem:[#allocation2] sm:$0x3] }
  0xd8   :  { %630 = vmatmul.f32.vlgmr.msra.gmra.mxu0 %v402_v24  ;;  %670 = vmatmul.f32.vlgmr.msra.gmra.mxu2 %v402_v24  ;;  %v8360_v24 = vld [vmem:[#allocation49_spill] sm:$0xff]  ;;  %v8366_v40 = vld [vmem:[#allocation55_spill] sm:$0xff] }
  0xd9   :  { %788 = vmatpush.msrb.mxu0 %v5287_v6  ;;  %820 = vmatmul.f32.vlgmr.msrb.gmra.mxu1 %v719_v44 }
  0xda   :  { %828 = vmatpush.msrb.mxu2 %v5291_v31  ;;  %860 = vmatmul.f32.vlgmr.msrb.gmra.mxu3 %v719_v44 }
  0xdb   :  { %789 = vmatpush.msrb.mxu0 %v5293_v22 }
  0xdc   :  { %829 = vmatpush.msrb.mxu2 %v8332_v33  ;;  %v8368_v33 = vld [vmem:[#allocation57_spill] sm:$0xff] }
  0xdd   :  { %790 = vmatpush.msrb.mxu0 %v5297_v37 }
  0xde   :  { %830 = vmatpush.msrb.mxu2 %v8333_v42  ;;  %v8369_v42 = vld [vmem:[#allocation58_spill] sm:$0xff] }
  0xdf   :  { %791 = vmatpush.msrb.mxu0 %v8334_v48  ;;  %v8370_v48 = vld [vmem:[#allocation59_spill] sm:$0xff] }
  0xe0   :  { %831 = vmatpush.msrb.mxu2 %v8335_v46  ;;  %v8371_v46 = vld [vmem:[#allocation60_spill] sm:$0xff] }
  0xe1   :  { %792 = vmatpush.msrb.mxu0 %v8336_v52  ;;  %v8372_v52 = vld [vmem:[#allocation61_spill] sm:$0xff] }
  0xe2   :  { %832 = vmatpush.msrb.mxu2 %v8337_v50  ;;  %v8373_v50 = vld [vmem:[#allocation62_spill] sm:$0xff] }
  0xe3   :  { %793 = vmatpush.msrb.mxu0 %v8338_v56  ;;  %v8374_v56 = vld [vmem:[#allocation63_spill] sm:$0xff] }
  0xe4   :  { %833 = vmatpush.msrb.mxu2 %v8339_v55  ;;  %v8375_v55 = vld [vmem:[#allocation64_spill] sm:$0xff] }
  0xe5   :  { %794 = vmatpush.msrb.mxu0 %v8340_v45  ;;  %v8376_v45 = vld [vmem:[#allocation65_spill] sm:$0xff] }
  0xe6   :  { %834 = vmatpush.msrb.mxu2 %v8341_v35  ;;  %v8377_v35 = vld [vmem:[#allocation66_spill] sm:$0xff] }
  0xe7   :  { %795 = vmatpush.msrb.mxu0 %v8342_v36  ;;  %v8378_v36 = vld [vmem:[#allocation67_spill] sm:$0xff] }
  0xe8   :  { %835 = vmatpush.msrb.mxu2 %v8343_v54  ;;  %v8379_v54 = vld [vmem:[#allocation68_spill] sm:$0xff] }
  0xe9   :  { %796 = vmatpush.msrb.mxu0 %v8344_v58  ;;  %v8380_v58 = vld [vmem:[#allocation69_spill] sm:$0xff] }
  0xea   :  { %836 = vmatpush.msrb.mxu2 %v8345_v60  ;;  %v8381_v60 = vld [vmem:[#allocation70_spill] sm:$0xff] }
  0xeb   :  { %797 = vmatpush.msrb.mxu0 %v8346_v62  ;;  %v8382_v62 = vld [vmem:[#allocation71_spill] sm:$0xff] }
  0xec   :  { %837 = vmatpush.msrb.mxu2 %v8347_v0  ;;  %v8383_v0 = vld [vmem:[#allocation72_spill] sm:$0xff] }
  0xed   :  { %798 = vmatpush.msrb.mxu0 %v8348_v2  ;;  %v8384_v2 = vld [vmem:[#allocation73_spill] sm:$0xff] }
  0xee   :  { %838 = vmatpush.msrb.mxu2 %v8349_v5  ;;  %v8385_v5 = vld [vmem:[#allocation74_spill] sm:$0xff] }
  0xef   :  { %799 = vmatpush.msrb.mxu0 %v8350_v8  ;;  %v8386_v8 = vld [vmem:[#allocation77_spill] sm:$0xff] }
  0xf0   :  { %839 = vmatpush.msrb.mxu2 %v8351_v10  ;;  %800 = vmatmul.f32.vlgmr.msrb.gmra.mxu0 %v719_v44  ;;  %v8387_v10 = vld [vmem:[#allocation78_spill] sm:$0xff] }
  0xf1   :  { %840 = vmatmul.f32.vlgmr.msrb.gmra.mxu2 %v719_v44  ;;  %1040 = vmatpush.msra.mxu0 %v8352_v12  ;;  %v8367_v44 = vld [vmem:[#allocation56_spill] sm:$0xff]  ;;  %v8388_v12 = vld [vmem:[#allocation81_spill] sm:$0xff] }
  0xf2   :  { %1080 = vmatpush.msra.mxu2 %v8353_v34  ;;  %v8389_v34 = vld [vmem:[#allocation84_spill] sm:$0xff] }
  0xf3   :  { %1041 = vmatpush.msra.mxu0 %v8354_v18  ;;  %v8390_v18 = vld [vmem:[#allocation85_spill] sm:$0xff] }
  0xf4   :  { %1081 = vmatpush.msra.mxu2 %v8355_v20  ;;  %v8391_v20 = vld [vmem:[#allocation88_spill] sm:$0xff] }
  0xf5   :  { %1042 = vmatpush.msra.mxu0 %v8356_v1  ;;  %v8392_v1 = vld [vmem:[#allocation89_spill] sm:$0xff] }
  0xf6   :  { %1082 = vmatpush.msra.mxu2 %v8357_v61  ;;  %v5435_v61 = vld [vmem:[#allocation12 + $0x398] sm:$0xff] }
  0xf7   :  { %1043 = vmatpush.msra.mxu0 %v8358_v63  ;;  %v221_v63 = vld [vmem:[%s7830_s5] sm:$0xf] }
  0xf8   :  { %1083 = vmatpush.msra.mxu2 %v8359_v3  ;;  %v5442_v3 = vld [vmem:[#allocation12 + $0x370] sm:$0xff] }
  0xf9   :  { %1044 = vmatpush.msra.mxu0 %v8360_v24  ;;  %v5444_v24 = vld [vmem:[#allocation12 + $0x378] sm:$0xff] }
  0xfa   :  { %1084 = vmatpush.msra.mxu2 %v8361_v57  ;;  %v5448_v57 = vperm.slane %v221_v63, 0 }
  0xfb   :  { %1045 = vmatpush.msra.mxu0 %v8362_v27  ;;  %v5450_v27 = vld [vmem:[#allocation12 + $0x350] sm:$0xff] }
  0xfc   :  { %1085 = vmatpush.msra.mxu2 %v8363_v7  ;;  %8396 = vst [vmem:[#allocation46_spill] sm:$0xff] %v5448_v57  ;;  %v5452_v7 = vld [vmem:[#allocation12 + $0x358] sm:$0xff] }
  0xfd   :  { %1046 = vmatpush.msra.mxu0 %v8364_v53 }
  0xfe   :  { %1086 = vmatpush.msra.mxu2 %v8365_v29  ;;  %v5456_v29 = vld [vmem:[#allocation12 + $0x330] sm:$0xff] }
  0xff   :  { %1047 = vmatpush.msra.mxu0 %v8366_v40  ;;  %v5458_v40 = vld [vmem:[#allocation12 + $0x338] sm:$0xff] }
 0x100   :  { %1087 = vmatpush.msra.mxu2 %v8367_v44 }
 0x101   :  { %1048 = vmatpush.msra.mxu0 %v8368_v33 }
 0x102   :  { %1088 = vmatpush.msra.mxu2 %v8369_v42  ;;  %v5463_v42 = vld [vmem:[#allocation12 + $0x310] sm:$0xff] }
 0x103   :  { %1049 = vmatpush.msra.mxu0 %v8370_v48  ;;  %v5465_v48 = vld [vmem:[#allocation12 + $0x318] sm:$0xff] }
 0x104   :  { %1089 = vmatpush.msra.mxu2 %v8371_v46 }
 0x105   :  { %1050 = vmatpush.msra.mxu0 %v8372_v52  ;;  %v5469_v52 = vperm.slane %v221_v63, 1 }
 0x106   :  { %1090 = vmatpush.msra.mxu2 %v8373_v50  ;;  %v5471_v50 = vld [vmem:[#allocation12 + $0x2f0] sm:$0xff] }
 0x107   :  { %1051 = vmatpush.msra.mxu0 %v8374_v56  ;;  %8397 = vst [vmem:[#allocation47_spill] sm:$0xff] %v5469_v52  ;;  %v5473_v56 = vld [vmem:[#allocation12 + $0x2f8] sm:$0xff] }
 0x108   :  { %1091 = vmatpush.msra.mxu2 %v8375_v55 }
 0x109   :  { %1052 = vmatpush.msra.mxu0 %v8376_v45  ;;  %v5477_v45 = vperm.slane %v221_v63, 2 }
 0x10a   :  { %1092 = vmatpush.msra.mxu2 %v8377_v35  ;;  %v5479_v35 = vld [vmem:[#allocation12 + $0x2d0] sm:$0xff] }
 0x10b   :  { %1053 = vmatpush.msra.mxu0 %v8378_v36  ;;  %8398 = vst [vmem:[#allocation48_spill] sm:$0xff] %v5477_v45  ;;  %v5481_v36 = vld [vmem:[#allocation12 + $0x2d8] sm:$0xff] }
 0x10c   :  { %1093 = vmatpush.msra.mxu2 %v8379_v54 }
 0x10d   :  { %1054 = vmatpush.msra.mxu0 %v8380_v58 }
 0x10e   :  { %1094 = vmatpush.msra.mxu2 %v8381_v60 }
 0x10f   :  { %1055 = vmatpush.msra.mxu0 %v8382_v62  ;;  %v5486_v62 = vld [vmem:[#allocation12 + $0x2b0] sm:$0xff] }
 0x110   :  { %1095 = vmatpush.msra.mxu2 %v8383_v0  ;;  %v5488_v0 = vld [vmem:[#allocation12 + $0x2b8] sm:$0xff] }
 0x111   :  { %1120 = vmatpush.msrb.mxu0 %v8384_v2  ;;  %8399 = vst [vmem:[#allocation17_spill] sm:$0xff] %v5488_v0 }
 0x112   :  { %1160 = vmatpush.msrb.mxu2 %v8385_v5 }
 0x113   :  { %1121 = vmatpush.msrb.mxu0 %v8386_v8 }
 0x114   :  { %1161 = vmatpush.msrb.mxu2 %v8387_v10 }
 0x115   :  { %1122 = vmatpush.msrb.mxu0 %v5118_v47  ;;  %v8395_v47 = vld [vmem:[#allocation92_spill] sm:$0xff]  ;;  %v571_v53 = vpop.f32.mrf.mxu1 }
 0x116   :  { %1162 = vmatpush.msrb.mxu2 %v8388_v12  ;;  %v5493_v12 = vld [vmem:[#allocation12 + $0x290] sm:$0xff] }
 0x117   :  { %1123 = vmatpush.msrb.mxu0 %v8389_v34  ;;  %8400 = vst [vmem:[#allocation18_spill] sm:$0xff] %v5493_v12  ;;  %v5495_v34 = vld [vmem:[#allocation12 + $0x298] sm:$0xff] }
 0x118   :  { %1163 = vmatpush.msrb.mxu2 %v8390_v18  ;;  %8401 = vst [vmem:[#allocation20_spill] sm:$0xff] %v5495_v34 }
 0x119   :  { %1124 = vmatpush.msrb.mxu0 %v8391_v20 }
 0x11a   :  { %1164 = vmatpush.msrb.mxu2 %v8392_v1  ;;  %v5499_v1 = vperm.slane %v221_v63, 3 }
 0x11b   :  { %1125 = vmatpush.msrb.mxu0 %v5152_v49  ;;  %v5387_v49 = vld [vmem:[#allocation12 + $0x288] sm:$0xff]  ;;  %v611_v54 = vpop.f32.mrf.mxu3 }
 0x11c   :  { %1165 = vmatpush.msrb.mxu2 %v5154_v39  ;;  %v5385_v39 = vld [vmem:[#allocation12 + $0x280] sm:$0xff]  ;;  %1111 = vmatpush.msra.mxu3 %v5387_v49  ;;  %8402 = vst [vmem:[#allocation19_spill] sm:$0xff] %v5499_v1 }
 0x11d   :  { %1126 = vmatpush.msrb.mxu0 %v5160_v51  ;;  %v8394_v51 = vld [vmem:[#allocation91_spill] sm:$0xff]  ;;  %1071 = vmatpush.msra.mxu1 %v5385_v39 }
 0x11e   :  { %1166 = vmatpush.msrb.mxu2 %v5162_v43  ;;  %v8393_v43 = vld [vmem:[#allocation90_spill] sm:$0xff] }
 0x11f   :  { %1127 = vmatpush.msrb.mxu0 %v5168_v4  ;;  %v5391_v4 = vld [vmem:[#allocation12 + $0x260] sm:$0xff] }
 0x120   :  { %1167 = vmatpush.msrb.mxu2 %v5170_v11  ;;  %v5393_v11 = vld [vmem:[#allocation12 + $0x268] sm:$0xff]  ;;  %1072 = vmatpush.msra.mxu1 %v5391_v4 }
 0x121   :  { %1128 = vmatpush.msrb.mxu0 %v5176_v9  ;;  %1112 = vmatpush.msra.mxu3 %v5393_v11  ;;  %v5397_v9 = vld [vmem:[#allocation12 + $0x240] sm:$0xff] }
 0x122   :  { %1168 = vmatpush.msrb.mxu2 %v5178_v15  ;;  %v5399_v15 = vld [vmem:[#allocation12 + $0x248] sm:$0xff]  ;;  %1073 = vmatpush.msra.mxu1 %v5397_v9 }
 0x123   :  { %1129 = vmatpush.msrb.mxu0 %v5184_v13  ;;  %1113 = vmatpush.msra.mxu3 %v5399_v15  ;;  %v5403_v13 = vld [vmem:[#allocation12 + $0x220] sm:$0xff] }
 0x124   :  { %1169 = vmatpush.msrb.mxu2 %v5186_v19  ;;  %v5405_v19 = vld [vmem:[#allocation12 + $0x228] sm:$0xff]  ;;  %1074 = vmatpush.msra.mxu1 %v5403_v13 }
 0x125   :  { %1130 = vmatpush.msrb.mxu0 %v5194_v17  ;;  %1114 = vmatpush.msra.mxu3 %v5405_v19  ;;  %v5409_v17 = vld [vmem:[#allocation12 + $0x200] sm:$0xff] }
 0x126   :  { %1170 = vmatpush.msrb.mxu2 %v5196_v23  ;;  %v5411_v23 = vld [vmem:[#allocation12 + $0x208] sm:$0xff]  ;;  %1075 = vmatpush.msra.mxu1 %v5409_v17 }
 0x127   :  { %1131 = vmatpush.msrb.mxu0 %v5202_v21  ;;  %1115 = vmatpush.msra.mxu3 %v5411_v23  ;;  %v5415_v21 = vld [vmem:[#allocation12 + $0x3f0] sm:$0xff] }
 0x128   :  { %1171 = vmatpush.msrb.mxu2 %v5204_v28  ;;  %v5417_v28 = vld [vmem:[#allocation12 + $0x3f8] sm:$0xff]  ;;  %1140 = vmatpush.msrb.mxu1 %v5415_v21 }
 0x129   :  { %1132 = vmatpush.msrb.mxu0 %v5210_v26  ;;  %1180 = vmatpush.msrb.mxu3 %v5417_v28  ;;  %v5421_v26 = vld [vmem:[#allocation12 + $0x3d0] sm:$0xff] }
 0x12a   :  { %1172 = vmatpush.msrb.mxu2 %v5212_v32  ;;  %v5423_v32 = vld [vmem:[#allocation12 + $0x3d8] sm:$0xff]  ;;  %1141 = vmatpush.msrb.mxu1 %v5421_v26 }
 0x12b   :  { %1133 = vmatpush.msrb.mxu0 %v5218_v30  ;;  %1181 = vmatpush.msrb.mxu3 %v5423_v32  ;;  %v5427_v30 = vld [vmem:[#allocation12 + $0x3b0] sm:$0xff] }
 0x12c   :  { %1173 = vmatpush.msrb.mxu2 %v8393_v43  ;;  %1142 = vmatpush.msrb.mxu1 %v5427_v30  ;;  %v8403_v43 = vld [vmem:[#allocation75_spill] sm:$0xff] }
 0x12d   :  { %1134 = vmatpush.msrb.mxu0 %v8394_v51  ;;  %v8404_v51 = vld [vmem:[#allocation76_spill] sm:$0xff] }
 0x12e   :  { %1174 = vmatpush.msrb.mxu2 %v8395_v47  ;;  %v651_v5 = vpop.f32.mrf.mxu1 }
 0x12f   :  { %1135 = vmatpush.msrb.mxu0 %v5234_v41  ;;  %v5429_v41 = vld [vmem:[#allocation12 + $0x3b8] sm:$0xff] }
 0x130   :  { %1175 = vmatpush.msrb.mxu2 %v5236_v38  ;;  %1182 = vmatpush.msrb.mxu3 %v5429_v41  ;;  %v5433_v38 = vld [vmem:[#allocation12 + $0x390] sm:$0xff] }
 0x131   :  { %1143 = vmatpush.msrb.mxu1 %v5433_v38 }
 0x132   :  { %1183 = vmatpush.msrb.mxu3 %v5435_v61 }
 0x133   :  { %1144 = vmatpush.msrb.mxu1 %v5442_v3 }
 0x134   :  { %1184 = vmatpush.msrb.mxu3 %v5444_v24 }
 0x135   :  { %1145 = vmatpush.msrb.mxu1 %v5450_v27 }
 0x136   :  { %1185 = vmatpush.msrb.mxu3 %v5452_v7 }
 0x137   :  { %1146 = vmatpush.msrb.mxu1 %v5456_v29 }
 0x138   :  { %1186 = vmatpush.msrb.mxu3 %v5458_v40 }
 0x139   :  { %1147 = vmatpush.msrb.mxu1 %v5463_v42 }
 0x13a   :  { %1187 = vmatpush.msrb.mxu3 %v5465_v48 }
 0x13b   :  { %1148 = vmatpush.msrb.mxu1 %v5471_v50 }
 0x13c   :  { %1188 = vmatpush.msrb.mxu3 %v5473_v56 }
 0x13d   :  { %1149 = vmatpush.msrb.mxu1 %v5479_v35 }
 0x13e   :  { %1189 = vmatpush.msrb.mxu3 %v5481_v36 }
 0x13f   :  { %1150 = vmatpush.msrb.mxu1 %v5486_v62 }
 0x140   :  { %1190 = vmatpush.msrb.mxu3 %v5488_v0 }
 0x141   :  { %1151 = vmatpush.msrb.mxu1 %v5493_v12 }
 0x142   :  { %1191 = vmatpush.msrb.mxu3 %v5495_v34  ;;  %v716_v34 = vld [vmem:[#allocation6] sm:$0xc] }
 0x143   :  { %1152 = vmatpush.msrb.mxu1 %v8403_v43 }
 0x144   :  { %1192 = vmatpush.msrb.mxu3 %v8404_v51 }
 0x14d   :  { %v551_v44 = vpop.f32.mrf.mxu0 }
 0x14e   :  { %v552_v33 = vadd.f32 %v551_v44, %v5448_v57  ;;  %v8406_v44 = vld [vmem:[#allocation80_spill] sm:$0xff] }
 0x14f   :  { %1193 = vmatpush.msrb.mxu3 %v8406_v44 }
 0x150   :  { %v572_v46 = vadd.f32 %v571_v53, %v552_v33  ;;  %v8405_v53 = vld [vmem:[#allocation79_spill] sm:$0xff] }
 0x151   :  { %1153 = vmatpush.msrb.mxu1 %v8405_v53  ;;  %v707_v53 = vld [vmem:[#allocation5] sm:$0x3] }
 0x152   :  { %v694_v55 = vmul.f32 0.5, %v572_v46 }
 0x153   :  { %v591_v58 = vpop.f32.mrf.mxu2 }
 0x154   :  { %v592_v60 = vadd.f32 %v591_v58, %v5469_v52  ;;  %4406 = vtanh.f32 %v694_v55  ;;  %v691_v55 = vpop.f32.mrf.mxu3  ;;  %v8408_v58 = vld [vmem:[#allocation83_spill] sm:$0xff] }
 0x155   :  { %v631_v2 = vpop.f32.mrf.mxu0  ;;  %1194 = vmatpush.msrb.mxu3 %v8408_v58 }
 0x156   :  { %v612_v8 = vadd.f32 %v611_v54, %v592_v60  ;;  %v632_v10 = vadd.f32 %v631_v2, %v5477_v45  ;;  %v8407_v54 = vld [vmem:[#allocation82_spill] sm:$0xff] }
 0x157   :  { %1154 = vmatpush.msrb.mxu1 %v8407_v54  ;;  %v8409_v2 = vld [vmem:[#allocation86_spill] sm:$0xff] }
 0x158   :  { %v698_v18 = vmul.f32 0.5, %v612_v8  ;;  %v652_v20 = vadd.f32 %v651_v5, %v632_v10  ;;  %v8410_v5 = vld [vmem:[#allocation87_spill] sm:$0xff]  ;;  %v821_v10 = vpop.f32.mrf.mxu1 }
 0x159   :  { %1155 = vmatpush.msrb.mxu1 %v8409_v2  ;;  %1195 = vmatpush.msrb.mxu3 %v8410_v5  ;;  %v869_v44 = vrot.slane %v821_v10, 6 }
 0x15a   :  { %4408 = vtanh.f32 %v698_v18  ;;  %v4407_v33 = vpop.eup %4406 }
 0x15b   :  { %v671_v47 = vpop.f32.mrf.mxu2  ;;  %4410 = vtanh.f32 %v652_v20  ;;  %v696_v60 = vmul.f32 0.5, %v4407_v33 }
 0x15c   :  { %v672_v46 = vadd.f32 %v671_v47, %v5499_v1 }
 0x15d   :  { %v697_v20 = vadd.f32 0.5, %v696_v60  ;;  %v861_v5 = vpop.f32.mrf.mxu3 }
 0x15e   :  { %v692_v63 = vadd.f32 %v691_v55, %v672_v46  ;;  %v877_v46 = vadd.f32 %v869_v44, %v716_v34  ;;  %v717_v44 = vld [vmem:[#allocation6 + $0x18] sm:$0xc] }
 0x160   :  { %v4409_v8 = vpop.eup %4408  ;;  %v703_v18 = vmul.f32 0.5, %v692_v63  ;;  %v884_v2 = vmul.f32 0.5, %v877_v46 }
 0x161   :  { %v700_v43 = vmul.f32 0.5, %v4409_v8  ;;  %v4411_v51 = vpop.eup %4410 }
 0x162   :  { %4412 = vtanh.f32 %v703_v18  ;;  %v709_v54 = vmul.f32 %v4411_v51, %v697_v20  ;;  %v715_v18 = vld [vmem:[#allocation6 + $0x30] sm:$0xc] }
 0x163   :  { %v701_v47 = vadd.f32 0.5, %v700_v43  ;;  %v871_v43 = vrot.slane %v861_v5, 6 }
 0x165   :  { %v708_v1 = vmul.f32 %v707_v53, %v701_v47  ;;  %v718_v53 = vld [vmem:[#allocation6 + $0x10] sm:$0xc] }
 0x167   :  { %v710_v58 = vadd.f32 %v709_v54, %v708_v1  ;;  %v879_v1 = vadd.f32 %v871_v43, %v718_v53 }
 0x168   :  { %v4413_v33 = vpop.eup %4412 }
 0x169   :  { %4414 = vtanh.f32 %v710_v58  ;;  %713 = vst [vmem:[#allocation5] sm:$0x3] %v710_v58  ;;  %v705_v55 = vmul.f32 0.5, %v4413_v33  ;;  %v889_v46 = vmul.f32 0.5, %v879_v1 }
 0x16a   :  { %4416 = vtanh.f32 %v884_v2  ;;  %v893_v2 = vld [vmem:[#allocation3] sm:$0x3] }
 0x16b   :  { %v706_v63 = vadd.f32 0.5, %v705_v55  ;;  %v895_v43 = vrot.slane %v893_v2, 6  ;;  %v5538_v2 = vld [vmem:[#allocation10 + $0x148] sm:$0xff] }
 0x16c   :  { %8411 = vst [vmem:[#allocation22_spill] sm:$0xff] %v5538_v2 }
 0x16d   :  { %v801_v12 = vpop.f32.mrf.mxu0 }
 0x16e   :  { %v868_v8 = vrot.slane %v801_v12, 6 }
 0x16f   :  { %v4415_v0 = vpop.eup %4414 }
 0x170   :  { %v712_v60 = vmul.f32 %v4415_v0, %v706_v63  ;;  %v876_v10 = vadd.f32 %v868_v8, %v715_v18  ;;  %v4417_v20 = vpop.eup %4416  ;;  %v5510_v8 = vld [vmem:[#allocation10 + $0x1e8] sm:$0xff]  ;;  %v5512_v18 = vld [vmem:[#allocation10 + $0x1f8] sm:$0xff] }
 0x171   :  { %v886_v58 = vmul.f32 0.5, %v4417_v20  ;;  %v5520_v20 = vld [vmem:[#allocation10 + $0x1a8] sm:$0xff] }
 0x172   :  { %714 = vst [vmem:[#allocation4] sm:$0x3] %v712_v60  ;;  %v880_v51 = vmul.f32 0.5, %v876_v10  ;;  %v5514_v10 = vld [vmem:[#allocation10 + $0x1c8] sm:$0xff] }
 0x173   :  { %v887_v5 = vadd.f32 0.5, %v886_v58  ;;  %v5526_v58 = vld [vmem:[#allocation10 + $0x188] sm:$0xff] }
 0x174   :  { %4418 = vtanh.f32 %v880_v51  ;;  %v841_v34 = vpop.f32.mrf.mxu2  ;;  %v5516_v51 = vld [vmem:[#allocation10 + $0x1d8] sm:$0xff] }
 0x175   :  { %v870_v47 = vrot.slane %v841_v34, 6  ;;  %v897_v1 = vmul.f32 %v895_v43, %v887_v5  ;;  %v5544_v5 = vld [vmem:[#allocation10 + $0x128] sm:$0xff] }
 0x177   :  { %v878_v54 = vadd.f32 %v870_v47, %v717_v44  ;;  %v5522_v47 = vld [vmem:[#allocation10 + $0x1b8] sm:$0xff] }
 0x179   :  { %4420 = vtanh.f32 %v878_v54  ;;  %v904_v12 = vld [vmem:[#allocation4] sm:$0x3] }
 0x17a   :  { %v4419_v33 = vpop.eup %4418  ;;  %v906_v55 = vrot.slane %v904_v12, 6  ;;  %4422 = vtanh.f32 %v889_v46  ;;  %v5528_v46 = vld [vmem:[#allocation10 + $0x198] sm:$0xff]  ;;  %v5532_v12 = vld [vmem:[#allocation10 + $0x168] sm:$0xff] }
 0x17b   :  { %v882_v0 = vmul.f32 0.5, %v4419_v33  ;;  %v5534_v33 = vld [vmem:[#allocation10 + $0x178] sm:$0xff] }
 0x17c   :  { %v1037_v63 = vrot.slane %v906_v55, 2 }
 0x17d   :  { %v883_v60 = vadd.f32 0.5, %v882_v0  ;;  %v5540_v0 = vld [vmem:[#allocation10 + $0x158] sm:$0xff] }
 0x17e   :  { %1076 = vmatmul.f32.vlgmr.msra.gmra.mxu1 %v1037_v63  ;;  %1116 = vmatmul.f32.vlgmr.msra.gmra.mxu3 %v1037_v63  ;;  %8412 = vst [vmem:[#allocation21_spill] sm:$0xff] %v5540_v0 }
 0x17f   :  { %v4421_v53 = vpop.eup %4420  ;;  %1310 = vmatpush.msra.mxu1 %v5510_v8  ;;  %1350 = vmatpush.msra.mxu3 %v5512_v18 }
 0x180   :  { %v898_v34 = vmul.f32 %v4421_v53, %v883_v60  ;;  %v4423_v44 = vpop.eup %4422  ;;  %v5546_v60 = vld [vmem:[#allocation10 + $0x138] sm:$0xff] }
 0x181   :  { %1311 = vmatpush.msra.mxu1 %v5514_v10  ;;  %1351 = vmatpush.msra.mxu3 %v5516_v51  ;;  %v891_v55 = vmul.f32 0.5, %v4423_v44 }
 0x182   :  { %v899_v54 = vadd.f32 %v898_v34, %v897_v1  ;;  %v5550_v1 = vld [vmem:[#allocation10 + $0x108] sm:$0xff] }
 0x183   :  { %1312 = vmatpush.msra.mxu1 %v5520_v20  ;;  %1352 = vmatpush.msra.mxu3 %v5522_v47  ;;  %v892_v43 = vadd.f32 0.5, %v891_v55  ;;  %8413 = vst [vmem:[#allocation24_spill] sm:$0xff] %v5550_v1  ;;  %v5560_v55 = vld [vmem:[#allocation10 + $0xe8] sm:$0xff] }
 0x184   :  { %4424 = vtanh.f32 %v899_v54  ;;  %902 = vst [vmem:[#allocation3 - $0x2] sm:$0xc] %v899_v54  ;;  %v5558_v54 = vld [vmem:[#allocation10 + $0x1f0] sm:$0xff] }
 0x185   :  { %1313 = vmatpush.msra.mxu1 %v5526_v58  ;;  %1353 = vmatpush.msra.mxu3 %v5528_v46  ;;  %8415 = vst [vmem:[#allocation26_spill] sm:$0xff] %v5558_v54 }
 0x186   :  { %1156 = vmatmul.f32.vlgmr.msrb.gmra.mxu1 %v1037_v63  ;;  %1196 = vmatmul.f32.vlgmr.msrb.gmra.mxu3 %v1037_v63  ;;  %v5552_v63 = vld [vmem:[#allocation10 + $0x118] sm:$0xff] }
 0x187   :  { %1314 = vmatpush.msra.mxu1 %v5532_v12  ;;  %1354 = vmatpush.msra.mxu3 %v5534_v33  ;;  %8414 = vst [vmem:[#allocation23_spill] sm:$0xff] %v5552_v63 }
 0x189   :  { %1315 = vmatpush.msra.mxu1 %v5538_v2  ;;  %1355 = vmatpush.msra.mxu3 %v5540_v0  ;;  %v5562_v0 = vld [vmem:[#allocation10 + $0xf8] sm:$0xff]  ;;  %v5564_v2 = vld [vmem:[#allocation10 + $0x1d0] sm:$0xff] }
 0x18a   :  { %v4425_v53 = vpop.eup %4424  ;;  %8416 = vst [vmem:[#allocation25_spill] sm:$0xff] %v5562_v0 }
 0x18b   :  { %1316 = vmatpush.msra.mxu1 %v5544_v5  ;;  %1356 = vmatpush.msra.mxu3 %v5546_v60  ;;  %v901_v34 = vmul.f32 %v4425_v53, %v892_v43  ;;  %v5568_v43 = vld [vmem:[#allocation10 + $0xc8] sm:$0xff]  ;;  %v5570_v53 = vld [vmem:[#allocation10 + $0xd8] sm:$0xff] }
 0x18d   :  { %1317 = vmatpush.msra.mxu1 %v5550_v1  ;;  %1357 = vmatpush.msra.mxu3 %v5552_v63  ;;  %903 = vst [vmem:[#allocation2 - $0x2] sm:$0xc] %v901_v34  ;;  %v1036_v44 = vrot.slane %v901_v34, 2  ;;  %v5574_v34 = vld [vmem:[#allocation10 + $0x1b0] sm:$0xff]  ;;  %v5578_v63 = vld [vmem:[#allocation10 + $0xa8] sm:$0xff]  ;;  %v5580_v1 = vld [vmem:[#allocation10 + $0xb8] sm:$0xff] }
 0x18e   :  { %8417 = vst [vmem:[#allocation28_spill] sm:$0xff] %v5574_v34 }
 0x18f   :  { %1056 = vmatmul.f32.vlgmr.msra.gmra.mxu0 %v1036_v44  ;;  %1096 = vmatmul.f32.vlgmr.msra.gmra.mxu2 %v1036_v44  ;;  %8418 = vst [vmem:[#allocation27_spill] sm:$0xff] %v5580_v1 }
 0x190   :  { %1290 = vmatpush.msra.mxu0 %v5274_v25  ;;  %1330 = vmatpush.msra.mxu2 %v5558_v54  ;;  %v5584_v25 = vld [vmem:[#allocation10 + $0x190] sm:$0xff]  ;;  %v5588_v54 = vld [vmem:[#allocation10 + $0x88] sm:$0xff] }
 0x191   :  { %1318 = vmatpush.msra.mxu1 %v5560_v55  ;;  %1358 = vmatpush.msra.mxu3 %v5562_v0  ;;  %8419 = vst [vmem:[#allocation30_spill] sm:$0xff] %v5584_v25  ;;  %v5590_v0 = vld [vmem:[#allocation10 + $0x98] sm:$0xff] }
 0x192   :  { %1291 = vmatpush.msra.mxu0 %v5278_v59  ;;  %1331 = vmatpush.msra.mxu2 %v5564_v2  ;;  %8420 = vst [vmem:[#allocation29_spill] sm:$0xff] %v5590_v0  ;;  %v5598_v59 = vld [vmem:[#allocation10 + $0x68] sm:$0xff] }
 0x193   :  { %1319 = vmatpush.msra.mxu1 %v5568_v43  ;;  %1359 = vmatpush.msra.mxu3 %v5570_v53 }
 0x194   :  { %1292 = vmatpush.msra.mxu0 %v5281_v14  ;;  %1332 = vmatpush.msra.mxu2 %v5574_v34  ;;  %v5600_v14 = vld [vmem:[#allocation10 + $0x78] sm:$0xff]  ;;  %v5602_v34 = vld [vmem:[#allocation10 + $0x150] sm:$0xff] }
 0x195   :  { %1320 = vmatpush.msra.mxu1 %v5578_v63  ;;  %1360 = vmatpush.msra.mxu3 %v5580_v1  ;;  %8421 = vst [vmem:[#allocation32_spill] sm:$0xff] %v5600_v14  ;;  %v5606_v1 = vld [vmem:[#allocation10 + $0x48] sm:$0xff] }
 0x196   :  { %1293 = vmatpush.msra.mxu0 %v5284_v16  ;;  %1333 = vmatpush.msra.mxu2 %v5584_v25  ;;  %8422 = vst [vmem:[#allocation31_spill] sm:$0xff] %v5602_v34  ;;  %v5608_v16 = vld [vmem:[#allocation10 + $0x58] sm:$0xff]  ;;  %v5612_v25 = vld [vmem:[#allocation10 + $0x130] sm:$0xff] }
 0x197   :  { %1321 = vmatpush.msra.mxu1 %v5588_v54  ;;  %1361 = vmatpush.msra.mxu3 %v5590_v0  ;;  %8423 = vst [vmem:[#allocation34_spill] sm:$0xff] %v5608_v16  ;;  %v5618_v0 = vld [vmem:[#allocation10 + $0x38] sm:$0xff] }
 0x198   :  { %1136 = vmatmul.f32.vlgmr.msrb.gmra.mxu0 %v1036_v44  ;;  %1176 = vmatmul.f32.vlgmr.msrb.gmra.mxu2 %v1036_v44  ;;  %8424 = vst [vmem:[#allocation33_spill] sm:$0xff] %v5612_v25  ;;  %v5616_v44 = vld [vmem:[#allocation10 + $0x28] sm:$0xff] }
 0x199   :  { %1294 = vmatpush.msra.mxu0 %v5287_v6  ;;  %1334 = vmatpush.msra.mxu2 %v5291_v31  ;;  %8425 = vst [vmem:[#allocation36_spill] sm:$0xff] %v5616_v44  ;;  %v5622_v6 = vld [vmem:[#allocation10 + $0x100] sm:$0xff]  ;;  %v5624_v31 = vld [vmem:[#allocation10 + $0x110] sm:$0xff] }
 0x19a   :  { %1322 = vmatpush.msra.mxu1 %v5598_v59  ;;  %1362 = vmatpush.msra.mxu3 %v5600_v14  ;;  %8426 = vst [vmem:[#allocation35_spill] sm:$0xff] %v5622_v6  ;;  %v5628_v14 = vld [vmem:[#allocation10 + $0x8] sm:$0xff] }
 0x19b   :  { %1295 = vmatpush.msra.mxu0 %v5293_v22  ;;  %1335 = vmatpush.msra.mxu2 %v5602_v34  ;;  %8427 = vst [vmem:[#allocation37_spill] sm:$0xff] %v5624_v31  ;;  %v5630_v22 = vld [vmem:[#allocation10 + $0x18] sm:$0xff]  ;;  %v5634_v34 = vld [vmem:[#allocation10 + $0xe0] sm:$0xff] }
 0x19c   :  { %1323 = vmatpush.msra.mxu1 %v5606_v1  ;;  %1363 = vmatpush.msra.mxu3 %v5608_v16  ;;  %8428 = vst [vmem:[#allocation38_spill] sm:$0xff] %v5628_v14  ;;  %v5638_v16 = vld [vmem:[#allocation10 + $0xf0] sm:$0xff] }
 0x19d   :  { %1296 = vmatpush.msra.mxu0 %v5297_v37  ;;  %1336 = vmatpush.msra.mxu2 %v5612_v25  ;;  %8429 = vst [vmem:[#allocation39_spill] sm:$0xff] %v5630_v22  ;;  %v1225_v37 = vld [vmem:[#allocation2] sm:$0x3]  ;;  %v5642_v25 = vld [vmem:[#allocation10 + $0xc0] sm:$0xff] }
 0x19e   :  { %1324 = vmatpush.msra.mxu1 %v5616_v44  ;;  %1364 = vmatpush.msra.mxu3 %v5618_v0  ;;  %8430 = vst [vmem:[#allocation40_spill] sm:$0xff] %v5634_v34  ;;  %v5645_v44 = vld [vmem:[#allocation10 + $0xd0] sm:$0xff] }
 0x19f   :  { %1297 = vmatpush.msra.mxu0 %v5622_v6  ;;  %1337 = vmatpush.msra.mxu2 %v5624_v31  ;;  %8431 = vst [vmem:[#allocation41_spill] sm:$0xff] %v5638_v16  ;;  %v5648_v6 = vld [vmem:[#allocation10 + $0xa0] sm:$0xff]  ;;  %v5651_v31 = vld [vmem:[#allocation10 + $0xb0] sm:$0xff] }
 0x1a0   :  { %1325 = vmatpush.msra.mxu1 %v5628_v14  ;;  %1365 = vmatpush.msra.mxu3 %v5630_v22  ;;  %8432 = vst [vmem:[#allocation42_spill] sm:$0xff] %v5642_v25  ;;  %v5654_v22 = vld [vmem:[#allocation10 + $0x80] sm:$0xff]  ;;  %v5657_v14 = vld [vmem:[#allocation10 + $0x90] sm:$0xff] }
 0x1a1   :  { %1298 = vmatpush.msra.mxu0 %v5634_v34  ;;  %1326 = vmatmul.f32.vlgmr.msra.gmra.mxu1 %v1225_v37  ;;  %8433 = vst [vmem:[#allocation43_spill] sm:$0xff] %v5645_v44  ;;  %v5660_v34 = vld [vmem:[#allocation10 + $0x60] sm:$0xff] }
 0x1a2   :  { %1338 = vmatpush.msra.mxu2 %v5638_v16  ;;  %1366 = vmatmul.f32.vlgmr.msra.gmra.mxu3 %v1225_v37  ;;  %8434 = vst [vmem:[#allocation44_spill] sm:$0xff] %v5648_v6  ;;  %v5663_v16 = vld [vmem:[#allocation10 + $0x70] sm:$0xff] }
 0x1a3   :  { %1299 = vmatpush.msra.mxu0 %v5642_v25  ;;  %8435 = vst [vmem:[#allocation45_spill] sm:$0xff] %v5651_v31  ;;  %v5666_v25 = vld [vmem:[#allocation10 + $0x40] sm:$0xff] }
 0x1a4   :  { %1339 = vmatpush.msra.mxu2 %v5645_v44  ;;  %8436 = vst [vmem:[#allocation49_spill] sm:$0xff] %v5654_v22  ;;  %v5669_v44 = vld [vmem:[#allocation10 + $0x50] sm:$0xff] }
 0x1a5   :  { %1300 = vmatpush.msra.mxu0 %v5648_v6  ;;  %8437 = vst [vmem:[#allocation50_spill] sm:$0xff] %v5657_v14  ;;  %v5672_v6 = vld [vmem:[#allocation10 + $0x20] sm:$0xff] }
 0x1a6   :  { %1340 = vmatpush.msra.mxu2 %v5651_v31  ;;  %8438 = vst [vmem:[#allocation51_spill] sm:$0xff] %v5660_v34  ;;  %v5675_v31 = vld [vmem:[#allocation10 + $0x30] sm:$0xff] }
 0x1a7   :  { %1301 = vmatpush.msra.mxu0 %v5654_v22  ;;  %8439 = vst [vmem:[#allocation52_spill] sm:$0xff] %v5663_v16  ;;  %v5678_v22 = vld [vmem:[#allocation10] sm:$0xff] }
 0x1a8   :  { %1341 = vmatpush.msra.mxu2 %v5657_v14  ;;  %8440 = vst [vmem:[#allocation53_spill] sm:$0xff] %v5666_v25  ;;  %v5681_v14 = vld [vmem:[#allocation10 + $0x10] sm:$0xff] }
 0x1a9   :  { %1302 = vmatpush.msra.mxu0 %v5660_v34  ;;  %8441 = vst [vmem:[#allocation54_spill] sm:$0xff] %v5669_v44  ;;  %v5690_v34 = vld [vmem:[#allocation12 + $0x3c0] sm:$0xff] }
 0x1aa   :  { %1342 = vmatpush.msra.mxu2 %v5663_v16  ;;  %8442 = vst [vmem:[#allocation55_spill] sm:$0xff] %v5672_v6  ;;  %v5686_v16 = vld [vmem:[#allocation12 + $0x3e0] sm:$0xff] }
 0x1ab   :  { %1303 = vmatpush.msra.mxu0 %v5666_v25  ;;  %8443 = vst [vmem:[#allocation56_spill] sm:$0xff] %v5675_v31  ;;  %v5688_v25 = vld [vmem:[#allocation12 + $0x3e8] sm:$0xff]  ;;  %1566 = vmatpush.msrb.mxu1 %v5686_v16 }
 0x1ac   :  { %1343 = vmatpush.msra.mxu2 %v5669_v44  ;;  %8444 = vst [vmem:[#allocation57_spill] sm:$0xff] %v5678_v22  ;;  %1606 = vmatpush.msrb.mxu3 %v5688_v25  ;;  %v5708_v44 = vld [vmem:[#allocation12 + $0x360] sm:$0xff] }
 0x1ad   :  { %1304 = vmatpush.msra.mxu0 %v5672_v6  ;;  %8445 = vst [vmem:[#allocation58_spill] sm:$0xff] %v5681_v14  ;;  %v5694_v6 = vld [vmem:[#allocation12 + $0x3c8] sm:$0xff]  ;;  %1567 = vmatpush.msrb.mxu1 %v5690_v34 }
 0x1ae   :  { %1344 = vmatpush.msra.mxu2 %v5675_v31  ;;  %8446 = vst [vmem:[#allocation59_spill] sm:$0xff] %v5688_v25  ;;  %1607 = vmatpush.msrb.mxu3 %v5694_v6  ;;  %v5706_v31 = vld [vmem:[#allocation12 + $0x388] sm:$0xff] }
 0x1af   :  { %1305 = vmatpush.msra.mxu0 %v5678_v22  ;;  %8447 = vst [vmem:[#allocation60_spill] sm:$0xff] %v5690_v34  ;;  %v5698_v22 = vld [vmem:[#allocation12 + $0x3a0] sm:$0xff]  ;;  %v5712_v34 = vld [vmem:[#allocation12 + $0x368] sm:$0xff] }
 0x1b0   :  { %1345 = vmatpush.msra.mxu2 %v5681_v14  ;;  %1306 = vmatmul.f32.vlgmr.msra.gmra.mxu0 %v1225_v37  ;;  %8448 = vst [vmem:[#allocation61_spill] sm:$0xff] %v5694_v6  ;;  %v5700_v14 = vld [vmem:[#allocation12 + $0x3a8] sm:$0xff]  ;;  %v5714_v6 = vld [vmem:[#allocation12 + $0x340] sm:$0xff] }
 0x1b1   :  { %1346 = vmatmul.f32.vlgmr.msra.gmra.mxu2 %v1225_v37  ;;  %8449 = vst [vmem:[#allocation62_spill] sm:$0xff] %v5698_v22  ;;  %1568 = vmatpush.msrb.mxu1 %v5698_v22  ;;  %v5704_v37 = vld [vmem:[#allocation12 + $0x380] sm:$0xff]  ;;  %v5716_v25 = vld [vmem:[#allocation12 + $0x348] sm:$0xff] }
 0x1b2   :  { %8450 = vst [vmem:[#allocation63_spill] sm:$0xff] %v5700_v14  ;;  %1608 = vmatpush.msrb.mxu3 %v5700_v14  ;;  %v5722_v14 = vld [vmem:[#allocation12 + $0x320] sm:$0xff]  ;;  %v5724_v22 = vld [vmem:[#allocation12 + $0x328] sm:$0xff] }
 0x1b3   :  { %8451 = vst [vmem:[#allocation64_spill] sm:$0xff] %v5704_v37  ;;  %1569 = vmatpush.msrb.mxu1 %v5704_v37  ;;  %v5730_v37 = vld [vmem:[#allocation12 + $0x308] sm:$0xff] }
 0x1b4   :  { %8452 = vst [vmem:[#allocation65_spill] sm:$0xff] %v5706_v31  ;;  %1609 = vmatpush.msrb.mxu3 %v5706_v31  ;;  %v5728_v31 = vld [vmem:[#allocation12 + $0x300] sm:$0xff] }
 0x1b5   :  { %8453 = vst [vmem:[#allocation66_spill] sm:$0xff] %v5712_v34  ;;  %1570 = vmatpush.msrb.mxu1 %v5708_v44 }
 0x1b6   :  { %8454 = vst [vmem:[#allocation67_spill] sm:$0xff] %v5714_v6  ;;  %1610 = vmatpush.msrb.mxu3 %v5712_v34  ;;  %v5734_v34 = vld [vmem:[#allocation12 + $0x1e0] sm:$0xff] }
 0x1b7   :  { %8455 = vst [vmem:[#allocation68_spill] sm:$0xff] %v5716_v25  ;;  %1571 = vmatpush.msrb.mxu1 %v5714_v6  ;;  %v5736_v6 = vld [vmem:[#allocation12 + $0x1e8] sm:$0xff]  ;;  %1546 = vmatpush.msrb.mxu0 %v5734_v34 }
 0x1b8   :  { %1611 = vmatpush.msrb.mxu3 %v5716_v25  ;;  %8456 = vst [vmem:[#allocation69_spill] sm:$0xff] %v5722_v14  ;;  %1586 = vmatpush.msrb.mxu2 %v5736_v6  ;;  %v5740_v25 = vld [vmem:[#allocation12 + $0x2e0] sm:$0xff] }
 0x1b9   :  { %8457 = vst [vmem:[#allocation70_spill] sm:$0xff] %v5724_v22  ;;  %1572 = vmatpush.msrb.mxu1 %v5722_v14  ;;  %v5742_v14 = vld [vmem:[#allocation12 + $0x2e8] sm:$0xff] }
 0x1ba   :  { %1612 = vmatpush.msrb.mxu3 %v5724_v22  ;;  %8458 = vst [vmem:[#allocation71_spill] sm:$0xff] %v5728_v31  ;;  %v5746_v22 = vld [vmem:[#allocation12 + $0x1c0] sm:$0xff] }
 0x1bb   :  { %8459 = vst [vmem:[#allocation72_spill] sm:$0xff] %v5730_v37  ;;  %1573 = vmatpush.msrb.mxu1 %v5728_v31  ;;  %v5748_v31 = vld [vmem:[#allocation12 + $0x1c8] sm:$0xff]  ;;  %1547 = vmatpush.msrb.mxu0 %v5746_v22 }
 0x1bc   :  { %1613 = vmatpush.msrb.mxu3 %v5730_v37  ;;  %8460 = vst [vmem:[#allocation73_spill] sm:$0xff] %v5734_v34  ;;  %1587 = vmatpush.msrb.mxu2 %v5748_v31  ;;  %v5752_v37 = vld [vmem:[#allocation12 + $0x2c0] sm:$0xff]  ;;  %v5754_v34 = vld [vmem:[#allocation12 + $0x2c8] sm:$0xff] }
 0x1bd   :  { %8461 = vst [vmem:[#allocation74_spill] sm:$0xff] %v5736_v6  ;;  %1574 = vmatpush.msrb.mxu1 %v5740_v25  ;;  %v5758_v6 = vld [vmem:[#allocation12 + $0x1a0] sm:$0xff] }
 0x1be   :  { %8462 = vst [vmem:[#allocation77_spill] sm:$0xff] %v5740_v25  ;;  %1614 = vmatpush.msrb.mxu3 %v5742_v14  ;;  %v5760_v25 = vld [vmem:[#allocation12 + $0x1a8] sm:$0xff]  ;;  %1548 = vmatpush.msrb.mxu0 %v5758_v6 }
 0x1bf   :  { %8463 = vst [vmem:[#allocation78_spill] sm:$0xff] %v5742_v14  ;;  %1575 = vmatpush.msrb.mxu1 %v5752_v37  ;;  %1588 = vmatpush.msrb.mxu2 %v5760_v25  ;;  %v5764_v14 = vld [vmem:[#allocation12 + $0x2a0] sm:$0xff] }
 0x1c0   :  { %8464 = vst [vmem:[#allocation81_spill] sm:$0xff] %v5746_v22  ;;  %1615 = vmatpush.msrb.mxu3 %v5754_v34  ;;  %v5766_v22 = vld [vmem:[#allocation12 + $0x2a8] sm:$0xff] }
 0x1c1   :  { %8465 = vst [vmem:[#allocation84_spill] sm:$0xff] %v5748_v31  ;;  %1576 = vmatpush.msrb.mxu1 %v5764_v14  ;;  %v5770_v31 = vld [vmem:[#allocation12 + $0x180] sm:$0xff] }
 0x1c2   :  { %8466 = vst [vmem:[#allocation85_spill] sm:$0xff] %v5752_v37  ;;  %1616 = vmatpush.msrb.mxu3 %v5766_v22  ;;  %v5772_v37 = vld [vmem:[#allocation12 + $0x188] sm:$0xff]  ;;  %1549 = vmatpush.msrb.mxu0 %v5770_v31 }
 0x1c3   :  { %8467 = vst [vmem:[#allocation88_spill] sm:$0xff] %v5754_v34  ;;  %1589 = vmatpush.msrb.mxu2 %v5772_v37  ;;  %1577 = vmatpush.msrb.mxu1 %v5385_v39  ;;  %v5780_v34 = vld [vmem:[#allocation12 + $0x168] sm:$0xff]  ;;  %v5794_v39 = vld [vmem:[#allocation12 + $0x120] sm:$0xff] }
 0x1c4   :  { %8468 = vst [vmem:[#allocation89_spill] sm:$0xff] %v5760_v25  ;;  %1617 = vmatpush.msrb.mxu3 %v5387_v49  ;;  %v5778_v25 = vld [vmem:[#allocation12 + $0x160] sm:$0xff]  ;;  %v5796_v49 = vld [vmem:[#allocation12 + $0x128] sm:$0xff] }
 0x1c5   :  { %8469 = vst [vmem:[#allocation90_spill] sm:$0xff] %v5766_v22  ;;  %1550 = vmatpush.msrb.mxu0 %v5778_v25  ;;  %1590 = vmatpush.msrb.mxu2 %v5780_v34  ;;  %v5786_v22 = vld [vmem:[#allocation12 + $0x140] sm:$0xff] }
 0x1c6   :  { %8470 = vst [vmem:[#allocation91_spill] sm:$0xff] %v5770_v31  ;;  %1578 = vmatpush.msrb.mxu1 %v5391_v4  ;;  %1618 = vmatpush.msrb.mxu3 %v5393_v11  ;;  %v5788_v31 = vld [vmem:[#allocation12 + $0x148] sm:$0xff]  ;;  %v5802_v4 = vld [vmem:[#allocation12 + $0x100] sm:$0xff] }
 0x1c7   :  { %1551 = vmatpush.msrb.mxu0 %v5786_v22  ;;  %1591 = vmatpush.msrb.mxu2 %v5788_v31  ;;  %v5804_v11 = vld [vmem:[#allocation12 + $0x108] sm:$0xff] }
 0x1c8   :  { %1579 = vmatpush.msrb.mxu1 %v5397_v9  ;;  %1619 = vmatpush.msrb.mxu3 %v5399_v15  ;;  %v5810_v9 = vld [vmem:[#allocation12 + $0xe0] sm:$0xff]  ;;  %v5812_v15 = vld [vmem:[#allocation12 + $0xe8] sm:$0xff] }
 0x1c9   :  { %1552 = vmatpush.msrb.mxu0 %v5794_v39  ;;  %1592 = vmatpush.msrb.mxu2 %v5796_v49 }
 0x1ca   :  { %1580 = vmatpush.msrb.mxu1 %v5403_v13  ;;  %1620 = vmatpush.msrb.mxu3 %v5405_v19  ;;  %v5818_v13 = vld [vmem:[#allocation12 + $0xc0] sm:$0xff]  ;;  %v5820_v19 = vld [vmem:[#allocation12 + $0xc8] sm:$0xff] }
 0x1cb   :  { %1553 = vmatpush.msrb.mxu0 %v5802_v4  ;;  %1593 = vmatpush.msrb.mxu2 %v5804_v11 }
 0x1cc   :  { %1581 = vmatpush.msrb.mxu1 %v5409_v17  ;;  %1621 = vmatpush.msrb.mxu3 %v5411_v23  ;;  %v5826_v17 = vld [vmem:[#allocation12 + $0xa0] sm:$0xff]  ;;  %v5828_v23 = vld [vmem:[#allocation12 + $0xa8] sm:$0xff] }
 0x1cd   :  { %1554 = vmatpush.msrb.mxu0 %v5810_v9  ;;  %1594 = vmatpush.msrb.mxu2 %v5812_v15 }
 0x1ce   :  { %1646 = vmatpush.msra.mxu1 %v5415_v21  ;;  %1686 = vmatpush.msra.mxu3 %v5417_v28  ;;  %v5834_v21 = vld [vmem:[#allocation12 + $0x80] sm:$0xff]  ;;  %v5836_v28 = vld [vmem:[#allocation12 + $0x88] sm:$0xff] }
 0x1cf   :  { %1555 = vmatpush.msrb.mxu0 %v5818_v13  ;;  %1595 = vmatpush.msrb.mxu2 %v5820_v19 }
 0x1d0   :  { %1647 = vmatpush.msra.mxu1 %v5421_v26  ;;  %1687 = vmatpush.msra.mxu3 %v5423_v32  ;;  %v5842_v26 = vld [vmem:[#allocation12 + $0x60] sm:$0xff]  ;;  %v5844_v32 = vld [vmem:[#allocation12 + $0x68] sm:$0xff] }
 0x1d1   :  { %1556 = vmatpush.msrb.mxu0 %v5826_v17  ;;  %1596 = vmatpush.msrb.mxu2 %v5828_v23  ;;  %8471 = vst [vmem:[#allocation92_spill] sm:$0xff] %v5844_v32 }
 0x1d2   :  { %1648 = vmatpush.msra.mxu1 %v5427_v30  ;;  %1688 = vmatpush.msra.mxu3 %v5429_v41  ;;  %v5850_v30 = vld [vmem:[#allocation12 + $0x40] sm:$0xff]  ;;  %v5852_v41 = vld [vmem:[#allocation12 + $0x48] sm:$0xff] }
 0x1d3   :  { %1557 = vmatpush.msrb.mxu0 %v5834_v21  ;;  %1597 = vmatpush.msrb.mxu2 %v5836_v28  ;;  %8472 = vst [vmem:[#allocation75_spill] sm:$0xff] %v5850_v30 }
 0x1d4   :  { %1649 = vmatpush.msra.mxu1 %v5433_v38  ;;  %1689 = vmatpush.msra.mxu3 %v5435_v61  ;;  %8473 = vst [vmem:[#allocation76_spill] sm:$0xff] %v5852_v41  ;;  %v5858_v61 = vld [vmem:[#allocation12 + $0x20] sm:$0xff] }
 0x1d5   :  { %1558 = vmatpush.msrb.mxu0 %v5842_v26  ;;  %1598 = vmatpush.msrb.mxu2 %v5844_v32  ;;  %8474 = vst [vmem:[#allocation79_spill] sm:$0xff] %v5858_v61  ;;  %v5860_v32 = vld [vmem:[#allocation12 + $0x28] sm:$0xff] }
 0x1d6   :  { %1650 = vmatpush.msra.mxu1 %v5442_v3  ;;  %1690 = vmatpush.msra.mxu3 %v5444_v24  ;;  %8475 = vst [vmem:[#allocation80_spill] sm:$0xff] %v5860_v32 }
 0x1d7   :  { %1559 = vmatpush.msrb.mxu0 %v5850_v30  ;;  %1599 = vmatpush.msrb.mxu2 %v5852_v41  ;;  %v5867_v41 = vld [vmem:[#allocation12] sm:$0xff]  ;;  %v5873_v30 = vld [vmem:[#allocation12 + $0x1f0] sm:$0xff] }
 0x1d8   :  { %1651 = vmatpush.msra.mxu1 %v5450_v27  ;;  %1691 = vmatpush.msra.mxu3 %v5452_v7  ;;  %8476 = vst [vmem:[#allocation82_spill] sm:$0xff] %v5867_v41  ;;  %v5869_v27 = vld [vmem:[#allocation12 + $0x8] sm:$0xff] }
 0x1d9   :  { %1560 = vmatpush.msrb.mxu0 %v5858_v61  ;;  %1600 = vmatpush.msrb.mxu2 %v5860_v32  ;;  %8477 = vst [vmem:[#allocation83_spill] sm:$0xff] %v5869_v27  ;;  %v1399_v61 = vld [vmem:[#allocation3] sm:$0x3] }
 0x1da   :  { %1652 = vmatpush.msra.mxu1 %v5456_v29  ;;  %1692 = vmatpush.msra.mxu3 %v5458_v40  ;;  %8478 = vst [vmem:[#allocation86_spill] sm:$0xff] %v5873_v30  ;;  %v5881_v40 = vld [vmem:[#allocation12 + $0x1d0] sm:$0xff] }
 0x1db   :  { %1561 = vmatpush.msrb.mxu0 %v5867_v41  ;;  %1601 = vmatpush.msrb.mxu2 %v5869_v27  ;;  %8480 = vst [vmem:[#allocation93_spill] sm:$0xff] %v5881_v40 }
 0x1dc   :  { %1653 = vmatpush.msra.mxu1 %v5463_v42  ;;  %1693 = vmatpush.msra.mxu3 %v5465_v48  ;;  %v5890_v42 = vld [vmem:[#allocation12 + $0x1b0] sm:$0xff]  ;;  %v5892_v48 = vld [vmem:[#allocation12 + $0x1b8] sm:$0xff] }
 0x1dd   :  { %1626 = vmatpush.msra.mxu0 %v5873_v30  ;;  %8482 = vst [vmem:[#allocation95_spill] sm:$0xff] %v5890_v42 }
 0x1de   :  { %1654 = vmatpush.msra.mxu1 %v5471_v50  ;;  %1694 = vmatpush.msra.mxu3 %v5473_v56  ;;  %8483 = vst [vmem:[#allocation96_spill] sm:$0xff] %v5892_v48  ;;  %v5898_v56 = vld [vmem:[#allocation12 + $0x190] sm:$0xff] }
 0x1df   :  { %1627 = vmatpush.msra.mxu0 %v5881_v40  ;;  %8484 = vst [vmem:[#allocation97_spill] sm:$0xff] %v5898_v56 }
 0x1e0   :  { %1655 = vmatpush.msra.mxu1 %v5479_v35  ;;  %1695 = vmatpush.msra.mxu3 %v5481_v36  ;;  %v5909_v36 = vld [vmem:[#allocation12 + $0x178] sm:$0xff] }
 0x1e1   :  { %1628 = vmatpush.msra.mxu0 %v5890_v42  ;;  %8488 = vst [vmem:[#allocation99_spill] sm:$0xff] %v5909_v36  ;;  %v1213_v42 = vld [vmem:[#allocation5] sm:$0x3] }
 0x1e2   :  { %1656 = vmatpush.msra.mxu1 %v5486_v62  ;;  %v5915_v62 = vld [vmem:[#allocation12 + $0x278] sm:$0xff] }
 0x1e3   :  { %1629 = vmatpush.msra.mxu0 %v5898_v56 }
 0x1fb   :  { %v1077_v3 = vpop.f32.mrf.mxu1 }
 0x203   :  { %v1157_v35 = vpop.f32.mrf.mxu1 }
 0x20c   :  { %v1057_v38 = vpop.f32.mrf.mxu0 }
 0x20d   :  { %v1058_v24 = vadd.f32 %v1057_v38, %v5448_v57  ;;  %v5875_v38 = vld [vmem:[#allocation12 + $0x1f8] sm:$0xff]  ;;  %v1117_v57 = vpop.f32.mrf.mxu3 }
 0x20e   :  { %8479 = vst [vmem:[#allocation87_spill] sm:$0xff] %v5875_v38  ;;  %1666 = vmatpush.msra.mxu2 %v5875_v38  ;;  %v5976_v38 = vld [vmem:[#allocation12 + $0x98] sm:$0xff] }
 0x20f   :  { %v1078_v7 = vadd.f32 %v1077_v3, %v1058_v24  ;;  %v5883_v3 = vld [vmem:[#allocation12 + $0x1d8] sm:$0xff]  ;;  %8513 = vst [vmem:[#allocation119_spill] sm:$0xff] %v5976_v38 }
 0x210   :  { %8481 = vst [vmem:[#allocation94_spill] sm:$0xff] %v5883_v3  ;;  %1667 = vmatpush.msra.mxu2 %v5883_v3  ;;  %v8486_v3 = vld [vmem:[#allocation17_spill] sm:$0xff] }
 0x211   :  { %v1200_v29 = vmul.f32 0.5, %v1078_v7  ;;  %1696 = vmatpush.msra.mxu3 %v8486_v3  ;;  %v5919_v3 = vld [vmem:[#allocation12 + $0x150] sm:$0xff] }
 0x212   :  { %v1097_v24 = vpop.f32.mrf.mxu2  ;;  %1668 = vmatpush.msra.mxu2 %v5892_v48  ;;  %v8490_v48 = vld [vmem:[#allocation20_spill] sm:$0xff]  ;;  %8493 = vst [vmem:[#allocation100_spill] sm:$0xff] %v5919_v3 }
 0x213   :  { %v1098_v27 = vadd.f32 %v1097_v24, %v5469_v52  ;;  %4426 = vtanh.f32 %v1200_v29  ;;  %v5900_v24 = vld [vmem:[#allocation12 + $0x198] sm:$0xff]  ;;  %v8489_v29 = vld [vmem:[#allocation18_spill] sm:$0xff]  ;;  %1697 = vmatpush.msra.mxu3 %v8490_v48  ;;  %8492 = vst [vmem:[#allocation20_spill] sm:$0xff] %v5915_v62 }
 0x214   :  { %8485 = vst [vmem:[#allocation98_spill] sm:$0xff] %v5900_v24  ;;  %1669 = vmatpush.msra.mxu2 %v5900_v24  ;;  %1657 = vmatpush.msra.mxu1 %v8489_v29  ;;  %v5927_v48 = vld [vmem:[#allocation12 + $0x258] sm:$0xff] }
 0x215   :  { %v1118_v7 = vadd.f32 %v1117_v57, %v1098_v27  ;;  %v1137_v50 = vpop.f32.mrf.mxu0  ;;  %v5907_v57 = vld [vmem:[#allocation12 + $0x170] sm:$0xff]  ;;  %1698 = vmatpush.msra.mxu3 %v5915_v62  ;;  %8496 = vst [vmem:[#allocation103_spill] sm:$0xff] %v5927_v48 }
 0x216   :  { %v1138_v52 = vadd.f32 %v1137_v50, %v5477_v45  ;;  %8487 = vst [vmem:[#allocation17_spill] sm:$0xff] %v5907_v57  ;;  %v5913_v50 = vld [vmem:[#allocation12 + $0x270] sm:$0xff]  ;;  %1630 = vmatpush.msra.mxu0 %v5907_v57  ;;  %1670 = vmatpush.msra.mxu2 %v5909_v36  ;;  %v5933_v45 = vld [vmem:[#allocation12 + $0x138] sm:$0xff] }
 0x217   :  { %v1204_v40 = vmul.f32 0.5, %v1118_v7  ;;  %8491 = vst [vmem:[#allocation18_spill] sm:$0xff] %v5913_v50  ;;  %v5921_v7 = vld [vmem:[#allocation12 + $0x158] sm:$0xff]  ;;  %1658 = vmatpush.msra.mxu1 %v5913_v50  ;;  %1699 = vmatpush.msra.mxu3 %v5927_v48  ;;  %v5938_v62 = vld [vmem:[#allocation12 + $0x230] sm:$0xff] }
 0x218   :  { %v1158_v27 = vadd.f32 %v1157_v35, %v1138_v52  ;;  %8494 = vst [vmem:[#allocation101_spill] sm:$0xff] %v5921_v7  ;;  %v5925_v52 = vld [vmem:[#allocation12 + $0x250] sm:$0xff]  ;;  %1631 = vmatpush.msra.mxu0 %v5919_v3  ;;  %1671 = vmatpush.msra.mxu2 %v5921_v7  ;;  %v5940_v50 = vld [vmem:[#allocation12 + $0x238] sm:$0xff] }
 0x219   :  { %4428 = vtanh.f32 %v1204_v40  ;;  %8495 = vst [vmem:[#allocation102_spill] sm:$0xff] %v5925_v52  ;;  %v4427_v35 = vpop.eup %4426  ;;  %v5931_v40 = vld [vmem:[#allocation12 + $0x130] sm:$0xff]  ;;  %1659 = vmatpush.msra.mxu1 %v5925_v52  ;;  %v5946_v3 = vld [vmem:[#allocation12 + $0x118] sm:$0xff]  ;;  %1700 = vmatpush.msra.mxu3 %v5940_v50 }
 0x21a   :  { %4430 = vtanh.f32 %v1158_v27  ;;  %8497 = vst [vmem:[#allocation104_spill] sm:$0xff] %v5931_v40  ;;  %v8499_v36 = vld [vmem:[#allocation19_spill] sm:$0xff]  ;;  %v1197_v27 = vpop.f32.mrf.mxu3  ;;  %1632 = vmatpush.msra.mxu0 %v5931_v40  ;;  %1672 = vmatpush.msra.mxu2 %v5933_v45  ;;  %v1202_v24 = vmul.f32 0.5, %v4427_v35 }
 0x21b   :  { %v1177_v29 = vpop.f32.mrf.mxu2  ;;  %8498 = vst [vmem:[#allocation105_spill] sm:$0xff] %v5933_v45  ;;  %v5944_v7 = vld [vmem:[#allocation12 + $0x110] sm:$0xff]  ;;  %1660 = vmatpush.msra.mxu1 %v5938_v62  ;;  %v5958_v45 = vld [vmem:[#allocation12 + $0xf8] sm:$0xff] }
 0x21c   :  { %v1178_v57 = vadd.f32 %v1177_v29, %v8499_v36  ;;  %8500 = vst [vmem:[#allocation106_spill] sm:$0xff] %v5938_v62  ;;  %v5950_v29 = vld [vmem:[#allocation12 + $0x210] sm:$0xff]  ;;  %v5952_v36 = vld [vmem:[#allocation12 + $0x218] sm:$0xff]  ;;  %1633 = vmatpush.msra.mxu0 %v5944_v7  ;;  %1673 = vmatpush.msra.mxu2 %v5946_v3 }
 0x21d   :  { %8501 = vst [vmem:[#allocation107_spill] sm:$0xff] %v5940_v50  ;;  %v5956_v52 = vld [vmem:[#allocation12 + $0xf0] sm:$0xff]  ;;  %1661 = vmatpush.msra.mxu1 %v5950_v29  ;;  %1701 = vmatpush.msra.mxu3 %v5952_v36  ;;  %v5966_v62 = vld [vmem:[#allocation12 + $0xd8] sm:$0xff] }
 0x21e   :  { %8502 = vst [vmem:[#allocation108_spill] sm:$0xff] %v5944_v7  ;;  %v1198_v56 = vadd.f32 %v1197_v27, %v1178_v57  ;;  %v1327_v57 = vpop.f32.mrf.mxu1  ;;  %1634 = vmatpush.msra.mxu0 %v5956_v52  ;;  %1674 = vmatpush.msra.mxu2 %v5958_v45  ;;  %v5964_v50 = vld [vmem:[#allocation12 + $0xd0] sm:$0xff] }
 0x21f   :  { %8503 = vst [vmem:[#allocation109_spill] sm:$0xff] %v5946_v3  ;;  %v4429_v48 = vpop.eup %4428  ;;  %v1203_v3 = vadd.f32 0.5, %v1202_v24 }
 0x220   :  { %8504 = vst [vmem:[#allocation110_spill] sm:$0xff] %v5950_v29  ;;  %v1206_v40 = vmul.f32 0.5, %v4429_v48  ;;  %v1209_v35 = vmul.f32 0.5, %v1198_v56  ;;  %v4431_v27 = vpop.eup %4430  ;;  %v1375_v48 = vrot.slane %v1327_v57, 4  ;;  %1635 = vmatpush.msra.mxu0 %v5964_v50  ;;  %1675 = vmatpush.msra.mxu2 %v5966_v62  ;;  %v5970_v56 = vld [vmem:[#allocation12 + $0xb0] sm:$0xff]  ;;  %v5982_v57 = vld [vmem:[#allocation12 + $0x78] sm:$0xff] }
 0x221   :  { %8505 = vst [vmem:[#allocation111_spill] sm:$0xff] %v5952_v36  ;;  %v5972_v36 = vld [vmem:[#allocation12 + $0xb8] sm:$0xff] }
 0x222   :  { %8506 = vst [vmem:[#allocation112_spill] sm:$0xff] %v5956_v52  ;;  %v1207_v7 = vadd.f32 0.5, %v1206_v40  ;;  %4432 = vtanh.f32 %v1209_v35  ;;  %v1215_v52 = vmul.f32 %v4431_v27, %v1203_v3  ;;  %1636 = vmatpush.msra.mxu0 %v5970_v56  ;;  %1676 = vmatpush.msra.mxu2 %v5972_v36  ;;  %v1222_v40 = vld [vmem:[#allocation6] sm:$0x30]  ;;  %v5980_v35 = vld [vmem:[#allocation12 + $0x70] sm:$0xff] }
 0x223   :  { %8507 = vst [vmem:[#allocation113_spill] sm:$0xff] %v5958_v45  ;;  %v5974_v45 = vld [vmem:[#allocation12 + $0x90] sm:$0xff] }
 0x224   :  { %8508 = vst [vmem:[#allocation114_spill] sm:$0xff] %v5964_v50  ;;  %v1214_v29 = vmul.f32 %v1213_v42, %v1207_v7  ;;  %1637 = vmatpush.msra.mxu0 %v5974_v45  ;;  %1677 = vmatpush.msra.mxu2 %v5976_v38  ;;  %v5986_v3 = vld [vmem:[#allocation12 + $0x50] sm:$0xff]  ;;  %v5988_v7 = vld [vmem:[#allocation12 + $0x58] sm:$0xff] }
 0x225   :  { %8509 = vst [vmem:[#allocation115_spill] sm:$0xff] %v5966_v62  ;;  %v1383_v62 = vadd.f32 %v1375_v48, %v1222_v40  ;;  %v5998_v40 = vld [vmem:[#allocation12 + $0x10] sm:$0xff] }
 0x226   :  { %8510 = vst [vmem:[#allocation116_spill] sm:$0xff] %v5970_v56  ;;  %v1216_v24 = vadd.f32 %v1215_v52, %v1214_v29  ;;  %1638 = vmatpush.msra.mxu0 %v5980_v35  ;;  %1678 = vmatpush.msra.mxu2 %v5982_v57  ;;  %v5992_v52 = vld [vmem:[#allocation12 + $0x30] sm:$0xff]  ;;  %v5994_v29 = vld [vmem:[#allocation12 + $0x38] sm:$0xff] }
 0x227   :  { %8511 = vst [vmem:[#allocation117_spill] sm:$0xff] %v5972_v36  ;;  %v1390_v48 = vmul.f32 0.5, %v1383_v62  ;;  %v1221_v62 = vld [vmem:[#allocation6 + $0x30] sm:$0x30] }
 0x228   :  { %8512 = vst [vmem:[#allocation118_spill] sm:$0xff] %v5974_v45  ;;  %v4433_v42 = vpop.eup %4432  ;;  %4434 = vtanh.f32 %v1216_v24  ;;  %1639 = vmatpush.msra.mxu0 %v5986_v3  ;;  %1679 = vmatpush.msra.mxu2 %v5988_v7  ;;  %v1367_v45 = vpop.f32.mrf.mxu3 }
 0x229   :  { %8514 = vst [vmem:[#allocation120_spill] sm:$0xff] %v5980_v35  ;;  %v1211_v27 = vmul.f32 0.5, %v4433_v42  ;;  %4436 = vtanh.f32 %v1390_v48 }
 0x22a   :  { %8515 = vst [vmem:[#allocation121_spill] sm:$0xff] %v5982_v57  ;;  %1640 = vmatpush.msra.mxu0 %v5992_v52  ;;  %1680 = vmatpush.msra.mxu2 %v5994_v29 }
 0x22b   :  { %1219 = vst [vmem:[#allocation5] sm:$0x3] %v1216_v24  ;;  %v6000_v24 = vld [vmem:[#allocation12 + $0x18] sm:$0xff]  ;;  %v1212_v38 = vadd.f32 0.5, %v1211_v27  ;;  %v1224_v27 = vld [vmem:[#allocation6 + $0x10] sm:$0x30] }
 0x22c   :  { %8516 = vst [vmem:[#allocation122_spill] sm:$0xff] %v5986_v3  ;;  %1641 = vmatpush.msra.mxu0 %v5998_v40  ;;  %1681 = vmatpush.msra.mxu2 %v6000_v24 }
 0x22d   :  { %8517 = vst [vmem:[#allocation123_spill] sm:$0xff] %v5988_v7  ;;  %v1307_v42 = vpop.f32.mrf.mxu0  ;;  %v1377_v7 = vrot.slane %v1367_v45, 4 }
 0x22e   :  { %8518 = vst [vmem:[#allocation124_spill] sm:$0xff] %v5992_v52  ;;  %v4435_v57 = vpop.eup %4434  ;;  %v1374_v35 = vrot.slane %v1307_v42, 4 }
 0x22f   :  { %8519 = vst [vmem:[#allocation125_spill] sm:$0xff] %v5994_v29  ;;  %v1218_v36 = vmul.f32 %v4435_v57, %v1212_v38  ;;  %v1385_v50 = vadd.f32 %v1377_v7, %v1224_v27  ;;  %v4437_v52 = vpop.eup %4436  ;;  %v1223_v29 = vld [vmem:[#allocation6 + $0x18] sm:$0x30]  ;;  %v6026_v7 = vld [vmem:[#allocation10 + $0x1c0] sm:$0xff]  ;;  %v8534_v27 = vld [vmem:[#allocation34_spill] sm:$0xff] }
 0x230   :  { %8520 = vst [vmem:[#allocation126_spill] sm:$0xff] %v5998_v40  ;;  %v1382_v3 = vadd.f32 %v1374_v35, %v1221_v62  ;;  %v1392_v42 = vmul.f32 0.5, %v4437_v52  ;;  %v6038_v52 = vld [vmem:[#allocation10 + $0x180] sm:$0xff]  ;;  %v8533_v62 = vld [vmem:[#allocation31_spill] sm:$0xff] }
 0x231   :  { %8521 = vst [vmem:[#allocation127_spill] sm:$0xff] %v6000_v24  ;;  %v1395_v38 = vmul.f32 0.5, %v1385_v50 }
 0x232   :  { %1220 = vst [vmem:[#allocation4] sm:$0x3] %v1218_v36  ;;  %v1386_v56 = vmul.f32 0.5, %v1382_v3  ;;  %v1393_v35 = vadd.f32 0.5, %v1392_v42  ;;  %v8535_v42 = vld [vmem:[#allocation33_spill] sm:$0xff] }
 0x234   :  { %4438 = vtanh.f32 %v1386_v56  ;;  %v1347_v30 = vpop.f32.mrf.mxu2  ;;  %v1401_v56 = vrot.slane %v1399_v61, 4 }
 0x235   :  { %v1376_v41 = vrot.slane %v1347_v30, 4 }
 0x237   :  { %v1384_v32 = vadd.f32 %v1376_v41, %v1223_v29  ;;  %v1403_v41 = vmul.f32 %v1401_v56, %v1393_v35  ;;  %v8529_v29 = vld [vmem:[#allocation28_spill] sm:$0xff]  ;;  %v8543_v56 = vld [vmem:[#allocation42_spill] sm:$0xff] }
 0x239   :  { %v1410_v57 = vld [vmem:[#allocation4] sm:$0x3]  ;;  %4440 = vtanh.f32 %v1384_v32 }
 0x23a   :  { %v1412_v48 = vrot.slane %v1410_v57, 4  ;;  %v4439_v40 = vpop.eup %4438  ;;  %4442 = vtanh.f32 %v1395_v38  ;;  %v8536_v38 = vld [vmem:[#allocation36_spill] sm:$0xff]  ;;  %v8538_v57 = vld [vmem:[#allocation37_spill] sm:$0xff] }
 0x23b   :  { %v1388_v24 = vmul.f32 0.5, %v4439_v40  ;;  %v6046_v40 = vld [vmem:[#allocation10 + $0x170] sm:$0xff] }
 0x23c   :  { %v1543_v45 = vrot.slane %v1412_v48, 4  ;;  %v8539_v48 = vld [vmem:[#allocation38_spill] sm:$0xff] }
 0x23d   :  { %v1389_v36 = vadd.f32 0.5, %v1388_v24  ;;  %v6056_v24 = vld [vmem:[#allocation10 + $0x120] sm:$0xff] }
 0x23e   :  { %1582 = vmatmul.f32.vlgmr.msrb.gmra.mxu1 %v1543_v45  ;;  %1622 = vmatmul.f32.vlgmr.msrb.gmra.mxu3 %v1543_v45 }
 0x23f   :  { %1816 = vmatpush.msrb.mxu1 %v5510_v8  ;;  %1856 = vmatpush.msrb.mxu3 %v5512_v18  ;;  %v4441_v30 = vpop.eup %4440  ;;  %v8522_v18 = vld [vmem:[#allocation22_spill] sm:$0xff] }
 0x240   :  { %v1404_v50 = vmul.f32 %v4441_v30, %v1389_v36  ;;  %v4443_v32 = vpop.eup %4442  ;;  %v8542_v36 = vld [vmem:[#allocation41_spill] sm:$0xff]  ;;  %v8545_v30 = vld [vmem:[#allocation59_spill] sm:$0xff] }
 0x241   :  { %1817 = vmatpush.msrb.mxu1 %v5514_v10  ;;  %1857 = vmatpush.msrb.mxu3 %v5516_v51  ;;  %v1397_v8 = vmul.f32 0.5, %v4443_v32  ;;  %v8523_v10 = vld [vmem:[#allocation21_spill] sm:$0xff] }
 0x242   :  { %v1405_v3 = vadd.f32 %v1404_v50, %v1403_v41  ;;  %v8546_v41 = vld [vmem:[#allocation44_spill] sm:$0xff]  ;;  %v8548_v32 = vld [vmem:[#allocation45_spill] sm:$0xff] }
 0x243   :  { %1818 = vmatpush.msrb.mxu1 %v5520_v20  ;;  %1858 = vmatpush.msrb.mxu3 %v5522_v47  ;;  %v1398_v51 = vadd.f32 0.5, %v1397_v8  ;;  %v8547_v50 = vld [vmem:[#allocation60_spill] sm:$0xff]  ;;  %v8550_v8 = vld [vmem:[#allocation49_spill] sm:$0xff] }
 0x244   :  { %4444 = vtanh.f32 %v1405_v3  ;;  %1408 = vst [vmem:[#allocation3 - $0x4] sm:$0x30] %v1405_v3  ;;  %v8549_v3 = vld [vmem:[#allocation61_spill] sm:$0xff] }
 0x245   :  { %1819 = vmatpush.msrb.mxu1 %v5526_v58  ;;  %1859 = vmatpush.msrb.mxu3 %v5528_v46  ;;  %v8524_v58 = vld [vmem:[#allocation24_spill] sm:$0xff]  ;;  %v8525_v46 = vld [vmem:[#allocation23_spill] sm:$0xff] }
 0x246   :  { %1662 = vmatmul.f32.vlgmr.msra.gmra.mxu1 %v1543_v45  ;;  %1702 = vmatmul.f32.vlgmr.msra.gmra.mxu3 %v1543_v45  ;;  %v8540_v45 = vld [vmem:[#allocation39_spill] sm:$0xff] }
 0x247   :  { %1820 = vmatpush.msrb.mxu1 %v5532_v12  ;;  %1860 = vmatpush.msrb.mxu3 %v5534_v33  ;;  %v6022_v12 = vld [vmem:[#allocation10 + $0x1e0] sm:$0xff] }
 0x248   :  { %v8526_v33 = vld [vmem:[#allocation25_spill] sm:$0xff] }
 0x249   :  { %1821 = vmatpush.msrb.mxu1 %v8522_v18  ;;  %1861 = vmatpush.msrb.mxu3 %v8523_v10  ;;  %v8551_v18 = vld [vmem:[#allocation62_spill] sm:$0xff] }
 0x24a   :  { %v4445_v20 = vpop.eup %4444  ;;  %v8552_v10 = vld [vmem:[#allocation50_spill] sm:$0xff] }
 0x24b   :  { %1822 = vmatpush.msrb.mxu1 %v5544_v5  ;;  %1862 = vmatpush.msrb.mxu3 %v5546_v60  ;;  %v1407_v47 = vmul.f32 %v4445_v20, %v1398_v51  ;;  %v8527_v5 = vld [vmem:[#allocation26_spill] sm:$0xff]  ;;  %v6032_v60 = vld [vmem:[#allocation10 + $0x1a0] sm:$0xff]  ;;  %v8553_v51 = vld [vmem:[#allocation63_spill] sm:$0xff] }
 0x24c   :  { %v8555_v20 = vld [vmem:[#allocation64_spill] sm:$0xff] }
 0x24d   :  { %1823 = vmatpush.msrb.mxu1 %v8524_v58  ;;  %1863 = vmatpush.msrb.mxu3 %v8525_v46  ;;  %1409 = vst [vmem:[#allocation2 - $0x4] sm:$0x30] %v1407_v47  ;;  %v1542_v61 = vrot.slane %v1407_v47, 4  ;;  %v8556_v47 = vld [vmem:[#allocation52_spill] sm:$0xff]  ;;  %v8557_v58 = vld [vmem:[#allocation65_spill] sm:$0xff] }
 0x24e   :  { %v8558_v46 = vld [vmem:[#allocation53_spill] sm:$0xff] }
 0x24f   :  { %1824 = vmatpush.msrb.mxu1 %v5560_v55  ;;  %1864 = vmatpush.msrb.mxu3 %v8526_v33  ;;  %v8528_v55 = vld [vmem:[#allocation27_spill] sm:$0xff]  ;;  %v8560_v33 = vld [vmem:[#allocation66_spill] sm:$0xff] }
 0x250   :  { %1562 = vmatmul.f32.vlgmr.msrb.gmra.mxu0 %v1542_v61  ;;  %1602 = vmatmul.f32.vlgmr.msrb.gmra.mxu2 %v1542_v61 }
 0x251   :  { %1796 = vmatpush.msrb.mxu0 %v6022_v12  ;;  %1836 = vmatpush.msrb.mxu2 %v8527_v5  ;;  %v8561_v5 = vld [vmem:[#allocation55_spill] sm:$0xff] }
 0x252   :  { %1825 = vmatpush.msrb.mxu1 %v5568_v43  ;;  %1865 = vmatpush.msrb.mxu3 %v5570_v53  ;;  %v8530_v43 = vld [vmem:[#allocation29_spill] sm:$0xff] }
 0x253   :  { %1797 = vmatpush.msrb.mxu0 %v6026_v7  ;;  %1837 = vmatpush.msrb.mxu2 %v5564_v2  ;;  %v6044_v53 = vld [vmem:[#allocation10 + $0x160] sm:$0xff]  ;;  %v8531_v2 = vld [vmem:[#allocation30_spill] sm:$0xff] }
 0x254   :  { %1826 = vmatpush.msrb.mxu1 %v5578_v63  ;;  %1866 = vmatpush.msrb.mxu3 %v8528_v55  ;;  %v6050_v63 = vld [vmem:[#allocation10 + $0x140] sm:$0xff]  ;;  %v1731_v35 = vld [vmem:[#allocation2] sm:$0x3] }
 0x255   :  { %1798 = vmatpush.msrb.mxu0 %v6032_v60  ;;  %1838 = vmatpush.msrb.mxu2 %v8529_v29  ;;  %v8562_v55 = vld [vmem:[#allocation67_spill] sm:$0xff]  ;;  %v8563_v29 = vld [vmem:[#allocation56_spill] sm:$0xff] }
 0x256   :  { %1827 = vmatpush.msrb.mxu1 %v5588_v54  ;;  %1867 = vmatpush.msrb.mxu3 %v8530_v43  ;;  %v8532_v54 = vld [vmem:[#allocation32_spill] sm:$0xff] }
 0x257   :  { %1799 = vmatpush.msrb.mxu0 %v6038_v52  ;;  %1839 = vmatpush.msrb.mxu2 %v8531_v2  ;;  %v8564_v43 = vld [vmem:[#allocation68_spill] sm:$0xff]  ;;  %v8565_v2 = vld [vmem:[#allocation57_spill] sm:$0xff] }
 0x258   :  { %1642 = vmatmul.f32.vlgmr.msra.gmra.mxu0 %v1542_v61  ;;  %1682 = vmatmul.f32.vlgmr.msra.gmra.mxu2 %v1542_v61  ;;  %v8559_v61 = vld [vmem:[#allocation54_spill] sm:$0xff] }
 0x259   :  { %1800 = vmatpush.msrb.mxu0 %v6044_v53  ;;  %1840 = vmatpush.msrb.mxu2 %v6046_v40 }
 0x25a   :  { %1828 = vmatpush.msrb.mxu1 %v5598_v59  ;;  %1868 = vmatpush.msrb.mxu3 %v8532_v54  ;;  %v8537_v59 = vld [vmem:[#allocation35_spill] sm:$0xff]  ;;  %v8566_v54 = vld [vmem:[#allocation69_spill] sm:$0xff] }
 0x25b   :  { %1801 = vmatpush.msrb.mxu0 %v6050_v63  ;;  %1841 = vmatpush.msrb.mxu2 %v8533_v62  ;;  %v8567_v62 = vld [vmem:[#allocation58_spill] sm:$0xff] }
 0x25c   :  { %1829 = vmatpush.msrb.mxu1 %v5606_v1  ;;  %1869 = vmatpush.msrb.mxu3 %v8534_v27  ;;  %v8541_v1 = vld [vmem:[#allocation40_spill] sm:$0xff]  ;;  %v8569_v27 = vld [vmem:[#allocation71_spill] sm:$0xff] }
 0x25d   :  { %1802 = vmatpush.msrb.mxu0 %v6056_v24  ;;  %1842 = vmatpush.msrb.mxu2 %v8535_v42  ;;  %v8570_v42 = vld [vmem:[#allocation73_spill] sm:$0xff] }
 0x25e   :  { %1830 = vmatpush.msrb.mxu1 %v8536_v38  ;;  %1870 = vmatpush.msrb.mxu3 %v5618_v0  ;;  %v8544_v0 = vld [vmem:[#allocation43_spill] sm:$0xff]  ;;  %v8571_v38 = vld [vmem:[#allocation72_spill] sm:$0xff] }
 0x25f   :  { %1803 = vmatpush.msrb.mxu0 %v8537_v59  ;;  %1843 = vmatpush.msrb.mxu2 %v8538_v57  ;;  %v8572_v59 = vld [vmem:[#allocation74_spill] sm:$0xff]  ;;  %v8573_v57 = vld [vmem:[#allocation77_spill] sm:$0xff] }
 0x260   :  { %1831 = vmatpush.msrb.mxu1 %v8539_v48  ;;  %1871 = vmatpush.msrb.mxu3 %v8540_v45  ;;  %v8574_v48 = vld [vmem:[#allocation81_spill] sm:$0xff]  ;;  %v8575_v45 = vld [vmem:[#allocation78_spill] sm:$0xff] }
 0x261   :  { %1804 = vmatpush.msrb.mxu0 %v8541_v1  ;;  %1832 = vmatmul.f32.vlgmr.msrb.gmra.mxu1 %v1731_v35  ;;  %v8576_v1 = vld [vmem:[#allocation84_spill] sm:$0xff] }
 0x262   :  { %1844 = vmatpush.msrb.mxu2 %v8542_v36  ;;  %1872 = vmatmul.f32.vlgmr.msrb.gmra.mxu3 %v1731_v35  ;;  %v8577_v36 = vld [vmem:[#allocation85_spill] sm:$0xff] }
 0x263   :  { %1805 = vmatpush.msrb.mxu0 %v8543_v56  ;;  %2072 = vmatpush.msra.mxu1 %v5686_v16  ;;  %v8554_v16 = vld [vmem:[#allocation51_spill] sm:$0xff]  ;;  %v8579_v56 = vld [vmem:[#allocation89_spill] sm:$0xff] }
 0x264   :  { %1845 = vmatpush.msrb.mxu2 %v8544_v0  ;;  %2112 = vmatpush.msra.mxu3 %v8545_v30  ;;  %v8580_v0 = vld [vmem:[#allocation91_spill] sm:$0xff]  ;;  %v8581_v30 = vld [vmem:[#allocation90_spill] sm:$0xff] }
 0x265   :  { %1806 = vmatpush.msrb.mxu0 %v8546_v41  ;;  %2073 = vmatpush.msra.mxu1 %v8547_v50  ;;  %v8602_v41 = vld [vmem:[#allocation105_spill] sm:$0xff]  ;;  %v8603_v50 = vld [vmem:[#allocation108_spill] sm:$0xff] }
 0x266   :  { %1846 = vmatpush.msrb.mxu2 %v8548_v32  ;;  %2113 = vmatpush.msra.mxu3 %v8549_v3  ;;  %v8604_v32 = vld [vmem:[#allocation109_spill] sm:$0xff]  ;;  %v8605_v3 = vld [vmem:[#allocation112_spill] sm:$0xff] }
 0x267   :  { %1807 = vmatpush.msrb.mxu0 %v8550_v8  ;;  %2074 = vmatpush.msra.mxu1 %v8551_v18  ;;  %v8606_v8 = vld [vmem:[#allocation113_spill] sm:$0xff]  ;;  %v8607_v18 = vld [vmem:[#allocation114_spill] sm:$0xff] }
 0x268   :  { %1847 = vmatpush.msrb.mxu2 %v8552_v10  ;;  %2114 = vmatpush.msra.mxu3 %v8553_v51  ;;  %v8608_v10 = vld [vmem:[#allocation115_spill] sm:$0xff]  ;;  %v8609_v51 = vld [vmem:[#allocation116_spill] sm:$0xff] }
 0x269   :  { %1808 = vmatpush.msrb.mxu0 %v8554_v16  ;;  %2075 = vmatpush.msra.mxu1 %v8555_v20  ;;  %v8610_v16 = vld [vmem:[#allocation117_spill] sm:$0xff]  ;;  %v8611_v20 = vld [vmem:[#allocation118_spill] sm:$0xff] }
 0x26a   :  { %1848 = vmatpush.msrb.mxu2 %v8556_v47  ;;  %2115 = vmatpush.msra.mxu3 %v8557_v58  ;;  %v8612_v47 = vld [vmem:[#allocation119_spill] sm:$0xff]  ;;  %v8613_v58 = vld [vmem:[#allocation120_spill] sm:$0xff] }
 0x26b   :  { %1809 = vmatpush.msrb.mxu0 %v8558_v46  ;;  %2076 = vmatpush.msra.mxu1 %v5708_v44  ;;  %v8568_v44 = vld [vmem:[#allocation70_spill] sm:$0xff]  ;;  %v8614_v46 = vld [vmem:[#allocation121_spill] sm:$0xff] }
 0x26c   :  { %1849 = vmatpush.msrb.mxu2 %v8559_v61  ;;  %2116 = vmatpush.msra.mxu3 %v8560_v33  ;;  %v8615_v61 = vld [vmem:[#allocation122_spill] sm:$0xff]  ;;  %v8616_v33 = vld [vmem:[#allocation123_spill] sm:$0xff] }
 0x26d   :  { %1810 = vmatpush.msrb.mxu0 %v8561_v5  ;;  %2077 = vmatpush.msra.mxu1 %v8562_v55  ;;  %v8617_v5 = vld [vmem:[#allocation124_spill] sm:$0xff]  ;;  %v8618_v55 = vld [vmem:[#allocation125_spill] sm:$0xff] }
 0x26e   :  { %1850 = vmatpush.msrb.mxu2 %v8563_v29  ;;  %2117 = vmatpush.msra.mxu3 %v8564_v43  ;;  %v8619_v29 = vld [vmem:[#allocation126_spill] sm:$0xff]  ;;  %v8620_v43 = vld [vmem:[#allocation127_spill] sm:$0xff] }
 0x26f   :  { %1811 = vmatpush.msrb.mxu0 %v8565_v2  ;;  %2078 = vmatpush.msra.mxu1 %v8566_v54  ;;  %v6172_v2 = vld [vmem:[#allocation12 + $0x280] sm:$0xff]  ;;  %v6174_v54 = vld [vmem:[#allocation12 + $0x288] sm:$0xff] }
 0x270   :  { %1851 = vmatpush.msrb.mxu2 %v8567_v62  ;;  %1812 = vmatmul.f32.vlgmr.msrb.gmra.mxu0 %v1731_v35  ;;  %v6178_v62 = vld [vmem:[#allocation12 + $0x260] sm:$0xff] }
 0x271   :  { %1852 = vmatmul.f32.vlgmr.msrb.gmra.mxu2 %v1731_v35  ;;  %2118 = vmatpush.msra.mxu3 %v8568_v44  ;;  %v8578_v35 = vld [vmem:[#allocation88_spill] sm:$0xff]  ;;  %v6180_v44 = vld [vmem:[#allocation12 + $0x268] sm:$0xff] }
 0x272   :  { %2079 = vmatpush.msra.mxu1 %v8569_v27  ;;  %2052 = vmatpush.msra.mxu0 %v8570_v42  ;;  %v6184_v27 = vld [vmem:[#allocation12 + $0x240] sm:$0xff]  ;;  %v6186_v42 = vld [vmem:[#allocation12 + $0x248] sm:$0xff] }
 0x273   :  { %2119 = vmatpush.msra.mxu3 %v8571_v38  ;;  %2092 = vmatpush.msra.mxu2 %v8572_v59  ;;  %v6190_v38 = vld [vmem:[#allocation12 + $0x220] sm:$0xff]  ;;  %v6192_v59 = vld [vmem:[#allocation12 + $0x228] sm:$0xff] }
 0x274   :  { %2080 = vmatpush.msra.mxu1 %v8573_v57  ;;  %2053 = vmatpush.msra.mxu0 %v8574_v48  ;;  %v6196_v57 = vld [vmem:[#allocation12 + $0x200] sm:$0xff]  ;;  %v6198_v48 = vld [vmem:[#allocation12 + $0x208] sm:$0xff] }
 0x275   :  { %2120 = vmatpush.msra.mxu3 %v8575_v45  ;;  %2093 = vmatpush.msra.mxu2 %v8576_v1  ;;  %v6202_v45 = vld [vmem:[#allocation12 + $0x3f0] sm:$0xff]  ;;  %v6204_v1 = vld [vmem:[#allocation12 + $0x3f8] sm:$0xff] }
 0x276   :  { %2081 = vmatpush.msra.mxu1 %v8577_v36  ;;  %2054 = vmatpush.msra.mxu0 %v5758_v6  ;;  %v8585_v6 = vld [vmem:[#allocation79_spill] sm:$0xff] }
 0x277   :  { %2121 = vmatpush.msra.mxu3 %v8578_v35  ;;  %2094 = vmatpush.msra.mxu2 %v8579_v56  ;;  %v6208_v36 = vld [vmem:[#allocation12 + $0x3d0] sm:$0xff]  ;;  %v6210_v35 = vld [vmem:[#allocation12 + $0x3d8] sm:$0xff] }
 0x278   :  { %2082 = vmatpush.msra.mxu1 %v5764_v14  ;;  %2055 = vmatpush.msra.mxu0 %v8580_v0  ;;  %v8584_v14 = vld [vmem:[#allocation76_spill] sm:$0xff]  ;;  %v6214_v56 = vld [vmem:[#allocation12 + $0x3b0] sm:$0xff] }
 0x279   :  { %2122 = vmatpush.msra.mxu3 %v8581_v30  ;;  %2095 = vmatpush.msra.mxu2 %v5772_v37  ;;  %v8588_v37 = vld [vmem:[#allocation83_spill] sm:$0xff] }
 0x27a   :  { %2056 = vmatpush.msra.mxu0 %v5778_v25  ;;  %v8583_v25 = vld [vmem:[#allocation75_spill] sm:$0xff]  ;;  %2083 = vmatpush.msra.mxu1 %v6172_v2 }
 0x27b   :  { %2096 = vmatpush.msra.mxu2 %v5780_v34  ;;  %v8582_v34 = vld [vmem:[#allocation92_spill] sm:$0xff]  ;;  %2123 = vmatpush.msra.mxu3 %v6174_v54  ;;  %v6220_v30 = vld [vmem:[#allocation12 + $0x390] sm:$0xff] }
 0x27c   :  { %2057 = vmatpush.msra.mxu0 %v5786_v22  ;;  %v8587_v22 = vld [vmem:[#allocation82_spill] sm:$0xff]  ;;  %2084 = vmatpush.msra.mxu1 %v6178_v62  ;;  %v6216_v0 = vld [vmem:[#allocation12 + $0x3b8] sm:$0xff] }
 0x27d   :  { %2097 = vmatpush.msra.mxu2 %v5788_v31  ;;  %v8586_v31 = vld [vmem:[#allocation80_spill] sm:$0xff]  ;;  %2124 = vmatpush.msra.mxu3 %v6180_v44 }
 0x27e   :  { %2058 = vmatpush.msra.mxu0 %v5794_v39  ;;  %v8589_v39 = vld [vmem:[#allocation86_spill] sm:$0xff]  ;;  %2085 = vmatpush.msra.mxu1 %v6184_v27 }
 0x27f   :  { %2098 = vmatpush.msra.mxu2 %v5796_v49  ;;  %v8590_v49 = vld [vmem:[#allocation87_spill] sm:$0xff]  ;;  %2125 = vmatpush.msra.mxu3 %v6186_v42 }
 0x280   :  { %2059 = vmatpush.msra.mxu0 %v5802_v4  ;;  %v8591_v4 = vld [vmem:[#allocation93_spill] sm:$0xff]  ;;  %2086 = vmatpush.msra.mxu1 %v6190_v38 }
 0x281   :  { %2099 = vmatpush.msra.mxu2 %v5804_v11  ;;  %v8592_v11 = vld [vmem:[#allocation94_spill] sm:$0xff]  ;;  %2126 = vmatpush.msra.mxu3 %v6192_v59 }
 0x282   :  { %2060 = vmatpush.msra.mxu0 %v5810_v9  ;;  %v8593_v9 = vld [vmem:[#allocation95_spill] sm:$0xff]  ;;  %2087 = vmatpush.msra.mxu1 %v6196_v57 }
 0x283   :  { %2100 = vmatpush.msra.mxu2 %v5812_v15  ;;  %v8594_v15 = vld [vmem:[#allocation96_spill] sm:$0xff]  ;;  %2127 = vmatpush.msra.mxu3 %v6198_v48 }
 0x284   :  { %2061 = vmatpush.msra.mxu0 %v5818_v13  ;;  %v8595_v13 = vld [vmem:[#allocation97_spill] sm:$0xff]  ;;  %2152 = vmatpush.msrb.mxu1 %v6202_v45 }
 0x285   :  { %2101 = vmatpush.msra.mxu2 %v5820_v19  ;;  %v8596_v19 = vld [vmem:[#allocation98_spill] sm:$0xff]  ;;  %2192 = vmatpush.msrb.mxu3 %v6204_v1 }
 0x286   :  { %2062 = vmatpush.msra.mxu0 %v5826_v17  ;;  %v8597_v17 = vld [vmem:[#allocation17_spill] sm:$0xff]  ;;  %2153 = vmatpush.msrb.mxu1 %v6208_v36 }
 0x287   :  { %2102 = vmatpush.msra.mxu2 %v5828_v23  ;;  %v8598_v23 = vld [vmem:[#allocation99_spill] sm:$0xff]  ;;  %2193 = vmatpush.msrb.mxu3 %v6210_v35 }
 0x288   :  { %2063 = vmatpush.msra.mxu0 %v5834_v21  ;;  %v8599_v21 = vld [vmem:[#allocation100_spill] sm:$0xff]  ;;  %2154 = vmatpush.msrb.mxu1 %v6214_v56 }
 0x289   :  { %2103 = vmatpush.msra.mxu2 %v5836_v28  ;;  %v8600_v28 = vld [vmem:[#allocation101_spill] sm:$0xff]  ;;  %2194 = vmatpush.msrb.mxu3 %v6216_v0 }
 0x28a   :  { %2064 = vmatpush.msra.mxu0 %v5842_v26  ;;  %v8601_v26 = vld [vmem:[#allocation104_spill] sm:$0xff]  ;;  %2155 = vmatpush.msrb.mxu1 %v6220_v30 }
 0x28b   :  { %2104 = vmatpush.msra.mxu2 %v8582_v34  ;;  %v6222_v34 = vld [vmem:[#allocation12 + $0x398] sm:$0xff] }
 0x28c   :  { %2065 = vmatpush.msra.mxu0 %v8583_v25  ;;  %2195 = vmatpush.msrb.mxu3 %v6222_v34  ;;  %v6226_v25 = vld [vmem:[#allocation12 + $0x370] sm:$0xff] }
 0x28d   :  { %2105 = vmatpush.msra.mxu2 %v8584_v14  ;;  %v6228_v14 = vld [vmem:[#allocation12 + $0x378] sm:$0xff]  ;;  %2156 = vmatpush.msrb.mxu1 %v6226_v25 }
 0x28e   :  { %2066 = vmatpush.msra.mxu0 %v8585_v6  ;;  %2196 = vmatpush.msrb.mxu3 %v6228_v14  ;;  %v6232_v6 = vld [vmem:[#allocation12 + $0x350] sm:$0xff] }
 0x28f   :  { %2106 = vmatpush.msra.mxu2 %v8586_v31  ;;  %v6234_v31 = vld [vmem:[#allocation12 + $0x358] sm:$0xff]  ;;  %2157 = vmatpush.msrb.mxu1 %v6232_v6 }
 0x290   :  { %2067 = vmatpush.msra.mxu0 %v8587_v22  ;;  %2197 = vmatpush.msrb.mxu3 %v6234_v31  ;;  %v6238_v22 = vld [vmem:[#allocation12 + $0x330] sm:$0xff] }
 0x291   :  { %2107 = vmatpush.msra.mxu2 %v8588_v37  ;;  %v6240_v37 = vld [vmem:[#allocation12 + $0x338] sm:$0xff]  ;;  %2158 = vmatpush.msrb.mxu1 %v6238_v22 }
 0x292   :  { %2132 = vmatpush.msrb.mxu0 %v8589_v39  ;;  %2198 = vmatpush.msrb.mxu3 %v6240_v37 }
 0x293   :  { %2172 = vmatpush.msrb.mxu2 %v8590_v49 }
 0x294   :  { %2133 = vmatpush.msrb.mxu0 %v8591_v4  ;;  %v8621_v4 = vld [vmem:[#allocation46_spill] sm:$0xff] }
 0x295   :  { %2173 = vmatpush.msrb.mxu2 %v8592_v11 }
 0x296   :  { %2134 = vmatpush.msrb.mxu0 %v8593_v9  ;;  %v6245_v9 = vld [vmem:[#allocation12 + $0x310] sm:$0xff] }
 0x297   :  { %2174 = vmatpush.msrb.mxu2 %v8594_v15  ;;  %v6247_v15 = vld [vmem:[#allocation12 + $0x318] sm:$0xff]  ;;  %2159 = vmatpush.msrb.mxu1 %v6245_v9 }
 0x298   :  { %2135 = vmatpush.msrb.mxu0 %v8595_v13  ;;  %2199 = vmatpush.msrb.mxu3 %v6247_v15 }
 0x299   :  { %2175 = vmatpush.msrb.mxu2 %v8596_v19  ;;  %v6251_v19 = vld [vmem:[#allocation12 + $0x2f0] sm:$0xff] }
 0x29a   :  { %2136 = vmatpush.msrb.mxu0 %v8597_v17  ;;  %v6253_v17 = vld [vmem:[#allocation12 + $0x2f8] sm:$0xff]  ;;  %2160 = vmatpush.msrb.mxu1 %v6251_v19 }
 0x29b   :  { %2176 = vmatpush.msrb.mxu2 %v8598_v23  ;;  %2200 = vmatpush.msrb.mxu3 %v6253_v17 }
 0x29c   :  { %2137 = vmatpush.msrb.mxu0 %v8599_v21  ;;  %v6257_v21 = vld [vmem:[#allocation12 + $0x2d0] sm:$0xff] }
 0x29d   :  { %2177 = vmatpush.msrb.mxu2 %v8600_v28  ;;  %v6259_v28 = vld [vmem:[#allocation12 + $0x2d8] sm:$0xff]  ;;  %2161 = vmatpush.msrb.mxu1 %v6257_v21 }
 0x29e   :  { %2138 = vmatpush.msrb.mxu0 %v8601_v26  ;;  %2201 = vmatpush.msrb.mxu3 %v6259_v28 }
 0x29f   :  { %2178 = vmatpush.msrb.mxu2 %v8602_v41 }
 0x2a0   :  { %2139 = vmatpush.msrb.mxu0 %v8603_v50  ;;  %v8622_v50 = vld [vmem:[#allocation47_spill] sm:$0xff] }
 0x2a1   :  { %2179 = vmatpush.msrb.mxu2 %v8604_v32 }
 0x2a2   :  { %2140 = vmatpush.msrb.mxu0 %v8605_v3  ;;  %v6264_v3 = vld [vmem:[#allocation12 + $0x2b0] sm:$0xff] }
 0x2a3   :  { %2180 = vmatpush.msrb.mxu2 %v8606_v8  ;;  %v6266_v8 = vld [vmem:[#allocation12 + $0x2b8] sm:$0xff]  ;;  %2162 = vmatpush.msrb.mxu1 %v6264_v3 }
 0x2a4   :  { %2141 = vmatpush.msrb.mxu0 %v8607_v18  ;;  %2202 = vmatpush.msrb.mxu3 %v6266_v8 }
 0x2a5   :  { %2181 = vmatpush.msrb.mxu2 %v8608_v10 }
 0x2a6   :  { %2142 = vmatpush.msrb.mxu0 %v8609_v51  ;;  %v8623_v51 = vld [vmem:[#allocation48_spill] sm:$0xff] }
 0x2a7   :  { %2182 = vmatpush.msrb.mxu2 %v8610_v16 }
 0x2a8   :  { %2143 = vmatpush.msrb.mxu0 %v8611_v20  ;;  %v6271_v20 = vld [vmem:[#allocation12 + $0x290] sm:$0xff] }
 0x2a9   :  { %2183 = vmatpush.msrb.mxu2 %v8612_v47  ;;  %8624 = vst [vmem:[#allocation22_spill] sm:$0xff] %v6271_v20  ;;  %v6273_v47 = vld [vmem:[#allocation12 + $0x298] sm:$0xff]  ;;  %2163 = vmatpush.msrb.mxu1 %v6271_v20 }
 0x2aa   :  { %2144 = vmatpush.msrb.mxu0 %v8613_v58  ;;  %8625 = vst [vmem:[#allocation21_spill] sm:$0xff] %v6273_v47  ;;  %2203 = vmatpush.msrb.mxu3 %v6273_v47 }
 0x2ab   :  { %2184 = vmatpush.msrb.mxu2 %v8614_v46 }
 0x2ac   :  { %2145 = vmatpush.msrb.mxu0 %v8615_v61 }
 0x2ad   :  { %2185 = vmatpush.msrb.mxu2 %v8616_v33  ;;  %v8626_v33 = vld [vmem:[#allocation18_spill] sm:$0xff] }
 0x2ae   :  { %2146 = vmatpush.msrb.mxu0 %v8617_v5  ;;  %2164 = vmatpush.msrb.mxu1 %v8626_v33  ;;  %v8627_v5 = vld [vmem:[#allocation20_spill] sm:$0xff] }
 0x2af   :  { %2186 = vmatpush.msrb.mxu2 %v8618_v55  ;;  %2204 = vmatpush.msrb.mxu3 %v8627_v5 }
 0x2b0   :  { %2147 = vmatpush.msrb.mxu0 %v8619_v29  ;;  %v8628_v29 = vld [vmem:[#allocation102_spill] sm:$0xff] }
 0x2b1   :  { %2187 = vmatpush.msrb.mxu2 %v8620_v43  ;;  %2165 = vmatpush.msrb.mxu1 %v8628_v29  ;;  %v8629_v43 = vld [vmem:[#allocation103_spill] sm:$0xff] }
 0x2b2   :  { %2205 = vmatpush.msrb.mxu3 %v8629_v43  ;;  %v1719_v43 = vld [vmem:[#allocation5] sm:$0x3] }
 0x2bb   :  { %v1583_v39 = vpop.f32.mrf.mxu1 }
 0x2c1   :  { %v1623_v26 = vpop.f32.mrf.mxu3 }
 0x2c3   :  { %v1663_v58 = vpop.f32.mrf.mxu1 }
 0x2cd   :  { %v1563_v49 = vpop.f32.mrf.mxu0 }
 0x2ce   :  { %v1564_v11 = vadd.f32 %v1563_v49, %v8621_v4  ;;  %v8630_v49 = vld [vmem:[#allocation19_spill] sm:$0xff] }
 0x2d0   :  { %v1584_v13 = vadd.f32 %v1583_v39, %v1564_v11 }
 0x2d2   :  { %v1706_v23 = vmul.f32 0.5, %v1584_v13  ;;  %v1703_v13 = vpop.f32.mrf.mxu3 }
 0x2d3   :  { %v1603_v41 = vpop.f32.mrf.mxu2 }
 0x2d4   :  { %v1604_v32 = vadd.f32 %v1603_v41, %v8622_v50  ;;  %4446 = vtanh.f32 %v1706_v23  ;;  %v8631_v23 = vld [vmem:[#allocation106_spill] sm:$0xff] }
 0x2d5   :  { %v1643_v18 = vpop.f32.mrf.mxu0  ;;  %2166 = vmatpush.msrb.mxu1 %v8631_v23 }
 0x2d6   :  { %v1624_v10 = vadd.f32 %v1623_v26, %v1604_v32  ;;  %v1644_v16 = vadd.f32 %v1643_v18, %v8623_v51  ;;  %v8632_v26 = vld [vmem:[#allocation107_spill] sm:$0xff]  ;;  %v8633_v18 = vld [vmem:[#allocation110_spill] sm:$0xff]  ;;  %v1728_v51 = vld [vmem:[#allocation6] sm:$0xc0] }
 0x2d7   :  { %2206 = vmatpush.msrb.mxu3 %v8632_v26  ;;  %2167 = vmatpush.msrb.mxu1 %v8633_v18 }
 0x2d8   :  { %v1710_v46 = vmul.f32 0.5, %v1624_v10  ;;  %v1664_v61 = vadd.f32 %v1663_v58, %v1644_v16  ;;  %v8634_v10 = vld [vmem:[#allocation111_spill] sm:$0xff] }
 0x2d9   :  { %2207 = vmatpush.msrb.mxu3 %v8634_v10 }
 0x2da   :  { %4448 = vtanh.f32 %v1710_v46  ;;  %v4447_v39 = vpop.eup %4446 }
 0x2db   :  { %v1683_v55 = vpop.f32.mrf.mxu2  ;;  %4450 = vtanh.f32 %v1664_v61  ;;  %v1708_v32 = vmul.f32 0.5, %v4447_v39 }
 0x2dc   :  { %v1684_v11 = vadd.f32 %v1683_v55, %v8630_v49 }
 0x2dd   :  { %v1709_v61 = vadd.f32 0.5, %v1708_v32  ;;  %v1727_v32 = vld [vmem:[#allocation6 + $0x30] sm:$0xc0] }
 0x2de   :  { %v1704_v41 = vadd.f32 %v1703_v13, %v1684_v11  ;;  %v1833_v46 = vpop.f32.mrf.mxu1 }
 0x2df   :  { %v1881_v55 = vrot.slane %v1833_v46, 2 }
 0x2e0   :  { %v4449_v16 = vpop.eup %4448  ;;  %v1715_v58 = vmul.f32 0.5, %v1704_v41 }
 0x2e1   :  { %v1712_v33 = vmul.f32 0.5, %v4449_v16  ;;  %v4451_v5 = vpop.eup %4450  ;;  %v1889_v11 = vadd.f32 %v1881_v55, %v1728_v51 }
 0x2e2   :  { %4452 = vtanh.f32 %v1715_v58  ;;  %v1721_v23 = vmul.f32 %v4451_v5, %v1709_v61  ;;  %v1730_v61 = vld [vmem:[#allocation6 + $0x10] sm:$0xc0] }
 0x2e3   :  { %v1713_v29 = vadd.f32 0.5, %v1712_v33  ;;  %v1896_v18 = vmul.f32 0.5, %v1889_v11 }
 0x2e5   :  { %v1720_v49 = vmul.f32 %v1719_v43, %v1713_v29  ;;  %v1873_v10 = vpop.f32.mrf.mxu3  ;;  %v1729_v43 = vld [vmem:[#allocation6 + $0x18] sm:$0xc0] }
 0x2e6   :  { %v1883_v46 = vrot.slane %v1873_v10, 2 }
 0x2e7   :  { %v1722_v26 = vadd.f32 %v1721_v23, %v1720_v49 }
 0x2e8   :  { %v4453_v39 = vpop.eup %4452  ;;  %v1891_v49 = vadd.f32 %v1883_v46, %v1730_v61 }
 0x2e9   :  { %4454 = vtanh.f32 %v1722_v26  ;;  %1725 = vst [vmem:[#allocation5] sm:$0x3] %v1722_v26  ;;  %v1717_v13 = vmul.f32 0.5, %v4453_v39 }
 0x2ea   :  { %4456 = vtanh.f32 %v1896_v18  ;;  %v1901_v11 = vmul.f32 0.5, %v1891_v49 }
 0x2eb   :  { %v1718_v47 = vadd.f32 0.5, %v1717_v13 }
 0x2ed   :  { %v1813_v41 = vpop.f32.mrf.mxu0 }
 0x2ee   :  { %v1880_v16 = vrot.slane %v1813_v41, 2  ;;  %v1905_v41 = vld [vmem:[#allocation3] sm:$0x3] }
 0x2ef   :  { %v4455_v20 = vpop.eup %4454  ;;  %v1907_v46 = vrot.slane %v1905_v41, 2  ;;  %v6314_v41 = vld [vmem:[#allocation10 + $0x148] sm:$0xff] }
 0x2f0   :  { %v1724_v58 = vmul.f32 %v4455_v20, %v1718_v47  ;;  %v1888_v33 = vadd.f32 %v1880_v16, %v1727_v32  ;;  %v4457_v29 = vpop.eup %4456  ;;  %v6286_v16 = vld [vmem:[#allocation10 + $0x1e8] sm:$0xff]  ;;  %v6288_v32 = vld [vmem:[#allocation10 + $0x1f8] sm:$0xff]  ;;  %8635 = vst [vmem:[#allocation24_spill] sm:$0xff] %v6314_v41 }
 0x2f1   :  { %v1898_v26 = vmul.f32 0.5, %v4457_v29  ;;  %v6296_v29 = vld [vmem:[#allocation10 + $0x1a8] sm:$0xff] }
 0x2f2   :  { %1726 = vst [vmem:[#allocation4] sm:$0x3] %v1724_v58  ;;  %v1892_v5 = vmul.f32 0.5, %v1888_v33  ;;  %v6290_v33 = vld [vmem:[#allocation10 + $0x1c8] sm:$0xff] }
 0x2f3   :  { %v1899_v47 = vadd.f32 0.5, %v1898_v26  ;;  %v6302_v26 = vld [vmem:[#allocation10 + $0x188] sm:$0xff] }
 0x2f4   :  { %4458 = vtanh.f32 %v1892_v5  ;;  %v1853_v51 = vpop.f32.mrf.mxu2  ;;  %v6292_v5 = vld [vmem:[#allocation10 + $0x1d8] sm:$0xff] }
 0x2f5   :  { %v1882_v55 = vrot.slane %v1853_v51, 2  ;;  %v1909_v49 = vmul.f32 %v1907_v46, %v1899_v47  ;;  %v6320_v47 = vld [vmem:[#allocation10 + $0x128] sm:$0xff] }
 0x2f7   :  { %v1890_v23 = vadd.f32 %v1882_v55, %v1729_v43  ;;  %v6298_v55 = vld [vmem:[#allocation10 + $0x1b8] sm:$0xff] }
 0x2f9   :  { %4460 = vtanh.f32 %v1890_v23  ;;  %v1916_v39 = vld [vmem:[#allocation4] sm:$0x3] }
 0x2fa   :  { %v4459_v13 = vpop.eup %4458  ;;  %v1918_v18 = vrot.slane %v1916_v39, 2  ;;  %4462 = vtanh.f32 %v1901_v11  ;;  %v6304_v11 = vld [vmem:[#allocation10 + $0x198] sm:$0xff]  ;;  %v6308_v39 = vld [vmem:[#allocation10 + $0x168] sm:$0xff] }
 0x2fb   :  { %v1894_v20 = vmul.f32 0.5, %v4459_v13  ;;  %v6310_v13 = vld [vmem:[#allocation10 + $0x178] sm:$0xff] }
 0x2fc   :  { %v2049_v10 = vrot.slane %v1918_v18, 6 }
 0x2fd   :  { %v1895_v58 = vadd.f32 0.5, %v1894_v20  ;;  %v6316_v20 = vld [vmem:[#allocation10 + $0x158] sm:$0xff] }
 0x2fe   :  { %2088 = vmatmul.f32.vlgmr.msra.gmra.mxu1 %v2049_v10  ;;  %2128 = vmatmul.f32.vlgmr.msra.gmra.mxu3 %v2049_v10  ;;  %8636 = vst [vmem:[#allocation23_spill] sm:$0xff] %v6316_v20 }
 0x2ff   :  { %v4461_v61 = vpop.eup %4460  ;;  %2322 = vmatpush.msra.mxu1 %v6286_v16  ;;  %2362 = vmatpush.msra.mxu3 %v6288_v32 }
 0x300   :  { %v1910_v51 = vmul.f32 %v4461_v61, %v1895_v58  ;;  %v4463_v43 = vpop.eup %4462  ;;  %v6322_v58 = vld [vmem:[#allocation10 + $0x138] sm:$0xff] }
 0x301   :  { %2323 = vmatpush.msra.mxu1 %v6290_v33  ;;  %2363 = vmatpush.msra.mxu3 %v6292_v5  ;;  %v1903_v18 = vmul.f32 0.5, %v4463_v43 }
 0x302   :  { %v1911_v23 = vadd.f32 %v1910_v51, %v1909_v49  ;;  %v6326_v49 = vld [vmem:[#allocation10 + $0x108] sm:$0xff] }
 0x303   :  { %2324 = vmatpush.msra.mxu1 %v6296_v29  ;;  %2364 = vmatpush.msra.mxu3 %v6298_v55  ;;  %v1904_v46 = vadd.f32 0.5, %v1903_v18  ;;  %8637 = vst [vmem:[#allocation25_spill] sm:$0xff] %v6326_v49  ;;  %v6336_v18 = vld [vmem:[#allocation10 + $0xe8] sm:$0xff] }
 0x304   :  { %4464 = vtanh.f32 %v1911_v23  ;;  %1914 = vst [vmem:[#allocation3 - $0x6] sm:$0xc0] %v1911_v23  ;;  %v6334_v23 = vld [vmem:[#allocation10 + $0x1f0] sm:$0xff] }
 0x305   :  { %2325 = vmatpush.msra.mxu1 %v6302_v26  ;;  %2365 = vmatpush.msra.mxu3 %v6304_v11  ;;  %8639 = vst [vmem:[#allocation27_spill] sm:$0xff] %v6334_v23 }
 0x306   :  { %2168 = vmatmul.f32.vlgmr.msrb.gmra.mxu1 %v2049_v10  ;;  %2208 = vmatmul.f32.vlgmr.msrb.gmra.mxu3 %v2049_v10  ;;  %v6328_v10 = vld [vmem:[#allocation10 + $0x118] sm:$0xff] }
 0x307   :  { %2326 = vmatpush.msra.mxu1 %v6308_v39  ;;  %2366 = vmatpush.msra.mxu3 %v6310_v13  ;;  %8638 = vst [vmem:[#allocation26_spill] sm:$0xff] %v6328_v10 }
 0x309   :  { %2327 = vmatpush.msra.mxu1 %v6314_v41  ;;  %2367 = vmatpush.msra.mxu3 %v6316_v20  ;;  %v6338_v20 = vld [vmem:[#allocation10 + $0xf8] sm:$0xff]  ;;  %v6340_v41 = vld [vmem:[#allocation10 + $0x1d0] sm:$0xff] }
 0x30a   :  { %v4465_v61 = vpop.eup %4464  ;;  %8640 = vst [vmem:[#allocation28_spill] sm:$0xff] %v6338_v20 }
 0x30b   :  { %2328 = vmatpush.msra.mxu1 %v6320_v47  ;;  %2368 = vmatpush.msra.mxu3 %v6322_v58  ;;  %v1913_v51 = vmul.f32 %v4465_v61, %v1904_v46  ;;  %v6344_v46 = vld [vmem:[#allocation10 + $0xc8] sm:$0xff]  ;;  %v6346_v61 = vld [vmem:[#allocation10 + $0xd8] sm:$0xff] }
 0x30d   :  { %2329 = vmatpush.msra.mxu1 %v6326_v49  ;;  %2369 = vmatpush.msra.mxu3 %v6328_v10  ;;  %1915 = vst [vmem:[#allocation2 - $0x6] sm:$0xc0] %v1913_v51  ;;  %v2048_v43 = vrot.slane %v1913_v51, 6  ;;  %v6350_v51 = vld [vmem:[#allocation10 + $0x1b0] sm:$0xff]  ;;  %v6354_v10 = vld [vmem:[#allocation10 + $0xa8] sm:$0xff]  ;;  %v6356_v49 = vld [vmem:[#allocation10 + $0xb8] sm:$0xff] }
 0x30e   :  { %8641 = vst [vmem:[#allocation29_spill] sm:$0xff] %v6350_v51 }
 0x30f   :  { %2068 = vmatmul.f32.vlgmr.msra.gmra.mxu0 %v2048_v43  ;;  %2108 = vmatmul.f32.vlgmr.msra.gmra.mxu2 %v2048_v43  ;;  %8642 = vst [vmem:[#allocation30_spill] sm:$0xff] %v6356_v49 }
 0x310   :  { %2302 = vmatpush.msra.mxu0 %v6022_v12  ;;  %2342 = vmatpush.msra.mxu2 %v6334_v23  ;;  %v6360_v12 = vld [vmem:[#allocation10 + $0x190] sm:$0xff]  ;;  %v6364_v23 = vld [vmem:[#allocation10 + $0x88] sm:$0xff] }
 0x311   :  { %2330 = vmatpush.msra.mxu1 %v6336_v18  ;;  %2370 = vmatpush.msra.mxu3 %v6338_v20  ;;  %8643 = vst [vmem:[#allocation32_spill] sm:$0xff] %v6360_v12  ;;  %v6366_v20 = vld [vmem:[#allocation10 + $0x98] sm:$0xff] }
 0x312   :  { %2303 = vmatpush.msra.mxu0 %v6026_v7  ;;  %2343 = vmatpush.msra.mxu2 %v6340_v41  ;;  %8644 = vst [vmem:[#allocation31_spill] sm:$0xff] %v6366_v20  ;;  %v6374_v7 = vld [vmem:[#allocation10 + $0x68] sm:$0xff] }
 0x313   :  { %2331 = vmatpush.msra.mxu1 %v6344_v46  ;;  %2371 = vmatpush.msra.mxu3 %v6346_v61 }
 0x314   :  { %2304 = vmatpush.msra.mxu0 %v6032_v60  ;;  %2344 = vmatpush.msra.mxu2 %v6350_v51  ;;  %v6376_v60 = vld [vmem:[#allocation10 + $0x78] sm:$0xff]  ;;  %v6378_v51 = vld [vmem:[#allocation10 + $0x150] sm:$0xff] }
 0x315   :  { %2332 = vmatpush.msra.mxu1 %v6354_v10  ;;  %2372 = vmatpush.msra.mxu3 %v6356_v49  ;;  %8645 = vst [vmem:[#allocation34_spill] sm:$0xff] %v6376_v60  ;;  %v6382_v49 = vld [vmem:[#allocation10 + $0x48] sm:$0xff] }
 0x316   :  { %2305 = vmatpush.msra.mxu0 %v6038_v52  ;;  %2345 = vmatpush.msra.mxu2 %v6360_v12  ;;  %8646 = vst [vmem:[#allocation33_spill] sm:$0xff] %v6378_v51  ;;  %v6384_v52 = vld [vmem:[#allocation10 + $0x58] sm:$0xff]  ;;  %v6388_v12 = vld [vmem:[#allocation10 + $0x130] sm:$0xff] }
 0x317   :  { %2333 = vmatpush.msra.mxu1 %v6364_v23  ;;  %2373 = vmatpush.msra.mxu3 %v6366_v20  ;;  %8647 = vst [vmem:[#allocation36_spill] sm:$0xff] %v6382_v49  ;;  %v6394_v20 = vld [vmem:[#allocation10 + $0x38] sm:$0xff] }
 0x318   :  { %2148 = vmatmul.f32.vlgmr.msrb.gmra.mxu0 %v2048_v43  ;;  %2188 = vmatmul.f32.vlgmr.msrb.gmra.mxu2 %v2048_v43  ;;  %8648 = vst [vmem:[#allocation35_spill] sm:$0xff] %v6384_v52  ;;  %v6392_v43 = vld [vmem:[#allocation10 + $0x28] sm:$0xff] }
 0x319   :  { %2306 = vmatpush.msra.mxu0 %v6044_v53  ;;  %2346 = vmatpush.msra.mxu2 %v6046_v40  ;;  %8649 = vst [vmem:[#allocation37_spill] sm:$0xff] %v6388_v12  ;;  %v6398_v53 = vld [vmem:[#allocation10 + $0x100] sm:$0xff]  ;;  %v6400_v40 = vld [vmem:[#allocation10 + $0x110] sm:$0xff] }
 0x31a   :  { %2334 = vmatpush.msra.mxu1 %v6374_v7  ;;  %2374 = vmatpush.msra.mxu3 %v6376_v60  ;;  %8650 = vst [vmem:[#allocation38_spill] sm:$0xff] %v6392_v43  ;;  %v6404_v60 = vld [vmem:[#allocation10 + $0x8] sm:$0xff] }
 0x31b   :  { %2307 = vmatpush.msra.mxu0 %v6050_v63  ;;  %2347 = vmatpush.msra.mxu2 %v6378_v51  ;;  %8651 = vst [vmem:[#allocation39_spill] sm:$0xff] %v6394_v20  ;;  %v6406_v63 = vld [vmem:[#allocation10 + $0x18] sm:$0xff]  ;;  %v6410_v51 = vld [vmem:[#allocation10 + $0xe0] sm:$0xff] }
 0x31c   :  { %2335 = vmatpush.msra.mxu1 %v6382_v49  ;;  %2375 = vmatpush.msra.mxu3 %v6384_v52  ;;  %8652 = vst [vmem:[#allocation40_spill] sm:$0xff] %v6400_v40  ;;  %v6414_v52 = vld [vmem:[#allocation10 + $0xf0] sm:$0xff]  ;;  %v6420_v49 = vld [vmem:[#allocation12 + $0x3e0] sm:$0xff] }
 0x31d   :  { %2308 = vmatpush.msra.mxu0 %v6056_v24  ;;  %2348 = vmatpush.msra.mxu2 %v6388_v12  ;;  %8653 = vst [vmem:[#allocation41_spill] sm:$0xff] %v6404_v60  ;;  %v2237_v24 = vld [vmem:[#allocation2] sm:$0x3]  ;;  %v6418_v12 = vld [vmem:[#allocation10 + $0xc0] sm:$0xff] }
 0x31e   :  { %8654 = vst [vmem:[#allocation42_spill] sm:$0xff] %v6406_v63  ;;  %2336 = vmatpush.msra.mxu1 %v6392_v43  ;;  %2376 = vmatpush.msra.mxu3 %v6394_v20  ;;  %v6423_v20 = vld [vmem:[#allocation10 + $0xd0] sm:$0xff]  ;;  %v6425_v43 = vld [vmem:[#allocation12 + $0x3e8] sm:$0xff] }
 0x31f   :  { %8655 = vst [vmem:[#allocation43_spill] sm:$0xff] %v6410_v51  ;;  %2309 = vmatpush.msra.mxu0 %v6398_v53  ;;  %2349 = vmatpush.msra.mxu2 %v6400_v40  ;;  %v6428_v40 = vld [vmem:[#allocation10 + $0xa0] sm:$0xff] }
 0x320   :  { %8656 = vst [vmem:[#allocation59_spill] sm:$0xff] %v6414_v52  ;;  %2337 = vmatpush.msra.mxu1 %v6404_v60  ;;  %2377 = vmatpush.msra.mxu3 %v6406_v63  ;;  %v6431_v63 = vld [vmem:[#allocation10 + $0xb0] sm:$0xff]  ;;  %v6435_v60 = vld [vmem:[#allocation10 + $0x80] sm:$0xff] }
 0x321   :  { %8657 = vst [vmem:[#allocation44_spill] sm:$0xff] %v6418_v12  ;;  %2310 = vmatpush.msra.mxu0 %v6410_v51  ;;  %2338 = vmatmul.f32.vlgmr.msra.gmra.mxu1 %v2237_v24  ;;  %v6439_v51 = vld [vmem:[#allocation10 + $0x90] sm:$0xff] }
 0x322   :  { %8658 = vst [vmem:[#allocation60_spill] sm:$0xff] %v6420_v49  ;;  %2350 = vmatpush.msra.mxu2 %v6414_v52  ;;  %2378 = vmatmul.f32.vlgmr.msra.gmra.mxu3 %v2237_v24  ;;  %v6442_v52 = vld [vmem:[#allocation10 + $0x60] sm:$0xff] }
 0x323   :  { %8659 = vst [vmem:[#allocation45_spill] sm:$0xff] %v6423_v20  ;;  %2311 = vmatpush.msra.mxu0 %v6418_v12  ;;  %2556 = vmatpush.msrb.mxu1 %v6420_v49  ;;  %v6445_v12 = vld [vmem:[#allocation10 + $0x70] sm:$0xff]  ;;  %v6448_v49 = vld [vmem:[#allocation10 + $0x40] sm:$0xff] }
 0x324   :  { %8660 = vst [vmem:[#allocation61_spill] sm:$0xff] %v6428_v40  ;;  %2351 = vmatpush.msra.mxu2 %v6423_v20  ;;  %2596 = vmatpush.msrb.mxu3 %v6425_v43  ;;  %v6451_v20 = vld [vmem:[#allocation10 + $0x50] sm:$0xff] }
 0x325   :  { %8661 = vst [vmem:[#allocation49_spill] sm:$0xff] %v6431_v63  ;;  %2312 = vmatpush.msra.mxu0 %v6428_v40  ;;  %v6454_v40 = vld [vmem:[#allocation10 + $0x20] sm:$0xff] }
 0x326   :  { %8662 = vst [vmem:[#allocation62_spill] sm:$0xff] %v6435_v60  ;;  %2352 = vmatpush.msra.mxu2 %v6431_v63  ;;  %v6457_v63 = vld [vmem:[#allocation10 + $0x30] sm:$0xff] }
 0x327   :  { %8663 = vst [vmem:[#allocation50_spill] sm:$0xff] %v6439_v51  ;;  %2313 = vmatpush.msra.mxu0 %v6435_v60  ;;  %v6460_v60 = vld [vmem:[#allocation10] sm:$0xff] }
 0x328   :  { %8664 = vst [vmem:[#allocation63_spill] sm:$0xff] %v6442_v52  ;;  %2353 = vmatpush.msra.mxu2 %v6439_v51  ;;  %v6463_v51 = vld [vmem:[#allocation10 + $0x10] sm:$0xff] }
 0x329   :  { %8665 = vst [vmem:[#allocation51_spill] sm:$0xff] %v6445_v12  ;;  %2314 = vmatpush.msra.mxu0 %v6442_v52  ;;  %v6472_v52 = vld [vmem:[#allocation12 + $0x3a0] sm:$0xff] }
 0x32a   :  { %8666 = vst [vmem:[#allocation64_spill] sm:$0xff] %v6448_v49  ;;  %2354 = vmatpush.msra.mxu2 %v6445_v12  ;;  %v6468_v12 = vld [vmem:[#allocation12 + $0x3c0] sm:$0xff] }
 0x32b   :  { %8667 = vst [vmem:[#allocation52_spill] sm:$0xff] %v6451_v20  ;;  %2315 = vmatpush.msra.mxu0 %v6448_v49  ;;  %v6470_v49 = vld [vmem:[#allocation12 + $0x3c8] sm:$0xff]  ;;  %2557 = vmatpush.msrb.mxu1 %v6468_v12 }
 0x32c   :  { %8668 = vst [vmem:[#allocation65_spill] sm:$0xff] %v6454_v40  ;;  %2355 = vmatpush.msra.mxu2 %v6451_v20  ;;  %2597 = vmatpush.msrb.mxu3 %v6470_v49  ;;  %v6478_v20 = vld [vmem:[#allocation12 + $0x380] sm:$0xff] }
 0x32d   :  { %8669 = vst [vmem:[#allocation53_spill] sm:$0xff] %v6457_v63  ;;  %2316 = vmatpush.msra.mxu0 %v6454_v40  ;;  %v6476_v40 = vld [vmem:[#allocation12 + $0x3a8] sm:$0xff]  ;;  %2558 = vmatpush.msrb.mxu1 %v6472_v52 }
 0x32e   :  { %8670 = vst [vmem:[#allocation54_spill] sm:$0xff] %v6460_v60  ;;  %2356 = vmatpush.msra.mxu2 %v6457_v63  ;;  %v6480_v63 = vld [vmem:[#allocation12 + $0x388] sm:$0xff]  ;;  %2598 = vmatpush.msrb.mxu3 %v6476_v40 }
 0x32f   :  { %8671 = vst [vmem:[#allocation66_spill] sm:$0xff] %v6463_v51  ;;  %2317 = vmatpush.msra.mxu0 %v6460_v60  ;;  %2559 = vmatpush.msrb.mxu1 %v6478_v20  ;;  %v6492_v60 = vld [vmem:[#allocation12 + $0x340] sm:$0xff] }
 0x330   :  { %2357 = vmatpush.msra.mxu2 %v6463_v51  ;;  %2318 = vmatmul.f32.vlgmr.msra.gmra.mxu0 %v2237_v24  ;;  %8672 = vst [vmem:[#allocation55_spill] sm:$0xff] %v6468_v12  ;;  %v6488_v51 = vld [vmem:[#allocation12 + $0x368] sm:$0xff]  ;;  %v6496_v12 = vld [vmem:[#allocation12 + $0x320] sm:$0xff] }
 0x331   :  { %2358 = vmatmul.f32.vlgmr.msra.gmra.mxu2 %v2237_v24  ;;  %8673 = vst [vmem:[#allocation67_spill] sm:$0xff] %v6470_v49  ;;  %2599 = vmatpush.msrb.mxu3 %v6480_v63  ;;  %v6486_v24 = vld [vmem:[#allocation12 + $0x360] sm:$0xff]  ;;  %v6494_v49 = vld [vmem:[#allocation12 + $0x348] sm:$0xff] }
 0x332   :  { %8674 = vst [vmem:[#allocation56_spill] sm:$0xff] %v6472_v52  ;;  %2560 = vmatpush.msrb.mxu1 %v6486_v24  ;;  %v6506_v52 = vld [vmem:[#allocation12 + $0x1e0] sm:$0xff] }
 0x333   :  { %8675 = vst [vmem:[#allocation68_spill] sm:$0xff] %v6476_v40  ;;  %2600 = vmatpush.msrb.mxu3 %v6488_v51  ;;  %v6504_v40 = vld [vmem:[#allocation12 + $0x308] sm:$0xff]  ;;  %2536 = vmatpush.msrb.mxu0 %v6506_v52 }
 0x334   :  { %8676 = vst [vmem:[#allocation57_spill] sm:$0xff] %v6478_v20  ;;  %2561 = vmatpush.msrb.mxu1 %v6492_v60  ;;  %v6500_v20 = vld [vmem:[#allocation12 + $0x328] sm:$0xff] }
 0x335   :  { %8677 = vst [vmem:[#allocation69_spill] sm:$0xff] %v6480_v63  ;;  %2601 = vmatpush.msrb.mxu3 %v6494_v49  ;;  %v6502_v63 = vld [vmem:[#allocation12 + $0x300] sm:$0xff] }
 0x336   :  { %8678 = vst [vmem:[#allocation58_spill] sm:$0xff] %v6486_v24  ;;  %v6508_v24 = vld [vmem:[#allocation12 + $0x1e8] sm:$0xff]  ;;  %2562 = vmatpush.msrb.mxu1 %v6496_v12 }
 0x337   :  { %8679 = vst [vmem:[#allocation70_spill] sm:$0xff] %v6488_v51  ;;  %2602 = vmatpush.msrb.mxu3 %v6500_v20  ;;  %2576 = vmatpush.msrb.mxu2 %v6508_v24  ;;  %v6522_v51 = vld [vmem:[#allocation12 + $0x1c0] sm:$0xff] }
 0x338   :  { %8680 = vst [vmem:[#allocation71_spill] sm:$0xff] %v6492_v60  ;;  %2563 = vmatpush.msrb.mxu1 %v6502_v63  ;;  %v6518_v60 = vld [vmem:[#allocation12 + $0x2e8] sm:$0xff]  ;;  %2537 = vmatpush.msrb.mxu0 %v6522_v51 }
 0x339   :  { %8681 = vst [vmem:[#allocation73_spill] sm:$0xff] %v6494_v49  ;;  %2603 = vmatpush.msrb.mxu3 %v6504_v40  ;;  %v6516_v49 = vld [vmem:[#allocation12 + $0x2e0] sm:$0xff] }
 0x33a   :  { %8682 = vst [vmem:[#allocation72_spill] sm:$0xff] %v6496_v12  ;;  %2564 = vmatpush.msrb.mxu1 %v6516_v49  ;;  %v6524_v12 = vld [vmem:[#allocation12 + $0x1c8] sm:$0xff] }
 0x33b   :  { %8683 = vst [vmem:[#allocation74_spill] sm:$0xff] %v6504_v40  ;;  %2604 = vmatpush.msrb.mxu3 %v6518_v60  ;;  %2577 = vmatpush.msrb.mxu2 %v6524_v12  ;;  %v6534_v40 = vld [vmem:[#allocation12 + $0x1a0] sm:$0xff] }
 0x33c   :  { %8684 = vst [vmem:[#allocation77_spill] sm:$0xff] %v6506_v52  ;;  %v6530_v52 = vld [vmem:[#allocation12 + $0x2c8] sm:$0xff]  ;;  %2538 = vmatpush.msrb.mxu0 %v6534_v40 }
 0x33d   :  { %8685 = vst [vmem:[#allocation81_spill] sm:$0xff] %v6508_v24  ;;  %v6528_v24 = vld [vmem:[#allocation12 + $0x2c0] sm:$0xff]  ;;  %2605 = vmatpush.msrb.mxu3 %v6530_v52 }
 0x33e   :  { %8686 = vst [vmem:[#allocation78_spill] sm:$0xff] %v6516_v49  ;;  %2565 = vmatpush.msrb.mxu1 %v6528_v24  ;;  %v6536_v49 = vld [vmem:[#allocation12 + $0x1a8] sm:$0xff] }
 0x33f   :  { %8687 = vst [vmem:[#allocation84_spill] sm:$0xff] %v6518_v60  ;;  %2578 = vmatpush.msrb.mxu2 %v6536_v49  ;;  %v6540_v60 = vld [vmem:[#allocation12 + $0x2a0] sm:$0xff] }
 0x340   :  { %8688 = vst [vmem:[#allocation85_spill] sm:$0xff] %v6522_v51  ;;  %v6542_v51 = vld [vmem:[#allocation12 + $0x2a8] sm:$0xff]  ;;  %2566 = vmatpush.msrb.mxu1 %v6540_v60 }
 0x341   :  { %8689 = vst [vmem:[#allocation88_spill] sm:$0xff] %v6524_v12  ;;  %2606 = vmatpush.msrb.mxu3 %v6542_v51  ;;  %v6546_v12 = vld [vmem:[#allocation12 + $0x180] sm:$0xff] }
 0x342   :  { %8690 = vst [vmem:[#allocation89_spill] sm:$0xff] %v6528_v24  ;;  %v6548_v24 = vld [vmem:[#allocation12 + $0x188] sm:$0xff]  ;;  %2539 = vmatpush.msrb.mxu0 %v6546_v12  ;;  %2567 = vmatpush.msrb.mxu1 %v6172_v2  ;;  %v6570_v2 = vld [vmem:[#allocation12 + $0x120] sm:$0xff] }
 0x343   :  { %8691 = vst [vmem:[#allocation91_spill] sm:$0xff] %v6530_v52  ;;  %2579 = vmatpush.msrb.mxu2 %v6548_v24  ;;  %2607 = vmatpush.msrb.mxu3 %v6174_v54  ;;  %v6556_v52 = vld [vmem:[#allocation12 + $0x168] sm:$0xff] }
 0x344   :  { %8692 = vst [vmem:[#allocation90_spill] sm:$0xff] %v6536_v49  ;;  %v6554_v49 = vld [vmem:[#allocation12 + $0x160] sm:$0xff]  ;;  %2568 = vmatpush.msrb.mxu1 %v6178_v62  ;;  %v6572_v54 = vld [vmem:[#allocation12 + $0x128] sm:$0xff] }
 0x345   :  { %8693 = vst [vmem:[#allocation92_spill] sm:$0xff] %v6542_v51  ;;  %2540 = vmatpush.msrb.mxu0 %v6554_v49  ;;  %2580 = vmatpush.msrb.mxu2 %v6556_v52  ;;  %v6562_v51 = vld [vmem:[#allocation12 + $0x140] sm:$0xff] }
 0x346   :  { %8694 = vst [vmem:[#allocation75_spill] sm:$0xff] %v6546_v12  ;;  %2608 = vmatpush.msrb.mxu3 %v6180_v44  ;;  %v6564_v12 = vld [vmem:[#allocation12 + $0x148] sm:$0xff]  ;;  %2569 = vmatpush.msrb.mxu1 %v6184_v27  ;;  %v6578_v62 = vld [vmem:[#allocation12 + $0x100] sm:$0xff] }
 0x347   :  { %2541 = vmatpush.msrb.mxu0 %v6562_v51  ;;  %2581 = vmatpush.msrb.mxu2 %v6564_v12  ;;  %v6580_v44 = vld [vmem:[#allocation12 + $0x108] sm:$0xff]  ;;  %v6586_v27 = vld [vmem:[#allocation12 + $0xe0] sm:$0xff] }
 0x348   :  { %2609 = vmatpush.msrb.mxu3 %v6186_v42  ;;  %2570 = vmatpush.msrb.mxu1 %v6190_v38  ;;  %v6588_v42 = vld [vmem:[#allocation12 + $0xe8] sm:$0xff]  ;;  %v6594_v38 = vld [vmem:[#allocation12 + $0xc0] sm:$0xff] }
 0x349   :  { %2542 = vmatpush.msrb.mxu0 %v6570_v2  ;;  %2582 = vmatpush.msrb.mxu2 %v6572_v54 }
 0x34a   :  { %2610 = vmatpush.msrb.mxu3 %v6192_v59  ;;  %2571 = vmatpush.msrb.mxu1 %v6196_v57  ;;  %v6596_v59 = vld [vmem:[#allocation12 + $0xc8] sm:$0xff]  ;;  %v6602_v57 = vld [vmem:[#allocation12 + $0xa0] sm:$0xff] }
 0x34b   :  { %2543 = vmatpush.msrb.mxu0 %v6578_v62  ;;  %2583 = vmatpush.msrb.mxu2 %v6580_v44 }
 0x34c   :  { %2611 = vmatpush.msrb.mxu3 %v6198_v48  ;;  %2636 = vmatpush.msra.mxu1 %v6202_v45  ;;  %v6604_v48 = vld [vmem:[#allocation12 + $0xa8] sm:$0xff]  ;;  %v6610_v45 = vld [vmem:[#allocation12 + $0x80] sm:$0xff] }
 0x34d   :  { %2544 = vmatpush.msrb.mxu0 %v6586_v27  ;;  %2584 = vmatpush.msrb.mxu2 %v6588_v42 }
 0x34e   :  { %2676 = vmatpush.msra.mxu3 %v6204_v1  ;;  %2637 = vmatpush.msra.mxu1 %v6208_v36  ;;  %v6612_v1 = vld [vmem:[#allocation12 + $0x88] sm:$0xff]  ;;  %v6618_v36 = vld [vmem:[#allocation12 + $0x60] sm:$0xff] }
 0x34f   :  { %2545 = vmatpush.msrb.mxu0 %v6594_v38  ;;  %2585 = vmatpush.msrb.mxu2 %v6596_v59 }
 0x350   :  { %2677 = vmatpush.msra.mxu3 %v6210_v35  ;;  %2638 = vmatpush.msra.mxu1 %v6214_v56  ;;  %v6620_v35 = vld [vmem:[#allocation12 + $0x68] sm:$0xff]  ;;  %v6626_v56 = vld [vmem:[#allocation12 + $0x40] sm:$0xff] }
 0x351   :  { %2546 = vmatpush.msrb.mxu0 %v6602_v57  ;;  %2586 = vmatpush.msrb.mxu2 %v6604_v48 }
 0x352   :  { %2678 = vmatpush.msra.mxu3 %v6216_v0  ;;  %2639 = vmatpush.msra.mxu1 %v6220_v30  ;;  %v6628_v0 = vld [vmem:[#allocation12 + $0x48] sm:$0xff]  ;;  %v6634_v30 = vld [vmem:[#allocation12 + $0x20] sm:$0xff] }
 0x353   :  { %2547 = vmatpush.msrb.mxu0 %v6610_v45  ;;  %2587 = vmatpush.msrb.mxu2 %v6612_v1  ;;  %8695 = vst [vmem:[#allocation76_spill] sm:$0xff] %v6628_v0 }
 0x354   :  { %2679 = vmatpush.msra.mxu3 %v6222_v34  ;;  %2640 = vmatpush.msra.mxu1 %v6226_v25  ;;  %8696 = vst [vmem:[#allocation79_spill] sm:$0xff] %v6634_v30  ;;  %v6636_v34 = vld [vmem:[#allocation12 + $0x28] sm:$0xff]  ;;  %v6642_v25 = vld [vmem:[#allocation12] sm:$0xff] }
 0x355   :  { %2548 = vmatpush.msrb.mxu0 %v6618_v36  ;;  %2588 = vmatpush.msrb.mxu2 %v6620_v35  ;;  %8697 = vst [vmem:[#allocation80_spill] sm:$0xff] %v6636_v34 }
 0x356   :  { %2680 = vmatpush.msra.mxu3 %v6228_v14  ;;  %2641 = vmatpush.msra.mxu1 %v6232_v6  ;;  %8698 = vst [vmem:[#allocation82_spill] sm:$0xff] %v6642_v25  ;;  %v6644_v14 = vld [vmem:[#allocation12 + $0x8] sm:$0xff]  ;;  %v6648_v6 = vld [vmem:[#allocation12 + $0x1f0] sm:$0xff] }
 0x357   :  { %2549 = vmatpush.msrb.mxu0 %v6626_v56  ;;  %2589 = vmatpush.msrb.mxu2 %v6628_v0  ;;  %8699 = vst [vmem:[#allocation83_spill] sm:$0xff] %v6644_v14 }
 0x358   :  { %2681 = vmatpush.msra.mxu3 %v6234_v31  ;;  %2642 = vmatpush.msra.mxu1 %v6238_v22  ;;  %8700 = vst [vmem:[#allocation86_spill] sm:$0xff] %v6648_v6  ;;  %v6650_v31 = vld [vmem:[#allocation12 + $0x1f8] sm:$0xff] }
 0x359   :  { %2550 = vmatpush.msrb.mxu0 %v6634_v30  ;;  %2590 = vmatpush.msrb.mxu2 %v6636_v34  ;;  %8701 = vst [vmem:[#allocation87_spill] sm:$0xff] %v6650_v31  ;;  %v6657_v34 = vld [vmem:[#allocation12 + $0x1d0] sm:$0xff] }
 0x35a   :  { %2682 = vmatpush.msra.mxu3 %v6240_v37  ;;  %2643 = vmatpush.msra.mxu1 %v6245_v9  ;;  %8702 = vst [vmem:[#allocation93_spill] sm:$0xff] %v6657_v34  ;;  %v6665_v9 = vld [vmem:[#allocation12 + $0x1b0] sm:$0xff] }
 0x35b   :  { %2551 = vmatpush.msrb.mxu0 %v6642_v25  ;;  %2591 = vmatpush.msrb.mxu2 %v6644_v14  ;;  %v6659_v25 = vld [vmem:[#allocation12 + $0x1d8] sm:$0xff]  ;;  %8704 = vst [vmem:[#allocation95_spill] sm:$0xff] %v6665_v9 }
 0x35c   :  { %2683 = vmatpush.msra.mxu3 %v6247_v15  ;;  %8703 = vst [vmem:[#allocation94_spill] sm:$0xff] %v6659_v25  ;;  %2644 = vmatpush.msra.mxu1 %v6251_v19  ;;  %v6667_v15 = vld [vmem:[#allocation12 + $0x1b8] sm:$0xff]  ;;  %v6673_v19 = vld [vmem:[#allocation12 + $0x190] sm:$0xff] }
 0x35d   :  { %2616 = vmatpush.msra.mxu0 %v6648_v6  ;;  %2656 = vmatpush.msra.mxu2 %v6650_v31  ;;  %8705 = vst [vmem:[#allocation96_spill] sm:$0xff] %v6667_v15  ;;  %v6764_v31 = vld [vmem:[#allocation12 + $0x58] sm:$0xff] }
 0x35e   :  { %2684 = vmatpush.msra.mxu3 %v6253_v17  ;;  %2645 = vmatpush.msra.mxu1 %v6257_v21  ;;  %8706 = vst [vmem:[#allocation97_spill] sm:$0xff] %v6673_v19  ;;  %v6675_v17 = vld [vmem:[#allocation12 + $0x198] sm:$0xff]  ;;  %v6682_v21 = vld [vmem:[#allocation12 + $0x170] sm:$0xff] }
 0x35f   :  { %2617 = vmatpush.msra.mxu0 %v6657_v34  ;;  %2657 = vmatpush.msra.mxu2 %v6659_v25  ;;  %8707 = vst [vmem:[#allocation98_spill] sm:$0xff] %v6675_v17  ;;  %v2225_v34 = vld [vmem:[#allocation5] sm:$0x3] }
 0x360   :  { %2685 = vmatpush.msra.mxu3 %v6259_v28  ;;  %2646 = vmatpush.msra.mxu1 %v6264_v3  ;;  %8708 = vst [vmem:[#allocation17_spill] sm:$0xff] %v6682_v21  ;;  %v6684_v28 = vld [vmem:[#allocation12 + $0x178] sm:$0xff] }
 0x361   :  { %2618 = vmatpush.msra.mxu0 %v6665_v9  ;;  %2658 = vmatpush.msra.mxu2 %v6667_v15  ;;  %8709 = vst [vmem:[#allocation99_spill] sm:$0xff] %v6684_v28  ;;  %v8711_v15 = vld [vmem:[#allocation21_spill] sm:$0xff]  ;;  %v6688_v9 = vld [vmem:[#allocation12 + $0x270] sm:$0xff]  ;;  %v6690_v3 = vld [vmem:[#allocation12 + $0x278] sm:$0xff] }
 0x362   :  { %2686 = vmatpush.msra.mxu3 %v6266_v8  ;;  %8712 = vst [vmem:[#allocation100_spill] sm:$0xff] %v6688_v9  ;;  %v6770_v6 = vld [vmem:[#allocation12 + $0x38] sm:$0xff] }
 0x363   :  { %2619 = vmatpush.msra.mxu0 %v6673_v19  ;;  %2659 = vmatpush.msra.mxu2 %v6675_v17  ;;  %8713 = vst [vmem:[#allocation101_spill] sm:$0xff] %v6690_v3  ;;  %v8716_v17 = vld [vmem:[#allocation48_spill] sm:$0xff] }
 0x364   :  { %2687 = vmatpush.msra.mxu3 %v8711_v15  ;;  %v6701_v15 = vld [vmem:[#allocation12 + $0x250] sm:$0xff]  ;;  %8739 = vst [vmem:[#allocation103_spill] sm:$0xff] %v6764_v31 }
 0x365   :  { %2620 = vmatpush.msra.mxu0 %v6682_v21  ;;  %2660 = vmatpush.msra.mxu2 %v6684_v28  ;;  %8717 = vst [vmem:[#allocation108_spill] sm:$0xff] %v6701_v15  ;;  %v6709_v28 = vld [vmem:[#allocation12 + $0x138] sm:$0xff] }
 0x366   :  { %2688 = vmatpush.msra.mxu3 %v6690_v3  ;;  %8720 = vst [vmem:[#allocation113_spill] sm:$0xff] %v6709_v28  ;;  %v6715_v3 = vld [vmem:[#allocation12 + $0x238] sm:$0xff] }
 0x367   :  { %8722 = vst [vmem:[#allocation115_spill] sm:$0xff] %v6715_v3 }
 0x368   :  { %8741 = vst [vmem:[#allocation107_spill] sm:$0xff] %v6770_v6 }
 0x37b   :  { %v2089_v22 = vpop.f32.mrf.mxu1 }
 0x38c   :  { %v2069_v0 = vpop.f32.mrf.mxu0 }
 0x38d   :  { %v2070_v37 = vadd.f32 %v2069_v0, %v8621_v4 }
 0x38f   :  { %v2090_v14 = vadd.f32 %v2089_v22, %v2070_v37  ;;  %v2129_v37 = vpop.f32.mrf.mxu3 }
 0x391   :  { %v2212_v0 = vmul.f32 0.5, %v2090_v14  ;;  %v8710_v14 = vld [vmem:[#allocation22_spill] sm:$0xff] }
 0x392   :  { %v2109_v22 = vpop.f32.mrf.mxu2  ;;  %2647 = vmatpush.msra.mxu1 %v8710_v14  ;;  %v6703_v14 = vld [vmem:[#allocation12 + $0x258] sm:$0xff] }
 0x393   :  { %v2110_v4 = vadd.f32 %v2109_v22, %v8622_v50  ;;  %4466 = vtanh.f32 %v2212_v0  ;;  %v6694_v22 = vld [vmem:[#allocation12 + $0x150] sm:$0xff]  ;;  %v6696_v50 = vld [vmem:[#allocation12 + $0x158] sm:$0xff]  ;;  %8718 = vst [vmem:[#allocation109_spill] sm:$0xff] %v6703_v14  ;;  %2689 = vmatpush.msra.mxu3 %v6703_v14 }
 0x394   :  { %8714 = vst [vmem:[#allocation104_spill] sm:$0xff] %v6694_v22  ;;  %2648 = vmatpush.msra.mxu1 %v6688_v9  ;;  %2621 = vmatpush.msra.mxu0 %v6694_v22  ;;  %v6721_v9 = vld [vmem:[#allocation12 + $0x118] sm:$0xff] }
 0x395   :  { %v2130_v8 = vadd.f32 %v2129_v37, %v2110_v4  ;;  %v2149_v25 = vpop.f32.mrf.mxu0  ;;  %8715 = vst [vmem:[#allocation105_spill] sm:$0xff] %v6696_v50  ;;  %v2169_v4 = vpop.f32.mrf.mxu1  ;;  %2661 = vmatpush.msra.mxu2 %v6696_v50  ;;  %v6707_v37 = vld [vmem:[#allocation12 + $0x130] sm:$0xff]  ;;  %2690 = vmatpush.msra.mxu3 %v6715_v3  ;;  %v6758_v22 = vld [vmem:[#allocation12 + $0x78] sm:$0xff] }
 0x396   :  { %v2150_v19 = vadd.f32 %v2149_v25, %v8716_v17  ;;  %8719 = vst [vmem:[#allocation112_spill] sm:$0xff] %v6707_v37  ;;  %2649 = vmatpush.msra.mxu1 %v6701_v15  ;;  %v6713_v25 = vld [vmem:[#allocation12 + $0x230] sm:$0xff]  ;;  %2622 = vmatpush.msra.mxu0 %v6707_v37  ;;  %v6733_v17 = vld [vmem:[#allocation12 + $0xf8] sm:$0xff] }
 0x397   :  { %v2216_v0 = vmul.f32 0.5, %v2130_v8  ;;  %8721 = vst [vmem:[#allocation114_spill] sm:$0xff] %v6713_v25  ;;  %2662 = vmatpush.msra.mxu2 %v6709_v28  ;;  %v6719_v8 = vld [vmem:[#allocation12 + $0x110] sm:$0xff]  ;;  %v2209_v3 = vpop.f32.mrf.mxu3 }
 0x398   :  { %v2170_v21 = vadd.f32 %v2169_v4, %v2150_v19  ;;  %8723 = vst [vmem:[#allocation116_spill] sm:$0xff] %v6719_v8  ;;  %2650 = vmatpush.msra.mxu1 %v6713_v25  ;;  %v6725_v19 = vld [vmem:[#allocation12 + $0x210] sm:$0xff]  ;;  %v6727_v4 = vld [vmem:[#allocation12 + $0x218] sm:$0xff]  ;;  %2623 = vmatpush.msra.mxu0 %v6719_v8 }
 0x399   :  { %4468 = vtanh.f32 %v2216_v0  ;;  %8724 = vst [vmem:[#allocation117_spill] sm:$0xff] %v6721_v9  ;;  %v4467_v14 = vpop.eup %4466  ;;  %2663 = vmatpush.msra.mxu2 %v6721_v9  ;;  %v6731_v0 = vld [vmem:[#allocation12 + $0xf0] sm:$0xff]  ;;  %2691 = vmatpush.msra.mxu3 %v6727_v4  ;;  %v6742_v25 = vld [vmem:[#allocation12 + $0xd8] sm:$0xff] }
 0x39a   :  { %8725 = vst [vmem:[#allocation118_spill] sm:$0xff] %v6725_v19  ;;  %4470 = vtanh.f32 %v2170_v21  ;;  %v8729_v28 = vld [vmem:[#allocation19_spill] sm:$0xff]  ;;  %2651 = vmatpush.msra.mxu1 %v6725_v19  ;;  %2624 = vmatpush.msra.mxu0 %v6731_v0  ;;  %v2214_v9 = vmul.f32 0.5, %v4467_v14 }
 0x39b   :  { %8726 = vst [vmem:[#allocation119_spill] sm:$0xff] %v6727_v4  ;;  %v2189_v15 = vpop.f32.mrf.mxu2  ;;  %2664 = vmatpush.msra.mxu2 %v6733_v17  ;;  %v6740_v21 = vld [vmem:[#allocation12 + $0xd0] sm:$0xff]  ;;  %v6748_v19 = vld [vmem:[#allocation12 + $0xb8] sm:$0xff] }
 0x39c   :  { %8727 = vst [vmem:[#allocation120_spill] sm:$0xff] %v6731_v0  ;;  %v2190_v37 = vadd.f32 %v2189_v15, %v8729_v28  ;;  %2625 = vmatpush.msra.mxu0 %v6740_v21  ;;  %v6746_v15 = vld [vmem:[#allocation12 + $0xb0] sm:$0xff]  ;;  %v6754_v14 = vld [vmem:[#allocation12 + $0x98] sm:$0xff] }
 0x39d   :  { %8728 = vst [vmem:[#allocation121_spill] sm:$0xff] %v6733_v17  ;;  %2665 = vmatpush.msra.mxu2 %v6742_v25  ;;  %v6752_v17 = vld [vmem:[#allocation12 + $0x90] sm:$0xff] }
 0x39e   :  { %8730 = vst [vmem:[#allocation122_spill] sm:$0xff] %v6740_v21  ;;  %v2210_v8 = vadd.f32 %v2209_v3, %v2190_v37  ;;  %2626 = vmatpush.msra.mxu0 %v6746_v15  ;;  %v2215_v3 = vadd.f32 0.5, %v2214_v9  ;;  %v2339_v21 = vpop.f32.mrf.mxu1 }
 0x39f   :  { %8731 = vst [vmem:[#allocation123_spill] sm:$0xff] %v6742_v25  ;;  %v4469_v50 = vpop.eup %4468  ;;  %2666 = vmatpush.msra.mxu2 %v6748_v19  ;;  %v6756_v25 = vld [vmem:[#allocation12 + $0x70] sm:$0xff] }
 0x3a0   :  { %8732 = vst [vmem:[#allocation124_spill] sm:$0xff] %v6746_v15  ;;  %v2218_v4 = vmul.f32 0.5, %v4469_v50  ;;  %v2221_v28 = vmul.f32 0.5, %v2210_v8  ;;  %v4471_v0 = vpop.eup %4470  ;;  %2627 = vmatpush.msra.mxu0 %v6752_v17  ;;  %v6762_v15 = vld [vmem:[#allocation12 + $0x50] sm:$0xff] }
 0x3a1   :  { %8733 = vst [vmem:[#allocation125_spill] sm:$0xff] %v6748_v19  ;;  %2667 = vmatpush.msra.mxu2 %v6754_v14  ;;  %v2227_v8 = vmul.f32 %v4471_v0, %v2215_v3  ;;  %v2234_v19 = vld [vmem:[#allocation6 + $0x20] sm:$0x3]  ;;  %v6774_v0 = vld [vmem:[#allocation12 + $0x10] sm:$0xff]  ;;  %v6776_v3 = vld [vmem:[#allocation12 + $0x18] sm:$0xff] }
 0x3a2   :  { %8734 = vst [vmem:[#allocation126_spill] sm:$0xff] %v6752_v17  ;;  %v2219_v37 = vadd.f32 0.5, %v2218_v4  ;;  %4472 = vtanh.f32 %v2221_v28  ;;  %v2383_v9 = vadd.f32 %v2339_v21, %v2234_v19  ;;  %2628 = vmatpush.msra.mxu0 %v6756_v25  ;;  %v6768_v4 = vld [vmem:[#allocation12 + $0x30] sm:$0xff] }
 0x3a3   :  { %8735 = vst [vmem:[#allocation127_spill] sm:$0xff] %v6754_v14  ;;  %2668 = vmatpush.msra.mxu2 %v6758_v22  ;;  %v2235_v14 = vld [vmem:[#allocation6 + $0x28] sm:$0x3] }
 0x3a4   :  { %8736 = vst [vmem:[#allocation18_spill] sm:$0xff] %v6756_v25  ;;  %v2226_v50 = vmul.f32 %v2225_v34, %v2219_v37  ;;  %2629 = vmatpush.msra.mxu0 %v6762_v15  ;;  %v2390_v21 = vmul.f32 0.5, %v2383_v9 }
 0x3a5   :  { %8737 = vst [vmem:[#allocation20_spill] sm:$0xff] %v6758_v22  ;;  %2669 = vmatpush.msra.mxu2 %v6764_v31  ;;  %v2379_v22 = vpop.f32.mrf.mxu3 }
 0x3a6   :  { %8738 = vst [vmem:[#allocation102_spill] sm:$0xff] %v6762_v15  ;;  %v2228_v28 = vadd.f32 %v2227_v8, %v2226_v50  ;;  %2630 = vmatpush.msra.mxu0 %v6768_v4  ;;  %v2233_v50 = vld [vmem:[#allocation6 + $0x8] sm:$0x3] }
 0x3a7   :  { %8740 = vst [vmem:[#allocation106_spill] sm:$0xff] %v6768_v4  ;;  %2670 = vmatpush.msra.mxu2 %v6770_v6 }
 0x3a8   :  { %v4473_v34 = vpop.eup %4472  ;;  %4474 = vtanh.f32 %v2228_v28  ;;  %2231 = vst [vmem:[#allocation5] sm:$0x3] %v2228_v28  ;;  %2631 = vmatpush.msra.mxu0 %v6774_v0 }
 0x3a9   :  { %8742 = vst [vmem:[#allocation110_spill] sm:$0xff] %v6774_v0  ;;  %v2223_v19 = vmul.f32 0.5, %v4473_v34  ;;  %2671 = vmatpush.msra.mxu2 %v6776_v3  ;;  %4476 = vtanh.f32 %v2390_v21  ;;  %v2236_v34 = vld [vmem:[#allocation6 + $0x38] sm:$0x3] }
 0x3aa   :  { %8743 = vst [vmem:[#allocation111_spill] sm:$0xff] %v6776_v3  ;;  %v2385_v9 = vadd.f32 %v2379_v22, %v2236_v34  ;;  %v2399_v22 = vld [vmem:[#allocation3] sm:$0x3]  ;;  %v8757_v34 = vld [vmem:[#allocation35_spill] sm:$0xff] }
 0x3ab   :  { %v2224_v37 = vadd.f32 0.5, %v2223_v19 }
 0x3ac   :  { %v2395_v30 = vmul.f32 0.5, %v2385_v9  ;;  %v8758_v9 = vld [vmem:[#allocation37_spill] sm:$0xff] }
 0x3ad   :  { %v2319_v8 = vpop.f32.mrf.mxu0 }
 0x3ae   :  { %v4475_v31 = vpop.eup %4474  ;;  %v2382_v28 = vadd.f32 %v2319_v8, %v2233_v50  ;;  %v8755_v8 = vld [vmem:[#allocation33_spill] sm:$0xff] }
 0x3af   :  { %v2230_v15 = vmul.f32 %v4475_v31, %v2224_v37  ;;  %v4477_v4 = vpop.eup %4476  ;;  %v6832_v37 = vld [vmem:[#allocation10 + $0x120] sm:$0xff] }
 0x3b0   :  { %v2386_v25 = vmul.f32 0.5, %v2382_v28  ;;  %v2392_v0 = vmul.f32 0.5, %v4477_v4  ;;  %v6814_v4 = vld [vmem:[#allocation10 + $0x180] sm:$0xff] }
 0x3b1   :  { %2232 = vst [vmem:[#allocation4] sm:$0x3] %v2230_v15  ;;  %v8756_v28 = vld [vmem:[#allocation36_spill] sm:$0xff] }
 0x3b2   :  { %4478 = vtanh.f32 %v2386_v25  ;;  %v2393_v50 = vadd.f32 0.5, %v2392_v0  ;;  %v8751_v0 = vld [vmem:[#allocation29_spill] sm:$0xff] }
 0x3b4   :  { %v2359_v6 = vpop.f32.mrf.mxu2  ;;  %v2400_v25 = vmul.f32 %v2399_v22, %v2393_v50  ;;  %v8762_v50 = vld [vmem:[#allocation41_spill] sm:$0xff]  ;;  %v8764_v22 = vld [vmem:[#allocation43_spill] sm:$0xff] }
 0x3b5   :  { %v2384_v17 = vadd.f32 %v2359_v6, %v2235_v14 }
 0x3b7   :  { %4480 = vtanh.f32 %v2384_v17 }
 0x3b8   :  { %v4479_v19 = vpop.eup %4478  ;;  %v2407_v21 = vld [vmem:[#allocation4] sm:$0x3]  ;;  %4482 = vtanh.f32 %v2395_v30  ;;  %v6798_v30 = vld [vmem:[#allocation10 + $0x1e0] sm:$0xff] }
 0x3b9   :  { %v2388_v3 = vmul.f32 0.5, %v4479_v19  ;;  %2572 = vmatmul.f32.vlgmr.msrb.gmra.mxu1 %v2407_v21  ;;  %2612 = vmatmul.f32.vlgmr.msrb.gmra.mxu3 %v2407_v21  ;;  %v8759_v19 = vld [vmem:[#allocation38_spill] sm:$0xff] }
 0x3ba   :  { %2806 = vmatpush.msrb.mxu1 %v6286_v16  ;;  %2846 = vmatpush.msrb.mxu3 %v6288_v32  ;;  %v8744_v32 = vld [vmem:[#allocation24_spill] sm:$0xff] }
 0x3bb   :  { %v2389_v31 = vadd.f32 0.5, %v2388_v3  ;;  %v6822_v3 = vld [vmem:[#allocation10 + $0x170] sm:$0xff] }
 0x3bc   :  { %2807 = vmatpush.msrb.mxu1 %v6290_v33  ;;  %2847 = vmatpush.msrb.mxu3 %v6292_v5  ;;  %v8745_v33 = vld [vmem:[#allocation23_spill] sm:$0xff] }
 0x3bd   :  { %v4481_v6 = vpop.eup %4480 }
 0x3be   :  { %v2401_v17 = vmul.f32 %v4481_v6, %v2389_v31  ;;  %2808 = vmatpush.msrb.mxu1 %v6296_v29  ;;  %2848 = vmatpush.msrb.mxu3 %v6298_v55  ;;  %v4483_v15 = vpop.eup %4482  ;;  %v8746_v55 = vld [vmem:[#allocation25_spill] sm:$0xff]  ;;  %v8763_v31 = vld [vmem:[#allocation42_spill] sm:$0xff] }
 0x3bf   :  { %v2397_v16 = vmul.f32 0.5, %v4483_v15  ;;  %v8767_v15 = vld [vmem:[#allocation60_spill] sm:$0xff] }
 0x3c0   :  { %v2402_v14 = vadd.f32 %v2401_v17, %v2400_v25  ;;  %2809 = vmatpush.msrb.mxu1 %v6302_v26  ;;  %2849 = vmatpush.msrb.mxu3 %v6304_v11  ;;  %v8747_v26 = vld [vmem:[#allocation26_spill] sm:$0xff]  ;;  %v8765_v25 = vld [vmem:[#allocation59_spill] sm:$0xff]  ;;  %v8766_v17 = vld [vmem:[#allocation44_spill] sm:$0xff] }
 0x3c1   :  { %2652 = vmatmul.f32.vlgmr.msra.gmra.mxu1 %v2407_v21  ;;  %2692 = vmatmul.f32.vlgmr.msra.gmra.mxu3 %v2407_v21  ;;  %v2398_v5 = vadd.f32 0.5, %v2397_v16  ;;  %v8760_v21 = vld [vmem:[#allocation39_spill] sm:$0xff] }
 0x3c2   :  { %4484 = vtanh.f32 %v2402_v14  ;;  %2405 = vst [vmem:[#allocation3] sm:$0x3] %v2402_v14  ;;  %2810 = vmatpush.msrb.mxu1 %v6308_v39  ;;  %2850 = vmatpush.msrb.mxu3 %v6310_v13  ;;  %v8748_v39 = vld [vmem:[#allocation28_spill] sm:$0xff]  ;;  %v8768_v14 = vld [vmem:[#allocation45_spill] sm:$0xff]  ;;  %v8770_v16 = vld [vmem:[#allocation55_spill] sm:$0xff] }
 0x3c3   :  { %v6802_v13 = vld [vmem:[#allocation10 + $0x1c0] sm:$0xff] }
 0x3c4   :  { %2811 = vmatpush.msrb.mxu1 %v8744_v32  ;;  %2851 = vmatpush.msrb.mxu3 %v8745_v33  ;;  %v8771_v32 = vld [vmem:[#allocation49_spill] sm:$0xff]  ;;  %v8772_v33 = vld [vmem:[#allocation67_spill] sm:$0xff] }
 0x3c6   :  { %2812 = vmatpush.msrb.mxu1 %v6320_v47  ;;  %2852 = vmatpush.msrb.mxu3 %v6322_v58  ;;  %v8749_v47 = vld [vmem:[#allocation27_spill] sm:$0xff]  ;;  %v6808_v58 = vld [vmem:[#allocation10 + $0x1a0] sm:$0xff] }
 0x3c8   :  { %v4485_v29 = vpop.eup %4484  ;;  %2813 = vmatpush.msrb.mxu1 %v8746_v55  ;;  %2853 = vmatpush.msrb.mxu3 %v8747_v26  ;;  %v8775_v55 = vld [vmem:[#allocation50_spill] sm:$0xff]  ;;  %v8776_v26 = vld [vmem:[#allocation68_spill] sm:$0xff] }
 0x3c9   :  { %v2404_v11 = vmul.f32 %v4485_v29, %v2398_v5  ;;  %v8773_v5 = vld [vmem:[#allocation62_spill] sm:$0xff]  ;;  %v8774_v29 = vld [vmem:[#allocation56_spill] sm:$0xff] }
 0x3ca   :  { %2814 = vmatpush.msrb.mxu1 %v6336_v18  ;;  %2854 = vmatpush.msrb.mxu3 %v8748_v39  ;;  %v8750_v18 = vld [vmem:[#allocation30_spill] sm:$0xff]  ;;  %v8778_v39 = vld [vmem:[#allocation57_spill] sm:$0xff] }
 0x3cb   :  { %2552 = vmatmul.f32.vlgmr.msrb.gmra.mxu0 %v2404_v11  ;;  %2406 = vst [vmem:[#allocation2] sm:$0x3] %v2404_v11  ;;  %2592 = vmatmul.f32.vlgmr.msrb.gmra.mxu2 %v2404_v11 }
 0x3cc   :  { %2786 = vmatpush.msrb.mxu0 %v6798_v30  ;;  %2826 = vmatpush.msrb.mxu2 %v8749_v47  ;;  %v8780_v47 = vld [vmem:[#allocation69_spill] sm:$0xff] }
 0x3cd   :  { %2815 = vmatpush.msrb.mxu1 %v6344_v46  ;;  %2855 = vmatpush.msrb.mxu3 %v6346_v61  ;;  %v8752_v46 = vld [vmem:[#allocation31_spill] sm:$0xff]  ;;  %v6820_v61 = vld [vmem:[#allocation10 + $0x160] sm:$0xff] }
 0x3ce   :  { %2787 = vmatpush.msrb.mxu0 %v6802_v13  ;;  %2827 = vmatpush.msrb.mxu2 %v6340_v41  ;;  %v8753_v41 = vld [vmem:[#allocation32_spill] sm:$0xff] }
 0x3cf   :  { %2816 = vmatpush.msrb.mxu1 %v6354_v10  ;;  %2856 = vmatpush.msrb.mxu3 %v8750_v18  ;;  %v6826_v10 = vld [vmem:[#allocation10 + $0x140] sm:$0xff] }
 0x3d0   :  { %2788 = vmatpush.msrb.mxu0 %v6808_v58  ;;  %2828 = vmatpush.msrb.mxu2 %v8751_v0  ;;  %v8781_v18 = vld [vmem:[#allocation64_spill] sm:$0xff]  ;;  %v8782_v0 = vld [vmem:[#allocation58_spill] sm:$0xff] }
 0x3d1   :  { %2817 = vmatpush.msrb.mxu1 %v6364_v23  ;;  %2857 = vmatpush.msrb.mxu3 %v8752_v46  ;;  %v8754_v23 = vld [vmem:[#allocation34_spill] sm:$0xff]  ;;  %v8783_v46 = vld [vmem:[#allocation52_spill] sm:$0xff] }
 0x3d2   :  { %2789 = vmatpush.msrb.mxu0 %v6814_v4  ;;  %2829 = vmatpush.msrb.mxu2 %v8753_v41  ;;  %v2721_v6 = vld [vmem:[#allocation2] sm:$0x3]  ;;  %v8784_v41 = vld [vmem:[#allocation70_spill] sm:$0xff] }
 0x3d3   :  { %2632 = vmatmul.f32.vlgmr.msra.gmra.mxu0 %v2404_v11  ;;  %2672 = vmatmul.f32.vlgmr.msra.gmra.mxu2 %v2404_v11  ;;  %v8777_v11 = vld [vmem:[#allocation63_spill] sm:$0xff] }
 0x3d4   :  { %2790 = vmatpush.msrb.mxu0 %v6820_v61  ;;  %2830 = vmatpush.msrb.mxu2 %v6822_v3 }
 0x3d5   :  { %2818 = vmatpush.msrb.mxu1 %v6374_v7  ;;  %2858 = vmatpush.msrb.mxu3 %v8754_v23  ;;  %v8761_v7 = vld [vmem:[#allocation40_spill] sm:$0xff]  ;;  %v8785_v23 = vld [vmem:[#allocation65_spill] sm:$0xff] }
 0x3d6   :  { %2791 = vmatpush.msrb.mxu0 %v6826_v10  ;;  %2831 = vmatpush.msrb.mxu2 %v8755_v8  ;;  %v8786_v8 = vld [vmem:[#allocation71_spill] sm:$0xff] }
 0x3d7   :  { %2819 = vmatpush.msrb.mxu1 %v8756_v28  ;;  %2859 = vmatpush.msrb.mxu3 %v8757_v34  ;;  %v8787_v28 = vld [vmem:[#allocation53_spill] sm:$0xff] }
 0x3d8   :  { %2792 = vmatpush.msrb.mxu0 %v6832_v37  ;;  %2832 = vmatpush.msrb.mxu2 %v8758_v9  ;;  %v8788_v34 = vld [vmem:[#allocation73_spill] sm:$0xff]  ;;  %v8789_v9 = vld [vmem:[#allocation54_spill] sm:$0xff] }
 0x3d9   :  { %2820 = vmatpush.msrb.mxu1 %v8759_v19  ;;  %2860 = vmatpush.msrb.mxu3 %v8760_v21  ;;  %v8790_v19 = vld [vmem:[#allocation72_spill] sm:$0xff]  ;;  %v8791_v21 = vld [vmem:[#allocation66_spill] sm:$0xff] }
 0x3da   :  { %2793 = vmatpush.msrb.mxu0 %v6398_v53  ;;  %2833 = vmatpush.msrb.mxu2 %v8761_v7  ;;  %v8769_v53 = vld [vmem:[#allocation61_spill] sm:$0xff] }
 0x3db   :  { %2821 = vmatpush.msrb.mxu1 %v8762_v50  ;;  %2861 = vmatpush.msrb.mxu3 %v8763_v31  ;;  %v8792_v7 = vld [vmem:[#allocation77_spill] sm:$0xff]  ;;  %v8793_v50 = vld [vmem:[#allocation74_spill] sm:$0xff] }
 0x3dc   :  { %2794 = vmatpush.msrb.mxu0 %v8764_v22  ;;  %2822 = vmatmul.f32.vlgmr.msrb.gmra.mxu1 %v2721_v6  ;;  %v8794_v31 = vld [vmem:[#allocation81_spill] sm:$0xff]  ;;  %v8795_v22 = vld [vmem:[#allocation78_spill] sm:$0xff] }
 0x3dd   :  { %2834 = vmatpush.msrb.mxu2 %v8765_v25  ;;  %2862 = vmatmul.f32.vlgmr.msrb.gmra.mxu3 %v2721_v6  ;;  %v8796_v25 = vld [vmem:[#allocation85_spill] sm:$0xff] }
 0x3de   :  { %2795 = vmatpush.msrb.mxu0 %v8766_v17  ;;  %3062 = vmatpush.msra.mxu1 %v8767_v15  ;;  %v8797_v17 = vld [vmem:[#allocation84_spill] sm:$0xff] }
 0x3df   :  { %2835 = vmatpush.msrb.mxu2 %v8768_v14  ;;  %3102 = vmatpush.msra.mxu3 %v6425_v43  ;;  %v8779_v43 = vld [vmem:[#allocation51_spill] sm:$0xff]  ;;  %v8798_v15 = vld [vmem:[#allocation88_spill] sm:$0xff]  ;;  %v8799_v14 = vld [vmem:[#allocation89_spill] sm:$0xff] }
 0x3e0   :  { %2796 = vmatpush.msrb.mxu0 %v8769_v53  ;;  %3063 = vmatpush.msra.mxu1 %v8770_v16  ;;  %v8803_v53 = vld [vmem:[#allocation92_spill] sm:$0xff]  ;;  %v8826_v16 = vld [vmem:[#allocation121_spill] sm:$0xff] }
 0x3e1   :  { %2836 = vmatpush.msrb.mxu2 %v8771_v32  ;;  %3103 = vmatpush.msra.mxu3 %v8772_v33  ;;  %v8827_v32 = vld [vmem:[#allocation122_spill] sm:$0xff]  ;;  %v8828_v33 = vld [vmem:[#allocation123_spill] sm:$0xff] }
 0x3e2   :  { %2797 = vmatpush.msrb.mxu0 %v8773_v5  ;;  %3064 = vmatpush.msra.mxu1 %v8774_v29  ;;  %v8829_v5 = vld [vmem:[#allocation124_spill] sm:$0xff]  ;;  %v8830_v29 = vld [vmem:[#allocation125_spill] sm:$0xff] }
 0x3e3   :  { %2837 = vmatpush.msrb.mxu2 %v8775_v55  ;;  %3104 = vmatpush.msra.mxu3 %v8776_v26  ;;  %v8831_v55 = vld [vmem:[#allocation126_spill] sm:$0xff]  ;;  %v8832_v26 = vld [vmem:[#allocation127_spill] sm:$0xff] }
 0x3e4   :  { %2798 = vmatpush.msrb.mxu0 %v8777_v11  ;;  %3065 = vmatpush.msra.mxu1 %v8778_v39  ;;  %v8833_v11 = vld [vmem:[#allocation18_spill] sm:$0xff]  ;;  %v8834_v39 = vld [vmem:[#allocation20_spill] sm:$0xff] }
 0x3e5   :  { %2838 = vmatpush.msrb.mxu2 %v8779_v43  ;;  %3105 = vmatpush.msra.mxu3 %v8780_v47  ;;  %v8835_v43 = vld [vmem:[#allocation102_spill] sm:$0xff]  ;;  %v8836_v47 = vld [vmem:[#allocation103_spill] sm:$0xff] }
 0x3e6   :  { %2799 = vmatpush.msrb.mxu0 %v8781_v18  ;;  %3066 = vmatpush.msra.mxu1 %v8782_v0  ;;  %v8837_v18 = vld [vmem:[#allocation106_spill] sm:$0xff]  ;;  %v8838_v0 = vld [vmem:[#allocation107_spill] sm:$0xff] }
 0x3e7   :  { %2839 = vmatpush.msrb.mxu2 %v8783_v46  ;;  %3106 = vmatpush.msra.mxu3 %v8784_v41  ;;  %v8839_v46 = vld [vmem:[#allocation110_spill] sm:$0xff]  ;;  %v8840_v41 = vld [vmem:[#allocation111_spill] sm:$0xff] }
 0x3e8   :  { %2800 = vmatpush.msrb.mxu0 %v8785_v23  ;;  %3067 = vmatpush.msra.mxu1 %v8786_v8  ;;  %v6948_v23 = vld [vmem:[#allocation12 + $0x280] sm:$0xff]  ;;  %v6950_v8 = vld [vmem:[#allocation12 + $0x288] sm:$0xff] }
 0x3e9   :  { %2840 = vmatpush.msrb.mxu2 %v8787_v28  ;;  %3107 = vmatpush.msra.mxu3 %v8788_v34  ;;  %v6954_v28 = vld [vmem:[#allocation12 + $0x260] sm:$0xff]  ;;  %v6956_v34 = vld [vmem:[#allocation12 + $0x268] sm:$0xff] }
 0x3ea   :  { %2801 = vmatpush.msrb.mxu0 %v8789_v9  ;;  %3068 = vmatpush.msra.mxu1 %v8790_v19  ;;  %v6960_v9 = vld [vmem:[#allocation12 + $0x240] sm:$0xff]  ;;  %v6962_v19 = vld [vmem:[#allocation12 + $0x248] sm:$0xff] }
 0x3eb   :  { %2841 = vmatpush.msrb.mxu2 %v8791_v21  ;;  %2802 = vmatmul.f32.vlgmr.msrb.gmra.mxu0 %v2721_v6  ;;  %v6966_v21 = vld [vmem:[#allocation12 + $0x220] sm:$0xff] }
 0x3ec   :  { %2842 = vmatmul.f32.vlgmr.msrb.gmra.mxu2 %v2721_v6  ;;  %3108 = vmatpush.msra.mxu3 %v6500_v20  ;;  %v8800_v20 = vld [vmem:[#allocation91_spill] sm:$0xff] }
 0x3ed   :  { %3069 = vmatpush.msra.mxu1 %v6502_v63  ;;  %3042 = vmatpush.msra.mxu0 %v8792_v7  ;;  %v8801_v63 = vld [vmem:[#allocation90_spill] sm:$0xff]  ;;  %v8802_v6 = vld [vmem:[#allocation75_spill] sm:$0xff] }
 0x3ee   :  { %3109 = vmatpush.msra.mxu3 %v8793_v50  ;;  %3082 = vmatpush.msra.mxu2 %v8794_v31  ;;  %v6968_v7 = vld [vmem:[#allocation12 + $0x228] sm:$0xff]  ;;  %v6972_v50 = vld [vmem:[#allocation12 + $0x200] sm:$0xff] }
 0x3ef   :  { %3070 = vmatpush.msra.mxu1 %v8795_v22  ;;  %3043 = vmatpush.msra.mxu0 %v8796_v25  ;;  %v6974_v31 = vld [vmem:[#allocation12 + $0x208] sm:$0xff]  ;;  %v6978_v22 = vld [vmem:[#allocation12 + $0x3f0] sm:$0xff]  ;;  %v6980_v25 = vld [vmem:[#allocation12 + $0x3f8] sm:$0xff] }
 0x3f0   :  { %3110 = vmatpush.msra.mxu3 %v8797_v17  ;;  %3083 = vmatpush.msra.mxu2 %v8798_v15  ;;  %v6984_v17 = vld [vmem:[#allocation12 + $0x3d0] sm:$0xff]  ;;  %v6986_v15 = vld [vmem:[#allocation12 + $0x3d8] sm:$0xff] }
 0x3f1   :  { %3071 = vmatpush.msra.mxu1 %v8799_v14  ;;  %3044 = vmatpush.msra.mxu0 %v6534_v40  ;;  %v8809_v40 = vld [vmem:[#allocation86_spill] sm:$0xff] }
 0x3f2   :  { %3111 = vmatpush.msra.mxu3 %v8800_v20  ;;  %3084 = vmatpush.msra.mxu2 %v8801_v63  ;;  %v6990_v14 = vld [vmem:[#allocation12 + $0x3b0] sm:$0xff]  ;;  %v6992_v20 = vld [vmem:[#allocation12 + $0x3b8] sm:$0xff] }
 0x3f3   :  { %3072 = vmatpush.msra.mxu1 %v6540_v60  ;;  %3045 = vmatpush.msra.mxu0 %v8802_v6  ;;  %v8807_v60 = vld [vmem:[#allocation82_spill] sm:$0xff]  ;;  %v6998_v6 = vld [vmem:[#allocation12 + $0x398] sm:$0xff] }
 0x3f4   :  { %3112 = vmatpush.msra.mxu3 %v8803_v53  ;;  %3085 = vmatpush.msra.mxu2 %v6548_v24  ;;  %v8810_v24 = vld [vmem:[#allocation87_spill] sm:$0xff] }
 0x3f5   :  { %3046 = vmatpush.msra.mxu0 %v6554_v49  ;;  %v8804_v49 = vld [vmem:[#allocation76_spill] sm:$0xff]  ;;  %3073 = vmatpush.msra.mxu1 %v6948_v23  ;;  %v6996_v63 = vld [vmem:[#allocation12 + $0x390] sm:$0xff] }
 0x3f6   :  { %3086 = vmatpush.msra.mxu2 %v6556_v52  ;;  %v8808_v52 = vld [vmem:[#allocation83_spill] sm:$0xff]  ;;  %3113 = vmatpush.msra.mxu3 %v6950_v8 }
 0x3f7   :  { %3047 = vmatpush.msra.mxu0 %v6562_v51  ;;  %v8805_v51 = vld [vmem:[#allocation79_spill] sm:$0xff]  ;;  %3074 = vmatpush.msra.mxu1 %v6954_v28 }
 0x3f8   :  { %3087 = vmatpush.msra.mxu2 %v6564_v12  ;;  %v8806_v12 = vld [vmem:[#allocation80_spill] sm:$0xff]  ;;  %3114 = vmatpush.msra.mxu3 %v6956_v34  ;;  %v7002_v53 = vld [vmem:[#allocation12 + $0x370] sm:$0xff] }
 0x3f9   :  { %3048 = vmatpush.msra.mxu0 %v6570_v2  ;;  %v8811_v2 = vld [vmem:[#allocation93_spill] sm:$0xff]  ;;  %3075 = vmatpush.msra.mxu1 %v6960_v9 }
 0x3fa   :  { %3088 = vmatpush.msra.mxu2 %v6572_v54  ;;  %v8812_v54 = vld [vmem:[#allocation94_spill] sm:$0xff]  ;;  %3115 = vmatpush.msra.mxu3 %v6962_v19 }
 0x3fb   :  { %3049 = vmatpush.msra.mxu0 %v6578_v62  ;;  %v8813_v62 = vld [vmem:[#allocation95_spill] sm:$0xff]  ;;  %3076 = vmatpush.msra.mxu1 %v6966_v21 }
 0x3fc   :  { %3089 = vmatpush.msra.mxu2 %v6580_v44  ;;  %v8814_v44 = vld [vmem:[#allocation96_spill] sm:$0xff]  ;;  %3116 = vmatpush.msra.mxu3 %v6968_v7 }
 0x3fd   :  { %3050 = vmatpush.msra.mxu0 %v6586_v27  ;;  %v8815_v27 = vld [vmem:[#allocation97_spill] sm:$0xff]  ;;  %3077 = vmatpush.msra.mxu1 %v6972_v50 }
 0x3fe   :  { %3090 = vmatpush.msra.mxu2 %v6588_v42  ;;  %v8816_v42 = vld [vmem:[#allocation98_spill] sm:$0xff]  ;;  %3117 = vmatpush.msra.mxu3 %v6974_v31 }
 0x3ff   :  { %3051 = vmatpush.msra.mxu0 %v6594_v38  ;;  %v8817_v38 = vld [vmem:[#allocation17_spill] sm:$0xff]  ;;  %3142 = vmatpush.msrb.mxu1 %v6978_v22 }
 0x400   :  { %3091 = vmatpush.msra.mxu2 %v6596_v59  ;;  %v8818_v59 = vld [vmem:[#allocation99_spill] sm:$0xff]  ;;  %3182 = vmatpush.msrb.mxu3 %v6980_v25 }
 0x401   :  { %3052 = vmatpush.msra.mxu0 %v6602_v57  ;;  %v8819_v57 = vld [vmem:[#allocation104_spill] sm:$0xff]  ;;  %3143 = vmatpush.msrb.mxu1 %v6984_v17 }
 0x402   :  { %3092 = vmatpush.msra.mxu2 %v6604_v48  ;;  %v8820_v48 = vld [vmem:[#allocation105_spill] sm:$0xff]  ;;  %3183 = vmatpush.msrb.mxu3 %v6986_v15 }
 0x403   :  { %3053 = vmatpush.msra.mxu0 %v6610_v45  ;;  %v8821_v45 = vld [vmem:[#allocation112_spill] sm:$0xff]  ;;  %3144 = vmatpush.msrb.mxu1 %v6990_v14 }
 0x404   :  { %3093 = vmatpush.msra.mxu2 %v6612_v1  ;;  %v8822_v1 = vld [vmem:[#allocation113_spill] sm:$0xff]  ;;  %3184 = vmatpush.msrb.mxu3 %v6992_v20 }
 0x405   :  { %3054 = vmatpush.msra.mxu0 %v6618_v36  ;;  %v8823_v36 = vld [vmem:[#allocation116_spill] sm:$0xff]  ;;  %3145 = vmatpush.msrb.mxu1 %v6996_v63 }
 0x406   :  { %3094 = vmatpush.msra.mxu2 %v6620_v35  ;;  %v8824_v35 = vld [vmem:[#allocation117_spill] sm:$0xff]  ;;  %3185 = vmatpush.msrb.mxu3 %v6998_v6 }
 0x407   :  { %3055 = vmatpush.msra.mxu0 %v6626_v56  ;;  %v8825_v56 = vld [vmem:[#allocation120_spill] sm:$0xff]  ;;  %3146 = vmatpush.msrb.mxu1 %v7002_v53 }
 0x408   :  { %3095 = vmatpush.msra.mxu2 %v8804_v49  ;;  %v7004_v49 = vld [vmem:[#allocation12 + $0x378] sm:$0xff] }
 0x409   :  { %3056 = vmatpush.msra.mxu0 %v8805_v51  ;;  %3186 = vmatpush.msrb.mxu3 %v7004_v49  ;;  %v7008_v51 = vld [vmem:[#allocation12 + $0x350] sm:$0xff] }
 0x40a   :  { %3096 = vmatpush.msra.mxu2 %v8806_v12  ;;  %v7010_v12 = vld [vmem:[#allocation12 + $0x358] sm:$0xff]  ;;  %3147 = vmatpush.msrb.mxu1 %v7008_v51 }
 0x40b   :  { %3057 = vmatpush.msra.mxu0 %v8807_v60  ;;  %3187 = vmatpush.msrb.mxu3 %v7010_v12  ;;  %v7014_v60 = vld [vmem:[#allocation12 + $0x330] sm:$0xff] }
 0x40c   :  { %3097 = vmatpush.msra.mxu2 %v8808_v52  ;;  %v7016_v52 = vld [vmem:[#allocation12 + $0x338] sm:$0xff]  ;;  %3148 = vmatpush.msrb.mxu1 %v7014_v60 }
 0x40d   :  { %3122 = vmatpush.msrb.mxu0 %v8809_v40  ;;  %3188 = vmatpush.msrb.mxu3 %v7016_v52 }
 0x40e   :  { %3162 = vmatpush.msrb.mxu2 %v8810_v24 }
 0x40f   :  { %3123 = vmatpush.msrb.mxu0 %v8811_v2  ;;  %v8841_v2 = vld [vmem:[#allocation46_spill] sm:$0xff] }
 0x410   :  { %3163 = vmatpush.msrb.mxu2 %v8812_v54 }
 0x411   :  { %3124 = vmatpush.msrb.mxu0 %v8813_v62  ;;  %v7021_v62 = vld [vmem:[#allocation12 + $0x310] sm:$0xff] }
 0x412   :  { %3164 = vmatpush.msrb.mxu2 %v8814_v44  ;;  %v7023_v44 = vld [vmem:[#allocation12 + $0x318] sm:$0xff]  ;;  %3149 = vmatpush.msrb.mxu1 %v7021_v62 }
 0x413   :  { %3125 = vmatpush.msrb.mxu0 %v8815_v27  ;;  %3189 = vmatpush.msrb.mxu3 %v7023_v44 }
 0x414   :  { %3165 = vmatpush.msrb.mxu2 %v8816_v42  ;;  %v7027_v42 = vld [vmem:[#allocation12 + $0x2f0] sm:$0xff] }
 0x415   :  { %3126 = vmatpush.msrb.mxu0 %v8817_v38  ;;  %v7029_v38 = vld [vmem:[#allocation12 + $0x2f8] sm:$0xff]  ;;  %3150 = vmatpush.msrb.mxu1 %v7027_v42 }
 0x416   :  { %3166 = vmatpush.msrb.mxu2 %v8818_v59  ;;  %3190 = vmatpush.msrb.mxu3 %v7029_v38 }
 0x417   :  { %3127 = vmatpush.msrb.mxu0 %v8819_v57  ;;  %v7033_v57 = vld [vmem:[#allocation12 + $0x2d0] sm:$0xff] }
 0x418   :  { %3167 = vmatpush.msrb.mxu2 %v8820_v48  ;;  %v7035_v48 = vld [vmem:[#allocation12 + $0x2d8] sm:$0xff]  ;;  %3151 = vmatpush.msrb.mxu1 %v7033_v57 }
 0x419   :  { %3128 = vmatpush.msrb.mxu0 %v8821_v45  ;;  %3191 = vmatpush.msrb.mxu3 %v7035_v48 }
 0x41a   :  { %3168 = vmatpush.msrb.mxu2 %v8822_v1 }
 0x41b   :  { %3129 = vmatpush.msrb.mxu0 %v8823_v36  ;;  %v8842_v36 = vld [vmem:[#allocation47_spill] sm:$0xff] }
 0x41c   :  { %3169 = vmatpush.msrb.mxu2 %v8824_v35 }
 0x41d   :  { %3130 = vmatpush.msrb.mxu0 %v8825_v56  ;;  %v7040_v56 = vld [vmem:[#allocation12 + $0x2b0] sm:$0xff] }
 0x41e   :  { %3170 = vmatpush.msrb.mxu2 %v8826_v16  ;;  %v7042_v16 = vld [vmem:[#allocation12 + $0x2b8] sm:$0xff]  ;;  %3152 = vmatpush.msrb.mxu1 %v7040_v56 }
 0x41f   :  { %3131 = vmatpush.msrb.mxu0 %v8827_v32  ;;  %8843 = vst [vmem:[#allocation22_spill] sm:$0xff] %v7042_v16  ;;  %3192 = vmatpush.msrb.mxu3 %v7042_v16 }
 0x420   :  { %3171 = vmatpush.msrb.mxu2 %v8828_v33 }
 0x421   :  { %3132 = vmatpush.msrb.mxu0 %v8829_v5  ;;  %v8844_v5 = vld [vmem:[#allocation48_spill] sm:$0xff] }
 0x422   :  { %3172 = vmatpush.msrb.mxu2 %v8830_v29 }
 0x423   :  { %3133 = vmatpush.msrb.mxu0 %v8831_v55  ;;  %v7047_v55 = vld [vmem:[#allocation12 + $0x290] sm:$0xff] }
 0x424   :  { %3173 = vmatpush.msrb.mxu2 %v8832_v26  ;;  %8845 = vst [vmem:[#allocation21_spill] sm:$0xff] %v7047_v55  ;;  %v7049_v26 = vld [vmem:[#allocation12 + $0x298] sm:$0xff]  ;;  %3153 = vmatpush.msrb.mxu1 %v7047_v55 }
 0x425   :  { %3134 = vmatpush.msrb.mxu0 %v8833_v11  ;;  %8846 = vst [vmem:[#allocation24_spill] sm:$0xff] %v7049_v26  ;;  %3193 = vmatpush.msrb.mxu3 %v7049_v26  ;;  %v2718_v26 = vld [vmem:[#allocation6 + $0x20] sm:$0xc] }
 0x426   :  { %3174 = vmatpush.msrb.mxu2 %v8834_v39 }
 0x427   :  { %3135 = vmatpush.msrb.mxu0 %v8835_v43 }
 0x428   :  { %3175 = vmatpush.msrb.mxu2 %v8836_v47  ;;  %v8847_v47 = vld [vmem:[#allocation100_spill] sm:$0xff] }
 0x429   :  { %3136 = vmatpush.msrb.mxu0 %v8837_v18  ;;  %3154 = vmatpush.msrb.mxu1 %v8847_v47  ;;  %v8848_v18 = vld [vmem:[#allocation101_spill] sm:$0xff] }
 0x42a   :  { %3176 = vmatpush.msrb.mxu2 %v8838_v0  ;;  %3194 = vmatpush.msrb.mxu3 %v8848_v18 }
 0x42b   :  { %3137 = vmatpush.msrb.mxu0 %v8839_v46  ;;  %v8849_v46 = vld [vmem:[#allocation108_spill] sm:$0xff] }
 0x42c   :  { %3177 = vmatpush.msrb.mxu2 %v8840_v41  ;;  %3155 = vmatpush.msrb.mxu1 %v8849_v46  ;;  %v8850_v41 = vld [vmem:[#allocation109_spill] sm:$0xff] }
 0x42d   :  { %3195 = vmatpush.msrb.mxu3 %v8850_v41  ;;  %v2709_v41 = vld [vmem:[#allocation5] sm:$0x3] }
 0x436   :  { %v2573_v40 = vpop.f32.mrf.mxu1 }
 0x43c   :  { %v2613_v45 = vpop.f32.mrf.mxu3 }
 0x43e   :  { %v2653_v11 = vpop.f32.mrf.mxu1 }
 0x448   :  { %v2553_v24 = vpop.f32.mrf.mxu0 }
 0x449   :  { %v2554_v54 = vadd.f32 %v2553_v24, %v8841_v2  ;;  %v8851_v24 = vld [vmem:[#allocation19_spill] sm:$0xff] }
 0x44b   :  { %v2574_v27 = vadd.f32 %v2573_v40, %v2554_v54 }
 0x44d   :  { %v2696_v59 = vmul.f32 0.5, %v2574_v27  ;;  %v2693_v27 = vpop.f32.mrf.mxu3 }
 0x44e   :  { %v2593_v1 = vpop.f32.mrf.mxu2 }
 0x44f   :  { %v2594_v35 = vadd.f32 %v2593_v1, %v8842_v36  ;;  %4486 = vtanh.f32 %v2696_v59  ;;  %v8852_v59 = vld [vmem:[#allocation114_spill] sm:$0xff] }
 0x450   :  { %v2633_v32 = vpop.f32.mrf.mxu0  ;;  %3156 = vmatpush.msrb.mxu1 %v8852_v59 }
 0x451   :  { %v2614_v33 = vadd.f32 %v2613_v45, %v2594_v35  ;;  %v2634_v29 = vadd.f32 %v2633_v32, %v8844_v5  ;;  %v8853_v45 = vld [vmem:[#allocation115_spill] sm:$0xff]  ;;  %v8854_v32 = vld [vmem:[#allocation118_spill] sm:$0xff] }
 0x452   :  { %3196 = vmatpush.msrb.mxu3 %v8853_v45  ;;  %3157 = vmatpush.msrb.mxu1 %v8854_v32 }
 0x453   :  { %v2700_v39 = vmul.f32 0.5, %v2614_v33  ;;  %v2654_v43 = vadd.f32 %v2653_v11, %v2634_v29  ;;  %v8855_v33 = vld [vmem:[#allocation119_spill] sm:$0xff] }
 0x454   :  { %3197 = vmatpush.msrb.mxu3 %v8855_v33 }
 0x455   :  { %4488 = vtanh.f32 %v2700_v39  ;;  %v4487_v40 = vpop.eup %4486 }
 0x456   :  { %v2673_v0 = vpop.f32.mrf.mxu2  ;;  %4490 = vtanh.f32 %v2654_v43  ;;  %v2698_v35 = vmul.f32 0.5, %v4487_v40 }
 0x457   :  { %v2674_v54 = vadd.f32 %v2673_v0, %v8851_v24 }
 0x458   :  { %v2699_v43 = vadd.f32 0.5, %v2698_v35  ;;  %v2717_v35 = vld [vmem:[#allocation6 + $0x8] sm:$0xc] }
 0x459   :  { %v2694_v1 = vadd.f32 %v2693_v27, %v2674_v54  ;;  %v2823_v39 = vpop.f32.mrf.mxu1 }
 0x45a   :  { %v2871_v0 = vrot.slane %v2823_v39, 6 }
 0x45b   :  { %v4489_v29 = vpop.eup %4488  ;;  %v2705_v11 = vmul.f32 0.5, %v2694_v1 }
 0x45c   :  { %v2702_v47 = vmul.f32 0.5, %v4489_v29  ;;  %v4491_v18 = vpop.eup %4490  ;;  %v2879_v54 = vadd.f32 %v2871_v0, %v2718_v26 }
 0x45d   :  { %4492 = vtanh.f32 %v2705_v11  ;;  %v2711_v59 = vmul.f32 %v4491_v18, %v2699_v43  ;;  %v2720_v43 = vld [vmem:[#allocation6 + $0x38] sm:$0xc] }
 0x45e   :  { %v2703_v46 = vadd.f32 0.5, %v2702_v47  ;;  %v2886_v32 = vmul.f32 0.5, %v2879_v54 }
 0x460   :  { %v2710_v24 = vmul.f32 %v2709_v41, %v2703_v46  ;;  %v2863_v33 = vpop.f32.mrf.mxu3  ;;  %v2719_v41 = vld [vmem:[#allocation6 + $0x28] sm:$0xc] }
 0x461   :  { %v2873_v39 = vrot.slane %v2863_v33, 6 }
 0x462   :  { %v2712_v45 = vadd.f32 %v2711_v59, %v2710_v24 }
 0x463   :  { %v4493_v40 = vpop.eup %4492  ;;  %v2881_v24 = vadd.f32 %v2873_v39, %v2720_v43 }
 0x464   :  { %4494 = vtanh.f32 %v2712_v45  ;;  %2715 = vst [vmem:[#allocation5] sm:$0x3] %v2712_v45  ;;  %v2707_v27 = vmul.f32 0.5, %v4493_v40 }
 0x465   :  { %4496 = vtanh.f32 %v2886_v32  ;;  %v2891_v54 = vmul.f32 0.5, %v2881_v24 }
 0x466   :  { %v2708_v55 = vadd.f32 0.5, %v2707_v27 }
 0x468   :  { %v2803_v1 = vpop.f32.mrf.mxu0 }
 0x469   :  { %v2870_v29 = vrot.slane %v2803_v1, 6  ;;  %v2895_v1 = vld [vmem:[#allocation3] sm:$0x3] }
 0x46a   :  { %v4495_v16 = vpop.eup %4494  ;;  %v2897_v39 = vrot.slane %v2895_v1, 6  ;;  %v7090_v1 = vld [vmem:[#allocation10 + $0x148] sm:$0xff] }
 0x46b   :  { %v2714_v11 = vmul.f32 %v4495_v16, %v2708_v55  ;;  %v2878_v47 = vadd.f32 %v2870_v29, %v2717_v35  ;;  %v4497_v46 = vpop.eup %4496  ;;  %v7062_v29 = vld [vmem:[#allocation10 + $0x1e8] sm:$0xff]  ;;  %v7064_v35 = vld [vmem:[#allocation10 + $0x1f8] sm:$0xff]  ;;  %8856 = vst [vmem:[#allocation23_spill] sm:$0xff] %v7090_v1 }
 0x46c   :  { %v2888_v45 = vmul.f32 0.5, %v4497_v46  ;;  %v7072_v46 = vld [vmem:[#allocation10 + $0x1a8] sm:$0xff] }
 0x46d   :  { %2716 = vst [vmem:[#allocation4] sm:$0x3] %v2714_v11  ;;  %v2882_v18 = vmul.f32 0.5, %v2878_v47  ;;  %v7066_v47 = vld [vmem:[#allocation10 + $0x1c8] sm:$0xff] }
 0x46e   :  { %v2889_v55 = vadd.f32 0.5, %v2888_v45  ;;  %v7078_v45 = vld [vmem:[#allocation10 + $0x188] sm:$0xff] }
 0x46f   :  { %4498 = vtanh.f32 %v2882_v18  ;;  %v2843_v26 = vpop.f32.mrf.mxu2  ;;  %v7068_v18 = vld [vmem:[#allocation10 + $0x1d8] sm:$0xff] }
 0x470   :  { %v2872_v0 = vrot.slane %v2843_v26, 6  ;;  %v2899_v24 = vmul.f32 %v2897_v39, %v2889_v55  ;;  %v7096_v55 = vld [vmem:[#allocation10 + $0x128] sm:$0xff] }
 0x472   :  { %v2880_v59 = vadd.f32 %v2872_v0, %v2719_v41  ;;  %v7074_v0 = vld [vmem:[#allocation10 + $0x1b8] sm:$0xff] }
 0x474   :  { %4500 = vtanh.f32 %v2880_v59  ;;  %v2906_v40 = vld [vmem:[#allocation4] sm:$0x3] }
 0x475   :  { %v4499_v27 = vpop.eup %4498  ;;  %v2908_v32 = vrot.slane %v2906_v40, 6  ;;  %4502 = vtanh.f32 %v2891_v54  ;;  %v7080_v54 = vld [vmem:[#allocation10 + $0x198] sm:$0xff]  ;;  %v7084_v40 = vld [vmem:[#allocation10 + $0x168] sm:$0xff] }
 0x476   :  { %v2884_v16 = vmul.f32 0.5, %v4499_v27  ;;  %v7086_v27 = vld [vmem:[#allocation10 + $0x178] sm:$0xff] }
 0x477   :  { %v3039_v33 = vrot.slane %v2908_v32, 2 }
 0x478   :  { %v2885_v11 = vadd.f32 0.5, %v2884_v16  ;;  %v7092_v16 = vld [vmem:[#allocation10 + $0x158] sm:$0xff] }
 0x479   :  { %3078 = vmatmul.f32.vlgmr.msra.gmra.mxu1 %v3039_v33  ;;  %3118 = vmatmul.f32.vlgmr.msra.gmra.mxu3 %v3039_v33  ;;  %8857 = vst [vmem:[#allocation25_spill] sm:$0xff] %v7092_v16 }
 0x47a   :  { %v4501_v43 = vpop.eup %4500  ;;  %3312 = vmatpush.msra.mxu1 %v7062_v29  ;;  %3352 = vmatpush.msra.mxu3 %v7064_v35 }
 0x47b   :  { %v2900_v26 = vmul.f32 %v4501_v43, %v2885_v11  ;;  %v4503_v41 = vpop.eup %4502  ;;  %v7098_v11 = vld [vmem:[#allocation10 + $0x138] sm:$0xff] }
 0x47c   :  { %3313 = vmatpush.msra.mxu1 %v7066_v47  ;;  %3353 = vmatpush.msra.mxu3 %v7068_v18  ;;  %v2893_v32 = vmul.f32 0.5, %v4503_v41 }
 0x47d   :  { %v2901_v59 = vadd.f32 %v2900_v26, %v2899_v24  ;;  %v7102_v24 = vld [vmem:[#allocation10 + $0x108] sm:$0xff] }
 0x47e   :  { %3314 = vmatpush.msra.mxu1 %v7072_v46  ;;  %3354 = vmatpush.msra.mxu3 %v7074_v0  ;;  %v2894_v39 = vadd.f32 0.5, %v2893_v32  ;;  %8858 = vst [vmem:[#allocation26_spill] sm:$0xff] %v7102_v24  ;;  %v7112_v32 = vld [vmem:[#allocation10 + $0xe8] sm:$0xff] }
 0x47f   :  { %4504 = vtanh.f32 %v2901_v59  ;;  %2904 = vst [vmem:[#allocation3 - $0x2] sm:$0xc] %v2901_v59  ;;  %v7110_v59 = vld [vmem:[#allocation10 + $0x1f0] sm:$0xff] }
 0x480   :  { %3315 = vmatpush.msra.mxu1 %v7078_v45  ;;  %3355 = vmatpush.msra.mxu3 %v7080_v54  ;;  %8860 = vst [vmem:[#allocation27_spill] sm:$0xff] %v7110_v59 }
 0x481   :  { %3158 = vmatmul.f32.vlgmr.msrb.gmra.mxu1 %v3039_v33  ;;  %3198 = vmatmul.f32.vlgmr.msrb.gmra.mxu3 %v3039_v33  ;;  %v7104_v33 = vld [vmem:[#allocation10 + $0x118] sm:$0xff] }
 0x482   :  { %3316 = vmatpush.msra.mxu1 %v7084_v40  ;;  %3356 = vmatpush.msra.mxu3 %v7086_v27  ;;  %8859 = vst [vmem:[#allocation28_spill] sm:$0xff] %v7104_v33 }
 0x484   :  { %3317 = vmatpush.msra.mxu1 %v7090_v1  ;;  %3357 = vmatpush.msra.mxu3 %v7092_v16  ;;  %v7114_v16 = vld [vmem:[#allocation10 + $0xf8] sm:$0xff]  ;;  %v7116_v1 = vld [vmem:[#allocation10 + $0x1d0] sm:$0xff] }
 0x485   :  { %v4505_v43 = vpop.eup %4504  ;;  %8861 = vst [vmem:[#allocation30_spill] sm:$0xff] %v7114_v16 }
 0x486   :  { %3318 = vmatpush.msra.mxu1 %v7096_v55  ;;  %3358 = vmatpush.msra.mxu3 %v7098_v11  ;;  %v2903_v26 = vmul.f32 %v4505_v43, %v2894_v39  ;;  %v7120_v39 = vld [vmem:[#allocation10 + $0xc8] sm:$0xff]  ;;  %v7122_v43 = vld [vmem:[#allocation10 + $0xd8] sm:$0xff] }
 0x488   :  { %3319 = vmatpush.msra.mxu1 %v7102_v24  ;;  %3359 = vmatpush.msra.mxu3 %v7104_v33  ;;  %v3038_v41 = vrot.slane %v2903_v26, 2  ;;  %2905 = vst [vmem:[#allocation2 - $0x2] sm:$0xc] %v2903_v26  ;;  %v7126_v26 = vld [vmem:[#allocation10 + $0x1b0] sm:$0xff]  ;;  %v7130_v33 = vld [vmem:[#allocation10 + $0xa8] sm:$0xff]  ;;  %v7132_v24 = vld [vmem:[#allocation10 + $0xb8] sm:$0xff] }
 0x489   :  { %8862 = vst [vmem:[#allocation29_spill] sm:$0xff] %v7126_v26 }
 0x48a   :  { %3058 = vmatmul.f32.vlgmr.msra.gmra.mxu0 %v3038_v41  ;;  %3098 = vmatmul.f32.vlgmr.msra.gmra.mxu2 %v3038_v41  ;;  %8863 = vst [vmem:[#allocation31_spill] sm:$0xff] %v7132_v24 }
 0x48b   :  { %3292 = vmatpush.msra.mxu0 %v6798_v30  ;;  %3332 = vmatpush.msra.mxu2 %v7110_v59  ;;  %v7136_v30 = vld [vmem:[#allocation10 + $0x190] sm:$0xff]  ;;  %v7140_v59 = vld [vmem:[#allocation10 + $0x88] sm:$0xff] }
 0x48c   :  { %3320 = vmatpush.msra.mxu1 %v7112_v32  ;;  %3360 = vmatpush.msra.mxu3 %v7114_v16  ;;  %8864 = vst [vmem:[#allocation32_spill] sm:$0xff] %v7136_v30  ;;  %v7142_v16 = vld [vmem:[#allocation10 + $0x98] sm:$0xff] }
 0x48d   :  { %3293 = vmatpush.msra.mxu0 %v6802_v13  ;;  %3333 = vmatpush.msra.mxu2 %v7116_v1  ;;  %8865 = vst [vmem:[#allocation34_spill] sm:$0xff] %v7142_v16  ;;  %v7150_v13 = vld [vmem:[#allocation10 + $0x68] sm:$0xff] }
 0x48e   :  { %3321 = vmatpush.msra.mxu1 %v7120_v39  ;;  %3361 = vmatpush.msra.mxu3 %v7122_v43 }
 0x48f   :  { %3294 = vmatpush.msra.mxu0 %v6808_v58  ;;  %3334 = vmatpush.msra.mxu2 %v7126_v26  ;;  %v7152_v58 = vld [vmem:[#allocation10 + $0x78] sm:$0xff]  ;;  %v7154_v26 = vld [vmem:[#allocation10 + $0x150] sm:$0xff] }
 0x490   :  { %3322 = vmatpush.msra.mxu1 %v7130_v33  ;;  %3362 = vmatpush.msra.mxu3 %v7132_v24  ;;  %8866 = vst [vmem:[#allocation33_spill] sm:$0xff] %v7152_v58  ;;  %v7158_v24 = vld [vmem:[#allocation10 + $0x48] sm:$0xff] }
 0x491   :  { %3295 = vmatpush.msra.mxu0 %v6814_v4  ;;  %3335 = vmatpush.msra.mxu2 %v7136_v30  ;;  %8867 = vst [vmem:[#allocation36_spill] sm:$0xff] %v7154_v26  ;;  %v7160_v4 = vld [vmem:[#allocation10 + $0x58] sm:$0xff]  ;;  %v7164_v30 = vld [vmem:[#allocation10 + $0x130] sm:$0xff] }
 0x492   :  { %3323 = vmatpush.msra.mxu1 %v7140_v59  ;;  %3363 = vmatpush.msra.mxu3 %v7142_v16  ;;  %8868 = vst [vmem:[#allocation35_spill] sm:$0xff] %v7160_v4  ;;  %v7170_v16 = vld [vmem:[#allocation10 + $0x38] sm:$0xff] }
 0x493   :  { %3138 = vmatmul.f32.vlgmr.msrb.gmra.mxu0 %v3038_v41  ;;  %3178 = vmatmul.f32.vlgmr.msrb.gmra.mxu2 %v3038_v41  ;;  %8869 = vst [vmem:[#allocation37_spill] sm:$0xff] %v7164_v30  ;;  %v7168_v41 = vld [vmem:[#allocation10 + $0x28] sm:$0xff] }
 0x494   :  { %3296 = vmatpush.msra.mxu0 %v6820_v61  ;;  %3336 = vmatpush.msra.mxu2 %v6822_v3  ;;  %8870 = vst [vmem:[#allocation38_spill] sm:$0xff] %v7168_v41  ;;  %v7174_v61 = vld [vmem:[#allocation10 + $0x100] sm:$0xff]  ;;  %v7176_v3 = vld [vmem:[#allocation10 + $0x110] sm:$0xff] }
 0x495   :  { %3324 = vmatpush.msra.mxu1 %v7150_v13  ;;  %3364 = vmatpush.msra.mxu3 %v7152_v58  ;;  %8871 = vst [vmem:[#allocation39_spill] sm:$0xff] %v7174_v61  ;;  %v7180_v58 = vld [vmem:[#allocation10 + $0x8] sm:$0xff] }
 0x496   :  { %3297 = vmatpush.msra.mxu0 %v6826_v10  ;;  %3337 = vmatpush.msra.mxu2 %v7154_v26  ;;  %8872 = vst [vmem:[#allocation40_spill] sm:$0xff] %v7176_v3  ;;  %v7182_v10 = vld [vmem:[#allocation10 + $0x18] sm:$0xff]  ;;  %v7186_v26 = vld [vmem:[#allocation10 + $0xe0] sm:$0xff] }
 0x497   :  { %3325 = vmatpush.msra.mxu1 %v7158_v24  ;;  %3365 = vmatpush.msra.mxu3 %v7160_v4  ;;  %8873 = vst [vmem:[#allocation41_spill] sm:$0xff] %v7180_v58  ;;  %v7190_v4 = vld [vmem:[#allocation10 + $0xf0] sm:$0xff] }
 0x498   :  { %3298 = vmatpush.msra.mxu0 %v6832_v37  ;;  %3338 = vmatpush.msra.mxu2 %v7164_v30  ;;  %8874 = vst [vmem:[#allocation42_spill] sm:$0xff] %v7182_v10  ;;  %v3227_v37 = vld [vmem:[#allocation2] sm:$0x3]  ;;  %v7194_v30 = vld [vmem:[#allocation10 + $0xc0] sm:$0xff] }
 0x499   :  { %3326 = vmatpush.msra.mxu1 %v7168_v41  ;;  %3366 = vmatpush.msra.mxu3 %v7170_v16  ;;  %8875 = vst [vmem:[#allocation43_spill] sm:$0xff] %v7186_v26  ;;  %v7197_v41 = vld [vmem:[#allocation10 + $0xd0] sm:$0xff] }
 0x49a   :  { %3299 = vmatpush.msra.mxu0 %v7174_v61  ;;  %3339 = vmatpush.msra.mxu2 %v7176_v3  ;;  %8876 = vst [vmem:[#allocation59_spill] sm:$0xff] %v7190_v4  ;;  %v7200_v61 = vld [vmem:[#allocation10 + $0xa0] sm:$0xff]  ;;  %v7203_v3 = vld [vmem:[#allocation10 + $0xb0] sm:$0xff] }
 0x49b   :  { %3327 = vmatpush.msra.mxu1 %v7180_v58  ;;  %3367 = vmatpush.msra.mxu3 %v7182_v10  ;;  %8877 = vst [vmem:[#allocation44_spill] sm:$0xff] %v7194_v30  ;;  %v7206_v10 = vld [vmem:[#allocation10 + $0x80] sm:$0xff]  ;;  %v7209_v58 = vld [vmem:[#allocation10 + $0x90] sm:$0xff] }
 0x49c   :  { %3300 = vmatpush.msra.mxu0 %v7186_v26  ;;  %3328 = vmatmul.f32.vlgmr.msra.gmra.mxu1 %v3227_v37  ;;  %8878 = vst [vmem:[#allocation60_spill] sm:$0xff] %v7197_v41  ;;  %v7212_v26 = vld [vmem:[#allocation10 + $0x60] sm:$0xff] }
 0x49d   :  { %3340 = vmatpush.msra.mxu2 %v7190_v4  ;;  %3368 = vmatmul.f32.vlgmr.msra.gmra.mxu3 %v3227_v37  ;;  %8879 = vst [vmem:[#allocation45_spill] sm:$0xff] %v7200_v61  ;;  %v7215_v4 = vld [vmem:[#allocation10 + $0x70] sm:$0xff] }
 0x49e   :  { %3301 = vmatpush.msra.mxu0 %v7194_v30  ;;  %8880 = vst [vmem:[#allocation61_spill] sm:$0xff] %v7203_v3  ;;  %v7218_v30 = vld [vmem:[#allocation10 + $0x40] sm:$0xff] }
 0x49f   :  { %3341 = vmatpush.msra.mxu2 %v7197_v41  ;;  %8881 = vst [vmem:[#allocation55_spill] sm:$0xff] %v7206_v10  ;;  %v7221_v41 = vld [vmem:[#allocation10 + $0x50] sm:$0xff] }
 0x4a0   :  { %3302 = vmatpush.msra.mxu0 %v7200_v61  ;;  %8882 = vst [vmem:[#allocation49_spill] sm:$0xff] %v7209_v58  ;;  %v7224_v61 = vld [vmem:[#allocation10 + $0x20] sm:$0xff] }
 0x4a1   :  { %3342 = vmatpush.msra.mxu2 %v7203_v3  ;;  %8883 = vst [vmem:[#allocation67_spill] sm:$0xff] %v7212_v26  ;;  %v7227_v3 = vld [vmem:[#allocation10 + $0x30] sm:$0xff] }
 0x4a2   :  { %3303 = vmatpush.msra.mxu0 %v7206_v10  ;;  %8884 = vst [vmem:[#allocation62_spill] sm:$0xff] %v7215_v4  ;;  %v7230_v10 = vld [vmem:[#allocation10] sm:$0xff] }
 0x4a3   :  { %3343 = vmatpush.msra.mxu2 %v7209_v58  ;;  %8885 = vst [vmem:[#allocation56_spill] sm:$0xff] %v7218_v30  ;;  %v7233_v58 = vld [vmem:[#allocation10 + $0x10] sm:$0xff] }
 0x4a4   :  { %3304 = vmatpush.msra.mxu0 %v7212_v26  ;;  %8886 = vst [vmem:[#allocation50_spill] sm:$0xff] %v7221_v41  ;;  %v7242_v26 = vld [vmem:[#allocation12 + $0x3c0] sm:$0xff] }
 0x4a5   :  { %3344 = vmatpush.msra.mxu2 %v7215_v4  ;;  %8887 = vst [vmem:[#allocation68_spill] sm:$0xff] %v7224_v61  ;;  %v7238_v4 = vld [vmem:[#allocation12 + $0x3e0] sm:$0xff] }
 0x4a6   :  { %3305 = vmatpush.msra.mxu0 %v7218_v30  ;;  %8888 = vst [vmem:[#allocation63_spill] sm:$0xff] %v7227_v3  ;;  %v7240_v30 = vld [vmem:[#allocation12 + $0x3e8] sm:$0xff]  ;;  %3568 = vmatpush.msrb.mxu1 %v7238_v4 }
 0x4a7   :  { %3345 = vmatpush.msra.mxu2 %v7221_v41  ;;  %8889 = vst [vmem:[#allocation57_spill] sm:$0xff] %v7230_v10  ;;  %3608 = vmatpush.msrb.mxu3 %v7240_v30  ;;  %v7260_v41 = vld [vmem:[#allocation12 + $0x360] sm:$0xff] }
 0x4a8   :  { %3306 = vmatpush.msra.mxu0 %v7224_v61  ;;  %8890 = vst [vmem:[#allocation51_spill] sm:$0xff] %v7233_v58  ;;  %v7246_v61 = vld [vmem:[#allocation12 + $0x3c8] sm:$0xff]  ;;  %3569 = vmatpush.msrb.mxu1 %v7242_v26 }
 0x4a9   :  { %3346 = vmatpush.msra.mxu2 %v7227_v3  ;;  %8891 = vst [vmem:[#allocation69_spill] sm:$0xff] %v7240_v30  ;;  %3609 = vmatpush.msrb.mxu3 %v7246_v61  ;;  %v7258_v3 = vld [vmem:[#allocation12 + $0x388] sm:$0xff] }
 0x4aa   :  { %3307 = vmatpush.msra.mxu0 %v7230_v10  ;;  %8892 = vst [vmem:[#allocation64_spill] sm:$0xff] %v7242_v26  ;;  %v7250_v10 = vld [vmem:[#allocation12 + $0x3a0] sm:$0xff]  ;;  %v7264_v26 = vld [vmem:[#allocation12 + $0x368] sm:$0xff] }
 0x4ab   :  { %3347 = vmatpush.msra.mxu2 %v7233_v58  ;;  %3308 = vmatmul.f32.vlgmr.msra.gmra.mxu0 %v3227_v37  ;;  %8893 = vst [vmem:[#allocation58_spill] sm:$0xff] %v7246_v61  ;;  %v7252_v58 = vld [vmem:[#allocation12 + $0x3a8] sm:$0xff]  ;;  %v7266_v61 = vld [vmem:[#allocation12 + $0x340] sm:$0xff] }
 0x4ac   :  { %3348 = vmatmul.f32.vlgmr.msra.gmra.mxu2 %v3227_v37  ;;  %8894 = vst [vmem:[#allocation52_spill] sm:$0xff] %v7250_v10  ;;  %3570 = vmatpush.msrb.mxu1 %v7250_v10  ;;  %v7256_v37 = vld [vmem:[#allocation12 + $0x380] sm:$0xff]  ;;  %v7268_v30 = vld [vmem:[#allocation12 + $0x348] sm:$0xff] }
 0x4ad   :  { %8895 = vst [vmem:[#allocation70_spill] sm:$0xff] %v7252_v58  ;;  %3610 = vmatpush.msrb.mxu3 %v7252_v58  ;;  %v7274_v58 = vld [vmem:[#allocation12 + $0x320] sm:$0xff]  ;;  %v7276_v10 = vld [vmem:[#allocation12 + $0x328] sm:$0xff] }
 0x4ae   :  { %8896 = vst [vmem:[#allocation65_spill] sm:$0xff] %v7256_v37  ;;  %3571 = vmatpush.msrb.mxu1 %v7256_v37  ;;  %v7282_v37 = vld [vmem:[#allocation12 + $0x308] sm:$0xff] }
 0x4af   :  { %8897 = vst [vmem:[#allocation71_spill] sm:$0xff] %v7258_v3  ;;  %3611 = vmatpush.msrb.mxu3 %v7258_v3  ;;  %v7280_v3 = vld [vmem:[#allocation12 + $0x300] sm:$0xff] }
 0x4b0   :  { %8898 = vst [vmem:[#allocation53_spill] sm:$0xff] %v7264_v26  ;;  %3572 = vmatpush.msrb.mxu1 %v7260_v41 }
 0x4b1   :  { %8899 = vst [vmem:[#allocation73_spill] sm:$0xff] %v7266_v61  ;;  %3612 = vmatpush.msrb.mxu3 %v7264_v26  ;;  %v7286_v26 = vld [vmem:[#allocation12 + $0x1e0] sm:$0xff] }
 0x4b2   :  { %8900 = vst [vmem:[#allocation54_spill] sm:$0xff] %v7268_v30  ;;  %3573 = vmatpush.msrb.mxu1 %v7266_v61  ;;  %v7288_v61 = vld [vmem:[#allocation12 + $0x1e8] sm:$0xff]  ;;  %3548 = vmatpush.msrb.mxu0 %v7286_v26 }
 0x4b3   :  { %3613 = vmatpush.msrb.mxu3 %v7268_v30  ;;  %8901 = vst [vmem:[#allocation72_spill] sm:$0xff] %v7274_v58  ;;  %3588 = vmatpush.msrb.mxu2 %v7288_v61  ;;  %v7292_v30 = vld [vmem:[#allocation12 + $0x2e0] sm:$0xff] }
 0x4b4   :  { %8902 = vst [vmem:[#allocation66_spill] sm:$0xff] %v7276_v10  ;;  %3574 = vmatpush.msrb.mxu1 %v7274_v58  ;;  %v7294_v58 = vld [vmem:[#allocation12 + $0x2e8] sm:$0xff] }
 0x4b5   :  { %3614 = vmatpush.msrb.mxu3 %v7276_v10  ;;  %8903 = vst [vmem:[#allocation77_spill] sm:$0xff] %v7280_v3  ;;  %v7298_v10 = vld [vmem:[#allocation12 + $0x1c0] sm:$0xff] }
 0x4b6   :  { %8904 = vst [vmem:[#allocation74_spill] sm:$0xff] %v7282_v37  ;;  %3575 = vmatpush.msrb.mxu1 %v7280_v3  ;;  %v7300_v3 = vld [vmem:[#allocation12 + $0x1c8] sm:$0xff]  ;;  %3549 = vmatpush.msrb.mxu0 %v7298_v10 }
 0x4b7   :  { %3615 = vmatpush.msrb.mxu3 %v7282_v37  ;;  %8905 = vst [vmem:[#allocation81_spill] sm:$0xff] %v7286_v26  ;;  %3589 = vmatpush.msrb.mxu2 %v7300_v3  ;;  %v7304_v37 = vld [vmem:[#allocation12 + $0x2c0] sm:$0xff]  ;;  %v7306_v26 = vld [vmem:[#allocation12 + $0x2c8] sm:$0xff] }
 0x4b8   :  { %8906 = vst [vmem:[#allocation78_spill] sm:$0xff] %v7288_v61  ;;  %3576 = vmatpush.msrb.mxu1 %v7292_v30  ;;  %v7310_v61 = vld [vmem:[#allocation12 + $0x1a0] sm:$0xff] }
 0x4b9   :  { %8907 = vst [vmem:[#allocation85_spill] sm:$0xff] %v7292_v30  ;;  %3616 = vmatpush.msrb.mxu3 %v7294_v58  ;;  %v7312_v30 = vld [vmem:[#allocation12 + $0x1a8] sm:$0xff]  ;;  %3550 = vmatpush.msrb.mxu0 %v7310_v61 }
 0x4ba   :  { %8908 = vst [vmem:[#allocation84_spill] sm:$0xff] %v7294_v58  ;;  %3577 = vmatpush.msrb.mxu1 %v7304_v37  ;;  %3590 = vmatpush.msrb.mxu2 %v7312_v30  ;;  %v7316_v58 = vld [vmem:[#allocation12 + $0x2a0] sm:$0xff] }
 0x4bb   :  { %8909 = vst [vmem:[#allocation88_spill] sm:$0xff] %v7298_v10  ;;  %3617 = vmatpush.msrb.mxu3 %v7306_v26  ;;  %v7318_v10 = vld [vmem:[#allocation12 + $0x2a8] sm:$0xff] }
 0x4bc   :  { %8910 = vst [vmem:[#allocation89_spill] sm:$0xff] %v7300_v3  ;;  %3578 = vmatpush.msrb.mxu1 %v7316_v58  ;;  %v7322_v3 = vld [vmem:[#allocation12 + $0x180] sm:$0xff] }
 0x4bd   :  { %8911 = vst [vmem:[#allocation91_spill] sm:$0xff] %v7304_v37  ;;  %3618 = vmatpush.msrb.mxu3 %v7318_v10  ;;  %v7324_v37 = vld [vmem:[#allocation12 + $0x188] sm:$0xff]  ;;  %3551 = vmatpush.msrb.mxu0 %v7322_v3 }
 0x4be   :  { %8912 = vst [vmem:[#allocation90_spill] sm:$0xff] %v7306_v26  ;;  %3591 = vmatpush.msrb.mxu2 %v7324_v37  ;;  %3579 = vmatpush.msrb.mxu1 %v6948_v23  ;;  %v7332_v26 = vld [vmem:[#allocation12 + $0x168] sm:$0xff]  ;;  %v7346_v23 = vld [vmem:[#allocation12 + $0x120] sm:$0xff] }
 0x4bf   :  { %8913 = vst [vmem:[#allocation75_spill] sm:$0xff] %v7312_v30  ;;  %3619 = vmatpush.msrb.mxu3 %v6950_v8  ;;  %v7330_v30 = vld [vmem:[#allocation12 + $0x160] sm:$0xff]  ;;  %v7348_v8 = vld [vmem:[#allocation12 + $0x128] sm:$0xff] }
 0x4c0   :  { %8914 = vst [vmem:[#allocation92_spill] sm:$0xff] %v7318_v10  ;;  %3552 = vmatpush.msrb.mxu0 %v7330_v30  ;;  %3592 = vmatpush.msrb.mxu2 %v7332_v26  ;;  %v7338_v10 = vld [vmem:[#allocation12 + $0x140] sm:$0xff] }
 0x4c1   :  { %8915 = vst [vmem:[#allocation76_spill] sm:$0xff] %v7322_v3  ;;  %3580 = vmatpush.msrb.mxu1 %v6954_v28  ;;  %3620 = vmatpush.msrb.mxu3 %v6956_v34  ;;  %v7340_v3 = vld [vmem:[#allocation12 + $0x148] sm:$0xff]  ;;  %v7354_v28 = vld [vmem:[#allocation12 + $0x100] sm:$0xff] }
 0x4c2   :  { %3553 = vmatpush.msrb.mxu0 %v7338_v10  ;;  %3593 = vmatpush.msrb.mxu2 %v7340_v3  ;;  %v7356_v34 = vld [vmem:[#allocation12 + $0x108] sm:$0xff] }
 0x4c3   :  { %3581 = vmatpush.msrb.mxu1 %v6960_v9  ;;  %3621 = vmatpush.msrb.mxu3 %v6962_v19  ;;  %v7362_v9 = vld [vmem:[#allocation12 + $0xe0] sm:$0xff]  ;;  %v7364_v19 = vld [vmem:[#allocation12 + $0xe8] sm:$0xff] }
 0x4c4   :  { %3554 = vmatpush.msrb.mxu0 %v7346_v23  ;;  %3594 = vmatpush.msrb.mxu2 %v7348_v8 }
 0x4c5   :  { %3582 = vmatpush.msrb.mxu1 %v6966_v21  ;;  %3622 = vmatpush.msrb.mxu3 %v6968_v7  ;;  %v7370_v21 = vld [vmem:[#allocation12 + $0xc0] sm:$0xff]  ;;  %v7372_v7 = vld [vmem:[#allocation12 + $0xc8] sm:$0xff] }
 0x4c6   :  { %3555 = vmatpush.msrb.mxu0 %v7354_v28  ;;  %3595 = vmatpush.msrb.mxu2 %v7356_v34 }
 0x4c7   :  { %3583 = vmatpush.msrb.mxu1 %v6972_v50  ;;  %3623 = vmatpush.msrb.mxu3 %v6974_v31  ;;  %v7378_v50 = vld [vmem:[#allocation12 + $0xa0] sm:$0xff]  ;;  %v7380_v31 = vld [vmem:[#allocation12 + $0xa8] sm:$0xff] }
 0x4c8   :  { %3556 = vmatpush.msrb.mxu0 %v7362_v9  ;;  %3596 = vmatpush.msrb.mxu2 %v7364_v19 }
 0x4c9   :  { %3648 = vmatpush.msra.mxu1 %v6978_v22  ;;  %3688 = vmatpush.msra.mxu3 %v6980_v25  ;;  %v7386_v22 = vld [vmem:[#allocation12 + $0x80] sm:$0xff]  ;;  %v7388_v25 = vld [vmem:[#allocation12 + $0x88] sm:$0xff] }
 0x4ca   :  { %3557 = vmatpush.msrb.mxu0 %v7370_v21  ;;  %3597 = vmatpush.msrb.mxu2 %v7372_v7 }
 0x4cb   :  { %3649 = vmatpush.msra.mxu1 %v6984_v17  ;;  %3689 = vmatpush.msra.mxu3 %v6986_v15  ;;  %v7394_v17 = vld [vmem:[#allocation12 + $0x60] sm:$0xff]  ;;  %v7396_v15 = vld [vmem:[#allocation12 + $0x68] sm:$0xff] }
 0x4cc   :  { %3558 = vmatpush.msrb.mxu0 %v7378_v50  ;;  %3598 = vmatpush.msrb.mxu2 %v7380_v31  ;;  %8916 = vst [vmem:[#allocation79_spill] sm:$0xff] %v7396_v15 }
 0x4cd   :  { %3650 = vmatpush.msra.mxu1 %v6990_v14  ;;  %3690 = vmatpush.msra.mxu3 %v6992_v20  ;;  %v7402_v14 = vld [vmem:[#allocation12 + $0x40] sm:$0xff]  ;;  %v7404_v20 = vld [vmem:[#allocation12 + $0x48] sm:$0xff] }
 0x4ce   :  { %3559 = vmatpush.msrb.mxu0 %v7386_v22  ;;  %3599 = vmatpush.msrb.mxu2 %v7388_v25  ;;  %8917 = vst [vmem:[#allocation80_spill] sm:$0xff] %v7402_v14 }
 0x4cf   :  { %3651 = vmatpush.msra.mxu1 %v6996_v63  ;;  %3691 = vmatpush.msra.mxu3 %v6998_v6  ;;  %8918 = vst [vmem:[#allocation82_spill] sm:$0xff] %v7404_v20  ;;  %v7410_v6 = vld [vmem:[#allocation12 + $0x20] sm:$0xff] }
 0x4d0   :  { %3560 = vmatpush.msrb.mxu0 %v7394_v17  ;;  %3600 = vmatpush.msrb.mxu2 %v7396_v15  ;;  %8919 = vst [vmem:[#allocation83_spill] sm:$0xff] %v7410_v6  ;;  %v7412_v15 = vld [vmem:[#allocation12 + $0x28] sm:$0xff] }
 0x4d1   :  { %3652 = vmatpush.msra.mxu1 %v7002_v53  ;;  %3692 = vmatpush.msra.mxu3 %v7004_v49  ;;  %8920 = vst [vmem:[#allocation86_spill] sm:$0xff] %v7412_v15 }
 0x4d2   :  { %3561 = vmatpush.msrb.mxu0 %v7402_v14  ;;  %3601 = vmatpush.msrb.mxu2 %v7404_v20  ;;  %v7419_v20 = vld [vmem:[#allocation12] sm:$0xff]  ;;  %v7425_v14 = vld [vmem:[#allocation12 + $0x1f0] sm:$0xff] }
 0x4d3   :  { %3653 = vmatpush.msra.mxu1 %v7008_v51  ;;  %3693 = vmatpush.msra.mxu3 %v7010_v12  ;;  %8921 = vst [vmem:[#allocation87_spill] sm:$0xff] %v7419_v20  ;;  %v7421_v51 = vld [vmem:[#allocation12 + $0x8] sm:$0xff] }
 0x4d4   :  { %3562 = vmatpush.msrb.mxu0 %v7410_v6  ;;  %3602 = vmatpush.msrb.mxu2 %v7412_v15  ;;  %8922 = vst [vmem:[#allocation93_spill] sm:$0xff] %v7421_v51  ;;  %v3401_v6 = vld [vmem:[#allocation3] sm:$0x3] }
 0x4d5   :  { %3654 = vmatpush.msra.mxu1 %v7014_v60  ;;  %3694 = vmatpush.msra.mxu3 %v7016_v52  ;;  %8923 = vst [vmem:[#allocation94_spill] sm:$0xff] %v7425_v14  ;;  %v7433_v52 = vld [vmem:[#allocation12 + $0x1d0] sm:$0xff] }
 0x4d6   :  { %3563 = vmatpush.msrb.mxu0 %v7419_v20  ;;  %3603 = vmatpush.msrb.mxu2 %v7421_v51  ;;  %8925 = vst [vmem:[#allocation96_spill] sm:$0xff] %v7433_v52 }
 0x4d7   :  { %3655 = vmatpush.msra.mxu1 %v7021_v62  ;;  %3695 = vmatpush.msra.mxu3 %v7023_v44  ;;  %v7442_v62 = vld [vmem:[#allocation12 + $0x1b0] sm:$0xff]  ;;  %v7444_v44 = vld [vmem:[#allocation12 + $0x1b8] sm:$0xff] }
 0x4d8   :  { %3628 = vmatpush.msra.mxu0 %v7425_v14  ;;  %8927 = vst [vmem:[#allocation98_spill] sm:$0xff] %v7442_v62 }
 0x4d9   :  { %3656 = vmatpush.msra.mxu1 %v7027_v42  ;;  %3696 = vmatpush.msra.mxu3 %v7029_v38  ;;  %8928 = vst [vmem:[#allocation17_spill] sm:$0xff] %v7444_v44  ;;  %v7450_v38 = vld [vmem:[#allocation12 + $0x190] sm:$0xff] }
 0x4da   :  { %3629 = vmatpush.msra.mxu0 %v7433_v52  ;;  %8929 = vst [vmem:[#allocation99_spill] sm:$0xff] %v7450_v38 }
 0x4db   :  { %3657 = vmatpush.msra.mxu1 %v7033_v57  ;;  %3697 = vmatpush.msra.mxu3 %v7035_v48  ;;  %v7461_v48 = vld [vmem:[#allocation12 + $0x178] sm:$0xff] }
 0x4dc   :  { %3630 = vmatpush.msra.mxu0 %v7442_v62  ;;  %8933 = vst [vmem:[#allocation112_spill] sm:$0xff] %v7461_v48  ;;  %v3215_v62 = vld [vmem:[#allocation5] sm:$0x3] }
 0x4dd   :  { %3658 = vmatpush.msra.mxu1 %v7040_v56  ;;  %v7467_v56 = vld [vmem:[#allocation12 + $0x278] sm:$0xff] }
 0x4de   :  { %3631 = vmatpush.msra.mxu0 %v7450_v38  ;;  %8937 = vst [vmem:[#allocation116_spill] sm:$0xff] %v7467_v56 }
 0x4f6   :  { %v3079_v53 = vpop.f32.mrf.mxu1 }
 0x4fe   :  { %v3159_v57 = vpop.f32.mrf.mxu1 }
 0x507   :  { %v3059_v63 = vpop.f32.mrf.mxu0 }
 0x508   :  { %v3060_v49 = vadd.f32 %v3059_v63, %v8841_v2  ;;  %v7427_v63 = vld [vmem:[#allocation12 + $0x1f8] sm:$0xff]  ;;  %v3119_v2 = vpop.f32.mrf.mxu3 }
 0x509   :  { %8924 = vst [vmem:[#allocation95_spill] sm:$0xff] %v7427_v63  ;;  %3668 = vmatpush.msra.mxu2 %v7427_v63  ;;  %v7528_v63 = vld [vmem:[#allocation12 + $0x98] sm:$0xff] }
 0x50a   :  { %v3080_v12 = vadd.f32 %v3079_v53, %v3060_v49  ;;  %v7435_v53 = vld [vmem:[#allocation12 + $0x1d8] sm:$0xff]  ;;  %8958 = vst [vmem:[#allocation108_spill] sm:$0xff] %v7528_v63 }
 0x50b   :  { %8926 = vst [vmem:[#allocation97_spill] sm:$0xff] %v7435_v53  ;;  %3669 = vmatpush.msra.mxu2 %v7435_v53  ;;  %v8931_v53 = vld [vmem:[#allocation22_spill] sm:$0xff] }
 0x50c   :  { %v3202_v60 = vmul.f32 0.5, %v3080_v12  ;;  %3698 = vmatpush.msra.mxu3 %v8931_v53  ;;  %v7471_v53 = vld [vmem:[#allocation12 + $0x150] sm:$0xff] }
 0x50d   :  { %v3099_v49 = vpop.f32.mrf.mxu2  ;;  %3670 = vmatpush.msra.mxu2 %v7444_v44  ;;  %v8935_v44 = vld [vmem:[#allocation24_spill] sm:$0xff]  ;;  %8938 = vst [vmem:[#allocation117_spill] sm:$0xff] %v7471_v53 }
 0x50e   :  { %v3100_v51 = vadd.f32 %v3099_v49, %v8842_v36  ;;  %4506 = vtanh.f32 %v3202_v60  ;;  %v7452_v49 = vld [vmem:[#allocation12 + $0x198] sm:$0xff]  ;;  %v8934_v60 = vld [vmem:[#allocation21_spill] sm:$0xff]  ;;  %3699 = vmatpush.msra.mxu3 %v8935_v44 }
 0x50f   :  { %8930 = vst [vmem:[#allocation104_spill] sm:$0xff] %v7452_v49  ;;  %3671 = vmatpush.msra.mxu2 %v7452_v49  ;;  %3659 = vmatpush.msra.mxu1 %v8934_v60  ;;  %v7479_v44 = vld [vmem:[#allocation12 + $0x258] sm:$0xff] }
 0x510   :  { %v3120_v12 = vadd.f32 %v3119_v2, %v3100_v51  ;;  %v3139_v42 = vpop.f32.mrf.mxu0  ;;  %v7459_v2 = vld [vmem:[#allocation12 + $0x170] sm:$0xff]  ;;  %3700 = vmatpush.msra.mxu3 %v7467_v56  ;;  %8941 = vst [vmem:[#allocation122_spill] sm:$0xff] %v7479_v44 }
 0x511   :  { %v3140_v36 = vadd.f32 %v3139_v42, %v8844_v5  ;;  %8932 = vst [vmem:[#allocation105_spill] sm:$0xff] %v7459_v2  ;;  %v7465_v42 = vld [vmem:[#allocation12 + $0x270] sm:$0xff]  ;;  %3632 = vmatpush.msra.mxu0 %v7459_v2  ;;  %3672 = vmatpush.msra.mxu2 %v7461_v48  ;;  %v7485_v5 = vld [vmem:[#allocation12 + $0x138] sm:$0xff] }
 0x512   :  { %v3206_v52 = vmul.f32 0.5, %v3120_v12  ;;  %8936 = vst [vmem:[#allocation113_spill] sm:$0xff] %v7465_v42  ;;  %v7473_v12 = vld [vmem:[#allocation12 + $0x158] sm:$0xff]  ;;  %3660 = vmatpush.msra.mxu1 %v7465_v42  ;;  %3701 = vmatpush.msra.mxu3 %v7479_v44  ;;  %v7490_v56 = vld [vmem:[#allocation12 + $0x230] sm:$0xff] }
 0x513   :  { %v3160_v51 = vadd.f32 %v3159_v57, %v3140_v36  ;;  %8939 = vst [vmem:[#allocation120_spill] sm:$0xff] %v7473_v12  ;;  %v7477_v36 = vld [vmem:[#allocation12 + $0x250] sm:$0xff]  ;;  %3633 = vmatpush.msra.mxu0 %v7471_v53  ;;  %3673 = vmatpush.msra.mxu2 %v7473_v12  ;;  %v7492_v42 = vld [vmem:[#allocation12 + $0x238] sm:$0xff] }
 0x514   :  { %4508 = vtanh.f32 %v3206_v52  ;;  %8940 = vst [vmem:[#allocation121_spill] sm:$0xff] %v7477_v36  ;;  %v4507_v57 = vpop.eup %4506  ;;  %v7483_v52 = vld [vmem:[#allocation12 + $0x130] sm:$0xff]  ;;  %3661 = vmatpush.msra.mxu1 %v7477_v36  ;;  %v7498_v53 = vld [vmem:[#allocation12 + $0x118] sm:$0xff]  ;;  %3702 = vmatpush.msra.mxu3 %v7492_v42 }
 0x515   :  { %4510 = vtanh.f32 %v3160_v51  ;;  %8942 = vst [vmem:[#allocation123_spill] sm:$0xff] %v7483_v52  ;;  %v8944_v48 = vld [vmem:[#allocation19_spill] sm:$0xff]  ;;  %v3199_v51 = vpop.f32.mrf.mxu3  ;;  %3634 = vmatpush.msra.mxu0 %v7483_v52  ;;  %3674 = vmatpush.msra.mxu2 %v7485_v5  ;;  %v3204_v49 = vmul.f32 0.5, %v4507_v57 }
 0x516   :  { %v3179_v60 = vpop.f32.mrf.mxu2  ;;  %8943 = vst [vmem:[#allocation124_spill] sm:$0xff] %v7485_v5  ;;  %v7496_v12 = vld [vmem:[#allocation12 + $0x110] sm:$0xff]  ;;  %3662 = vmatpush.msra.mxu1 %v7490_v56  ;;  %v7504_v44 = vld [vmem:[#allocation12 + $0x218] sm:$0xff] }
 0x517   :  { %v3180_v2 = vadd.f32 %v3179_v60, %v8944_v48  ;;  %8945 = vst [vmem:[#allocation125_spill] sm:$0xff] %v7490_v56  ;;  %v7502_v60 = vld [vmem:[#allocation12 + $0x210] sm:$0xff]  ;;  %3635 = vmatpush.msra.mxu0 %v7496_v12  ;;  %3675 = vmatpush.msra.mxu2 %v7498_v53  ;;  %v7510_v5 = vld [vmem:[#allocation12 + $0xf8] sm:$0xff] }
 0x518   :  { %8946 = vst [vmem:[#allocation126_spill] sm:$0xff] %v7492_v42  ;;  %v7508_v48 = vld [vmem:[#allocation12 + $0xf0] sm:$0xff]  ;;  %3663 = vmatpush.msra.mxu1 %v7502_v60  ;;  %3703 = vmatpush.msra.mxu3 %v7504_v44  ;;  %v7518_v56 = vld [vmem:[#allocation12 + $0xd8] sm:$0xff] }
 0x519   :  { %8947 = vst [vmem:[#allocation127_spill] sm:$0xff] %v7496_v12  ;;  %v3200_v38 = vadd.f32 %v3199_v51, %v3180_v2  ;;  %v3329_v2 = vpop.f32.mrf.mxu1  ;;  %3636 = vmatpush.msra.mxu0 %v7508_v48  ;;  %3676 = vmatpush.msra.mxu2 %v7510_v5  ;;  %v7516_v42 = vld [vmem:[#allocation12 + $0xd0] sm:$0xff] }
 0x51a   :  { %8948 = vst [vmem:[#allocation18_spill] sm:$0xff] %v7498_v53  ;;  %v4509_v36 = vpop.eup %4508  ;;  %v3205_v53 = vadd.f32 0.5, %v3204_v49 }
 0x51b   :  { %8949 = vst [vmem:[#allocation20_spill] sm:$0xff] %v7502_v60  ;;  %v3208_v52 = vmul.f32 0.5, %v4509_v36  ;;  %v3211_v57 = vmul.f32 0.5, %v3200_v38  ;;  %v4511_v51 = vpop.eup %4510  ;;  %v3377_v36 = vrot.slane %v3329_v2, 4  ;;  %3637 = vmatpush.msra.mxu0 %v7516_v42  ;;  %3677 = vmatpush.msra.mxu2 %v7518_v56  ;;  %v7522_v38 = vld [vmem:[#allocation12 + $0xb0] sm:$0xff]  ;;  %v7534_v2 = vld [vmem:[#allocation12 + $0x78] sm:$0xff] }
 0x51c   :  { %8950 = vst [vmem:[#allocation102_spill] sm:$0xff] %v7504_v44  ;;  %v7524_v44 = vld [vmem:[#allocation12 + $0xb8] sm:$0xff] }
 0x51d   :  { %8951 = vst [vmem:[#allocation103_spill] sm:$0xff] %v7508_v48  ;;  %v3209_v12 = vadd.f32 0.5, %v3208_v52  ;;  %4512 = vtanh.f32 %v3211_v57  ;;  %v3217_v48 = vmul.f32 %v4511_v51, %v3205_v53  ;;  %3638 = vmatpush.msra.mxu0 %v7522_v38  ;;  %3678 = vmatpush.msra.mxu2 %v7524_v44  ;;  %v3224_v52 = vld [vmem:[#allocation6 + $0x20] sm:$0x30]  ;;  %v7532_v57 = vld [vmem:[#allocation12 + $0x70] sm:$0xff] }
 0x51e   :  { %8952 = vst [vmem:[#allocation106_spill] sm:$0xff] %v7510_v5  ;;  %v7526_v5 = vld [vmem:[#allocation12 + $0x90] sm:$0xff] }
 0x51f   :  { %8953 = vst [vmem:[#allocation107_spill] sm:$0xff] %v7516_v42  ;;  %v3216_v60 = vmul.f32 %v3215_v62, %v3209_v12  ;;  %3639 = vmatpush.msra.mxu0 %v7526_v5  ;;  %3679 = vmatpush.msra.mxu2 %v7528_v63  ;;  %v7538_v53 = vld [vmem:[#allocation12 + $0x50] sm:$0xff]  ;;  %v7540_v12 = vld [vmem:[#allocation12 + $0x58] sm:$0xff] }
 0x520   :  { %8954 = vst [vmem:[#allocation110_spill] sm:$0xff] %v7518_v56  ;;  %v3385_v56 = vadd.f32 %v3377_v36, %v3224_v52  ;;  %v7550_v52 = vld [vmem:[#allocation12 + $0x10] sm:$0xff] }
 0x521   :  { %8955 = vst [vmem:[#allocation111_spill] sm:$0xff] %v7522_v38  ;;  %v3218_v49 = vadd.f32 %v3217_v48, %v3216_v60  ;;  %3640 = vmatpush.msra.mxu0 %v7532_v57  ;;  %3680 = vmatpush.msra.mxu2 %v7534_v2  ;;  %v7544_v48 = vld [vmem:[#allocation12 + $0x30] sm:$0xff]  ;;  %v7546_v60 = vld [vmem:[#allocation12 + $0x38] sm:$0xff] }
 0x522   :  { %8956 = vst [vmem:[#allocation100_spill] sm:$0xff] %v7524_v44  ;;  %v3392_v36 = vmul.f32 0.5, %v3385_v56  ;;  %v3223_v56 = vld [vmem:[#allocation6 + $0x8] sm:$0x30] }
 0x523   :  { %8957 = vst [vmem:[#allocation101_spill] sm:$0xff] %v7526_v5  ;;  %v4513_v62 = vpop.eup %4512  ;;  %4514 = vtanh.f32 %v3218_v49  ;;  %3641 = vmatpush.msra.mxu0 %v7538_v53  ;;  %3681 = vmatpush.msra.mxu2 %v7540_v12  ;;  %v3369_v5 = vpop.f32.mrf.mxu3 }
 0x524   :  { %8959 = vst [vmem:[#allocation109_spill] sm:$0xff] %v7532_v57  ;;  %v3213_v51 = vmul.f32 0.5, %v4513_v62  ;;  %4516 = vtanh.f32 %v3392_v36 }
 0x525   :  { %8960 = vst [vmem:[#allocation114_spill] sm:$0xff] %v7534_v2  ;;  %3642 = vmatpush.msra.mxu0 %v7544_v48  ;;  %3682 = vmatpush.msra.mxu2 %v7546_v60 }
 0x526   :  { %3221 = vst [vmem:[#allocation5] sm:$0x3] %v3218_v49  ;;  %v7552_v49 = vld [vmem:[#allocation12 + $0x18] sm:$0xff]  ;;  %v3214_v63 = vadd.f32 0.5, %v3213_v51 }
 0x527   :  { %8961 = vst [vmem:[#allocation115_spill] sm:$0xff] %v7538_v53  ;;  %3643 = vmatpush.msra.mxu0 %v7550_v52  ;;  %3683 = vmatpush.msra.mxu2 %v7552_v49  ;;  %v3226_v51 = vld [vmem:[#allocation6 + $0x38] sm:$0x30] }
 0x528   :  { %8962 = vst [vmem:[#allocation118_spill] sm:$0xff] %v7540_v12  ;;  %v3309_v62 = vpop.f32.mrf.mxu0  ;;  %v3379_v12 = vrot.slane %v3369_v5, 4 }
 0x529   :  { %8963 = vst [vmem:[#allocation119_spill] sm:$0xff] %v7544_v48  ;;  %v4515_v2 = vpop.eup %4514  ;;  %v3376_v57 = vrot.slane %v3309_v62, 4 }
 0x52a   :  { %8964 = vst [vmem:[#allocation22_spill] sm:$0xff] %v7546_v60  ;;  %v3220_v44 = vmul.f32 %v4515_v2, %v3214_v63  ;;  %v3387_v42 = vadd.f32 %v3379_v12, %v3226_v51  ;;  %v4517_v48 = vpop.eup %4516  ;;  %v3225_v60 = vld [vmem:[#allocation6 + $0x28] sm:$0x30]  ;;  %v3790_v12 = vld [vmem:[#allocation10 + $0x1c0] sm:$0xff] }
 0x52b   :  { %8965 = vst [vmem:[#allocation21_spill] sm:$0xff] %v7550_v52  ;;  %v3384_v53 = vadd.f32 %v3376_v57, %v3223_v56  ;;  %v3394_v62 = vmul.f32 0.5, %v4517_v48  ;;  %v8972_v48 = vld [vmem:[#allocation27_spill] sm:$0xff]  ;;  %v3770_v56 = vld [vmem:[#allocation10 + $0x120] sm:$0xff] }
 0x52c   :  { %8966 = vst [vmem:[#allocation24_spill] sm:$0xff] %v7552_v49  ;;  %v3397_v63 = vmul.f32 0.5, %v3387_v42  ;;  %v8978_v51 = vld [vmem:[#allocation36_spill] sm:$0xff] }
 0x52d   :  { %3222 = vst [vmem:[#allocation4] sm:$0x3] %v3220_v44  ;;  %v3388_v38 = vmul.f32 0.5, %v3384_v53  ;;  %v3395_v57 = vadd.f32 0.5, %v3394_v62  ;;  %v8980_v62 = vld [vmem:[#allocation37_spill] sm:$0xff] }
 0x52f   :  { %4518 = vtanh.f32 %v3388_v38  ;;  %v3349_v14 = vpop.f32.mrf.mxu2  ;;  %v3403_v38 = vrot.slane %v3401_v6, 4 }
 0x530   :  { %v3378_v20 = vrot.slane %v3349_v14, 4 }
 0x532   :  { %v3386_v15 = vadd.f32 %v3378_v20, %v3225_v60  ;;  %v3405_v20 = vmul.f32 %v3403_v38, %v3395_v57  ;;  %v8974_v60 = vld [vmem:[#allocation29_spill] sm:$0xff]  ;;  %v8988_v38 = vld [vmem:[#allocation44_spill] sm:$0xff] }
 0x534   :  { %v3412_v2 = vld [vmem:[#allocation4] sm:$0x3]  ;;  %4520 = vtanh.f32 %v3386_v15 }
 0x535   :  { %v3414_v36 = vrot.slane %v3412_v2, 4  ;;  %v4519_v52 = vpop.eup %4518  ;;  %4522 = vtanh.f32 %v3397_v63  ;;  %v8981_v63 = vld [vmem:[#allocation38_spill] sm:$0xff]  ;;  %v8982_v2 = vld [vmem:[#allocation39_spill] sm:$0xff] }
 0x536   :  { %v3390_v49 = vmul.f32 0.5, %v4519_v52  ;;  %v8975_v52 = vld [vmem:[#allocation34_spill] sm:$0xff] }
 0x537   :  { %v3545_v5 = vrot.slane %v3414_v36, 4  ;;  %v8984_v36 = vld [vmem:[#allocation41_spill] sm:$0xff] }
 0x538   :  { %v3391_v44 = vadd.f32 0.5, %v3390_v49  ;;  %v3778_v49 = vld [vmem:[#allocation10 + $0x160] sm:$0xff] }
 0x539   :  { %3584 = vmatmul.f32.vlgmr.msrb.gmra.mxu1 %v3545_v5  ;;  %3624 = vmatmul.f32.vlgmr.msrb.gmra.mxu3 %v3545_v5 }
 0x53a   :  { %3818 = vmatpush.msrb.mxu1 %v7062_v29  ;;  %3858 = vmatpush.msrb.mxu3 %v7064_v35  ;;  %v4521_v14 = vpop.eup %4520  ;;  %v8967_v35 = vld [vmem:[#allocation23_spill] sm:$0xff] }
 0x53b   :  { %v3406_v42 = vmul.f32 %v4521_v14, %v3391_v44  ;;  %v4523_v15 = vpop.eup %4522  ;;  %v8986_v44 = vld [vmem:[#allocation43_spill] sm:$0xff]  ;;  %v8990_v14 = vld [vmem:[#allocation69_spill] sm:$0xff] }
 0x53c   :  { %3819 = vmatpush.msrb.mxu1 %v7066_v47  ;;  %3859 = vmatpush.msrb.mxu3 %v7068_v18  ;;  %v3399_v29 = vmul.f32 0.5, %v4523_v15  ;;  %v8968_v47 = vld [vmem:[#allocation25_spill] sm:$0xff] }
 0x53d   :  { %v3407_v53 = vadd.f32 %v3406_v42, %v3405_v20  ;;  %v8991_v20 = vld [vmem:[#allocation45_spill] sm:$0xff]  ;;  %v8992_v42 = vld [vmem:[#allocation64_spill] sm:$0xff] }
 0x53e   :  { %3820 = vmatpush.msrb.mxu1 %v7072_v46  ;;  %3860 = vmatpush.msrb.mxu3 %v7074_v0  ;;  %v3400_v18 = vadd.f32 0.5, %v3399_v29  ;;  %v8993_v15 = vld [vmem:[#allocation61_spill] sm:$0xff]  ;;  %v8995_v29 = vld [vmem:[#allocation55_spill] sm:$0xff] }
 0x53f   :  { %4524 = vtanh.f32 %v3407_v53  ;;  %3410 = vst [vmem:[#allocation3 - $0x4] sm:$0x30] %v3407_v53  ;;  %v8994_v53 = vld [vmem:[#allocation58_spill] sm:$0xff] }
 0x540   :  { %3821 = vmatpush.msrb.mxu1 %v7078_v45  ;;  %3861 = vmatpush.msrb.mxu3 %v7080_v54  ;;  %v8969_v45 = vld [vmem:[#allocation26_spill] sm:$0xff]  ;;  %v8970_v54 = vld [vmem:[#allocation28_spill] sm:$0xff] }
 0x541   :  { %3664 = vmatmul.f32.vlgmr.msra.gmra.mxu1 %v3545_v5  ;;  %3704 = vmatmul.f32.vlgmr.msra.gmra.mxu3 %v3545_v5  ;;  %v8985_v5 = vld [vmem:[#allocation42_spill] sm:$0xff] }
 0x542   :  { %3822 = vmatpush.msrb.mxu1 %v7084_v40  ;;  %3862 = vmatpush.msrb.mxu3 %v7086_v27  ;;  %v3794_v40 = vld [vmem:[#allocation10 + $0x1e0] sm:$0xff]  ;;  %v8971_v27 = vld [vmem:[#allocation30_spill] sm:$0xff] }
 0x544   :  { %3823 = vmatpush.msrb.mxu1 %v8967_v35  ;;  %3863 = vmatpush.msrb.mxu3 %v8968_v47  ;;  %v8996_v35 = vld [vmem:[#allocation52_spill] sm:$0xff]  ;;  %v8997_v47 = vld [vmem:[#allocation49_spill] sm:$0xff] }
 0x545   :  { %v4525_v46 = vpop.eup %4524 }
 0x546   :  { %3824 = vmatpush.msrb.mxu1 %v7096_v55  ;;  %3864 = vmatpush.msrb.mxu3 %v7098_v11  ;;  %v3409_v0 = vmul.f32 %v4525_v46, %v3400_v18  ;;  %v3786_v55 = vld [vmem:[#allocation10 + $0x1a0] sm:$0xff]  ;;  %v8973_v11 = vld [vmem:[#allocation31_spill] sm:$0xff]  ;;  %v8998_v18 = vld [vmem:[#allocation70_spill] sm:$0xff] }
 0x547   :  { %v9000_v46 = vld [vmem:[#allocation65_spill] sm:$0xff] }
 0x548   :  { %3825 = vmatpush.msrb.mxu1 %v8969_v45  ;;  %3865 = vmatpush.msrb.mxu3 %v8970_v54  ;;  %v3544_v6 = vrot.slane %v3409_v0, 4  ;;  %3411 = vst [vmem:[#allocation2 - $0x4] sm:$0x30] %v3409_v0  ;;  %v9001_v0 = vld [vmem:[#allocation62_spill] sm:$0xff]  ;;  %v9002_v45 = vld [vmem:[#allocation71_spill] sm:$0xff]  ;;  %v9003_v54 = vld [vmem:[#allocation56_spill] sm:$0xff] }
 0x54a   :  { %3826 = vmatpush.msrb.mxu1 %v7112_v32  ;;  %3866 = vmatpush.msrb.mxu3 %v8971_v27  ;;  %v3782_v32 = vld [vmem:[#allocation10 + $0x180] sm:$0xff] }
 0x54b   :  { %3564 = vmatmul.f32.vlgmr.msrb.gmra.mxu0 %v3544_v6  ;;  %3604 = vmatmul.f32.vlgmr.msrb.gmra.mxu2 %v3544_v6  ;;  %v9006_v27 = vld [vmem:[#allocation68_spill] sm:$0xff] }
 0x54c   :  { %3798 = vmatpush.msrb.mxu0 %v3794_v40  ;;  %3838 = vmatpush.msrb.mxu2 %v8972_v48  ;;  %v9005_v40 = vld [vmem:[#allocation53_spill] sm:$0xff]  ;;  %v9008_v48 = vld [vmem:[#allocation63_spill] sm:$0xff] }
 0x54d   :  { %3827 = vmatpush.msrb.mxu1 %v7120_v39  ;;  %3867 = vmatpush.msrb.mxu3 %v7122_v43  ;;  %v3780_v39 = vld [vmem:[#allocation10 + $0x170] sm:$0xff]  ;;  %v8976_v43 = vld [vmem:[#allocation32_spill] sm:$0xff] }
 0x54e   :  { %3799 = vmatpush.msrb.mxu0 %v3790_v12  ;;  %3839 = vmatpush.msrb.mxu2 %v7116_v1  ;;  %v3774_v1 = vld [vmem:[#allocation10 + $0x140] sm:$0xff] }
 0x54f   :  { %3828 = vmatpush.msrb.mxu1 %v7130_v33  ;;  %3868 = vmatpush.msrb.mxu3 %v8973_v11  ;;  %v8977_v33 = vld [vmem:[#allocation33_spill] sm:$0xff]  ;;  %v3733_v57 = vld [vmem:[#allocation2] sm:$0x3] }
 0x550   :  { %3800 = vmatpush.msrb.mxu0 %v3786_v55  ;;  %3840 = vmatpush.msrb.mxu2 %v8974_v60  ;;  %v9007_v12 = vld [vmem:[#allocation73_spill] sm:$0xff]  ;;  %v9009_v55 = vld [vmem:[#allocation54_spill] sm:$0xff]  ;;  %v9012_v60 = vld [vmem:[#allocation51_spill] sm:$0xff] }
 0x551   :  { %3829 = vmatpush.msrb.mxu1 %v7140_v59  ;;  %3869 = vmatpush.msrb.mxu3 %v8975_v52  ;;  %v8979_v59 = vld [vmem:[#allocation35_spill] sm:$0xff]  ;;  %v9010_v11 = vld [vmem:[#allocation57_spill] sm:$0xff] }
 0x552   :  { %3801 = vmatpush.msrb.mxu0 %v3782_v32  ;;  %3841 = vmatpush.msrb.mxu2 %v8976_v43  ;;  %v9011_v32 = vld [vmem:[#allocation72_spill] sm:$0xff]  ;;  %v9014_v52 = vld [vmem:[#allocation77_spill] sm:$0xff]  ;;  %v9017_v43 = vld [vmem:[#allocation78_spill] sm:$0xff] }
 0x553   :  { %3644 = vmatmul.f32.vlgmr.msra.gmra.mxu0 %v3544_v6  ;;  %3684 = vmatmul.f32.vlgmr.msra.gmra.mxu2 %v3544_v6  ;;  %v9004_v6 = vld [vmem:[#allocation50_spill] sm:$0xff] }
 0x554   :  { %3802 = vmatpush.msrb.mxu0 %v3778_v49  ;;  %3842 = vmatpush.msrb.mxu2 %v3780_v39  ;;  %v9015_v49 = vld [vmem:[#allocation81_spill] sm:$0xff]  ;;  %v9016_v39 = vld [vmem:[#allocation74_spill] sm:$0xff] }
 0x555   :  { %3830 = vmatpush.msrb.mxu1 %v7150_v13  ;;  %3870 = vmatpush.msrb.mxu3 %v8977_v33  ;;  %v8983_v13 = vld [vmem:[#allocation40_spill] sm:$0xff] }
 0x556   :  { %3803 = vmatpush.msrb.mxu0 %v3774_v1  ;;  %3843 = vmatpush.msrb.mxu2 %v8978_v51  ;;  %v9018_v1 = vld [vmem:[#allocation85_spill] sm:$0xff]  ;;  %v9019_v33 = vld [vmem:[#allocation88_spill] sm:$0xff] }
 0x557   :  { %3831 = vmatpush.msrb.mxu1 %v7158_v24  ;;  %3871 = vmatpush.msrb.mxu3 %v8979_v59  ;;  %v8987_v24 = vld [vmem:[#allocation59_spill] sm:$0xff]  ;;  %v9021_v51 = vld [vmem:[#allocation89_spill] sm:$0xff] }
 0x558   :  { %3804 = vmatpush.msrb.mxu0 %v3770_v56  ;;  %3844 = vmatpush.msrb.mxu2 %v8980_v62  ;;  %v9020_v56 = vld [vmem:[#allocation84_spill] sm:$0xff]  ;;  %v9022_v59 = vld [vmem:[#allocation91_spill] sm:$0xff]  ;;  %v9023_v62 = vld [vmem:[#allocation90_spill] sm:$0xff] }
 0x559   :  { %3832 = vmatpush.msrb.mxu1 %v8981_v63  ;;  %3872 = vmatpush.msrb.mxu3 %v7170_v16  ;;  %v8989_v16 = vld [vmem:[#allocation60_spill] sm:$0xff]  ;;  %v9024_v63 = vld [vmem:[#allocation75_spill] sm:$0xff] }
 0x55a   :  { %3805 = vmatpush.msrb.mxu0 %v8982_v2  ;;  %3845 = vmatpush.msrb.mxu2 %v8983_v13  ;;  %v9025_v2 = vld [vmem:[#allocation76_spill] sm:$0xff] }
 0x55b   :  { %3833 = vmatpush.msrb.mxu1 %v8984_v36  ;;  %3873 = vmatpush.msrb.mxu3 %v8985_v5  ;;  %v9026_v13 = vld [vmem:[#allocation92_spill] sm:$0xff]  ;;  %v9048_v5 = vld [vmem:[#allocation127_spill] sm:$0xff] }
 0x55c   :  { %3806 = vmatpush.msrb.mxu0 %v8986_v44  ;;  %3834 = vmatmul.f32.vlgmr.msrb.gmra.mxu1 %v3733_v57  ;;  %v9047_v36 = vld [vmem:[#allocation124_spill] sm:$0xff]  ;;  %v9050_v44 = vld [vmem:[#allocation103_spill] sm:$0xff] }
 0x55d   :  { %3846 = vmatpush.msrb.mxu2 %v8987_v24  ;;  %3874 = vmatmul.f32.vlgmr.msrb.gmra.mxu3 %v3733_v57  ;;  %v9051_v24 = vld [vmem:[#allocation106_spill] sm:$0xff] }
 0x55e   :  { %3807 = vmatpush.msrb.mxu0 %v8988_v38  ;;  %4074 = vmatpush.msra.mxu1 %v7238_v4  ;;  %v8999_v4 = vld [vmem:[#allocation67_spill] sm:$0xff] }
 0x55f   :  { %3847 = vmatpush.msrb.mxu2 %v8989_v16  ;;  %4114 = vmatpush.msra.mxu3 %v8990_v14  ;;  %v9052_v38 = vld [vmem:[#allocation107_spill] sm:$0xff]  ;;  %v9053_v16 = vld [vmem:[#allocation110_spill] sm:$0xff] }
 0x560   :  { %3808 = vmatpush.msrb.mxu0 %v8991_v20  ;;  %4075 = vmatpush.msra.mxu1 %v8992_v42  ;;  %v9054_v14 = vld [vmem:[#allocation111_spill] sm:$0xff]  ;;  %v9055_v20 = vld [vmem:[#allocation100_spill] sm:$0xff]  ;;  %v9056_v42 = vld [vmem:[#allocation101_spill] sm:$0xff] }
 0x561   :  { %3848 = vmatpush.msrb.mxu2 %v8993_v15  ;;  %4115 = vmatpush.msra.mxu3 %v8994_v53  ;;  %v9057_v15 = vld [vmem:[#allocation108_spill] sm:$0xff]  ;;  %v9058_v53 = vld [vmem:[#allocation109_spill] sm:$0xff] }
 0x562   :  { %3809 = vmatpush.msrb.mxu0 %v8995_v29  ;;  %4076 = vmatpush.msra.mxu1 %v8996_v35  ;;  %v9059_v29 = vld [vmem:[#allocation114_spill] sm:$0xff]  ;;  %v9060_v35 = vld [vmem:[#allocation115_spill] sm:$0xff] }
 0x563   :  { %3849 = vmatpush.msrb.mxu2 %v8997_v47  ;;  %4116 = vmatpush.msra.mxu3 %v8998_v18  ;;  %v9061_v47 = vld [vmem:[#allocation118_spill] sm:$0xff]  ;;  %v9062_v18 = vld [vmem:[#allocation119_spill] sm:$0xff] }
 0x564   :  { %3810 = vmatpush.msrb.mxu0 %v8999_v4  ;;  %4077 = vmatpush.msra.mxu1 %v9000_v46  ;;  %v9063_v4 = vld [vmem:[#allocation22_spill] sm:$0xff]  ;;  %v9064_v46 = vld [vmem:[#allocation21_spill] sm:$0xff] }
 0x565   :  { %3850 = vmatpush.msrb.mxu2 %v9001_v0  ;;  %4117 = vmatpush.msra.mxu3 %v9002_v45  ;;  %v9065_v0 = vld [vmem:[#allocation24_spill] sm:$0xff] }
 0x566   :  { %3811 = vmatpush.msrb.mxu0 %v9003_v54  ;;  %4078 = vmatpush.msra.mxu1 %v7260_v41  ;;  %v9013_v41 = vld [vmem:[#allocation66_spill] sm:$0xff]  ;;  %v4001_v45 = vld [vmem:[#allocation12 + $0x280] sm:$0xff] }
 0x567   :  { %3851 = vmatpush.msrb.mxu2 %v9004_v6  ;;  %4118 = vmatpush.msra.mxu3 %v9005_v40  ;;  %v4002_v54 = vld [vmem:[#allocation12 + $0x288] sm:$0xff]  ;;  %v3997_v6 = vld [vmem:[#allocation12 + $0x260] sm:$0xff] }
 0x568   :  { %3812 = vmatpush.msrb.mxu0 %v9006_v27  ;;  %4079 = vmatpush.msra.mxu1 %v9007_v12  ;;  %v3998_v40 = vld [vmem:[#allocation12 + $0x268] sm:$0xff]  ;;  %v3993_v27 = vld [vmem:[#allocation12 + $0x240] sm:$0xff] }
 0x569   :  { %3852 = vmatpush.msrb.mxu2 %v9008_v48  ;;  %4119 = vmatpush.msra.mxu3 %v9009_v55  ;;  %v3994_v12 = vld [vmem:[#allocation12 + $0x248] sm:$0xff]  ;;  %v3989_v48 = vld [vmem:[#allocation12 + $0x220] sm:$0xff] }
 0x56a   :  { %3813 = vmatpush.msrb.mxu0 %v9010_v11  ;;  %4080 = vmatpush.msra.mxu1 %v9011_v32  ;;  %v3990_v55 = vld [vmem:[#allocation12 + $0x228] sm:$0xff]  ;;  %v3985_v11 = vld [vmem:[#allocation12 + $0x200] sm:$0xff] }
 0x56b   :  { %3853 = vmatpush.msrb.mxu2 %v9012_v60  ;;  %3814 = vmatmul.f32.vlgmr.msrb.gmra.mxu0 %v3733_v57  ;;  %v3986_v32 = vld [vmem:[#allocation12 + $0x208] sm:$0xff]  ;;  %v4047_v60 = vld [vmem:[#allocation12 + $0x3f0] sm:$0xff] }
 0x56c   :  { %3854 = vmatmul.f32.vlgmr.msrb.gmra.mxu2 %v3733_v57  ;;  %4120 = vmatpush.msra.mxu3 %v9013_v41  ;;  %v9049_v57 = vld [vmem:[#allocation18_spill] sm:$0xff]  ;;  %v4048_v41 = vld [vmem:[#allocation12 + $0x3f8] sm:$0xff] }
 0x56d   :  { %4081 = vmatpush.msra.mxu1 %v9014_v52  ;;  %4054 = vmatpush.msra.mxu0 %v9015_v49  ;;  %v4043_v52 = vld [vmem:[#allocation12 + $0x3d0] sm:$0xff]  ;;  %v4044_v49 = vld [vmem:[#allocation12 + $0x3d8] sm:$0xff] }
 0x56e   :  { %4121 = vmatpush.msra.mxu3 %v9016_v39  ;;  %4094 = vmatpush.msra.mxu2 %v9017_v43  ;;  %v4039_v39 = vld [vmem:[#allocation12 + $0x3b0] sm:$0xff]  ;;  %v4040_v43 = vld [vmem:[#allocation12 + $0x3b8] sm:$0xff] }
 0x56f   :  { %4082 = vmatpush.msra.mxu1 %v9018_v1  ;;  %4055 = vmatpush.msra.mxu0 %v9019_v33 }
 0x570   :  { %4122 = vmatpush.msra.mxu3 %v9020_v56  ;;  %4095 = vmatpush.msra.mxu2 %v9021_v51  ;;  %v9066_v56 = vld [vmem:[#allocation46_spill] sm:$0xff] }
 0x571   :  { %4083 = vmatpush.msra.mxu1 %v9022_v59  ;;  %4056 = vmatpush.msra.mxu0 %v7310_v61  ;;  %v9030_v61 = vld [vmem:[#allocation83_spill] sm:$0xff] }
 0x572   :  { %4123 = vmatpush.msra.mxu3 %v9023_v62  ;;  %4096 = vmatpush.msra.mxu2 %v9024_v63  ;;  %v4035_v59 = vld [vmem:[#allocation12 + $0x390] sm:$0xff]  ;;  %v4036_v62 = vld [vmem:[#allocation12 + $0x398] sm:$0xff] }
 0x573   :  { %4084 = vmatpush.msra.mxu1 %v7316_v58  ;;  %4057 = vmatpush.msra.mxu0 %v9025_v2  ;;  %v9029_v58 = vld [vmem:[#allocation82_spill] sm:$0xff] }
 0x574   :  { %4124 = vmatpush.msra.mxu3 %v9026_v13  ;;  %4097 = vmatpush.msra.mxu2 %v7324_v37  ;;  %v9033_v37 = vld [vmem:[#allocation93_spill] sm:$0xff]  ;;  %v4031_v2 = vld [vmem:[#allocation12 + $0x370] sm:$0xff]  ;;  %v4032_v13 = vld [vmem:[#allocation12 + $0x378] sm:$0xff] }
 0x575   :  { %4058 = vmatpush.msra.mxu0 %v7330_v30  ;;  %v9028_v30 = vld [vmem:[#allocation80_spill] sm:$0xff]  ;;  %4085 = vmatpush.msra.mxu1 %v4001_v45 }
 0x576   :  { %4098 = vmatpush.msra.mxu2 %v7332_v26  ;;  %v9027_v26 = vld [vmem:[#allocation79_spill] sm:$0xff]  ;;  %4125 = vmatpush.msra.mxu3 %v4002_v54 }
 0x577   :  { %4059 = vmatpush.msra.mxu0 %v7338_v10  ;;  %v9032_v10 = vld [vmem:[#allocation87_spill] sm:$0xff]  ;;  %4086 = vmatpush.msra.mxu1 %v3997_v6 }
 0x578   :  { %4099 = vmatpush.msra.mxu2 %v7340_v3  ;;  %v9031_v3 = vld [vmem:[#allocation86_spill] sm:$0xff]  ;;  %4126 = vmatpush.msra.mxu3 %v3998_v40 }
 0x579   :  { %4060 = vmatpush.msra.mxu0 %v7346_v23  ;;  %v9034_v23 = vld [vmem:[#allocation94_spill] sm:$0xff]  ;;  %4087 = vmatpush.msra.mxu1 %v3993_v27  ;;  %v9072_v27 = vld [vmem:[#allocation121_spill] sm:$0xff] }
 0x57a   :  { %4100 = vmatpush.msra.mxu2 %v7348_v8  ;;  %v9035_v8 = vld [vmem:[#allocation95_spill] sm:$0xff]  ;;  %4127 = vmatpush.msra.mxu3 %v3994_v12  ;;  %v9073_v12 = vld [vmem:[#allocation122_spill] sm:$0xff] }
 0x57b   :  { %4061 = vmatpush.msra.mxu0 %v7354_v28  ;;  %v9036_v28 = vld [vmem:[#allocation96_spill] sm:$0xff]  ;;  %4088 = vmatpush.msra.mxu1 %v3989_v48 }
 0x57c   :  { %4101 = vmatpush.msra.mxu2 %v7356_v34  ;;  %v9037_v34 = vld [vmem:[#allocation97_spill] sm:$0xff]  ;;  %4128 = vmatpush.msra.mxu3 %v3990_v55  ;;  %v3721_v48 = vld [vmem:[#allocation5] sm:$0x3] }
 0x57d   :  { %4062 = vmatpush.msra.mxu0 %v7362_v9  ;;  %v9038_v9 = vld [vmem:[#allocation98_spill] sm:$0xff]  ;;  %4089 = vmatpush.msra.mxu1 %v3985_v11 }
 0x57e   :  { %4102 = vmatpush.msra.mxu2 %v7364_v19  ;;  %v9039_v19 = vld [vmem:[#allocation17_spill] sm:$0xff]  ;;  %4129 = vmatpush.msra.mxu3 %v3986_v32 }
 0x57f   :  { %4063 = vmatpush.msra.mxu0 %v7370_v21  ;;  %v9040_v21 = vld [vmem:[#allocation99_spill] sm:$0xff]  ;;  %4154 = vmatpush.msrb.mxu1 %v4047_v60  ;;  %v9074_v32 = vld [vmem:[#allocation125_spill] sm:$0xff]  ;;  %v9075_v60 = vld [vmem:[#allocation126_spill] sm:$0xff] }
 0x580   :  { %4103 = vmatpush.msra.mxu2 %v7372_v7  ;;  %v9041_v7 = vld [vmem:[#allocation104_spill] sm:$0xff]  ;;  %4194 = vmatpush.msrb.mxu3 %v4048_v41  ;;  %v3730_v41 = vld [vmem:[#allocation6 + $0x20] sm:$0xc0] }
 0x581   :  { %4064 = vmatpush.msra.mxu0 %v7378_v50  ;;  %v9042_v50 = vld [vmem:[#allocation105_spill] sm:$0xff]  ;;  %4155 = vmatpush.msrb.mxu1 %v4043_v52 }
 0x582   :  { %4104 = vmatpush.msra.mxu2 %v7380_v31  ;;  %v9043_v31 = vld [vmem:[#allocation112_spill] sm:$0xff]  ;;  %4195 = vmatpush.msrb.mxu3 %v4044_v49 }
 0x583   :  { %4065 = vmatpush.msra.mxu0 %v7386_v22  ;;  %v9044_v22 = vld [vmem:[#allocation117_spill] sm:$0xff]  ;;  %4156 = vmatpush.msrb.mxu1 %v4039_v39  ;;  %v9076_v39 = vld [vmem:[#allocation20_spill] sm:$0xff] }
 0x584   :  { %4105 = vmatpush.msra.mxu2 %v7388_v25  ;;  %v9045_v25 = vld [vmem:[#allocation120_spill] sm:$0xff]  ;;  %4196 = vmatpush.msrb.mxu3 %v4040_v43  ;;  %v9077_v43 = vld [vmem:[#allocation102_spill] sm:$0xff] }
 0x585   :  { %4066 = vmatpush.msra.mxu0 %v7394_v17  ;;  %v9046_v17 = vld [vmem:[#allocation123_spill] sm:$0xff]  ;;  %4157 = vmatpush.msrb.mxu1 %v4035_v59 }
 0x586   :  { %4106 = vmatpush.msra.mxu2 %v9027_v26  ;;  %4197 = vmatpush.msrb.mxu3 %v4036_v62 }
 0x587   :  { %4067 = vmatpush.msra.mxu0 %v9028_v30  ;;  %4158 = vmatpush.msrb.mxu1 %v4031_v2  ;;  %v4027_v30 = vld [vmem:[#allocation12 + $0x350] sm:$0xff] }
 0x588   :  { %4107 = vmatpush.msra.mxu2 %v9029_v58  ;;  %4198 = vmatpush.msrb.mxu3 %v4032_v13  ;;  %v4028_v58 = vld [vmem:[#allocation12 + $0x358] sm:$0xff] }
 0x589   :  { %4068 = vmatpush.msra.mxu0 %v9030_v61  ;;  %4159 = vmatpush.msrb.mxu1 %v4027_v30 }
 0x58a   :  { %4108 = vmatpush.msra.mxu2 %v9031_v3  ;;  %4199 = vmatpush.msrb.mxu3 %v4028_v58 }
 0x58b   :  { %4069 = vmatpush.msra.mxu0 %v9032_v10  ;;  %v9067_v10 = vld [vmem:[#allocation47_spill] sm:$0xff] }
 0x58c   :  { %4109 = vmatpush.msra.mxu2 %v9033_v37 }
 0x58d   :  { %4134 = vmatpush.msrb.mxu0 %v9034_v23  ;;  %v4023_v23 = vld [vmem:[#allocation12 + $0x330] sm:$0xff] }
 0x58e   :  { %4174 = vmatpush.msrb.mxu2 %v9035_v8  ;;  %v4024_v8 = vld [vmem:[#allocation12 + $0x338] sm:$0xff]  ;;  %4160 = vmatpush.msrb.mxu1 %v4023_v23 }
 0x58f   :  { %4135 = vmatpush.msrb.mxu0 %v9036_v28  ;;  %4200 = vmatpush.msrb.mxu3 %v4024_v8 }
 0x590   :  { %4175 = vmatpush.msrb.mxu2 %v9037_v34 }
 0x591   :  { %4136 = vmatpush.msrb.mxu0 %v9038_v9  ;;  %v9068_v9 = vld [vmem:[#allocation48_spill] sm:$0xff] }
 0x592   :  { %4176 = vmatpush.msrb.mxu2 %v9039_v19 }
 0x593   :  { %4137 = vmatpush.msrb.mxu0 %v9040_v21  ;;  %v4019_v21 = vld [vmem:[#allocation12 + $0x310] sm:$0xff] }
 0x594   :  { %4177 = vmatpush.msrb.mxu2 %v9041_v7  ;;  %v4020_v7 = vld [vmem:[#allocation12 + $0x318] sm:$0xff]  ;;  %4161 = vmatpush.msrb.mxu1 %v4019_v21 }
 0x595   :  { %4138 = vmatpush.msrb.mxu0 %v9042_v50  ;;  %4201 = vmatpush.msrb.mxu3 %v4020_v7 }
 0x596   :  { %4178 = vmatpush.msrb.mxu2 %v9043_v31 }
 0x597   :  { %4139 = vmatpush.msrb.mxu0 %v9044_v22 }
 0x598   :  { %4179 = vmatpush.msrb.mxu2 %v9045_v25  ;;  %v4015_v25 = vld [vmem:[#allocation12 + $0x2f0] sm:$0xff] }
 0x599   :  { %4140 = vmatpush.msrb.mxu0 %v9046_v17  ;;  %v4016_v17 = vld [vmem:[#allocation12 + $0x2f8] sm:$0xff]  ;;  %4162 = vmatpush.msrb.mxu1 %v4015_v25 }
 0x59a   :  { %4180 = vmatpush.msrb.mxu2 %v9047_v36  ;;  %4202 = vmatpush.msrb.mxu3 %v4016_v17  ;;  %v4011_v36 = vld [vmem:[#allocation12 + $0x2d0] sm:$0xff]  ;;  %v3907_v17 = vld [vmem:[#allocation3] sm:$0x3] }
 0x59b   :  { %4141 = vmatpush.msrb.mxu0 %v9048_v5  ;;  %v4012_v5 = vld [vmem:[#allocation12 + $0x2d8] sm:$0xff]  ;;  %4163 = vmatpush.msrb.mxu1 %v4011_v36 }
 0x59c   :  { %4181 = vmatpush.msrb.mxu2 %v9049_v57  ;;  %4203 = vmatpush.msrb.mxu3 %v4012_v5 }
 0x59d   :  { %4142 = vmatpush.msrb.mxu0 %v9050_v44 }
 0x59e   :  { %4182 = vmatpush.msrb.mxu2 %v9051_v24  ;;  %v9069_v24 = vld [vmem:[#allocation19_spill] sm:$0xff] }
 0x59f   :  { %4143 = vmatpush.msrb.mxu0 %v9052_v38 }
 0x5a0   :  { %4183 = vmatpush.msrb.mxu2 %v9053_v16  ;;  %v4007_v16 = vld [vmem:[#allocation12 + $0x2b0] sm:$0xff] }
 0x5a1   :  { %4144 = vmatpush.msrb.mxu0 %v9054_v14  ;;  %v4008_v14 = vld [vmem:[#allocation12 + $0x2b8] sm:$0xff]  ;;  %4164 = vmatpush.msrb.mxu1 %v4007_v16 }
 0x5a2   :  { %4184 = vmatpush.msrb.mxu2 %v9055_v20  ;;  %4204 = vmatpush.msrb.mxu3 %v4008_v14 }
 0x5a3   :  { %4145 = vmatpush.msrb.mxu0 %v9056_v42 }
 0x5a4   :  { %4185 = vmatpush.msrb.mxu2 %v9057_v15  ;;  %v4003_v15 = vld [vmem:[#allocation12 + $0x290] sm:$0xff] }
 0x5a5   :  { %4146 = vmatpush.msrb.mxu0 %v9058_v53  ;;  %v4004_v53 = vld [vmem:[#allocation12 + $0x298] sm:$0xff]  ;;  %4165 = vmatpush.msrb.mxu1 %v4003_v15 }
 0x5a6   :  { %4186 = vmatpush.msrb.mxu2 %v9059_v29  ;;  %4205 = vmatpush.msrb.mxu3 %v4004_v53 }
 0x5a7   :  { %4147 = vmatpush.msrb.mxu0 %v9060_v35 }
 0x5a8   :  { %4187 = vmatpush.msrb.mxu2 %v9061_v47 }
 0x5a9   :  { %4148 = vmatpush.msrb.mxu0 %v9062_v18 }
 0x5aa   :  { %4188 = vmatpush.msrb.mxu2 %v9063_v4 }
 0x5ab   :  { %4149 = vmatpush.msrb.mxu0 %v9064_v46  ;;  %v9070_v46 = vld [vmem:[#allocation113_spill] sm:$0xff] }
 0x5ac   :  { %4189 = vmatpush.msrb.mxu2 %v9065_v0  ;;  %4166 = vmatpush.msrb.mxu1 %v9070_v46  ;;  %v9071_v0 = vld [vmem:[#allocation116_spill] sm:$0xff]  ;;  %v4250_v46 = vld [vmem:[%s7831_s6 + $0x70] sm:$0xff] }
 0x5ad   :  { %4206 = vmatpush.msrb.mxu3 %v9071_v0  ;;  %v4249_v0 = vld [vmem:[%s7831_s6 + $0x68] sm:$0xff] }
 0x5ae   :  { %4167 = vmatpush.msrb.mxu1 %v9072_v27  ;;  %v4244_v27 = vld [vmem:[%s7831_s6 + $0x40] sm:$0xff] }
 0x5af   :  { %4207 = vmatpush.msrb.mxu3 %v9073_v12  ;;  %v4243_v12 = vld [vmem:[%s7831_s6 + $0x38] sm:$0xff] }
 0x5b0   :  { %4168 = vmatpush.msrb.mxu1 %v9074_v32 }
 0x5b1   :  { %4208 = vmatpush.msrb.mxu3 %v9075_v60  ;;  %v4241_v60 = vld [vmem:[%s7831_s6 + $0x28] sm:$0xff] }
 0x5b2   :  { %4169 = vmatpush.msrb.mxu1 %v9076_v39  ;;  %v4239_v39 = vld [vmem:[%s7831_s6 + $0x18] sm:$0xff] }
 0x5b3   :  { %4209 = vmatpush.msrb.mxu3 %v9077_v43 }
 0x5b6   :  { %v3585_v1 = vpop.f32.mrf.mxu1 }
 0x5bc   :  { %v3625_v61 = vpop.f32.mrf.mxu3 }
 0x5be   :  { %v3665_v50 = vpop.f32.mrf.mxu1 }
 0x5c4   :  { %v3705_v20 = vpop.f32.mrf.mxu3 }
 0x5c8   :  { %v3565_v33 = vpop.f32.mrf.mxu0 }
 0x5c9   :  { %v3566_v51 = vadd.f32 %v3565_v33, %v9066_v56 }
 0x5cb   :  { %v3586_v63 = vadd.f32 %v3585_v1, %v3566_v51 }
 0x5cd   :  { %v3708_v26 = vmul.f32 0.5, %v3586_v63 }
 0x5ce   :  { %v3605_v3 = vpop.f32.mrf.mxu2 }
 0x5cf   :  { %v3606_v37 = vadd.f32 %v3605_v3, %v9067_v10  ;;  %4526 = vtanh.f32 %v3708_v26  ;;  %v3729_v26 = vld [vmem:[#allocation6 + $0x8] sm:$0xc0] }
 0x5d0   :  { %v3645_v28 = vpop.f32.mrf.mxu0 }
 0x5d1   :  { %v3626_v34 = vadd.f32 %v3625_v61, %v3606_v37  ;;  %v3646_v19 = vadd.f32 %v3645_v28, %v9068_v9  ;;  %v3732_v37 = vld [vmem:[#allocation6 + $0x38] sm:$0xc0] }
 0x5d3   :  { %v3712_v31 = vmul.f32 0.5, %v3626_v34  ;;  %v3666_v22 = vadd.f32 %v3665_v50, %v3646_v19  ;;  %v3731_v19 = vld [vmem:[#allocation6 + $0x28] sm:$0xc0] }
 0x5d5   :  { %4528 = vtanh.f32 %v3712_v31  ;;  %v4527_v44 = vpop.eup %4526 }
 0x5d6   :  { %v3685_v57 = vpop.f32.mrf.mxu2  ;;  %4530 = vtanh.f32 %v3666_v22  ;;  %v3710_v29 = vmul.f32 0.5, %v4527_v44 }
 0x5d7   :  { %v3686_v38 = vadd.f32 %v3685_v57, %v9069_v24 }
 0x5d8   :  { %v3711_v54 = vadd.f32 0.5, %v3710_v29 }
 0x5d9   :  { %v3706_v42 = vadd.f32 %v3705_v20, %v3686_v38  ;;  %v3835_v18 = vpop.f32.mrf.mxu1  ;;  %v3909_v38 = vrot.slane %v3907_v17, 2 }
 0x5da   :  { %v3883_v40 = vrot.slane %v3835_v18, 2 }
 0x5db   :  { %v4529_v35 = vpop.eup %4528  ;;  %v3717_v47 = vmul.f32 0.5, %v3706_v42 }
 0x5dc   :  { %v3714_v4 = vmul.f32 0.5, %v4529_v35  ;;  %v4531_v45 = vpop.eup %4530  ;;  %v3891_v49 = vadd.f32 %v3883_v40, %v3730_v41  ;;  %v4245_v40 = vld [vmem:[%s7831_s6 + $0x48] sm:$0xff] }
 0x5dd   :  { %4532 = vtanh.f32 %v3717_v47  ;;  %v3723_v11 = vmul.f32 %v4531_v45, %v3711_v54  ;;  %v4248_v45 = vld [vmem:[%s7831_s6 + $0x60] sm:$0xff]  ;;  %v4247_v54 = vld [vmem:[%s7831_s6 + $0x58] sm:$0xff] }
 0x5de   :  { %v3715_v6 = vadd.f32 0.5, %v3714_v4  ;;  %v3898_v51 = vmul.f32 0.5, %v3891_v49  ;;  %v4251_v4 = vld [vmem:[%s7831_s6 + $0x78] sm:$0xff] }
 0x5e0   :  { %v3722_v55 = vmul.f32 %v3721_v48, %v3715_v6  ;;  %v3875_v59 = vpop.f32.mrf.mxu3  ;;  %v4246_v6 = vld [vmem:[%s7831_s6 + $0x50] sm:$0xff] }
 0x5e1   :  { %v3885_v58 = vrot.slane %v3875_v59, 2  ;;  %v4237_v59 = vld [vmem:[%s7831_s6 + $0x8] sm:$0xff] }
 0x5e2   :  { %v3724_v52 = vadd.f32 %v3723_v11, %v3722_v55  ;;  %v4242_v11 = vld [vmem:[%s7831_s6 + $0x30] sm:$0xff] }
 0x5e3   :  { %v4533_v1 = vpop.eup %4532  ;;  %v3893_v23 = vadd.f32 %v3885_v58, %v3732_v37  ;;  %v4291_v58 = vld [vmem:[%s7833_s8 + $0x70] sm:$0xff]  ;;  %v4290_v37 = vld [vmem:[%s7833_s8 + $0x68] sm:$0xff] }
 0x5e4   :  { %4534 = vtanh.f32 %v3724_v52  ;;  %3727 = vst [vmem:[#allocation5] sm:$0x3] %v3724_v52  ;;  %v3719_v33 = vmul.f32 0.5, %v4533_v1  ;;  %v4240_v52 = vld [vmem:[%s7831_s6 + $0x20] sm:$0xff] }
 0x5e5   :  { %4536 = vtanh.f32 %v3898_v51  ;;  %v3903_v50 = vmul.f32 0.5, %v3893_v23 }
 0x5e6   :  { %v3720_v63 = vadd.f32 0.5, %v3719_v33 }
 0x5e8   :  { %v3815_v62 = vpop.f32.mrf.mxu0 }
 0x5e9   :  { %v3882_v2 = vrot.slane %v3815_v62, 2 }
 0x5ea   :  { %v4535_v13 = vpop.eup %4534 }
 0x5eb   :  { %v3726_v30 = vmul.f32 %v4535_v13, %v3720_v63  ;;  %v3890_v61 = vadd.f32 %v3882_v2, %v3729_v26  ;;  %v4537_v28 = vpop.eup %4536  ;;  %v4236_v13 = vld [vmem:[%s7831_s6] sm:$0xff] }
 0x5ec   :  { %v3900_v7 = vmul.f32 0.5, %v4537_v28  ;;  %v4289_v28 = vld [vmem:[%s7833_s8 + $0x60] sm:$0xff] }
 0x5ed   :  { %3728 = vst [vmem:[#allocation4] sm:$0x3] %v3726_v30  ;;  %v3894_v3 = vmul.f32 0.5, %v3890_v61  ;;  %v4227_v17 = vld [vmem:[#allocation5] sm:$0x3] }
 0x5ee   :  { %v3901_v5 = vadd.f32 0.5, %v3900_v7  ;;  %v4288_v7 = vld [vmem:[%s7833_s8 + $0x58] sm:$0xff] }
 0x5ef   :  { %4538 = vtanh.f32 %v3894_v3  ;;  %v3855_v8 = vpop.f32.mrf.mxu2 }
 0x5f0   :  { %v3884_v34 = vrot.slane %v3855_v8, 2  ;;  %v3911_v14 = vmul.f32 %v3909_v38, %v3901_v5 }
 0x5f2   :  { %v3892_v21 = vadd.f32 %v3884_v34, %v3731_v19 }
 0x5f4   :  { %4540 = vtanh.f32 %v3892_v21  ;;  %v3918_v31 = vld [vmem:[#allocation4] sm:$0x3] }
 0x5f5   :  { %v4539_v22 = vpop.eup %4538  ;;  %v3920_v25 = vrot.slane %v3918_v31, 2  ;;  %4542 = vtanh.f32 %v3903_v50  ;;  %v4287_v31 = vld [vmem:[%s7833_s8 + $0x50] sm:$0xff] }
 0x5f6   :  { %v3896_v36 = vmul.f32 0.5, %v4539_v22 }
 0x5f7   :  { %v4051_v57 = vrot.slane %v3920_v25, 6 }
 0x5f8   :  { %v3897_v44 = vadd.f32 0.5, %v3896_v36  ;;  %v4286_v36 = vld [vmem:[%s7833_s8 + $0x48] sm:$0xff] }
 0x5f9   :  { %4090 = vmatmul.f32.vlgmr.msra.gmra.mxu1 %v4051_v57  ;;  %4130 = vmatmul.f32.vlgmr.msra.gmra.mxu3 %v4051_v57 }
 0x5fa   :  { %v4541_v16 = vpop.eup %4540 }
 0x5fb   :  { %v3912_v20 = vmul.f32 %v4541_v16, %v3897_v44  ;;  %v4543_v42 = vpop.eup %4542  ;;  %v4285_v44 = vld [vmem:[%s7833_s8 + $0x40] sm:$0xff] }
 0x5fc   :  { %v3905_v53 = vmul.f32 0.5, %v4543_v42  ;;  %v4283_v42 = vld [vmem:[%s7833_s8 + $0x30] sm:$0xff] }
 0x5fd   :  { %v3913_v15 = vadd.f32 %v3912_v20, %v3911_v14  ;;  %v4284_v14 = vld [vmem:[%s7833_s8 + $0x38] sm:$0xff] }
 0x5fe   :  { %v3906_v29 = vadd.f32 0.5, %v3905_v53 }
 0x5ff   :  { %4544 = vtanh.f32 %v3913_v15  ;;  %3916 = vst [vmem:[#allocation3 - $0x6] sm:$0xc0] %v3913_v15  ;;  %v4282_v15 = vld [vmem:[%s7833_s8 + $0x28] sm:$0xff] }
 0x601   :  { %4170 = vmatmul.f32.vlgmr.msrb.gmra.mxu1 %v4051_v57  ;;  %4210 = vmatmul.f32.vlgmr.msrb.gmra.mxu3 %v4051_v57 }
 0x605   :  { %v4545_v35 = vpop.eup %4544 }
 0x606   :  { %v3915_v47 = vmul.f32 %v4545_v35, %v3906_v29  ;;  %v4281_v29 = vld [vmem:[%s7833_s8 + $0x20] sm:$0xff] }
 0x608   :  { %3917 = vst [vmem:[#allocation2 - $0x6] sm:$0xc0] %v3915_v47  ;;  %v4050_v18 = vrot.slane %v3915_v47, 6 }
 0x60a   :  { %4070 = vmatmul.f32.vlgmr.msra.gmra.mxu0 %v4050_v18  ;;  %4110 = vmatmul.f32.vlgmr.msra.gmra.mxu2 %v4050_v18 }
 0x60b   :  { %4256 = vmatpush.msra.mxu0 %v4251_v4 }
 0x60d   :  { %4257 = vmatpush.msra.mxu0 %v4250_v46  ;;  %v4279_v46 = vld [vmem:[%s7833_s8 + $0x10] sm:$0xff] }
 0x60f   :  { %4258 = vmatpush.msra.mxu0 %v4249_v0  ;;  %v4278_v0 = vld [vmem:[%s7833_s8 + $0x8] sm:$0xff] }
 0x611   :  { %4259 = vmatpush.msra.mxu0 %v4248_v45  ;;  %v4277_v45 = vld [vmem:[%s7833_s8] sm:$0xff] }
 0x612   :  { %4150 = vmatmul.f32.vlgmr.msrb.gmra.mxu0 %v4050_v18  ;;  %4190 = vmatmul.f32.vlgmr.msrb.gmra.mxu2 %v4050_v18  ;;  %v4280_v18 = vld [vmem:[%s7833_s8 + $0x18] sm:$0xff] }
 0x613   :  { %4260 = vmatpush.msra.mxu0 %v4247_v54  ;;  %v4394_v54 = vld [vmem:[%s7832_s7] ss:$0 sm:$0xff]  ;;  %s4671_s7 = smov [#allocation13]  }
 0x615   :  { %4261 = vmatpush.msra.mxu0 %v4246_v6 }
 0x617   :  { %4262 = vmatpush.msra.mxu0 %v4245_v40 }
 0x619   :  { %4263 = vmatpush.msra.mxu0 %v4244_v27 }
 0x61b   :  { %4264 = vmatpush.msra.mxu0 %v4243_v12  ;;  %v4317_v12 = vlaneseq }
 0x61d   :  { %4265 = vmatpush.msra.mxu0 %v4242_v11 }
 0x61f   :  { %4266 = vmatpush.msra.mxu0 %v4241_v60 }
 0x621   :  { %4267 = vmatpush.msra.mxu0 %v4240_v52 }
 0x623   :  { %4268 = vmatpush.msra.mxu0 %v4239_v39 }
 0x676   :  { %v4091_v48 = vpop.f32.mrf.mxu1 }
 0x67c   :  { %v4131_v43 = vpop.f32.mrf.mxu3 }
 0x67e   :  { %v4171_v2 = vpop.f32.mrf.mxu1 }
 0x684   :  { %v4211_v23 = vpop.f32.mrf.mxu3 }
 0x687   :  { %v4071_v55 = vpop.f32.mrf.mxu0 }
 0x688   :  { %v4072_v32 = vadd.f32 %v4071_v55, %v9066_v56  ;;  %v4238_v56 = vld [vmem:[%s7831_s6 + $0x10] sm:$0xff]  ;;  %v4318_v55 = vand.u32 127, %v4317_v12 }
 0x689   :  { %4269 = vmatpush.msra.mxu0 %v4238_v56 }
 0x68a   :  { %v4092_v41 = vadd.f32 %v4091_v48, %v4072_v32  ;;  %v4395_v48 = vld [vmem:[%s7834_s9] ss:$0 sm:$0xff]  ;;  %vm4319_vm2 = vcmp.ge.s32.totalorder %v4318_v55, 3 }
 0x68b   :  { %4270 = vmatpush.msra.mxu0 %v4237_v59 }
 0x68c   :  { %v4214_v49 = vmul.f32 0.5, %v4092_v41 }
 0x68d   :  { %v4111_v1 = vpop.f32.mrf.mxu2  ;;  %4271 = vmatpush.msra.mxu0 %v4236_v13 }
 0x68e   :  { %v4112_v33 = vadd.f32 %v4111_v1, %v9067_v10  ;;  %4546 = vtanh.f32 %v4214_v49  ;;  %v4292_v10 = vld [vmem:[%s7833_s8 + $0x78] sm:$0xff]  ;;  %s4362_s8 = sshll.u32 %s4671_s7, 4  ;;  %s4363_s8 = int_to_ptr.vmem [resolvable:$true] %s4362_s8 }
 0x68f   :  { %v4151_v51 = vpop.f32.mrf.mxu0  ;;  %4297 = vmatpush.msra.mxu1 %v4292_v10 }
 0x690   :  { %v4132_v62 = vadd.f32 %v4131_v43, %v4112_v33  ;;  %v4152_v63 = vadd.f32 %v4151_v51, %v9068_v9 }
 0x691   :  { %4298 = vmatpush.msra.mxu1 %v4291_v58 }
 0x692   :  { %v4218_v26 = vmul.f32 0.5, %v4132_v62  ;;  %v4172_v30 = vadd.f32 %v4171_v2, %v4152_v63 }
 0x693   :  { %4299 = vmatpush.msra.mxu1 %v4290_v37 }
 0x694   :  { %4548 = vtanh.f32 %v4218_v26  ;;  %v4547_v61 = vpop.eup %4546 }
 0x695   :  { %v4191_v9 = vpop.f32.mrf.mxu2  ;;  %4550 = vtanh.f32 %v4172_v30  ;;  %v4216_v34 = vmul.f32 0.5, %v4547_v61  ;;  %4300 = vmatpush.msra.mxu1 %v4289_v28 }
 0x696   :  { %v4192_v3 = vadd.f32 %v4191_v9, %v9069_v24 }
 0x697   :  { %v4217_v22 = vadd.f32 0.5, %v4216_v34  ;;  %4301 = vmatpush.msra.mxu1 %v4288_v7 }
 0x698   :  { %v4212_v8 = vadd.f32 %v4211_v23, %v4192_v3 }
 0x699   :  { %4302 = vmatpush.msra.mxu1 %v4287_v31 }
 0x69a   :  { %v4549_v19 = vpop.eup %4548  ;;  %v4223_v21 = vmul.f32 0.5, %v4212_v8 }
 0x69b   :  { %v4220_v24 = vmul.f32 0.5, %v4549_v19  ;;  %v4551_v50 = vpop.eup %4550  ;;  %4303 = vmatpush.msra.mxu1 %v4286_v36 }
 0x69c   :  { %4552 = vtanh.f32 %v4223_v21  ;;  %v4229_v57 = vmul.f32 %v4551_v50, %v4217_v22 }
 0x69d   :  { %v4221_v25 = vadd.f32 0.5, %v4220_v24  ;;  %4304 = vmatpush.msra.mxu1 %v4285_v44 }
 0x69f   :  { %v4228_v5 = vmul.f32 %v4227_v17, %v4221_v25  ;;  %4305 = vmatpush.msra.mxu1 %v4284_v14 }
 0x6a1   :  { %v4230_v38 = vadd.f32 %v4229_v57, %v4228_v5  ;;  %4306 = vmatpush.msra.mxu1 %v4283_v42 }
 0x6a2   :  { %v4553_v16 = vpop.eup %4552 }
 0x6a3   :  { %4554 = vtanh.f32 %v4230_v38  ;;  %4233 = vst [vmem:[#allocation5] sm:$0x3] %v4230_v38  ;;  %v4225_v20 = vmul.f32 0.5, %v4553_v16  ;;  %4307 = vmatpush.msra.mxu1 %v4282_v15 }
 0x6a5   :  { %v4226_v53 = vadd.f32 0.5, %v4225_v20  ;;  %4308 = vmatpush.msra.mxu1 %v4281_v29 }
 0x6a7   :  { %4309 = vmatpush.msra.mxu1 %v4280_v18 }
 0x6a9   :  { %v4555_v35 = vpop.eup %4554  ;;  %4310 = vmatpush.msra.mxu1 %v4279_v46 }
 0x6aa   :  { %v4232_v47 = vmul.f32 %v4555_v35, %v4226_v53 }
 0x6ab   :  { %4311 = vmatpush.msra.mxu1 %v4278_v0 }
 0x6ac   :  { %4234 = vst [vmem:[#allocation4] sm:$0x3] %v4232_v47 }
 0x6ad   :  { %4312 = vmatpush.msra.mxu1 %v4277_v45 }
 0x6b3   :  { %v4235_v4 = vld [vmem:[#allocation4] sm:$0x3] }
 0x6b4   :  { %4272 = vmatmul.f32.vlgmr.msra.gmra.mxu0 %v4235_v4 }
 0x731   :  { %v4273_v6 = vpop.f32.mrf.mxu0 }
 0x732   :  { %v4274_v40 = vadd.f32 %v4394_v54, %v4273_v6 }
 0x734   :  { %v4276_v27 = vmax.f32 %v4274_v40, 0.0 }
 0x736   :  { %4313 = vmatmul.f32.vlgmr.msra.gmra.mxu1 %v4276_v27 }
 0x7b3   :  { %v4314_v11 = vpop.f32.mrf.mxu1 }
 0x7b4   :  { %v4315_v32 = vadd.f32 %v4395_v48, %v4314_v11 }
 0x7b6   :  { %v4320_v60 = vmul.f32 %v4315_v32, %v4315_v32 }
 0x7b8   :  { %v4321_v41 = vsel %vm4319_vm2, %v4320_v60, 0.0 }
 0x7b9   :  { %v4323_v52 = vsel %vm4322_vm3, %v4321_v41, 0.0 }
 0x7ba   :  { %4324 = vadd.xlane.f32.xlu0 %v4323_v52 }
 0x82d   :  { %v4325_v49 = vpop.xlane.xlu0 %4324 }
 0x82e   :  { %4556 = vrsqrt.f32 %v4325_v49  ;;  %vm4333_vm4 = vcmp.eq.f32.partialorder %v4325_v49, inf  ;;  %v4336_v62 = vand.u32 2147483648, %v4325_v49  ;;  %vm4335_vm5 = vcmp.eq.f32.partialorder %v4325_v49, 0.0 }
 0x834   :  { %v4557_v39 = vpop.eup %4556 }
 0x835   :  { %v4327_v43 = vmul.f32 %v4557_v39, %v4325_v49 }
 0x837   :  { %v4328_v1 = vmul.f32 %v4557_v39, %v4327_v43 }
 0x839   :  { %v4329_v56 = vmul.f32 0.5, %v4328_v1 }
 0x83b   :  { %v4330_v33 = vsub.f32 1.5, %v4329_v56 }
 0x83d   :  { %v4331_v51 = vmul.f32 %v4557_v39, %v4330_v33 }
 0x83f   :  { %v4332_v59 = vmul.f32 %v4331_v51, %v4325_v49 }
 0x841   :  { %v4334_v63 = vsel %vm4333_vm4, %v4325_v49, %v4332_v59 }
 0x842   :  { %v4337_v2 = vsel %vm4335_vm5, %v4336_v62, %v4334_v63 }
 0x843   :  { %v4338_v13 = vmax.f32 %v4337_v2, 1e-12 }
 0x845   :  { %4558 = vrcp.f32 %v4338_v13  ;;  %v4350_v58 = vand.u32 2147483648, %v4338_v13  ;;  %v4348_v61 = vand.u32 2147483647, %v4338_v13  ;;  %vm4344_vm7 = vweird.f32 %v4338_v13 }
 0x847   :  { %v4351_v37 = vor.u32 1.1754944e-38, %v4350_v58  ;;  %vm4349_vm9 = vcmp.eq.f32.partialorder %v4348_v61, 8.507059e+37 }
 0x84b   :  { %v4559_v26 = vpop.eup %4558 }
 0x84c   :  { %v4340_v30 = vmul.f32 %v4559_v26, %v4338_v13  ;;  %vm4345_vm6 = vweird.f32 %v4559_v26 }
 0x84d   :  { %vm4346_vm8 = vmor %vm4344_vm7, %vm4345_vm6 }
 0x84e   :  { %v4341_v10 = vsub.f32 1.0, %v4340_v30 }
 0x850   :  { %v4342_v9 = vmul.f32 %v4559_v26, %v4341_v10 }
 0x852   :  { %v4343_v3 = vadd.f32 %v4559_v26, %v4342_v9 }
 0x854   :  { %v4347_v23 = vsel %vm4346_vm8, %v4559_v26, %v4343_v3 }
 0x855   :  { %v4352_v8 = vsel %vm4349_vm9, %v4351_v37, %v4347_v23 }
 0x856   :  { %v4354_v28 = vsel %vm4319_vm2, %v4352_v8, 1.0 }
 0x857   :  { %v4355_v34 = vmul.f32 %v4354_v28, %v4315_v32 }
 0x859   :  { %4356 = vst.msk [vmem:[#allocation13] sm:$0x3] %vm4322_vm3, %v4355_v34 }
 0x85a   :  { %4367 = dma.vmem_to_hbm [thread:$0]  %s4363_s8, 32, %s4365_s27, [#allocation9]  }
 0x85b   :  { %4663 = dma.done.wait [#allocation9], 32  }
 0x85c   :  { %4664 = vsyncadd [#allocation9], 4294967264 }
 0x85d   :  { %4372 = vsyncpa [#allocation8], 1 }
 0x85e   :  { %4373 = vsyncpa [#allocation11], 1 }
 0x85f   :  { %4374 = vsyncpa [#allocation9], 1 }

</bundles_post_ra>
